<compile_context>
chip_gen: v7x
topology: tpu7x:2x2x1
jax: 0.10.0
libtpu: 0.0.40
codegen_flags: <defaults>
</compile_context>

<pallas_src>
import jax
import jax.numpy as jnp
from jax.experimental import pallas as pl
from jax.experimental.pallas import tpu as pltpu


# ----------------------------- Pallas kernel ------------------------------- #

def _wavelet_up_kernel(x_ref, wa_ref, b1_ref, w2_ref, b2_ref, e_ref, out_ref):
    TH, W, C4 = out_ref.shape[1], out_ref.shape[2], out_ref.shape[3]
    C = C4 // 4
    He, We = TH + 2, W + 2          # extended region = output tile + 1-px h1 halo
    N = TH * W

    x = x_ref[0]                     # [TH+4, W+4, C]  bf16 (2-px zero pad from wrapper)

    # ---- shared im2col slab over the extended region (one MXU call) -------
    taps = [x[ky:ky + He, kx:kx + We, :].reshape(He * We, C)
            for ky in range(3) for kx in range(3)]
    slab = jnp.concatenate(taps, axis=-1)                       # [He*We, 9C] bf16

    big = jnp.dot(slab, wa_ref[...],
                  preferred_element_type=jnp.float32)           # [He*We, 5C] f32
    big = big.reshape(He, We, 5 * C)

    # splitter sub-bands for the interior (actual output pixels), band-major
    s_big = big[1:TH + 1, 1:W + 1, :4 * C].reshape(N, 4 * C)    # [N, 4C] f32

    # conv1 -> SiLU on the extended region; zero the ring that lies outside the
    # image (that is conv2's 'same' zero padding — h there must be exactly 0).
    h1 = big[:, :, 4 * C:] + b1_ref[...]
    h1 = h1 * jax.nn.sigmoid(h1)                                # SiLU, f32
    t = pl.program_id(1)
    last = pl.num_programs(1) - 1
    row = jax.lax.broadcasted_iota(jnp.int32, (He, We, 1), 0)
    col = jax.lax.broadcasted_iota(jnp.int32, (He, We, 1), 1)
    outside = ((col == 0) | (col == We - 1)
               | ((row == 0) & (t == 0))
               | ((row == He - 1) & (t == last)))
    h1 = jnp.where(outside, 0.0, h1).astype(jnp.bfloat16)       # [He, We, C]

    # ---- conv2 / gate at width C only --------------------------------------
    taps2 = [h1[ky:ky + TH, kx:kx + W, :].reshape(N, C)
             for ky in range(3) for kx in range(3)]
    slab2 = jnp.concatenate(taps2, axis=-1)                     # [N, 9C] bf16
    gate = jax.nn.sigmoid(
        jnp.dot(slab2, w2_ref[...], preferred_element_type=jnp.float32)
        + b2_ref[...])                                          # [N, C] f32

    # expand gate to the band-major 4C layout with a one-hot matmul, then gate
    gate_big = jnp.dot(gate, e_ref[...],
                       preferred_element_type=jnp.float32)      # [N, 4C] f32
    a = gate_big * s_big                                        # [N, 4C] f32

    # inverse-Haar step (== conv_transpose2d stride-2, 2x2, groups=C):
    # four signed band sums on whole tiles (pure VPU), assembled phase-major.
    a0 = a[:, 0 * C:1 * C]
    a1 = a[:, 1 * C:2 * C]
    a2 = a[:, 2 * C:3 * C]
    a3 = a[:, 3 * C:4 * C]
    out = 0.5 * jnp.concatenate(
        [a0 + a1 + a2 + a3,      # (di,dj)=(0,0)
         a0 - a1 + a2 - a3,      # (0,1)
         a0 + a1 - a2 - a3,      # (1,0)
         a0 - a1 - a2 + a3],     # (1,1)
        axis=-1)                                                # [N, 4C] lane-dense
    out_ref[0] = out.reshape(TH, W, 4 * C).astype(out_ref.dtype)


# ------------------------------- wrapper ----------------------------------- #

def _pick_tile_h(H, W, C):
    """Largest divisor of H whose per-step working set fits a conservative VMEM
    budget (sized for v7x's 64 MiB), preferring >=2 tiles so megacore and the
    software pipeline have work even at batch 1-2."""
    budget = 32 << 20

    def est_bytes(th):
        he, we, n = th + 2, W + 2, th * W
        b = 2 * (th + 4) * (W + 4) * C * 2            # bf16 input block, 2x buffered
        b += 2 * n * 4 * C * 4                        # f32 output block, 2x buffered
        b += he * we * C * (9 * 2 + 5 * 4 + 4 + 2)    # slab + fused result + h1
        b += n * C * (9 * 2 + 4 * 4 * 4)              # conv2 slab + gate/Haar temps
        b += (9 * C * 6 * C) * 2 + (C * 4 * C + 2 * C) * 4   # resident weights
        return b

    divisors = [d for d in range(1, H + 1) if H % d == 0]
    fitting = [d for d in divisors if est_bytes(d) <= budget] or [1]
    multi = [d for d in fitting if H // d >= 2]
    return max(multi) if multi else max(fitting)


def wavelet_upsample(x_nchw, params, tile_h=None):
    """Forward pass of WaveletUpSample. x_nchw: [B, C, H, W] -> [B, C, 2H, 2W]."""
    B, C, H, W = x_nchw.shape
    TH = tile_h if tile_h is not None else _pick_tile_h(H, W, C)
    assert H % TH == 0, "tile height must divide H"
    nT = H // TH

    # ---- parameter glue (done once in plain JAX) ---------------------------
    def to_mat(w):  # PyTorch OIHW -> [9*Cin, Cout], row = (ky*3+kx)*Cin + cin
        cout, cin = w.shape[0], w.shape[1]
        return jnp.transpose(w, (2, 3, 1, 0)).reshape(9 * cin, cout)

    ws = to_mat(params["splitter_w"])          # [9C, 4C]
    w1 = to_mat(params["conv1_w"])             # [9C, C]
    w2 = to_mat(params["conv2_w"])             # [9C, C]

    # band-major column layout: column r*C+g == splitter channel 4g+r; the gate
    # channel it needs is (4g+r) % C  (matches chunk/cat + grouped transpose-conv)
    perm_split = jnp.array([4 * g + r for r in range(4) for g in range(C)], jnp.int32)
    gate_idx = jnp.array([(4 * g + r) % C for r in range(4) for g in range(C)], jnp.int32)

    wa = jnp.concatenate([ws[:, perm_split], w1], axis=1).astype(jnp.bfloat16)  # [9C, 5C]
    w2b = w2.astype(jnp.bfloat16)                                               # [9C, C]
    b1 = params["conv1_b"].reshape(1, C).astype(jnp.float32)
    b2 = params["conv2_b"].reshape(1, C).astype(jnp.float32)
    E = jax.nn.one_hot(gate_idx, C, dtype=jnp.float32).T                        # [C, 4C]

    # ---- input: NCHW -> NHWC bf16, 2-px zero pad, overlapping H tiles -------
    x_nhwc = jnp.transpose(x_nchw, (0, 2, 3, 1)).astype(jnp.bfloat16)
    xpad = jnp.pad(x_nhwc, ((0, 0), (2, 2), (2, 2), (0, 0)))                    # [B,H+4,W+4,C]
    x_tiles = jnp.stack([xpad[:, t * TH:t * TH + TH + 4] for t in range(nT)],
                        axis=1).reshape(B * nT, TH + 4, W + 4, C)

    # ---- cost estimate (advisory) -------------------------------------------
    He, We, N = TH + 2, W + 2, TH * W
    flops = 2 * B * nT * (He * We * 9 * C * 5 * C + N * 9 * C * C + N * C * 4 * C) \
        + B * nT * N * 4 * C * 8
    transcendentals = B * nT * (He * We * 2 * C + N * C)
    bytes_accessed = (x_tiles.size * 2
                      + B * H * W * 4 * C * x_nchw.dtype.itemsize
                      + (wa.size + w2b.size) * 2
                      + (b1.size + b2.size + E.size) * 4)
    cost = pl.CostEstimate(flops=int(flops),
                           transcendentals=int(transcendentals),
                           bytes_accessed=int(bytes_accessed))

    out_nhwc4 = pl.pallas_call(
        _wavelet_up_kernel,
        out_shape=jax.ShapeDtypeStruct((B, H, W, 4 * C), x_nchw.dtype),
        grid_spec=pltpu.PrefetchScalarGridSpec(
            num_scalar_prefetch=0,
            grid=(B, nT),
            in_specs=[
                pl.BlockSpec((1, TH + 4, W + 4, C),
                             lambda b, t: (b * nT + t, 0, 0, 0)),
                pl.BlockSpec((9 * C, 5 * C), lambda b, t: (0, 0)),
                pl.BlockSpec((1, C), lambda b, t: (0, 0)),
                pl.BlockSpec((9 * C, C), lambda b, t: (0, 0)),
                pl.BlockSpec((1, C), lambda b, t: (0, 0)),
                pl.BlockSpec((C, 4 * C), lambda b, t: (0, 0)),
            ],
            out_specs=pl.BlockSpec((1, TH, W, 4 * C), lambda b, t: (b, t, 0, 0)),
        ),
        compiler_params=pltpu.CompilerParams(
            dimension_semantics=("parallel", "parallel"),
            vmem_limit_bytes=48 * 1024 * 1024),
        cost_estimate=cost,
    )(x_tiles, wa, b1, w2b, b2, E)

    # interleave the 4 stride-2 phases (phase-major last dim) -> [B, 2H, 2W, C]
    out6 = out_nhwc4.reshape(B, H, W, 2, 2, C)
    y_nhwc = jnp.transpose(out6, (0, 1, 3, 2, 4, 5)).reshape(B, 2 * H, 2 * W, C)
    return jnp.transpose(y_nhwc, (0, 3, 1, 2))   # back to NCHW


# ------------------------- deterministic params ---------------------------- #

def init_params(key, C):
    ks = jax.random.split(key, 5)
    return {
        "splitter_w": 0.1 * jax.random.normal(ks[0], (4 * C, C, 3, 3), jnp.float32),
        "conv1_w": 0.1 * jax.random.normal(ks[1], (C, C, 3, 3), jnp.float32),
        "conv1_b": 0.1 * jax.random.normal(ks[2], (C,), jnp.float32),
        "conv2_w": 0.1 * jax.random.normal(ks[3], (C, C, 3, 3), jnp.float32),
        "conv2_b": 0.1 * jax.random.normal(ks[4], (C,), jnp.float32),
    }


# --------------------------- pure-JAX reference ----------------------------- #

def reference_forward(x, params):
    """Literal transcription of the PyTorch forward (NCHW) for verification."""
    B, C, H, W = x.shape

    def conv(inp, w, b=None):
        y = jax.lax.conv_general_dilated(
            inp, w, (1, 1), ((1, 1), (1, 1)),
            dimension_numbers=("NCHW", "OIHW", "NCHW"))
        if b is not None:
            y = y + b[None, :, None, None]
        return y

    S = conv(x, params["splitter_w"])
    LL, LH, HL, HH = jnp.split(S, 4, axis=1)
    h = conv(x, params["conv1_w"], params["conv1_b"])
    h = h * jax.nn.sigmoid(h)                                  # SiLU
    gate = jax.nn.sigmoid(conv(h, params["conv2_w"], params["conv2_b"]))
    xcat = jnp.concatenate([gate * LL, gate * LH, gate * HL, gate * HH], axis=1)

    low = jnp.array([1.0, 1.0]) / jnp.sqrt(jnp.array(2.0))
    high = jnp.array([1.0, -1.0]) / jnp.sqrt(jnp.array(2.0))
    pats = jnp.stack([jnp.outer(low, low), jnp.outer(low, high),
                      jnp.outer(high, low), jnp.outer(high, high)])  # [4,2,2]
    dwt = jnp.tile(pats[:, None], (C, 1, 1, 1))                      # [4C,1,2,2]

    # conv_transpose2d(stride=2, groups=C), 2x2 kernel -> non-overlapping scatter
    y = jnp.zeros((B, C, 2 * H, 2 * W), x.dtype)
    for g in range(C):
        for r in range(4):
            m = 4 * g + r
            for di in range(2):
                for dj in range(2):
                    y = y.at[:, g, di::2, dj::2].add(xcat[:, m] * dwt[m, 0, di, dj])
    return y


# ---------------------------------- main ------------------------------------ #

if __name__ == "__main__":
    def _check(B, C, H, W):
        key = jax.random.PRNGKey(0)
        kx_, kp_ = jax.random.split(key)
        x = jax.random.normal(kx_, (B, C, H, W), jnp.float32)
        params = init_params(kp_, C)

        y = jax.block_until_ready(wavelet_upsample(x, params))
        assert y.shape == (B, C, 2 * H, 2 * W)

        y_ref = reference_forward(x, params)
        err = float(jnp.max(jnp.abs(y - y_ref)))
        tol = 5e-2 * max(1.0, float(jnp.max(jnp.abs(y_ref))))   # bf16 MXU operands
        assert err < tol, f"mismatch vs reference ({B},{C},{H},{W}): {err} (tol {tol})"

    _check(2, 4, 16, 16)    # required small shape (2 H-tiles per image)
    _check(1, 8, 8, 12)     # C != 4, non-square: validates permutation folding + tiling masks
    print("KERNEL_OK")
</pallas_src>

<mosaic_0001>
module attributes {stable_mosaic.version = 11 : i64} {
  func.func @_wavelet_up_kernel(%arg0: i32, %arg1: i32, %arg2: memref<1x12x20x4xbf16, #tpu.memory_space<vmem>>, %arg3: memref<36x20xbf16, #tpu.memory_space<vmem>>, %arg4: memref<1x4xf32, #tpu.memory_space<vmem>>, %arg5: memref<36x4xbf16, #tpu.memory_space<vmem>>, %arg6: memref<1x4xf32, #tpu.memory_space<vmem>>, %arg7: memref<4x16xf32, #tpu.memory_space<vmem>>, %arg8: memref<1x8x16x16xf32, #tpu.memory_space<vmem>>) attributes {dimension_semantics = [#tpu.dimension_semantics<parallel>, #tpu.dimension_semantics<parallel>], iteration_bounds = array<i64: 2, 2>, scalar_prefetch = 0 : i64, scratch_operands = 0 : i64, tpu.core_type = #tpu.core_type<tc>, window_params = [{transform_indices = @transform_0, window_bounds = array<i64: 1, 12, 20, 4>}, {pipeline_mode = #tpu.pipeline_mode<synchronous>, transform_indices = @transform_1, window_bounds = array<i64: 36, 20>}, {pipeline_mode = #tpu.pipeline_mode<synchronous>, transform_indices = @transform_2, window_bounds = array<i64: 1, 4>}, {pipeline_mode = #tpu.pipeline_mode<synchronous>, transform_indices = @transform_3, window_bounds = array<i64: 36, 4>}, {pipeline_mode = #tpu.pipeline_mode<synchronous>, transform_indices = @transform_4, window_bounds = array<i64: 1, 4>}, {pipeline_mode = #tpu.pipeline_mode<synchronous>, transform_indices = @transform_5, window_bounds = array<i64: 4, 16>}, {transform_indices = @transform_6, window_bounds = array<i64: 1, 8, 16, 16>}]} {
    %c0 = arith.constant 0 : index
    %c0_0 = arith.constant 0 : index
    %c0_1 = arith.constant 0 : index
    %c0_2 = arith.constant 0 : index
    %0 = vector.load %arg2[%c0, %c0_0, %c0_1, %c0_2] : memref<1x12x20x4xbf16, #tpu.memory_space<vmem>>, vector<1x12x20x4xbf16>
    %1 = vector.shape_cast %0 : vector<1x12x20x4xbf16> to vector<12x20x4xbf16>
    %2 = vector.extract_strided_slice %1 {offsets = [0, 0, 0], sizes = [10, 18, 4], strides = [1, 1, 1]} : vector<12x20x4xbf16> to vector<10x18x4xbf16>
    %3 = vector.shape_cast %2 : vector<10x18x4xbf16> to vector<180x4xbf16>
    %4 = vector.extract_strided_slice %1 {offsets = [0, 1, 0], sizes = [10, 18, 4], strides = [1, 1, 1]} : vector<12x20x4xbf16> to vector<10x18x4xbf16>
    %5 = vector.shape_cast %4 : vector<10x18x4xbf16> to vector<180x4xbf16>
    %6 = vector.extract_strided_slice %1 {offsets = [0, 2, 0], sizes = [10, 18, 4], strides = [1, 1, 1]} : vector<12x20x4xbf16> to vector<10x18x4xbf16>
    %7 = vector.shape_cast %6 : vector<10x18x4xbf16> to vector<180x4xbf16>
    %8 = vector.extract_strided_slice %1 {offsets = [1, 0, 0], sizes = [10, 18, 4], strides = [1, 1, 1]} : vector<12x20x4xbf16> to vector<10x18x4xbf16>
    %9 = vector.shape_cast %8 : vector<10x18x4xbf16> to vector<180x4xbf16>
    %10 = vector.extract_strided_slice %1 {offsets = [1, 1, 0], sizes = [10, 18, 4], strides = [1, 1, 1]} : vector<12x20x4xbf16> to vector<10x18x4xbf16>
    %11 = vector.shape_cast %10 : vector<10x18x4xbf16> to vector<180x4xbf16>
    %12 = vector.extract_strided_slice %1 {offsets = [1, 2, 0], sizes = [10, 18, 4], strides = [1, 1, 1]} : vector<12x20x4xbf16> to vector<10x18x4xbf16>
    %13 = vector.shape_cast %12 : vector<10x18x4xbf16> to vector<180x4xbf16>
    %14 = vector.extract_strided_slice %1 {offsets = [2, 0, 0], sizes = [10, 18, 4], strides = [1, 1, 1]} : vector<12x20x4xbf16> to vector<10x18x4xbf16>
    %15 = vector.shape_cast %14 : vector<10x18x4xbf16> to vector<180x4xbf16>
    %16 = vector.extract_strided_slice %1 {offsets = [2, 1, 0], sizes = [10, 18, 4], strides = [1, 1, 1]} : vector<12x20x4xbf16> to vector<10x18x4xbf16>
    %17 = vector.shape_cast %16 : vector<10x18x4xbf16> to vector<180x4xbf16>
    %18 = vector.extract_strided_slice %1 {offsets = [2, 2, 0], sizes = [10, 18, 4], strides = [1, 1, 1]} : vector<12x20x4xbf16> to vector<10x18x4xbf16>
    %19 = vector.shape_cast %18 : vector<10x18x4xbf16> to vector<180x4xbf16>
    %20 = tpu.concatenate %3, %5, %7, %9, %11, %13, %15, %17, %19 in 1 : vector<180x4xbf16>, vector<180x4xbf16>, vector<180x4xbf16>, vector<180x4xbf16>, vector<180x4xbf16>, vector<180x4xbf16>, vector<180x4xbf16>, vector<180x4xbf16>, vector<180x4xbf16> -> vector<180x36xbf16>
    %c0_3 = arith.constant 0 : index
    %c0_4 = arith.constant 0 : index
    %21 = vector.load %arg3[%c0_3, %c0_4] : memref<36x20xbf16, #tpu.memory_space<vmem>>, vector<36x20xbf16>
    %cst = arith.constant dense<0.000000e+00> : vector<180x20xf32>
    %22 = tpu.matmul %20, %21, %cst {dimension_numbers = #tpu.dot_dimension_numbers<[1], [0], [0], [1], [0, 0, 1, 1], [], []>} : vector<180x36xbf16>, vector<36x20xbf16>, vector<180x20xf32> -> vector<180x20xf32>
    %23 = vector.shape_cast %22 : vector<180x20xf32> to vector<10x18x20xf32>
    %24 = vector.extract_strided_slice %23 {offsets = [1, 1, 0], sizes = [8, 16, 16], strides = [1, 1, 1]} : vector<10x18x20xf32> to vector<8x16x16xf32>
    %25 = vector.shape_cast %24 : vector<8x16x16xf32> to vector<128x16xf32>
    %26 = vector.extract_strided_slice %23 {offsets = [0, 0, 16], sizes = [10, 18, 4], strides = [1, 1, 1]} : vector<10x18x20xf32> to vector<10x18x4xf32>
    %c0_5 = arith.constant 0 : index
    %c0_6 = arith.constant 0 : index
    %27 = vector.load %arg4[%c0_5, %c0_6] : memref<1x4xf32, #tpu.memory_space<vmem>>, vector<1x4xf32>
    %28 = vector.shape_cast %27 : vector<1x4xf32> to vector<1x1x4xf32>
    %29 = vector.broadcast %28 : vector<1x1x4xf32> to vector<10x18x4xf32>
    %30 = arith.addf %26, %29 : vector<10x18x4xf32>
    %31 = arith.negf %30 : vector<10x18x4xf32>
    %32 = math.exp %31 : vector<10x18x4xf32>
    %cst_7 = arith.constant 1.000000e+00 : f32
    %33 = vector.broadcast %cst_7 : f32 to vector<10x18x4xf32>
    %34 = arith.addf %33, %32 : vector<10x18x4xf32>
    %35 = arith.divf %33, %34 : vector<10x18x4xf32>
    %36 = arith.mulf %30, %35 : vector<10x18x4xf32>
    %37 = tpu.iota {dimensions = array<i32: 0>} : vector<10x18x1xi32>
    %38 = tpu.iota {dimensions = array<i32: 1>} : vector<10x18x1xi32>
    %c0_i32 = arith.constant 0 : i32
    %39 = vector.broadcast %c0_i32 : i32 to vector<10x18x1xi32>
    %40 = arith.cmpi eq, %38, %39 : vector<10x18x1xi32>
    %c17_i32 = arith.constant 17 : i32
    %41 = vector.broadcast %c17_i32 : i32 to vector<10x18x1xi32>
    %42 = arith.cmpi eq, %38, %41 : vector<10x18x1xi32>
    %43 = arith.ori %40, %42 : vector<10x18x1xi1>
    %c0_i32_8 = arith.constant 0 : i32
    %44 = vector.broadcast %c0_i32_8 : i32 to vector<10x18x1xi32>
    %45 = arith.cmpi eq, %37, %44 : vector<10x18x1xi32>
    %c0_i32_9 = arith.constant 0 : i32
    %46 = arith.cmpi eq, %arg1, %c0_i32_9 : i32
    %47 = vector.broadcast %46 : i1 to vector<10x18x1xi1>
    %48 = arith.andi %45, %47 : vector<10x18x1xi1>
    %49 = arith.ori %43, %48 : vector<10x18x1xi1>
    %c9_i32 = arith.constant 9 : i32
    %50 = vector.broadcast %c9_i32 : i32 to vector<10x18x1xi32>
    %51 = arith.cmpi eq, %37, %50 : vector<10x18x1xi32>
    %c1_i32 = arith.constant 1 : i32
    %52 = arith.cmpi eq, %arg1, %c1_i32 : i32
    %53 = vector.broadcast %52 : i1 to vector<10x18x1xi1>
    %54 = arith.andi %51, %53 : vector<10x18x1xi1>
    %55 = arith.ori %49, %54 : vector<10x18x1xi1>
    %cst_10 = arith.constant 0.000000e+00 : f32
    %56 = vector.shape_cast %55 : vector<10x18x1xi1> to vector<10x18x1xi1>
    %57 = vector.broadcast %56 : vector<10x18x1xi1> to vector<10x18x4xi1>
    %58 = vector.broadcast %cst_10 : f32 to vector<10x18x4xf32>
    %59 = arith.select %57, %58, %36 : vector<10x18x4xi1>, vector<10x18x4xf32>
    %60 = arith.truncf %59 : vector<10x18x4xf32> to vector<10x18x4xbf16>
    %61 = vector.extract_strided_slice %60 {offsets = [0, 0, 0], sizes = [8, 16, 4], strides = [1, 1, 1]} : vector<10x18x4xbf16> to vector<8x16x4xbf16>
    %62 = vector.shape_cast %61 : vector<8x16x4xbf16> to vector<128x4xbf16>
    %63 = vector.extract_strided_slice %60 {offsets = [0, 1, 0], sizes = [8, 16, 4], strides = [1, 1, 1]} : vector<10x18x4xbf16> to vector<8x16x4xbf16>
    %64 = vector.shape_cast %63 : vector<8x16x4xbf16> to vector<128x4xbf16>
    %65 = vector.extract_strided_slice %60 {offsets = [0, 2, 0], sizes = [8, 16, 4], strides = [1, 1, 1]} : vector<10x18x4xbf16> to vector<8x16x4xbf16>
    %66 = vector.shape_cast %65 : vector<8x16x4xbf16> to vector<128x4xbf16>
    %67 = vector.extract_strided_slice %60 {offsets = [1, 0, 0], sizes = [8, 16, 4], strides = [1, 1, 1]} : vector<10x18x4xbf16> to vector<8x16x4xbf16>
    %68 = vector.shape_cast %67 : vector<8x16x4xbf16> to vector<128x4xbf16>
    %69 = vector.extract_strided_slice %60 {offsets = [1, 1, 0], sizes = [8, 16, 4], strides = [1, 1, 1]} : vector<10x18x4xbf16> to vector<8x16x4xbf16>
    %70 = vector.shape_cast %69 : vector<8x16x4xbf16> to vector<128x4xbf16>
    %71 = vector.extract_strided_slice %60 {offsets = [1, 2, 0], sizes = [8, 16, 4], strides = [1, 1, 1]} : vector<10x18x4xbf16> to vector<8x16x4xbf16>
    %72 = vector.shape_cast %71 : vector<8x16x4xbf16> to vector<128x4xbf16>
    %73 = vector.extract_strided_slice %60 {offsets = [2, 0, 0], sizes = [8, 16, 4], strides = [1, 1, 1]} : vector<10x18x4xbf16> to vector<8x16x4xbf16>
    %74 = vector.shape_cast %73 : vector<8x16x4xbf16> to vector<128x4xbf16>
    %75 = vector.extract_strided_slice %60 {offsets = [2, 1, 0], sizes = [8, 16, 4], strides = [1, 1, 1]} : vector<10x18x4xbf16> to vector<8x16x4xbf16>
    %76 = vector.shape_cast %75 : vector<8x16x4xbf16> to vector<128x4xbf16>
    %77 = vector.extract_strided_slice %60 {offsets = [2, 2, 0], sizes = [8, 16, 4], strides = [1, 1, 1]} : vector<10x18x4xbf16> to vector<8x16x4xbf16>
    %78 = vector.shape_cast %77 : vector<8x16x4xbf16> to vector<128x4xbf16>
    %79 = tpu.concatenate %62, %64, %66, %68, %70, %72, %74, %76, %78 in 1 : vector<128x4xbf16>, vector<128x4xbf16>, vector<128x4xbf16>, vector<128x4xbf16>, vector<128x4xbf16>, vector<128x4xbf16>, vector<128x4xbf16>, vector<128x4xbf16>, vector<128x4xbf16> -> vector<128x36xbf16>
    %c0_11 = arith.constant 0 : index
    %c0_12 = arith.constant 0 : index
    %80 = vector.load %arg5[%c0_11, %c0_12] : memref<36x4xbf16, #tpu.memory_space<vmem>>, vector<36x4xbf16>
    %cst_13 = arith.constant dense<0.000000e+00> : vector<128x4xf32>
    %81 = tpu.matmul %79, %80, %cst_13 {dimension_numbers = #tpu.dot_dimension_numbers<[1], [0], [0], [1], [0, 0, 1, 1], [], []>} : vector<128x36xbf16>, vector<36x4xbf16>, vector<128x4xf32> -> vector<128x4xf32>
    %c0_14 = arith.constant 0 : index
    %c0_15 = arith.constant 0 : index
    %82 = vector.load %arg6[%c0_14, %c0_15] : memref<1x4xf32, #tpu.memory_space<vmem>>, vector<1x4xf32>
    %83 = vector.broadcast %82 : vector<1x4xf32> to vector<128x4xf32>
    %84 = arith.addf %81, %83 : vector<128x4xf32>
    %85 = arith.negf %84 : vector<128x4xf32>
    %86 = math.exp %85 : vector<128x4xf32>
    %cst_16 = arith.constant 1.000000e+00 : f32
    %87 = vector.broadcast %cst_16 : f32 to vector<128x4xf32>
    %88 = arith.addf %87, %86 : vector<128x4xf32>
    %89 = arith.divf %87, %88 : vector<128x4xf32>
    %c0_17 = arith.constant 0 : index
    %c0_18 = arith.constant 0 : index
    %90 = vector.load %arg7[%c0_17, %c0_18] : memref<4x16xf32, #tpu.memory_space<vmem>>, vector<4x16xf32>
    %cst_19 = arith.constant dense<0.000000e+00> : vector<128x16xf32>
    %91 = tpu.matmul %89, %90, %cst_19 {dimension_numbers = #tpu.dot_dimension_numbers<[1], [0], [0], [1], [0, 0, 1, 1], [], []>} : vector<128x4xf32>, vector<4x16xf32>, vector<128x16xf32> -> vector<128x16xf32>
    %92 = arith.mulf %91, %25 : vector<128x16xf32>
    %93 = vector.extract_strided_slice %92 {offsets = [0, 0], sizes = [128, 4], strides = [1, 1]} : vector<128x16xf32> to vector<128x4xf32>
    %94 = vector.extract_strided_slice %92 {offsets = [0, 4], sizes = [128, 4], strides = [1, 1]} : vector<128x16xf32> to vector<128x4xf32>
    %95 = vector.extract_strided_slice %92 {offsets = [0, 8], sizes = [128, 4], strides = [1, 1]} : vector<128x16xf32> to vector<128x4xf32>
    %96 = vector.extract_strided_slice %92 {offsets = [0, 12], sizes = [128, 4], strides = [1, 1]} : vector<128x16xf32> to vector<128x4xf32>
    %97 = arith.addf %93, %94 : vector<128x4xf32>
    %98 = arith.addf %97, %95 : vector<128x4xf32>
    %99 = arith.addf %98, %96 : vector<128x4xf32>
    %100 = arith.subf %93, %94 : vector<128x4xf32>
    %101 = arith.addf %100, %95 : vector<128x4xf32>
    %102 = arith.subf %101, %96 : vector<128x4xf32>
    %103 = arith.addf %93, %94 : vector<128x4xf32>
    %104 = arith.subf %103, %95 : vector<128x4xf32>
    %105 = arith.subf %104, %96 : vector<128x4xf32>
    %106 = arith.subf %93, %94 : vector<128x4xf32>
    %107 = arith.subf %106, %95 : vector<128x4xf32>
    %108 = arith.addf %107, %96 : vector<128x4xf32>
    %109 = tpu.concatenate %99, %102, %105, %108 in 1 : vector<128x4xf32>, vector<128x4xf32>, vector<128x4xf32>, vector<128x4xf32> -> vector<128x16xf32>
    %cst_20 = arith.constant 5.000000e-01 : f32
    %110 = vector.broadcast %cst_20 : f32 to vector<128x16xf32>
    %111 = arith.mulf %110, %109 : vector<128x16xf32>
    %112 = vector.shape_cast %111 : vector<128x16xf32> to vector<8x16x16xf32>
    %c0_21 = arith.constant 0 : index
    %c0_22 = arith.constant 0 : index
    %c0_23 = arith.constant 0 : index
    %c0_24 = arith.constant 0 : index
    %113 = vector.load %arg8[%c0_21, %c0_22, %c0_23, %c0_24] : memref<1x8x16x16xf32, #tpu.memory_space<vmem>>, vector<1x8x16x16xf32>
    %114 = vector.shape_cast %113 : vector<1x8x16x16xf32> to vector<8x16x16xf32>
    %115 = vector.shape_cast %112 : vector<8x16x16xf32> to vector<1x8x16x16xf32>
    tpu.vector_store %arg8[%c0_21, %c0_22, %c0_23, %c0_24], %115 {strides = array<i32>} : memref<1x8x16x16xf32, #tpu.memory_space<vmem>>, vector<1x8x16x16xf32>,
    return
  }
  func.func @transform_0(%arg0: i32, %arg1: i32) -> (i32, i32, i32, i32) {
    %c2_i32 = arith.constant 2 : i32
    %0 = arith.muli %arg0, %c2_i32 : i32
    %1 = arith.addi %0, %arg1 : i32
    %c0_i32 = arith.constant 0 : i32
    %c0_i32_0 = arith.constant 0 : i32
    %c0_i32_1 = arith.constant 0 : i32
    %c0_i32_2 = arith.constant 0 : i32
    return %1, %c0_i32, %c0_i32_0, %c0_i32_1 : i32, i32, i32, i32
  }
  func.func @transform_1(%arg0: i32, %arg1: i32) -> (i32, i32) {
    %c0_i32 = arith.constant 0 : i32
    %c0_i32_0 = arith.constant 0 : i32
    %c0_i32_1 = arith.constant 0 : i32
    return %c0_i32, %c0_i32_0 : i32, i32
  }
  func.func @transform_2(%arg0: i32, %arg1: i32) -> (i32, i32) {
    %c0_i32 = arith.constant 0 : i32
    %c0_i32_0 = arith.constant 0 : i32
    %c0_i32_1 = arith.constant 0 : i32
    return %c0_i32, %c0_i32_0 : i32, i32
  }
  func.func @transform_3(%arg0: i32, %arg1: i32) -> (i32, i32) {
    %c0_i32 = arith.constant 0 : i32
    %c0_i32_0 = arith.constant 0 : i32
    %c0_i32_1 = arith.constant 0 : i32
    return %c0_i32, %c0_i32_0 : i32, i32
  }
  func.func @transform_4(%arg0: i32, %arg1: i32) -> (i32, i32) {
    %c0_i32 = arith.constant 0 : i32
    %c0_i32_0 = arith.constant 0 : i32
    %c0_i32_1 = arith.constant 0 : i32
    return %c0_i32, %c0_i32_0 : i32, i32
  }
  func.func @transform_5(%arg0: i32, %arg1: i32) -> (i32, i32) {
    %c0_i32 = arith.constant 0 : i32
    %c0_i32_0 = arith.constant 0 : i32
    %c0_i32_1 = arith.constant 0 : i32
    return %c0_i32, %c0_i32_0 : i32, i32
  }
  func.func @transform_6(%arg0: i32, %arg1: i32) -> (i32, i32, i32, i32) {
    %c0_i32 = arith.constant 0 : i32
    %c0_i32_0 = arith.constant 0 : i32
    %c0_i32_1 = arith.constant 0 : i32
    return %arg0, %arg1, %c0_i32, %c0_i32_0 : i32, i32, i32, i32
  }
}

</mosaic_0001>

<bundles_post_ra>
// kernel: tpu_custom_call.1
= control target key start
LH: loop header
LB: loop body
LE: loop exit
PB: predicated region body
PF: predicated region fallthrough
CT: control target
= control target key end

     0   :  { %11 = vsyncpa [#allocation3], 0  ;;  %s16731_s0 = inlined_call_operand.vmem [shape: bf16[4,12,20,4], index: 0, kind: input, shape index: {}]   ;;  %s16732_s1 = inlined_call_operand.vmem [shape: bf16[36,20], index: 1, kind: input, shape index: {}]   ;;  %s16733_s2 = inlined_call_operand.vmem [shape: f32[1,4], index: 2, kind: input, shape index: {}]   ;;  %s16734_s3 = inlined_call_operand.vmem [shape: bf16[36,4], index: 3, kind: input, shape index: {}]   ;;  %s16735_s4 = inlined_call_operand.vmem [shape: f32[1,4], index: 4, kind: input, shape index: {}]   ;;  %s16736_s5 = inlined_call_operand.vmem [shape: f32[4,16], index: 5, kind: input, shape index: {}]   ;;  %s16737_s6 = inlined_call_operand.hbm [shape: f32[2,16,16,16], index: 6, kind: output, shape index: {}]  }
   0x1   :  { %13 = vsyncpa [#allocation3 + $0x1], 0  ;;  %s11267_s21 = smov 0   ;;  %s11269_s22 = smov 0  }
   0x2   :  { %s11271_s23 = smov 0   ;;  %s11273_s24 = smov 0  }
   0x3   :  { %s11275_s25 = smov 0   ;;  %s11277_s26 = smov 0  }
   0x4   :  { %s11279_s27 = smov 0   ;;  %s11281_s28 = smov 0  }
   0x5 LB: > { %s10053_s29 = sadd.s32 4294967295, %s11214_s28   ;;  %s10054_s30 = sadd.s32 4294967294, %s11214_s28   ;;  %s11214_s28 = sphi %s11281_s28, %s19_s28   ;;  %s11210_s27 = sphi %s11279_s27, %s17383_s27   ;;  %s11206_s26 = sphi %s11277_s26, %s17382_s26   ;;  %s11202_s25 = sphi %s11275_s25, %s17381_s25   ;;  %s11198_s24 = sphi %s11273_s24, %s17380_s24   ;;  %s11194_s23 = sphi %s11271_s23, %s17379_s23   ;;  %s11190_s22 = sphi %s11269_s22, %s17378_s22   ;;  %s11186_s21 = sphi %s11267_s21, %s17377_s21  }
   0x6   : > { %s28_s7 = sadd.s32 1, %s11206_s26  ;;  %s31_s8 = sadd.s32 1, %s11210_s27 }
   0x7   : > { %p29_p0 = scmp.ge.s32.totalorder %s28_s7, 2  ;;  %p185_p1 = scmp.ne.s32.totalorder %s11194_s23, %s11190_s22 }
   0x8   : > { %p186_p2 = scmp.eq.s32.totalorder %s10053_s29, 3  ;;  %p191_p5 = scmp.ne.s32.totalorder %s11190_s22, %s11186_s21 }
   0x9   : > { %s17385_s7 = smov (%p29_p0, %s28_s7), 0  ;;  %s17387_s8 = smov (!%p29_p0, %s31_s8), %s11210_s27 }
   0xa   : > { %s171_s9 = ssub.s32 %s11206_s26, %s17385_s7  ;;  %p11318_p3 = por %p186_p2, %p185_p1 }
   0xb   : > { %p33_p4 = scmp.ge.s32.totalorder %s17387_s8, 2  ;;  %p192_p6 = scmp.eq.s32.totalorder %s10054_s30, 3 }
   0xc   : > { %p10059_p7 = scmp.ge.s32.totalorder %s11214_s28, 1  ;;  %p237_p9 = scmp.lt.s32.totalorder %s11214_s28, 5 }
   0xd   : > { %s17389_s8 = smov (%p33_p4, %s17387_s8), 0  ;;  %p11327_p8 = por %p192_p6, %p191_p5 }
   0xe   : > { %s170_s12 = ssub.s32 %s11210_s27, %s17389_s8  ;;  %s175_s13 = sadd.s32 1, %s11194_s23 }
   0xf   : > { %s172_s14 = sor.u32 %s171_s9, %s170_s12  ;;  %p238_p10 = pnand %p10059_p7, %p237_p9 }
  0x10   : > { %p173_p11 = scmp.eq.s32.totalorder %s172_s14, 0 }
  0x11   : > { %241 = sbr.rel (%p238_p10) target bundleno = 1799 (0x707), region = 44 }
  0x12   : > { %s11336_s15 = scalar_select %p173_p11, %s11194_s23, %s175_s13  }
  0x18   : > { %s10061_s16 = sshll.u32 %s11202_s25, 1  ;;  %v357_v0 = vlaneseq  ;;  %v11216_v1 = vmov 1966171168   ;;  %vm1046_vm0 = vsmask.f32 256  ;;  %s11217_s30 = smov 12  }
  0x19   : > { %s270_s17 = sadd.s32 %s11198_s24, %s10061_s16  ;;  %v355_v2 = vunpack.c.l.s4 %v11216_v1  ;;  %vm1047_vm1 = vsmask.f32 1284  ;;  %vm1049_vm2 = vsmask.f32 2312  ;;  %vm1051_vm3 = vsmask.f32 3340 }
  0x1a   : > { %p271_p12 = scmp.lt.s32.totalorder %s270_s17, 3  ;;  %v11340_v3 = vshrl.u32 %v357_v0, 7  ;;  %vm1053_vm4 = vsmask.f32 4368  ;;  %vm11464_vm5 = vmor %vm1046_vm0, %vm1047_vm1  ;;  %vm1055_vm6 = vsmask.f32 5396 }
  0x1b   : > { %v356_v4 = vunpack.c.0.s8 %v355_v2  ;;  %s11218_s9 = smov 8   ;;  %vm11494_vm7 = vmor %vm11464_vm5, %vm1049_vm2  ;;  %vm1057_vm8 = vsmask.f32 6424  ;;  %s16873_s12 = smov 24   ;;  %vm1059_vm10 = vsmask.f32 7452 }
  0x1c   : > { %16883 = vst [vmem:[#allocation5_spill] sm:$0xff] %v11340_v3  ;;  %s17391_s17 = smov (!%p271_p12, %s270_s17), 3  ;;  %vm11537_vm9 = vmor %vm11494_vm7, %vm1051_vm3  ;;  %s11220_s13 = smov 20   ;;  %vm5659_vm15 = vcmask 31744   ;;  %vm5696_vm0 = vcmask 64512   ;;  %vm5721_vm1 = vcmask 97280  }
  0x1d   : > { %s10528_s18 = smul.u32 144, %s17391_s17  ;;  %v11343_v5 = vsub.s32 %v356_v4, %v11340_v3  ;;  %vm11573_vm11 = vmor %vm11537_vm9, %vm1053_vm4  ;;  %s11221_s14 = smov 32   ;;  %vm5746_vm2 = vcmask 130048   ;;  %vm5771_vm3 = vcmask 162816   ;;  %vm5796_vm4 = vcmask 195584  }
  0x1e   : > { %vm1056_vm12 = vmor %vm11573_vm11, %vm1055_vm6  ;;  %s11222_s16 = smov 4   ;;  %s11223_s17 = smov 16   ;;  %vm5821_vm5 = vcmask 228352   ;;  %vm5916_vm6 = vcmask 1041408   ;;  %vm5846_vm7 = vcmask 261120   ;;  %vm6543_vm9 = vcmask 1040384  }
  0x1f   : > { %s11348_s29 = scalar_lea.vmem %s16731_s0, %s10528_s18  ;;  %vm1058_vm13 = vmor %vm1056_vm12, %vm1057_vm8  ;;  %s11224_s18 = smov 28   ;;  %vm5891_vm8 = vcmask 293888   ;;  %vm6546_vm11 = vcmask 1044484  }
  0x20   : > { %v10066_v6 = vld.sshfl [vmem:[%s11348_s29 + $0xc] sm:$0x33 pattern:$0x75316420]  ;;  %vm11642_vm14 = vmor %vm1058_vm13, %vm1059_vm10  ;;  %vm6544_vm10 = vcmask 1042434   ;;  %vm6548_vm13 = vcmask 1046534  }
  0x21   : > { %v10067_v7 = vld.sshfl [vmem:[%s11348_s29 + $0x10] sm:$0x33 pattern:$0x75316420]  ;;  %v415_v8 = vcombine.high %v10066_v6, %v10066_v6  ;;  %v11353_v9 = vrot.slane %v10066_v6, %v11343_v5  ;;  %vm6545_vm12 = vmor %vm6543_vm9, %vm6544_vm10  ;;  %s11226_s20 = smov 112   ;;  %p7518_p13 = scmp.eq.s32.totalorder %s11198_s24, 0 }
  0x22   : > { %v439_v10 = vcombine.high %v10067_v7, %v10067_v7  ;;  %v11356_v11 = vrot.slane %v10067_v7, %v11343_v5  ;;  %v10065_v12 = vld.sshfl [vmem:[%s11348_s29 + $0x8] sm:$0x11 pattern:$0x75316420]  ;;  %p7528_p0 = scmp.eq.s32.totalorder %s11198_s24, 1  ;;  %s11227_s19 = smov 124  }
  0x23   : > { %v11360_v13 = vrot.slane %v415_v8, %v11343_v5  ;;  %v966_v14 = vcombine.high %v10065_v12, %v10065_v12  ;;  %v11363_v15 = vrot.slane %v10065_v12, %v11343_v5  ;;  %v10069_v16 = vld.sshfl [vmem:[%s11348_s29 + $0x18] sm:$0x33 pattern:$0x75316420]  ;;  %v11368_v17 = vcombine.high %v11353_v9, %v11353_v9 }
  0x24   : > { %v11371_v18 = vrot.slane %v439_v10, %v11343_v5  ;;  %v10070_v19 = vld.sshfl [vmem:[%s11348_s29 + $0x1c] sm:$0x33 pattern:$0x75316420]  ;;  %v477_v20 = vcombine.high %v10069_v16, %v10069_v16  ;;  %v11375_v21 = vrot.slane %v10069_v16, %v11343_v5  ;;  %v11379_v22 = vcombine.high %v11356_v11, %v11356_v11 }
  0x25   : > { %v10217_v23 = vcombine.high %v11353_v9, %v11360_v13  ;;  %v3793_v24 = vcombine.low %v11353_v9, %v11360_v13  ;;  %v11386_v25 = vrot.slane %v966_v14, %v11343_v5  ;;  %v501_v26 = vcombine.high %v10070_v19, %v10070_v19  ;;  %v10068_v39 = vld.sshfl [vmem:[%s11348_s29 + $0x14] sm:$0x11 pattern:$0x75316420] }
  0x26   : > { %v3266_v27 = vcombine.low %v11356_v11, %v11371_v18  ;;  %v10218_v28 = vcombine.high %v11356_v11, %v11371_v18  ;;  %v11393_v29 = vrot.slane %v477_v20, %v11343_v5  ;;  %v11396_v30 = vrot.slane %v10070_v19, %v11343_v5  ;;  %v10063_v0 = vld.sshfl [vmem:[%s11348_s29] sm:$0x33 pattern:$0x75316420] }
  0x27   : > { %v3281_v31 = vrot.slane %v10217_v23, %v11343_v5  ;;  %v3800_v32 = vrot.slane %v3793_v24, %v11343_v5  ;;  %v3264_v33 = vcombine.low %v11386_v25, %v11360_v13  ;;  %v11406_v37 = vrot.slane %v501_v26, %v11343_v5  ;;  %v10064_v7 = vld.sshfl [vmem:[%s11348_s29 + $0x4] sm:$0x33 pattern:$0x75316420] }
  0x28   : > { %v3288_v35 = vrot.slane %v3266_v27, %v11343_v5  ;;  %v3295_v36 = vrot.slane %v10218_v28, %v11343_v5  ;;  %v2182_v38 = vcombine.low %v11375_v21, %v11393_v29  ;;  %v10209_v42 = vcombine.high %v11375_v21, %v11393_v29 }
  0x29   : > { %v3801_v40 = vcombine.low %v3800_v32, %v3281_v31  ;;  %v3274_v41 = vrot.slane %v3264_v33, %v11343_v5  ;;  %v11415_v43 = vrot.slane %v10068_v39, %v11343_v5  ;;  %v2184_v45 = vcombine.low %v11396_v30, %v11406_v37 }
  0x2a   : > { %v3297_v44 = vcombine.low %v3288_v35, %v3295_v36  ;;  %v11420_v46 = vrot.slane %v2182_v38, %v11343_v5  ;;  %v10210_v47 = vcombine.high %v11396_v30, %v11406_v37  ;;  %v11426_v50 = vrot.slane %v10209_v42, %v11343_v5 }
  0x2b   : > { %v3808_v48 = vrot.slane %v3801_v40, %v11343_v5  ;;  %v3296_v49 = vcombine.low %v3274_v41, %v3281_v31  ;;  %v974_v51 = vcombine.high %v10068_v39, %v10068_v39  ;;  %v11430_v53 = vrot.slane %v2184_v45, %v11343_v5 }
  0x2c   : > { %16884 = vst [vmem:[#allocation6_spill] sm:$0xff] %v11420_v46  ;;  %16885 = vst [vmem:[#allocation7_spill] sm:$0xff] %v11426_v50  ;;  %v3311_v52 = vrot.slane %v3297_v44, %v11343_v5  ;;  %v11433_v54 = vrot.slane %v10210_v47, %v11343_v5  ;;  %v11437_v55 = vcombine.high %v11360_v13, %v11360_v13 }
  0x2d   : > { %16886 = vst [vmem:[#allocation8_spill] sm:$0xff] %v11430_v53  ;;  %v3304_v56 = vrot.slane %v3296_v49, %v11343_v5  ;;  %v4934_v57 = vcombine.low %v11420_v46, %v11426_v50  ;;  %v11443_v58 = vrot.slane %v974_v51, %v11343_v5  ;;  %v11447_v59 = vcombine.high %v11371_v18, %v11371_v18  ;;  %v11532_v49 = vld.sshfl [vmem:[%s11348_s29 + $0x20] sm:$0x11 pattern:$0x75316420] }
  0x2e   : > { %16887 = vst [vmem:[#allocation9_spill] sm:$0xff] %v11433_v54  ;;  %v3809_v60 = vcombine.low %v3808_v48, %v3311_v52  ;;  %v4638_v61 = vcombine.low %v11430_v53, %v11433_v54  ;;  %v2133_v62 = vcombine.low %v11360_v13, %v11368_v17  ;;  %v2134_v63 = vcombine.low %v11437_v55, %v11356_v11 }
  0x2f   : > { %v3312_v1 = vcombine.low %v3304_v56, %v3311_v52  ;;  %v4941_v2 = vrot.slane %v4934_v57, %v11343_v5  ;;  %v4629_v4 = vcombine.low %v11443_v58, %v11393_v29  ;;  %v2135_v6 = vcombine.low %v11371_v18, %v11379_v22 }
  0x30   : > { %4010 = vrot.lane.b32.xlu0 %v3809_v60, %s11217_s30  ;;  %v4652_v10 = vrot.slane %v4638_v61, %v11343_v5  ;;  %v11471_v12 = vrot.slane %v2133_v62, %v11343_v5  ;;  %v11474_v14 = vrot.slane %v2134_v63, %v11343_v5  ;;  %v2181_v16 = vcombine.low %v11447_v59, %v11415_v43 }
  0x31   : > { %3771 = vrot.lane.b32.xlu1 %v3312_v1, %s11218_s9  ;;  %v4636_v19 = vrot.slane %v4629_v4, %v11343_v5  ;;  %v11481_v20 = vrot.slane %v2135_v6, %v11343_v5  ;;  %v353_v23 = vcombine.high %v10063_v0, %v10063_v0  ;;  %v11484_v24 = vrot.slane %v10063_v0, %v11343_v5 }
  0x32   : > { %16890 = vst [vmem:[#allocation10_spill] sm:$0xff] %v11471_v12  ;;  %v4942_v26 = vcombine.low %v4941_v2, %v4652_v10  ;;  %v11487_v27 = vrot.slane %v2181_v16, %v11343_v5  ;;  %v4612_v28 = vcombine.low %v11471_v12, %v11474_v14  ;;  %v377_v31 = vcombine.high %v10064_v7, %v10064_v7 }
  0x33   : > { %v4637_v33 = vcombine.low %v4636_v19, %v11426_v50  ;;  %v11500_v35 = vrot.slane %v353_v23, %v11343_v5  ;;  %v11504_v36 = vcombine.high %v11484_v24, %v11484_v24  ;;  %v11507_v38 = vrot.slane %v10064_v7, %v11343_v5  ;;  %v10072_v7 = vld.sshfl [vmem:[%s11348_s29 + $0x24] sm:$0x33 pattern:$0x75316420] }
  0x34   : > { %16891 = vst [vmem:[#allocation11_spill] sm:$0xff] %v11487_v27  ;;  %5087 = vrot.lane.b32.xlu0 %v4942_v26, %s16873_s12  ;;  %v4613_v39 = vcombine.low %v11481_v20, %v11487_v27  ;;  %v4620_v40 = vrot.slane %v4612_v28, %v11343_v5  ;;  %v11514_v41 = vrot.slane %v377_v31, %v11343_v5 }
  0x35   : > { %v11518_v42 = vcombine.high %v11375_v21, %v11375_v21  ;;  %v4645_v44 = vrot.slane %v4637_v33, %v11343_v5  ;;  %v11523_v45 = vcombine.high %v11500_v35, %v11500_v35  ;;  %v11527_v47 = vcombine.high %v11507_v38, %v11507_v38 }
  0x36   : > { %v3215_v48 = vcombine.low %v11500_v35, %v11504_v36  ;;  %v4627_v52 = vrot.slane %v4613_v39, %v11343_v5  ;;  %v11544_v56 = vcombine.high %v11514_v41, %v11514_v41  ;;  %v11548_v57 = vcombine.high %v11393_v29, %v11393_v29 }
  0x37   : > { %v11552_v60 = vcombine.high %v11396_v30, %v11396_v30  ;;  %v4653_v61 = vcombine.low %v4645_v44, %v4652_v10  ;;  %v3216_v62 = vcombine.low %v11523_v45, %v11507_v38  ;;  %v3217_v63 = vcombine.low %v11514_v41, %v11527_v47 }
  0x38   : > { %v3225_v0 = vrot.slane %v3215_v48, %v11343_v5  ;;  %v4628_v1 = vcombine.low %v4620_v40, %v4627_v52  ;;  %v3218_v2 = vcombine.low %v11544_v56, %v11363_v15  ;;  %v11563_v4 = vcombine.high %v11406_v37, %v11406_v37 }
  0x39   : > { %v11567_v6 = vrot.slane %v11532_v49, %v11343_v5  ;;  %4912 = vrot.lane.b32.xlu1 %v4653_v61, %s11220_s13  ;;  %v3232_v10 = vrot.slane %v3216_v62, %v11343_v5  ;;  %v3239_v16 = vrot.slane %v3217_v63, %v11343_v5  ;;  %v3314_v19 = vcombine.low %v11393_v29, %v11518_v42  ;;  %v10073_v62 = vld.sshfl [vmem:[%s11348_s29 + $0x28] sm:$0x33 pattern:$0x75316420] }
  0x3a   : > { %v3315_v23 = vcombine.low %v11548_v57, %v11396_v30  ;;  %4910 = vrot.lane.b32.xlu0 %v4628_v1, %s11220_s13  ;;  %v3246_v26 = vrot.slane %v3218_v2, %v11343_v5  ;;  %v3316_v28 = vcombine.low %v11406_v37, %v11552_v60  ;;  %v3810_v32 = vcombine.low %v11415_v43, %v11375_v21 }
  0x3b   : > { %v3362_v31 = vcombine.low %v11563_v4, %v11567_v6  ;;  %v3247_v33 = vcombine.low %v3225_v0, %v3232_v10  ;;  %v11593_v39 = vrot.slane %v3314_v19, %v11343_v5  ;;  %v539_v44 = vcombine.high %v10072_v7, %v10072_v7 }
  0x3c   : > { %v3337_v40 = vrot.slane %v3315_v23, %v11343_v5  ;;  %v3248_v48 = vcombine.low %v3239_v16, %v3246_v26  ;;  %v3344_v51 = vrot.slane %v3316_v28, %v11343_v5  ;;  %v3817_v61 = vrot.slane %v3810_v32, %v11343_v5 }
  0x3d   : > { %v11601_v52 = vrot.slane %v3362_v31, %v11343_v5  ;;  %v3255_v63 = vrot.slane %v3247_v33, %v11343_v5  ;;  %v11608_v1 = vrot.slane %v10072_v7, %v11343_v5  ;;  %v11611_v2 = vrot.slane %v539_v44, %v11343_v5 }
  0x3e   : > { %v5401_v0 = vcombine.low %v11593_v39, %v3337_v40  ;;  %v3262_v8 = vrot.slane %v3248_v48, %v11343_v5  ;;  %v3346_v16 = vcombine.low %v3337_v40, %v3344_v51  ;;  %v3818_v19 = vcombine.low %v3817_v61, %v11593_v39 }
  0x3f   : > { %v5402_v10 = vcombine.low %v3344_v51, %v11601_v52  ;;  %v11620_v26 = vcombine.high %v11608_v1, %v11608_v1  ;;  %v11624_v7 = vcombine.high %v11611_v2, %v11611_v2  ;;  %v563_v28 = vcombine.high %v10073_v62, %v10073_v62 }
  0x40   : > { %v5409_v23 = vrot.slane %v5401_v0, %v11343_v5  ;;  %v3263_v31 = vcombine.low %v3255_v63, %v3262_v8  ;;  %v11628_v33 = vrot.slane %v3346_v16, %v11343_v5  ;;  %v3825_v40 = vrot.slane %v3818_v19, %v11343_v5 }
  0x41   : > { %v5416_v32 = vrot.slane %v5402_v10, %v11343_v5  ;;  %v11632_v44 = vrot.slane %v10073_v62, %v11343_v5  ;;  %v11635_v48 = vrot.slane %v563_v28, %v11343_v5  ;;  %v2231_v51 = vcombine.low %v11567_v6, %v11608_v1 }
  0x42   : > { %v2232_v61 = vcombine.low %v11611_v2, %v11620_v26  ;;  %3769 = vrot.lane.b32.xlu1 %v3263_v31, %s11218_s9  ;;  %v3826_v62 = vcombine.low %v3825_v40, %v11628_v33  ;;  %v1062_v8 = vshrl.u32 %v11484_v24, 16  ;;  %v1067_v10 = vshll.u32 %v11500_v35, 16 }
  0x43   : > { %v5417_v0 = vcombine.low %v5409_v23, %v5416_v32  ;;  %v11652_v16 = vcombine.high %v11632_v44, %v11632_v44  ;;  %v2233_v19 = vcombine.low %v11624_v7, %v11632_v44  ;;  %v11657_v28 = vrot.slane %v2231_v51, %v11343_v5 }
  0x44   : > { %v11660_v34 = vrot.slane %v2232_v61, %v11343_v5  ;;  %v1069_v23 = vsel %vm11642_vm14, %v1062_v8, %v1067_v10  ;;  %v1070_v31 = vshrl.u32 %v11500_v35, 16  ;;  %v1075_v32 = vshll.u32 %v11504_v36, 16 }
  0x45   : > { %16900 = vst [vmem:[#allocation12_spill] sm:$0xff] %v11657_v28  ;;  %5635 = vrot.lane.b32.xlu0 %v5417_v0, %s11221_s14  ;;  %v1078_v40 = vshrl.u32 %v11504_v36, 16  ;;  %v11669_v3 = vrot.slane %v2233_v19, %v11343_v5  ;;  %v2279_v51 = vcombine.low %v11635_v48, %v11652_v16  ;;  %v1083_v0 = vshll.u32 %v11523_v45, 16 }
  0x46   : > { %16901 = vst [vmem:[#allocation13_spill] sm:$0xff] %v11660_v34  ;;  %v4943_v61 = vcombine.low %v11657_v28, %v11660_v34  ;;  %4012 = vrot.lane.b32.xlu1 %v3826_v62, %s11217_s30  ;;  %v1077_v8 = vsel %vm11642_vm14, %v1070_v31, %v1075_v32  ;;  %v1086_v10 = vshrl.u32 %v11523_v45, 16  ;;  %v1091_v36 = vshll.u32 %v11507_v38, 16 }
  0x47   : > { %16902 = vst [vmem:[#allocation14_spill] sm:$0xff] %v11669_v3  ;;  %v1094_v19 = vshrl.u32 %v11507_v38, 16  ;;  %v11683_v54 = vrot.slane %v2279_v51, %v11343_v5  ;;  %v1085_v28 = vsel %vm11642_vm14, %v1078_v40, %v1083_v0  ;;  %v1099_v53 = vshll.u32 %v11514_v41, 16 }
  0x48   : > { %v4950_v50 = vrot.slane %v4943_v61, %v11343_v5  ;;  %v1093_v62 = vsel %vm11642_vm14, %v1086_v10, %v1091_v36  ;;  %v1102_v31 = vshrl.u32 %v11514_v41, 16  ;;  %v1107_v45 = vshll.u32 %v11527_v47, 16 }
  0x49   : > { %16903 = vst [vmem:[#allocation15_spill] sm:$0xff] %v11683_v54  ;;  %v1110_v32 = vshrl.u32 %v11527_v47, 16  ;;  %v4663_v51 = vcombine.low %v11669_v3, %v11683_v54  ;;  %v1101_v61 = vsel %vm11642_vm14, %v1094_v19, %v1099_v53  ;;  %v1115_v27 = vshll.u32 %v11544_v56, 16 }
  0x4a   : > { %v1118_v40 = vshrl.u32 %v11544_v56, 16  ;;  %v1109_v0 = vsel %vm11642_vm14, %v1102_v31, %v1107_v45  ;;  %v1123_v10 = vshll.u32 %v11363_v15, 16  ;;  %v2637_v36 = vcombine.low %v1069_v23, %v1077_v8 }
  0x4b   : > { %v2638_v46 = vcombine.low %v1085_v28, %v1093_v62  ;;  %v11704_v12 = vrot.slane %v4663_v51, %v11343_v5  ;;  %v1117_v47 = vsel %vm11642_vm14, %v1110_v32, %v1115_v27  ;;  %v2639_v54 = vcombine.low %v1101_v61, %v1109_v0 }
  0x4c   : > { %v1199_v53 = vshrl.u32 %v11415_v43, 16  ;;  %v1125_v19 = vsel %vm11642_vm14, %v1118_v40, %v1123_v10  ;;  %v2647_v56 = vrot.slane %v2637_v36, %v11343_v5  ;;  %v1204_v45 = vshll.u32 %v11443_v58, 16 }
  0x4d   : > { %v2654_v31 = vrot.slane %v2638_v46, %v11343_v5  ;;  %v4951_v28 = vcombine.low %v4950_v50, %v11704_v12  ;;  %v2640_v23 = vcombine.low %v1117_v47, %v1125_v19  ;;  %v2661_v8 = vrot.slane %v2639_v54, %v11343_v5 }
  0x4e   : > { %v1208_v62 = vshrl.u32 %v11375_v21, 16  ;;  %v11719_v32 = vsel %vm11642_vm14, %v1199_v53, %v1204_v45  ;;  %v1213_v51 = vshll.u32 %v11393_v29, 16  ;;  %v1216_v61 = vshrl.u32 %v11393_v29, 16 }
  0x4f   : > { %v2669_v27 = vcombine.low %v2647_v56, %v2654_v31  ;;  %5089 = vrot.lane.b32.xlu1 %v4951_v28, %s16873_s12  ;;  %v2668_v46 = vrot.slane %v2640_v23, %v11343_v5  ;;  %v1221_v50 = vshll.u32 %v11518_v42, 16  ;;  %v1224_v40 = vshrl.u32 %v11518_v42, 16 }
  0x50   : > { %v1229_v54 = vshll.u32 %v11548_v57, 16  ;;  %v11731_v0 = vsel %vm11642_vm14, %v1208_v62, %v1213_v51  ;;  %v1232_v10 = vshrl.u32 %v11548_v57, 16  ;;  %v1237_v29 = vshll.u32 %v11396_v30, 16 }
  0x51   : > { %v2677_v21 = vrot.slane %v2669_v27, %v11343_v5  ;;  %v2670_v36 = vcombine.low %v2661_v8, %v2668_v46  ;;  %v11737_v47 = vsel %vm11642_vm14, %v1216_v61, %v1221_v50  ;;  %v1240_v53 = vshrl.u32 %v11396_v30, 16 }
  0x52   : > { %v11741_v42 = vsel %vm11642_vm14, %v1224_v40, %v1229_v54  ;;  %v11746_v19 = vsel %vm11642_vm14, %v1232_v10, %v1237_v29  ;;  %v1245_v56 = vshll.u32 %v11406_v37, 16  ;;  %v1248_v57 = vshrl.u32 %v11406_v37, 16 }
  0x53   : > { %v1253_v31 = vshll.u32 %v11552_v60, 16  ;;  %v2684_v45 = vrot.slane %v2670_v36, %v11343_v5  ;;  %v1256_v28 = vshrl.u32 %v11552_v60, 16  ;;  %v1261_v23 = vshll.u32 %v11563_v4, 16 }
  0x54   : > { %v4083_v8 = vcombine.low %v11719_v32, %v11731_v0  ;;  %v11758_v30 = vsel %vm11642_vm14, %v1240_v53, %v1245_v56  ;;  %v4084_v37 = vcombine.low %v11737_v47, %v11741_v42  ;;  %v1126_v27 = vshrl.u32 %v11363_v15, 16 }
  0x55   : > { %v11762_v62 = vsel %vm11642_vm14, %v1248_v57, %v1253_v31  ;;  %v2685_v51 = vcombine.low %v2677_v21, %v2684_v45  ;;  %v11769_v60 = vsel %vm11642_vm14, %v1256_v28, %v1261_v23  ;;  %v4085_v61 = vcombine.low %v11746_v19, %v11758_v30 }
  0x56   : > { %v4093_v46 = vrot.slane %v4083_v8, %v11343_v5  ;;  %v4086_v50 = vcombine.low %v11762_v62, %v11769_v60  ;;  %v4100_v40 = vrot.slane %v4084_v37, %v11343_v5  ;;  %v16904_v54 = vshll.u32 %v11386_v25, 16 }
  0x57   : > { %v1135_v21 = vshrl.u32 %v11353_v9, 16  ;;  %3191 = vrot.lane.b32.xlu0 %v2685_v51, %s11222_s16  ;;  %v4107_v29 = vrot.slane %v4085_v61, %v11343_v5  ;;  %v1140_v36 = vshll.u32 %v11360_v13, 16  ;;  %v1143_v53 = vshrl.u32 %v11360_v13, 16 }
  0x58   : > { %v1133_v10 = vsel %vm11642_vm14, %v1126_v27, %v16904_v54  ;;  %v1148_v56 = vshll.u32 %v11368_v17, 16  ;;  %v4114_v57 = vrot.slane %v4086_v50, %v11343_v5  ;;  %v4115_v31 = vcombine.low %v4093_v46, %v4100_v40 }
  0x59   : > { %v1151_v25 = vshrl.u32 %v11368_v17, 16  ;;  %v1156_v45 = vshll.u32 %v11437_v55, 16  ;;  %v11792_v28 = vsel %vm11642_vm14, %v1135_v21, %v1140_v36  ;;  %v1159_v8 = vshrl.u32 %v11437_v55, 16 }
  0x5a   : > { %v11796_v23 = vsel %vm11642_vm14, %v1143_v53, %v1148_v56  ;;  %v1164_v13 = vshll.u32 %v11356_v11, 16  ;;  %v4116_v37 = vcombine.low %v4107_v29, %v4114_v57  ;;  %v4123_v27 = vrot.slane %v4115_v31, %v11343_v5 }
  0x5b   : > { %v11803_v17 = vsel %vm11642_vm14, %v1151_v25, %v1156_v45  ;;  %v1167_v51 = vshrl.u32 %v11356_v11, 16  ;;  %v1172_v46 = vshll.u32 %v11371_v18, 16  ;;  %v1175_v50 = vshrl.u32 %v11371_v18, 16 }
  0x5c   : > { %v11808_v61 = vsel %vm11642_vm14, %v1159_v8, %v1164_v13  ;;  %v1180_v55 = vshll.u32 %v11379_v22, 16  ;;  %v4130_v40 = vrot.slane %v4116_v37, %v11343_v5  ;;  %v1183_v54 = vshrl.u32 %v11379_v22, 16 }
  0x5d   : > { %v1188_v21 = vshll.u32 %v11447_v59, 16  ;;  %v2686_v29 = vcombine.low %v1133_v10, %v11792_v28  ;;  %v11819_v11 = vsel %vm11642_vm14, %v1167_v51, %v1172_v46  ;;  %v2687_v18 = vcombine.low %v11796_v23, %v11803_v17 }
  0x5e   : > { %v11823_v36 = vsel %vm11642_vm14, %v1175_v50, %v1180_v55  ;;  %v11829_v53 = vcombine.high %v11635_v48, %v11635_v48  ;;  %v4131_v22 = vcombine.low %v4123_v27, %v4130_v40  ;;  %v2688_v10 = vcombine.low %v11808_v61, %v11819_v11 }
  0x5f   : > { %v11833_v56 = vsel %vm11642_vm14, %v1183_v54, %v1188_v21  ;;  %v2696_v57 = vrot.slane %v2686_v29, %v11343_v5  ;;  %v2703_v25 = vrot.slane %v2687_v18, %v11343_v5  ;;  %v982_v45 = vcombine.high %v11532_v49, %v11532_v49 }
  0x60   : > { %v2689_v31 = vcombine.low %v11823_v36, %v11833_v56  ;;  %v1272_v8 = vshrl.u32 %v11567_v6, 16  ;;  %4590 = vrot.lane.b32.xlu1 %v4131_v22, %s11223_s17  ;;  %v2710_v13 = vrot.slane %v2688_v10, %v11343_v5  ;;  %v1281_v37 = vshrl.u32 %v11608_v1, 16 }
  0x61   : > { %v1286_v27 = vshll.u32 %v11611_v2, 16  ;;  %v1289_v51 = vshrl.u32 %v11611_v2, 16  ;;  %v2718_v50 = vcombine.low %v2696_v57, %v2703_v25  ;;  %v11851_v55 = vrot.slane %v982_v45, %v11343_v5 }
  0x62   : > { %v2717_v46 = vrot.slane %v2689_v31, %v11343_v5  ;;  %v1294_v49 = vshll.u32 %v11620_v26, 16  ;;  %v1297_v54 = vshrl.u32 %v11620_v26, 16  ;;  %v1302_v21 = vshll.u32 %v11624_v7, 16 }
  0x63   : > { %v11856_v40 = vsel %vm11642_vm14, %v1281_v37, %v1286_v27  ;;  %v1305_v29 = vshrl.u32 %v11624_v7, 16  ;;  %v2726_v22 = vrot.slane %v2718_v50, %v11343_v5  ;;  %v1277_v10 = vshll.u32 %v11851_v55, 16 }
  0x64   : > { %v2719_v18 = vcombine.low %v2710_v13, %v2717_v46  ;;  %v11865_v57 = vsel %vm11642_vm14, %v1289_v51, %v1294_v49  ;;  %v11869_v31 = vsel %vm11642_vm14, %v1297_v54, %v1302_v21  ;;  %v1310_v25 = vshll.u32 %v11632_v44, 16 }
  0x65   : > { %v1313_v26 = vshrl.u32 %v11632_v44, 16  ;;  %v1318_v45 = vshll.u32 %v11635_v48, 16  ;;  %v11877_v13 = vsel %vm11642_vm14, %v1272_v8, %v1277_v10  ;;  %v1321_v37 = vshrl.u32 %v11635_v48, 16 }
  0x66   : > { %v2733_v7 = vrot.slane %v2719_v18, %v11343_v5  ;;  %v1326_v27 = vshll.u32 %v11652_v16, 16  ;;  %v11883_v51 = vsel %vm11642_vm14, %v1305_v29, %v1310_v25  ;;  %v1329_v50 = vshrl.u32 %v11652_v16, 16 }
  0x67   : > { %v11887_v46 = vsel %vm11642_vm14, %v1313_v26, %v1318_v45  ;;  %v1334_v49 = vshll.u32 %v11829_v53, 16  ;;  %v2785_v21 = vcombine.low %v11877_v13, %v11856_v40  ;;  %v2786_v29 = vcombine.low %v11865_v57, %v11869_v31 }
  0x68   : > { %v2734_v54 = vcombine.low %v2726_v22, %v2733_v7  ;;  %v11893_v8 = vsel %vm11642_vm14, %v1321_v37, %v1326_v27  ;;  %v2787_v16 = vcombine.low %v11883_v51, %v11887_v46  ;;  %v1191_v10 = vshrl.u32 %v11447_v59, 16 }
  0x69   : > { %v11901_v18 = vsel %vm11642_vm14, %v1329_v50, %v1334_v49  ;;  %v1196_v22 = vshll.u32 %v11415_v43, 16  ;;  %v11909_v25 = vrot.slane %v2785_v21, %v11343_v5  ;;  %v2808_v26 = vrot.slane %v2786_v29, %v11343_v5 }
  0x6a   : > { %3193 = vrot.lane.b32.xlu0 %v2734_v54, %s11222_s16  ;;  %v2833_v45 = vcombine.low %v11893_v8, %v11901_v18  ;;  %v4034_v7 = vcombine.low %v11792_v28, %v11796_v23  ;;  %v2815_v37 = vrot.slane %v2787_v16, %v11343_v5  ;;  %v4035_v27 = vcombine.low %v11803_v17, %v11808_v61 }
  0x6b   : > { %v1198_v59 = vsel %vm11642_vm14, %v1191_v10, %v1196_v22  ;;  %v4036_v50 = vcombine.low %v11819_v11, %v11823_v36  ;;  %v5128_v54 = vcombine.low %v11909_v25, %v2808_v26  ;;  %v2736_v17 = vcombine.low %v11731_v0, %v11737_v47 }
  0x6c   : > { %v11924_v49 = vrot.slane %v2833_v45, %v11343_v5  ;;  %v4037_v21 = vcombine.low %v11833_v56, %v1198_v59  ;;  %v4044_v28 = vrot.slane %v4034_v7, %v11343_v5  ;;  %v4051_v23 = vrot.slane %v4035_v27, %v11343_v5 }
  0x6d   : > { %v4058_v29 = vrot.slane %v4036_v50, %v11343_v5  ;;  %v2735_v16 = vcombine.low %v1198_v59, %v11719_v32  ;;  %v5136_v11 = vrot.slane %v5128_v54, %v11343_v5  ;;  %v2737_v56 = vcombine.low %v11741_v42, %v11746_v19 }
  0x6e   : > { %v5129_v61 = vcombine.low %v2815_v37, %v11924_v49  ;;  %v4065_v36 = vrot.slane %v4037_v21, %v11343_v5  ;;  %v4066_v10 = vcombine.low %v4044_v28, %v4051_v23  ;;  %v2738_v22 = vcombine.low %v11758_v30, %v11762_v62 }
  0x6f   : > { %v2745_v45 = vrot.slane %v2735_v16, %v11343_v5  ;;  %v2752_v32 = vrot.slane %v2736_v17, %v11343_v5  ;;  %v2759_v47 = vrot.slane %v2737_v56, %v11343_v5  ;;  %v1264_v59 = vshrl.u32 %v11563_v4, 16  ;;  %v11958_v16 = vld.sshfl [vmem:[%s11348_s29 + $0x2c] sm:$0x11 pattern:$0x75316420] }
  0x70   : > { %v5143_v7 = vrot.slane %v5129_v61, %v11343_v5  ;;  %v4067_v0 = vcombine.low %v4058_v29, %v4065_v36  ;;  %v4074_v27 = vrot.slane %v4066_v10, %v11343_v5  ;;  %v2766_v42 = vrot.slane %v2738_v22, %v11343_v5 }
  0x71   : > { %v2767_v19 = vcombine.low %v2745_v45, %v2752_v32  ;;  %v1269_v50 = vshll.u32 %v11567_v6, 16  ;;  %v5111_v54 = vcombine.low %v2752_v32, %v2759_v47  ;;  %v2817_v21 = vcombine.low %v2808_v26, %v2815_v37  ;;  %v10075_v32 = vld.sshfl [vmem:[%s11348_s29 + $0x30] sm:$0x33 pattern:$0x75316420] }
  0x72   : > { %v5144_v30 = vcombine.low %v5136_v11, %v5143_v7  ;;  %v4081_v62 = vrot.slane %v4067_v0, %v11343_v5  ;;  %v2768_v28 = vcombine.low %v2759_v47, %v2766_v42  ;;  %v3363_v4 = vcombine.low %v11851_v55, %v11611_v2 }
  0x73   : > { %v2775_v23 = vrot.slane %v2767_v19, %v11343_v5  ;;  %v11953_v29 = vsel %vm11642_vm14, %v1264_v59, %v1269_v50  ;;  %v5119_v37 = vrot.slane %v5111_v54, %v11343_v5  ;;  %v2831_v61 = vrot.slane %v2817_v21, %v11343_v5 }
  0x74   : > { %5379 = vrot.lane.b32.xlu1 %v5144_v30, %s11224_s18  ;;  %v4082_v17 = vcombine.low %v4074_v27, %v4081_v62  ;;  %v2784_v26 = vcombine.low %v11769_v60, %v11953_v29  ;;  %v2782_v11 = vrot.slane %v2768_v28, %v11343_v5  ;;  %v10219_v36 = vcombine.high %v11608_v1, %v11611_v2  ;;  %v10076_v28 = vld.sshfl [vmem:[%s11348_s29 + $0x34] sm:$0x33 pattern:$0x75316420] }
  0x75   : > { %v3365_v56 = vcombine.low %v11632_v44, %v11635_v48  ;;  %v3379_v10 = vrot.slane %v3363_v4, %v11343_v5  ;;  %v10220_v60 = vcombine.high %v11632_v44, %v11635_v48  ;;  %v3313_v45 = vcombine.low %v11415_v43, %v11443_v58 }
  0x76   : > { %4588 = vrot.lane.b32.xlu0 %v4082_v17, %s11223_s17  ;;  %v2794_v22 = vrot.slane %v2784_v26, %v11343_v5  ;;  %v11980_v7 = vrot.slane %v11958_v16, %v11343_v5  ;;  %v2783_v0 = vcombine.low %v2775_v23, %v2782_v11  ;;  %v3386_v47 = vrot.slane %v10219_v36, %v11343_v5 }
  0x77   : > { %v3393_v59 = vrot.slane %v3365_v56, %v11343_v5  ;;  %v3394_v27 = vcombine.low %v11601_v52, %v3379_v10  ;;  %v11987_v44 = vrot.slane %v10220_v60, %v11343_v5  ;;  %v3323_v43 = vrot.slane %v3313_v45, %v11343_v5 }
  0x78   : > { %v5112_v19 = vcombine.low %v2766_v42, %v2794_v22  ;;  %v2816_v50 = vcombine.low %v2794_v22, %v11909_v25  ;;  %3195 = vrot.lane.b32.xlu1 %v2783_v0, %s11222_s16  ;;  %v5418_v58 = vcombine.low %v3379_v10, %v3386_v47  ;;  %v601_v62 = vcombine.high %v10075_v32, %v10075_v32 }
  0x79   : > { %v3395_v48 = vcombine.low %v3386_v47, %v3393_v59  ;;  %v3402_v30 = vrot.slane %v3394_v27, %v11343_v5  ;;  %v5419_v42 = vcombine.low %v3393_v59, %v11987_v44  ;;  %v3345_v25 = vcombine.low %v3323_v43, %v11593_v39 }
  0x7a   : > { %v5126_v54 = vrot.slane %v5112_v19, %v11343_v5  ;;  %v2824_v21 = vrot.slane %v2816_v50, %v11343_v5  ;;  %v5426_v23 = vrot.slane %v5418_v58, %v11343_v5  ;;  %v12002_v17 = vrot.slane %v10075_v32, %v11343_v5 }
  0x7b   : > { %v11999_v4 = vrot.slane %v3395_v48, %v11343_v5  ;;  %v12005_v26 = vrot.slane %v601_v62, %v11343_v5  ;;  %v5433_v56 = vrot.slane %v5419_v42, %v11343_v5  ;;  %v3353_v10 = vrot.slane %v3345_v25, %v11343_v5 }
  0x7c   : > { %v5127_v11 = vcombine.low %v5119_v37, %v5126_v54  ;;  %v2832_v36 = vcombine.low %v2824_v21, %v2831_v61  ;;  %v616_v22 = vcombine.high %v12002_v17, %v12002_v17  ;;  %v625_v45 = vcombine.high %v10076_v28, %v10076_v28 }
  0x7d   : > { %v3410_v39 = vcombine.low %v3402_v30, %v11999_v4  ;;  %v617_v60 = vcombine.high %v12005_v26, %v12005_v26  ;;  %v5434_v32 = vcombine.low %v5426_v23, %v5433_v56  ;;  %v3361_v37 = vcombine.low %v3353_v10, %v11628_v33 }
  0x7e   : > { %5377 = vrot.lane.b32.xlu0 %v5127_v11, %s11224_s18  ;;  %3197 = vrot.lane.b32.xlu1 %v2832_v36, %s11222_s16  ;;  %v12018_v61 = vrot.slane %v10076_v28, %v11343_v5  ;;  %v1337_v0 = vshrl.u32 %v11829_v53, 16  ;;  %v12022_v47 = vrot.slane %v625_v45, %v11343_v5  ;;  %v3413_v59 = vcombine.low %v12005_v26, %v616_v22 }
  0x7f   : > { %v3844_v27 = vcombine.low %v11980_v7, %v12002_v17  ;;  %v3827_v19 = vcombine.low %v11608_v1, %v11611_v2  ;;  %v990_v33 = vcombine.high %v11958_v16, %v11958_v16  ;;  %v1342_v43 = vshll.u32 %v11980_v7, 16 }
  0x80   : > { %v3414_v50 = vcombine.low %v617_v60, %v12018_v61  ;;  %v1345_v58 = vshrl.u32 %v11980_v7, 16  ;;  %v12035_v48 = vrot.slane %v3413_v59, %v11343_v5  ;;  %v1354_v54 = vshrl.u32 %v12002_v17, 16 }
  0x81   : > { %v3851_v30 = vrot.slane %v3844_v27, %v11343_v5  ;;  %v3834_v62 = vrot.slane %v3827_v19, %v11343_v5  ;;  %v12046_v2 = vrot.slane %v990_v33, %v11343_v5  ;;  %v12050_v16 = vsel %vm11642_vm14, %v1337_v0, %v1342_v43 }
  0x82   : > { %5637 = vrot.lane.b32.xlu0 %v5434_v32, %s11221_s14  ;;  %3775 = vrot.lane.b32.xlu1 %v3410_v39, %s11218_s9  ;;  %v12043_v1 = vrot.slane %v3414_v50, %v11343_v5  ;;  %v1359_v21 = vshll.u32 %v12005_v26, 16  ;;  %v1362_v28 = vshrl.u32 %v12005_v26, 16  ;;  %v1367_v23 = vshll.u32 %v616_v22, 16 }
  0x83   : > { %v3852_v42 = vcombine.low %v11987_v44, %v3851_v30  ;;  %v3835_v25 = vcombine.low %v11601_v52, %v3834_v62  ;;  %v1350_v36 = vshll.u32 %v12046_v2, 16  ;;  %v1370_v10 = vshrl.u32 %v616_v22, 16 }
  0x84   : > { %v3444_v11 = vcombine.low %v12035_v48, %v12043_v1  ;;  %v12061_v56 = vsel %vm11642_vm14, %v1354_v54, %v1359_v21  ;;  %v12067_v52 = vsel %vm11642_vm14, %v1362_v28, %v1367_v23  ;;  %v1375_v32 = vshll.u32 %v617_v60, 16 }
  0x85   : > { %v3859_v39 = vrot.slane %v3852_v42, %v11343_v5  ;;  %v3842_v45 = vrot.slane %v3835_v25, %v11343_v5  ;;  %v12075_v59 = vsel %vm11642_vm14, %v1345_v58, %v1350_v36  ;;  %v1378_v27 = vshrl.u32 %v617_v60, 16 }
  0x86   : > { %3773 = vrot.lane.b32.xlu0 %v3361_v37, %s11218_s9  ;;  %v12071_v0 = vrot.slane %v3444_v11, %v11343_v5  ;;  %v1383_v22 = vshll.u32 %v12018_v61, 16  ;;  %v12081_v50 = vsel %vm11642_vm14, %v1370_v10, %v1375_v32  ;;  %v1386_v33 = vshrl.u32 %v12018_v61, 16 }
  0x87   : > { %v3843_v19 = vcombine.low %v3842_v45, %v11999_v4  ;;  %v1391_v37 = vshll.u32 %v12022_v47, 16  ;;  %v4181_v60 = vcombine.low %v11901_v18, %v12050_v16  ;;  %v4182_v4 = vcombine.low %v12075_v59, %v12061_v56 }
  0x88   : > { %v3860_v43 = vcombine.low %v3859_v39, %v12071_v0  ;;  %v12088_v30 = vsel %vm11642_vm14, %v1378_v27, %v1383_v22  ;;  %v4183_v62 = vcombine.low %v12067_v52, %v12081_v50  ;;  %v4132_v54 = vcombine.low %v11953_v29, %v11877_v13 }
  0x89   : > { %v12096_v58 = vsel %vm11642_vm14, %v1386_v33, %v1391_v37  ;;  %v4133_v21 = vcombine.low %v11856_v40, %v11865_v57  ;;  %v4191_v42 = vrot.slane %v4181_v60, %v11343_v5  ;;  %v4198_v25 = vrot.slane %v4182_v4, %v11343_v5  ;;  %v10079_v60 = vld.sshfl [vmem:[%s11348_s29 + $0x40] sm:$0x33 pattern:$0x75316420] }
  0x8a   : > { %4016 = vrot.lane.b32.xlu1 %v3860_v43, %s11217_s30  ;;  %4014 = vrot.lane.b32.xlu0 %v3843_v19, %s11217_s30  ;;  %v4184_v18 = vcombine.low %v12088_v30, %v12096_v58  ;;  %v4205_v23 = vrot.slane %v4183_v62, %v11343_v5  ;;  %v4134_v13 = vcombine.low %v11869_v31, %v11883_v51  ;;  %v10078_v19 = vld.sshfl [vmem:[%s11348_s29 + $0x3c] sm:$0x33 pattern:$0x75316420] }
  0x8b   : > { %v4135_v40 = vcombine.low %v11887_v46, %v11893_v8  ;;  %v4142_v57 = vrot.slane %v4132_v54, %v11343_v5  ;;  %v4213_v11 = vcombine.low %v4191_v42, %v4198_v25  ;;  %v4149_v36 = vrot.slane %v4133_v21, %v11343_v5  ;;  %v10077_v46 = vld.sshfl [vmem:[%s11348_s29 + $0x38] sm:$0x11 pattern:$0x75316420] }
  0x8c   : > { %v4212_v29 = vrot.slane %v4184_v18, %v11343_v5  ;;  %v2280_v10 = vcombine.low %v11829_v53, %v11980_v7  ;;  %v4156_v39 = vrot.slane %v4134_v13, %v11343_v5  ;;  %v10211_v31 = vcombine.high %v12002_v17, %v12005_v26 }
  0x8d   : > { %v4163_v45 = vrot.slane %v4135_v40, %v11343_v5  ;;  %v2328_v51 = vcombine.low %v12018_v61, %v12022_v47  ;;  %v4221_v32 = vrot.slane %v4213_v11, %v11343_v5  ;;  %v4164_v27 = vcombine.low %v4142_v57, %v4149_v36 }
  0x8e   : > { %v4214_v8 = vcombine.low %v4205_v23, %v4212_v29  ;;  %v12130_v22 = vrot.slane %v2280_v10, %v11343_v5  ;;  %v12134_v33 = vrot.slane %v10211_v31, %v11343_v5  ;;  %v4679_v43 = vcombine.low %v12046_v2, %v12005_v26 }
  0x8f   : > { %v4165_v53 = vcombine.low %v4156_v39, %v4163_v45  ;;  %v12137_v37 = vrot.slane %v2328_v51, %v11343_v5  ;;  %v4172_v62 = vrot.slane %v4164_v27, %v11343_v5  ;;  %v4654_v54 = vcombine.low %v11567_v6, %v11851_v55 }
  0x90   : > { %16905 = vst [vmem:[#allocation16_spill] sm:$0xff] %v12130_v22  ;;  %16906 = vst [vmem:[#allocation17_spill] sm:$0xff] %v12134_v33  ;;  %v4228_v4 = vrot.slane %v4214_v8, %v11343_v5  ;;  %v12147_v21 = vrot.slane %v10077_v46, %v11343_v5  ;;  %v4686_v42 = vrot.slane %v4679_v43, %v11343_v5 }
  0x91   : > { %16907 = vst [vmem:[#allocation18_spill] sm:$0xff] %v12137_v37  ;;  %v4179_v18 = vrot.slane %v4165_v53, %v11343_v5  ;;  %v4688_v25 = vcombine.low %v12134_v33, %v12137_v37  ;;  %v663_v23 = vcombine.high %v10078_v19, %v10078_v19  ;;  %v4661_v40 = vrot.slane %v4654_v54, %v11343_v5 }
  0x92   : > { %v4229_v13 = vcombine.low %v4221_v32, %v4228_v4  ;;  %v12155_v57 = vrot.slane %v10078_v19, %v11343_v5  ;;  %v687_v29 = vcombine.high %v10079_v60, %v10079_v60  ;;  %v4687_v6 = vcombine.low %v12130_v22, %v4686_v42 }
  0x93   : > { %v4180_v11 = vcombine.low %v4172_v62, %v4179_v18  ;;  %v4702_v55 = vrot.slane %v4688_v25, %v11343_v5  ;;  %v12160_v36 = vrot.slane %v663_v23, %v11343_v5  ;;  %v4662_v10 = vcombine.low %v4661_v40, %v11660_v34 }
  0x94   : > { %4594 = vrot.lane.b32.xlu1 %v4229_v13, %s11223_s17  ;;  %v678_v39 = vcombine.high %v12155_v57, %v12155_v57  ;;  %v12167_v45 = vrot.slane %v10079_v60, %v11343_v5  ;;  %v12170_v31 = vrot.slane %v687_v29, %v11343_v5  ;;  %v4695_v51 = vrot.slane %v4687_v6, %v11343_v5 }
  0x95   : > { %4592 = vrot.lane.b32.xlu0 %v4180_v11, %s11223_s17  ;;  %v679_v8 = vcombine.high %v12160_v36, %v12160_v36  ;;  %v10212_v32 = vcombine.high %v12018_v61, %v12022_v47  ;;  %v2330_v27 = vcombine.low %v12147_v21, %v12155_v57  ;;  %v4670_v19 = vrot.slane %v4662_v10, %v11343_v5 }
  0x96   : > { %v2331_v53 = vcombine.low %v12160_v36, %v678_v39  ;;  %v2281_v43 = vcombine.low %v12002_v17, %v12005_v26  ;;  %v12186_v60 = vcombine.high %v12018_v61, %v12018_v61  ;;  %v4703_v4 = vcombine.low %v4695_v51, %v4702_v55 }
  0x97   : > { %v12189_v62 = vrot.slane %v10212_v32, %v11343_v5  ;;  %v12192_v54 = vrot.slane %v2330_v27, %v11343_v5  ;;  %v2377_v18 = vcombine.low %v679_v8, %v12167_v45  ;;  %v4678_v42 = vcombine.low %v4670_v19, %v11704_v12 }
  0x98   : > { %v12197_v25 = vrot.slane %v2331_v53, %v11343_v5  ;;  %v12200_v17 = vrot.slane %v2281_v43, %v11343_v5  ;;  %v12204_v26 = vcombine.high %v12022_v47, %v12022_v47  ;;  %4916 = vrot.lane.b32.xlu1 %v4703_v4, %s11220_s13  ;;  %v998_v13 = vcombine.high %v10077_v46, %v10077_v46 }
  0x99   : > { %16908 = vst [vmem:[#allocation19_spill] sm:$0xff] %v12189_v62  ;;  %16909 = vst [vmem:[#allocation20_spill] sm:$0xff] %v12192_v54  ;;  %v12208_v61 = vrot.slane %v2377_v18, %v11343_v5  ;;  %v4961_v23 = vcombine.low %v12189_v62, %v12192_v54  ;;  %v1402_v12 = vshrl.u32 %v12186_v60, 16  ;;  %4914 = vrot.lane.b32.xlu0 %v4678_v42, %s11220_s13  ;;  %v1415_v6 = vshll.u32 %v12147_v21, 16 }
  0x9a   : > { %16910 = vst [vmem:[#allocation21_spill] sm:$0xff] %v12197_v25  ;;  %16911 = vst [vmem:[#allocation22_spill] sm:$0xff] %v12200_v17  ;;  %v4952_v40 = vcombine.low %v12130_v22, %v12200_v17  ;;  %v1407_v29 = vshll.u32 %v12204_v26, 16  ;;  %v1410_v11 = vshrl.u32 %v12204_v26, 16  ;;  %v12223_v46 = vrot.slane %v998_v13, %v11343_v5 }
  0x9b   : > { %16912 = vst [vmem:[#allocation23_spill] sm:$0xff] %v12208_v61  ;;  %v4713_v10 = vcombine.low %v12197_v25, %v12208_v61  ;;  %v4968_v51 = vrot.slane %v4961_v23, %v11343_v5  ;;  %v1418_v32 = vshrl.u32 %v12147_v21, 16  ;;  %v1427_v43 = vshrl.u32 %v12155_v57, 16 }
  0x9c   : > { %v4959_v27 = vrot.slane %v4952_v40, %v11343_v5  ;;  %v12229_v19 = vsel %vm11642_vm14, %v1402_v12, %v1407_v29  ;;  %v12233_v53 = vsel %vm11642_vm14, %v1410_v11, %v1415_v6  ;;  %v1423_v18 = vshll.u32 %v12223_v46, 16 }
  0x9d   : > { %v12237_v4 = vrot.slane %v4713_v10, %v11343_v5  ;;  %v1432_v42 = vshll.u32 %v12160_v36, 16  ;;  %v1435_v23 = vshrl.u32 %v12160_v36, 16  ;;  %v1440_v40 = vshll.u32 %v678_v39, 16 }
  0x9e   : > { %v4960_v13 = vcombine.low %v4959_v27, %v4702_v55  ;;  %v1443_v28 = vshrl.u32 %v678_v39, 16  ;;  %v1448_v12 = vshll.u32 %v679_v8, 16  ;;  %v12245_v11 = vsel %vm11642_vm14, %v1418_v32, %v1423_v18 }
  0x9f   : > { %v4969_v29 = vcombine.low %v4968_v51, %v12237_v4  ;;  %v12249_v6 = vsel %vm11642_vm14, %v1427_v43, %v1432_v42  ;;  %v1451_v10 = vshrl.u32 %v679_v8, 16  ;;  %v12254_v61 = vsel %vm11642_vm14, %v1435_v23, %v1440_v40 }
  0xa0   : > { %5091 = vrot.lane.b32.xlu0 %v4960_v13, %s16873_s12  ;;  %v12258_v55 = vsel %vm11642_vm14, %v1443_v28, %v1448_v12  ;;  %v1456_v39 = vshll.u32 %v12167_v45, 16  ;;  %v1459_v51 = vshrl.u32 %v12167_v45, 16  ;;  %v1464_v32 = vshll.u32 %v12170_v31, 16 }
  0xa1   : > { %5093 = vrot.lane.b32.xlu1 %v4969_v29, %s16873_s12  ;;  %v2883_v8 = vcombine.low %v12229_v19, %v12233_v53  ;;  %v2884_v27 = vcombine.low %v12245_v11, %v12249_v6  ;;  %v2885_v43 = vcombine.low %v12254_v61, %v12258_v55  ;;  %v1399_v18 = vshll.u32 %v12186_v60, 16 }
  0xa2   : > { %v12272_v28 = vsel %vm11642_vm14, %v1451_v10, %v1456_v39  ;;  %v2834_v42 = vcombine.low %v12050_v16, %v12075_v59  ;;  %v2835_v23 = vcombine.low %v12061_v56, %v12067_v52  ;;  %v12281_v13 = vsel %vm11642_vm14, %v1459_v51, %v1464_v32  ;;  %v12652_v25 = vpop.permute.xlu0 %4010 }
  0xa3   : > { %v2899_v40 = vrot.slane %v2883_v8, %v11343_v5  ;;  %v2906_v12 = vrot.slane %v2884_v27, %v11343_v5  ;;  %v2913_v29 = vrot.slane %v2885_v43, %v11343_v5  ;;  %v2931_v10 = vcombine.low %v12272_v28, %v12281_v13 }
  0xa4   : > { %v16913_v39 = vshrl.u32 %v12022_v47, 16  ;;  %v2836_v56 = vcombine.low %v12081_v50, %v12088_v30  ;;  %v2850_v52 = vrot.slane %v2834_v42, %v11343_v5  ;;  %v2857_v51 = vrot.slane %v2835_v23, %v11343_v5 }
  0xa5   : > { %v5162_v59 = vcombine.low %v2899_v40, %v2906_v12  ;;  %v3412_v8 = vcombine.low %v11980_v7, %v12046_v2  ;;  %v12303_v27 = vrot.slane %v2931_v10, %v11343_v5  ;;  %v3460_v50 = vcombine.low %v12022_v47, %v12186_v60  ;;  %v10690_v60 = vld [vmem:[%s16732_s1] sm:$0xff]  }
  0xa6   : > { %v12292_v16 = vsel %vm11642_vm14, %v16913_v39, %v1399_v18  ;;  %v2864_v43 = vrot.slane %v2836_v56, %v11343_v5  ;;  %v2865_v18 = vcombine.low %v11924_v49, %v2850_v52  ;;  %v5145_v23 = vcombine.low %v2850_v52, %v2857_v51  ;;  %10441 = vmatprep.subr.bf16.mxu0 %v10690_v60 }
  0xa7   : > { %v2882_v32 = vcombine.low %v12096_v58, %v12292_v16  ;;  %v5170_v30 = vrot.slane %v5162_v59, %v11343_v5  ;;  %v3428_v58 = vrot.slane %v3412_v8, %v11343_v5  ;;  %v5163_v39 = vcombine.low %v2913_v29, %v12303_v27  ;;  %10442 = vmatpush3.bf16.msra.mxu0 %v10690_v60 }
  0xa8   : > { %v2866_v7 = vcombine.low %v2857_v51, %v2864_v43  ;;  %v2873_v2 = vrot.slane %v2865_v18, %v11343_v5  ;;  %v3470_v10 = vrot.slane %v3460_v50, %v11343_v5  ;;  %v5153_v49 = vrot.slane %v5145_v23, %v11343_v5 }
  0xa9   : > { %v2892_v42 = vrot.slane %v2882_v32, %v11343_v5  ;;  %v5435_v54 = vcombine.low %v3428_v58, %v12035_v48  ;;  %v5177_v52 = vrot.slane %v5163_v39, %v11343_v5  ;;  %v2915_v32 = vcombine.low %v2906_v12, %v2913_v29  ;;  %v10080_v39 = vld.sshfl [vmem:[%s11348_s29 + $0x44] sm:$0x11 pattern:$0x75316420] }
  0xaa   : > { %v2880_v59 = vrot.slane %v2866_v7, %v11343_v5  ;;  %v5436_v51 = vcombine.low %v12043_v1, %v3470_v10  ;;  %v3462_v12 = vcombine.low %v12223_v46, %v12160_v36  ;;  %v10081_v7 = vld.sshfl [vmem:[%s11348_s29 + $0x48] sm:$0x33 pattern:$0x75316420] }
  0xab   : > { %v5146_v56 = vcombine.low %v2864_v43, %v2892_v42  ;;  %v2914_v47 = vcombine.low %v2892_v42, %v2899_v40  ;;  %v5443_v43 = vrot.slane %v5435_v54, %v11343_v5  ;;  %v3461_v40 = vcombine.low %v12204_v26, %v12147_v21 }
  0xac   : > { %v5178_v18 = vcombine.low %v5170_v30, %v5177_v52  ;;  %v2881_v50 = vcombine.low %v2873_v2, %v2880_v59  ;;  %v5450_v42 = vrot.slane %v5436_v51, %v11343_v5  ;;  %v2929_v23 = vrot.slane %v2915_v32, %v11343_v5 }
  0xad   : > { %v5160_v8 = vrot.slane %v5146_v56, %v11343_v5  ;;  %v2922_v48 = vrot.slane %v2914_v47, %v11343_v5  ;;  %v10221_v54 = vcombine.high %v12155_v57, %v12160_v36  ;;  %v3477_v29 = vrot.slane %v3461_v40, %v11343_v5 }
  0xae   : > { %5383 = vrot.lane.b32.xlu1 %v5178_v18, %s11224_s18  ;;  %v5451_v26 = vcombine.low %v5443_v43, %v5450_v42  ;;  %v3509_v2 = vcombine.low %v12167_v45, %v12170_v31  ;;  %v3443_v56 = vcombine.low %v11987_v44, %v3428_v58  ;;  %v12345_v52 = vrot.slane %v10080_v39, %v11343_v5 }
  0xaf   : > { %v5161_v1 = vcombine.low %v5153_v49, %v5160_v8  ;;  %v2930_v30 = vcombine.low %v2922_v48, %v2929_v23  ;;  %v3484_v49 = vrot.slane %v3462_v12, %v11343_v5  ;;  %v3491_v47 = vrot.slane %v10221_v54, %v11343_v5 }
  0xb0   : > { %v3492_v60 = vcombine.low %v3470_v10, %v3477_v29  ;;  %v3519_v59 = vrot.slane %v3509_v2, %v11343_v5  ;;  %v3451_v51 = vrot.slane %v3443_v56, %v11343_v5  ;;  %v725_v32 = vcombine.high %v10081_v7, %v10081_v7  ;;  %v10691_v10 = vld [vmem:[%s16732_s1 + $0x8] sm:$0xff]  }
  0xb1   : > { %5381 = vrot.lane.b32.xlu0 %v5161_v1, %s11224_s18  ;;  %v12350_v8 = vrot.slane %v10081_v7, %v11343_v5  ;;  %v5452_v43 = vcombine.low %v3477_v29, %v3484_v49  ;;  %v3493_v44 = vcombine.low %v3484_v49, %v3491_v47  ;;  %v10222_v48 = vcombine.high %v12167_v45, %v12170_v31 }
  0xb2   : > { %v12353_v58 = vrot.slane %v3492_v60, %v11343_v5  ;;  %3199 = vrot.lane.b32.xlu1 %v2881_v50, %s11222_s16  ;;  %v5453_v40 = vcombine.low %v3491_v47, %v3519_v59  ;;  %v3459_v18 = vcombine.low %v3451_v51, %v12071_v0  ;;  %v12363_v42 = vrot.slane %v725_v32, %v11343_v5 }
  0xb3   : > { %v740_v23 = vcombine.high %v12350_v8, %v12350_v8  ;;  %v5460_v1 = vrot.slane %v5452_v43, %v11343_v5  ;;  %v3507_v12 = vrot.slane %v3493_v44, %v11343_v5  ;;  %v12371_v54 = vrot.slane %v10222_v48, %v11343_v5  ;;  %10443 = vmatprep.subr.bf16.mxu0 %v10691_v10 }
  0xb4   : > { %v3878_v50 = vcombine.low %v12345_v52, %v12350_v8  ;;  %v5467_v0 = vrot.slane %v5453_v40, %v11343_v5  ;;  %v3861_v7 = vcombine.low %v12155_v57, %v12160_v36  ;;  %v12388_v60 = vcombine.high %v12170_v31, %v12170_v31  ;;  %10444 = vmatpush3.bf16.msra.mxu0 %v10691_v10 }
  0xb5   : > { %5639 = vrot.lane.b32.xlu0 %v5451_v26, %s11221_s14  ;;  %v3512_v29 = vcombine.low %v12363_v42, %v740_v23  ;;  %v12381_v26 = vcombine.high %v12167_v45, %v12167_v45  ;;  %v3508_v2 = vcombine.low %v12353_v58, %v3507_v12  ;;  %v3541_v56 = vcombine.low %v3519_v59, %v12371_v54 }
  0xb6   : > { %v3885_v49 = vrot.slane %v3878_v50, %v11343_v5  ;;  %3201 = vrot.lane.b32.xlu1 %v2930_v30, %s11222_s16  ;;  %v5468_v51 = vcombine.low %v5460_v1, %v5467_v0  ;;  %v3868_v36 = vrot.slane %v3861_v7, %v11343_v5  ;;  %v12397_v45 = vcombine.high %v12363_v42, %v12363_v42 }
  0xb7   : > { %v12392_v57 = vrot.slane %v3512_v29, %v11343_v5  ;;  %v12400_v59 = vrot.slane %v3541_v56, %v11343_v5  ;;  %v1006_v32 = vcombine.high %v10080_v39, %v10080_v39  ;;  %v1467_v43 = vshrl.u32 %v12170_v31, 16 }
  0xb8   : > { %v1472_v44 = vshll.u32 %v12381_v26, 16  ;;  %v3869_v48 = vcombine.low %v3868_v36, %v3491_v47  ;;  %v1475_v10 = vshrl.u32 %v12381_v26, 16  ;;  %v1480_v40 = vshll.u32 %v12388_v60, 16 }
  0xb9   : > { %5641 = vrot.lane.b32.xlu0 %v5468_v51, %s11221_s14  ;;  %v3886_v30 = vcombine.low %v3885_v49, %v12392_v57  ;;  %v12409_v1 = vrot.slane %v1006_v32, %v11343_v5  ;;  %v1483_v39 = vshrl.u32 %v12388_v60, 16  ;;  %v1488_v50 = vshll.u32 %v12345_v52, 16 }
  0xba   : > { %v12413_v12 = vsel %vm11642_vm14, %v1467_v43, %v1472_v44  ;;  %3779 = vrot.lane.b32.xlu1 %v3508_v2, %s11218_s9  ;;  %v3876_v47 = vrot.slane %v3869_v48, %v11343_v5  ;;  %v12422_v29 = vsel %vm11642_vm14, %v1475_v10, %v1480_v40  ;;  %v1491_v7 = vshrl.u32 %v12345_v52, 16 }
  0xbb   : > { %v3893_v0 = vrot.slane %v3886_v30, %v11343_v5  ;;  %v12427_v56 = vsel %vm11642_vm14, %v1483_v39, %v1488_v50  ;;  %v1496_v49 = vshll.u32 %v12409_v1, 16  ;;  %v1500_v51 = vshrl.u32 %v12350_v8, 16 }
  0xbc   : > { %v1505_v2 = vshll.u32 %v12363_v42, 16  ;;  %v3877_v32 = vcombine.low %v12353_v58, %v3876_v47  ;;  %v1508_v43 = vshrl.u32 %v12363_v42, 16  ;;  %v1513_v44 = vshll.u32 %v740_v23, 16 }
  0xbd   : > { %3777 = vrot.lane.b32.xlu0 %v3459_v18, %s11218_s9  ;;  %v3894_v36 = vcombine.low %v12400_v59, %v3893_v0  ;;  %v12438_v30 = vsel %vm11642_vm14, %v1491_v7, %v1496_v49  ;;  %v1516_v10 = vshrl.u32 %v740_v23, 16  ;;  %v1521_v40 = vshll.u32 %v12397_v45, 16 }
  0xbe   : > { %v12442_v48 = vsel %vm11642_vm14, %v1500_v51, %v1505_v2  ;;  %v12448_v18 = vsel %vm11642_vm14, %v1508_v43, %v1513_v44  ;;  %v4279_v58 = vcombine.low %v12281_v13, %v12413_v12  ;;  %v4280_v39 = vcombine.low %v12422_v29, %v12427_v56 }
  0xbf   : > { %4020 = vrot.lane.b32.xlu1 %v3894_v36, %s11217_s30  ;;  %v4281_v50 = vcombine.low %v12438_v30, %v12442_v48  ;;  %v12458_v23 = vsel %vm11642_vm14, %v1516_v10, %v1521_v40  ;;  %v4230_v0 = vcombine.low %v12292_v16, %v12229_v19  ;;  %v4231_v47 = vcombine.low %v12233_v53, %v12245_v11  ;;  %v10082_v10 = vld.sshfl [vmem:[%s11348_s29 + $0x4c] sm:$0x33 pattern:$0x75316420] }
  0xc0   : > { %v4232_v7 = vcombine.low %v12249_v6, %v12254_v61  ;;  %v4282_v13 = vcombine.low %v12448_v18, %v12458_v23  ;;  %v4289_v49 = vrot.slane %v4279_v58, %v11343_v5  ;;  %v4296_v51 = vrot.slane %v4280_v39, %v11343_v5 }
  0xc1   : > { %4018 = vrot.lane.b32.xlu0 %v3877_v32, %s11217_s30  ;;  %v4303_v2 = vrot.slane %v4281_v50, %v11343_v5  ;;  %v4233_v19 = vcombine.low %v12258_v55, %v12272_v28  ;;  %v4240_v53 = vrot.slane %v4230_v0, %v11343_v5  ;;  %v4247_v61 = vrot.slane %v4231_v47, %v11343_v5 }
  0xc2   : > { %v4254_v11 = vrot.slane %v4232_v7, %v11343_v5  ;;  %v4310_v6 = vrot.slane %v4282_v13, %v11343_v5  ;;  %v4311_v16 = vcombine.low %v4289_v49, %v4296_v51  ;;  %v2378_v36 = vcombine.low %v12170_v31, %v12381_v26  ;;  %v10083_v26 = vld.sshfl [vmem:[%s11348_s29 + $0x50] sm:$0x11 pattern:$0x75316420] }
  0xc3   : > { %v2379_v32 = vcombine.low %v12388_v60, %v12345_v52  ;;  %v4261_v43 = vrot.slane %v4233_v19, %v11343_v5  ;;  %v4262_v44 = vcombine.low %v4240_v53, %v4247_v61  ;;  %v10213_v55 = vcombine.high %v12350_v8, %v12363_v42  ;;  %v10084_v51 = vld.sshfl [vmem:[%s11348_s29 + $0x54] sm:$0x33 pattern:$0x75316420] }
  0xc4   : > { %v4729_v28 = vcombine.low %v12409_v1, %v12363_v42  ;;  %v4312_v40 = vcombine.low %v4303_v2, %v4310_v6  ;;  %v4319_v58 = vrot.slane %v4311_v16, %v11343_v5  ;;  %v12490_v39 = vrot.slane %v2378_v36, %v11343_v5 }
  0xc5   : > { %v12493_v31 = vrot.slane %v2379_v32, %v11343_v5  ;;  %v4263_v60 = vcombine.low %v4254_v11, %v4261_v43  ;;  %v4270_v50 = vrot.slane %v4262_v44, %v11343_v5  ;;  %v12498_v0 = vrot.slane %v10213_v55, %v11343_v5 }
  0xc6   : > { %16914 = vst [vmem:[#allocation24_spill] sm:$0xff] %v12490_v39  ;;  %v4736_v47 = vrot.slane %v4729_v28, %v11343_v5  ;;  %v4326_v7 = vrot.slane %v4312_v40, %v11343_v5  ;;  %v4704_v49 = vcombine.low %v12147_v21, %v12223_v46  ;;  %v749_v2 = vcombine.high %v10082_v10, %v10082_v10 }
  0xc7   : > { %16915 = vst [vmem:[#allocation25_spill] sm:$0xff] %v12493_v31  ;;  %16916 = vst [vmem:[#allocation26_spill] sm:$0xff] %v12498_v0  ;;  %v4737_v13 = vcombine.low %v12490_v39, %v12493_v31  ;;  %v4277_v19 = vrot.slane %v4263_v60, %v11343_v5  ;;  %v12510_v61 = vrot.slane %v10082_v10, %v11343_v5 }
  0xc8   : > { %v4738_v53 = vcombine.low %v4736_v47, %v12498_v0  ;;  %v12513_v11 = vrot.slane %v10083_v26, %v11343_v5  ;;  %v4327_v6 = vcombine.low %v4319_v58, %v4326_v7  ;;  %v4711_v36 = vrot.slane %v4704_v49, %v11343_v5 }
  0xc9   : > { %v4745_v16 = vrot.slane %v4737_v13, %v11343_v5  ;;  %v12518_v32 = vrot.slane %v749_v2, %v11343_v5  ;;  %v4278_v21 = vcombine.low %v4270_v50, %v4277_v19  ;;  %v787_v43 = vcombine.high %v10084_v51, %v10084_v51 }
  0xca   : > { %v4752_v46 = vrot.slane %v4738_v53, %v11343_v5  ;;  %v12522_v44 = vrot.slane %v10084_v51, %v11343_v5  ;;  %4598 = vrot.lane.b32.xlu1 %v4327_v6, %s11223_s17  ;;  %v4712_v55 = vcombine.low %v12189_v62, %v4711_v36  ;;  %v2380_v40 = vcombine.low %v12350_v8, %v12363_v42  ;;  %v10085_v62 = vld.sshfl [vmem:[%s11348_s29 + $0x58] sm:$0x33 pattern:$0x75316420] }
  0xcb   : > { %v2427_v28 = vcombine.low %v12510_v61, %v12518_v32  ;;  %v10214_v10 = vcombine.high %v12510_v61, %v12518_v32  ;;  %4596 = vrot.lane.b32.xlu0 %v4278_v21, %s11223_s17  ;;  %v12534_v60 = vrot.slane %v787_v43, %v11343_v5  ;;  %v12556_v2 = vcombine.high %v12510_v61, %v12510_v61 }
  0xcc   : > { %v4753_v58 = vcombine.low %v4745_v16, %v4752_v46  ;;  %v802_v50 = vcombine.high %v12522_v44, %v12522_v44  ;;  %v2429_v47 = vcombine.low %v12513_v11, %v12522_v44  ;;  %v4720_v7 = vrot.slane %v4712_v55, %v11343_v5 }
  0xcd   : > { %v12542_v13 = vrot.slane %v2427_v28, %v11343_v5  ;;  %v12545_v49 = vrot.slane %v10214_v10, %v11343_v5  ;;  %v12548_v8 = vrot.slane %v2380_v40, %v11343_v5  ;;  %v12560_v19 = vcombine.high %v12518_v32, %v12518_v32 }
  0xce   : > { %v12551_v42 = vrot.slane %v2429_v47, %v11343_v5  ;;  %v2475_v51 = vcombine.low %v12534_v60, %v802_v50  ;;  %4920 = vrot.lane.b32.xlu1 %v4753_v58, %s11220_s13  ;;  %v4728_v53 = vcombine.low %v4720_v7, %v12237_v4  ;;  %v12570_v21 = vcombine.high %v12534_v60, %v12534_v60 }
  0xcf   : > { %16917 = vst [vmem:[#allocation27_spill] sm:$0xff] %v12542_v13  ;;  %16918 = vst [vmem:[#allocation28_spill] sm:$0xff] %v12545_v49  ;;  %v4762_v6 = vcombine.low %v12542_v13, %v12545_v49  ;;  %v4970_v36 = vcombine.low %v12548_v8, %v12498_v0  ;;  %v1014_v43 = vcombine.high %v10083_v26, %v10083_v26  ;;  %v1532_v55 = vshrl.u32 %v12510_v61, 16 }
  0xd0   : > { %16919 = vst [vmem:[#allocation29_spill] sm:$0xff] %v12548_v8  ;;  %16920 = vst [vmem:[#allocation30_spill] sm:$0xff] %v12551_v42  ;;  %v12573_v46 = vrot.slane %v2475_v51, %v11343_v5  ;;  %v1537_v28 = vshll.u32 %v12518_v32, 16  ;;  %4918 = vrot.lane.b32.xlu0 %v4728_v53, %s11220_s13  ;;  %v1540_v40 = vshrl.u32 %v12518_v32, 16  ;;  %v1545_v58 = vshll.u32 %v12556_v2, 16 }
  0xd1   : > { %v12579_v4 = vrot.slane %v4762_v6, %v11343_v5  ;;  %v4977_v10 = vrot.slane %v4970_v36, %v11343_v5  ;;  %v12587_v26 = vrot.slane %v1014_v43, %v11343_v5  ;;  %v1548_v51 = vshrl.u32 %v12556_v2, 16 }
  0xd2   : > { %16921 = vst [vmem:[#allocation31_spill] sm:$0xff] %v12573_v46  ;;  %v4979_v47 = vcombine.low %v12551_v42, %v12573_v46  ;;  %v12591_v7 = vsel %vm11642_vm14, %v1532_v55, %v1537_v28  ;;  %v12596_v6 = vsel %vm11642_vm14, %v1540_v40, %v1545_v58  ;;  %v1553_v36 = vshll.u32 %v12560_v19, 16 }
  0xd3   : > { %v4978_v53 = vcombine.low %v4745_v16, %v4977_v10  ;;  %v1556_v49 = vshrl.u32 %v12560_v19, 16  ;;  %v1561_v43 = vshll.u32 %v12513_v11, 16  ;;  %v1564_v0 = vshrl.u32 %v12513_v11, 16 }
  0xd4   : > { %v4986_v42 = vrot.slane %v4979_v47, %v11343_v5  ;;  %v1569_v55 = vshll.u32 %v12587_v26, 16  ;;  %v12607_v16 = vsel %vm11642_vm14, %v1548_v51, %v1553_v36  ;;  %v1573_v28 = vshrl.u32 %v12522_v44, 16 }
  0xd5   : > { %5095 = vrot.lane.b32.xlu0 %v4978_v53, %s16873_s12  ;;  %v1578_v10 = vshll.u32 %v12534_v60, 16  ;;  %v1581_v40 = vshrl.u32 %v12534_v60, 16  ;;  %v12615_v47 = vsel %vm11642_vm14, %v1556_v49, %v1561_v43  ;;  %v1586_v53 = vshll.u32 %v802_v50, 16 }
  0xd6   : > { %v4987_v58 = vcombine.low %v12579_v4, %v4986_v42  ;;  %v12619_v13 = vsel %vm11642_vm14, %v1564_v0, %v1569_v55  ;;  %v1589_v36 = vshrl.u32 %v802_v50, 16  ;;  %v1594_v31 = vshll.u32 %v12570_v21, 16 }
  0xd7   : > { %v12623_v51 = vsel %vm11642_vm14, %v1573_v28, %v1578_v10  ;;  %v2981_v8 = vcombine.low %v12591_v7, %v12596_v6  ;;  %v12631_v49 = vsel %vm11642_vm14, %v1581_v40, %v1586_v53  ;;  %v2982_v0 = vcombine.low %v12607_v16, %v12615_v47 }
  0xd8   : > { %5097 = vrot.lane.b32.xlu1 %v4987_v58, %s16873_s12  ;;  %v2983_v42 = vcombine.low %v12619_v13, %v12623_v51  ;;  %v1524_v43 = vshrl.u32 %v12397_v45, 16  ;;  %v12640_v50 = vsel %vm11642_vm14, %v1589_v36, %v1594_v31  ;;  %v1529_v28 = vshll.u32 %v12510_v61, 16 }
  0xd9   : > { %v2997_v55 = vrot.slane %v2981_v8, %v11343_v5  ;;  %v2932_v10 = vcombine.low %v12413_v12, %v12422_v29  ;;  %v3004_v40 = vrot.slane %v2982_v0, %v11343_v5  ;;  %v3029_v53 = vcombine.low %v12631_v49, %v12640_v50 }
  0xda   : > { %v3011_v58 = vrot.slane %v2983_v42, %v11343_v5  ;;  %v2933_v39 = vcombine.low %v12427_v56, %v12438_v30  ;;  %v12656_v31 = vsel %vm11642_vm14, %v1524_v43, %v1529_v28  ;;  %v2934_v8 = vcombine.low %v12442_v48, %v12448_v18 }
  0xdb   : > { %v2948_v12 = vrot.slane %v2932_v10, %v11343_v5  ;;  %v3511_v29 = vcombine.low %v12345_v52, %v12409_v1  ;;  %v12664_v36 = vrot.slane %v3029_v53, %v11343_v5  ;;  %v5196_v0 = vcombine.low %v2997_v55, %v3004_v40 }
  0xdc   : > { %v2955_v56 = vrot.slane %v2933_v39, %v11343_v5  ;;  %v2980_v30 = vcombine.low %v12458_v23, %v12656_v31  ;;  %v2962_v42 = vrot.slane %v2934_v8, %v11343_v5  ;;  %v3558_v18 = vcombine.low %v12397_v45, %v12510_v61 }
  0xdd   : > { %v2963_v43 = vcombine.low %v12303_v27, %v2948_v12  ;;  %v3533_v48 = vrot.slane %v3511_v29, %v11343_v5  ;;  %v5197_v52 = vcombine.low %v3011_v58, %v12664_v36  ;;  %v5204_v1 = vrot.slane %v5196_v0, %v11343_v5  ;;  %v12680_v27 = vpop.permute.xlu1 %3771  ;;  %v12684_v0 = vpop.permute.xlu0 %5087 }
  0xde   : > { %v2990_v28 = vrot.slane %v2980_v30, %v11343_v5  ;;  %v5179_v10 = vcombine.low %v2948_v12, %v2955_v56  ;;  %v2964_v39 = vcombine.low %v2955_v56, %v2962_v42  ;;  %v3568_v23 = vrot.slane %v3558_v18, %v11343_v5  ;;  %16922 = vst [vmem:[#allocation32_spill] sm:$0xff] %v12684_v0 }
  0xdf   : > { %v2971_v53 = vrot.slane %v2963_v43, %v11343_v5  ;;  %v5469_v8 = vcombine.low %v12371_v54, %v3533_v48  ;;  %v5211_v29 = vrot.slane %v5197_v52, %v11343_v5  ;;  %v3013_v43 = vcombine.low %v3004_v40, %v3011_v58 }
  0xe0   : > { %v5180_v37 = vcombine.low %v2962_v42, %v2990_v28  ;;  %v5187_v45 = vrot.slane %v5179_v10, %v11343_v5  ;;  %v3012_v61 = vcombine.low %v2990_v28, %v2997_v55  ;;  %v2978_v12 = vrot.slane %v2964_v39, %v11343_v5 }
  0xe1   : > { %v5470_v56 = vcombine.low %v12392_v57, %v3568_v23  ;;  %v5477_v30 = vrot.slane %v5469_v8, %v11343_v5  ;;  %v5212_v54 = vcombine.low %v5204_v1, %v5211_v29  ;;  %v3559_v42 = vcombine.low %v12518_v32, %v12556_v2  ;;  %v10086_v2 = vld.sshfl [vmem:[%s11348_s29 + $0x5c] sm:$0x11 pattern:$0x75316420]  ;;  %v12707_v29 = vpop.permute.xlu1 %4912 }
  0xe2   : > { %v5194_v18 = vrot.slane %v5180_v37, %v11343_v5  ;;  %v3020_v52 = vrot.slane %v3012_v61, %v11343_v5  ;;  %v2979_v10 = vcombine.low %v2971_v53, %v2978_v12  ;;  %v3027_v28 = vrot.slane %v3013_v43, %v11343_v5 }
  0xe3   : > { %v5484_v55 = vrot.slane %v5470_v56, %v11343_v5  ;;  %v3560_v39 = vcombine.low %v12560_v19, %v12513_v11  ;;  %5387 = vrot.lane.b32.xlu1 %v5212_v54, %s11224_s18  ;;  %v3561_v37 = vcombine.low %v12587_v26, %v12534_v60  ;;  %v3575_v58 = vrot.slane %v3559_v42, %v11343_v5  ;;  %v10087_v56 = vld.sshfl [vmem:[%s11348_s29 + $0x60] sm:$0x33 pattern:$0x75316420]  ;;  %v12713_v54 = vpop.permute.xlu0 %4910 }
  0xe4   : > { %v5195_v40 = vcombine.low %v5187_v45, %v5194_v18  ;;  %v10223_v32 = vcombine.high %v12522_v44, %v12534_v60  ;;  %v3028_v53 = vcombine.low %v3020_v52, %v3027_v28  ;;  %v3542_v19 = vcombine.low %v3533_v48, %v12392_v57 }
  0xe5   : > { %v5485_v1 = vcombine.low %v5477_v30, %v5484_v55  ;;  %v3582_v8 = vrot.slane %v3560_v39, %v11343_v5  ;;  %v3589_v45 = vrot.slane %v3561_v37, %v11343_v5  ;;  %v3590_v12 = vcombine.low %v3568_v23, %v3575_v58 }
  0xe6   : > { %5385 = vrot.lane.b32.xlu0 %v5195_v40, %s11224_s18  ;;  %v3617_v61 = vrot.slane %v10223_v32, %v11343_v5  ;;  %v811_v43 = vcombine.high %v10085_v62, %v10085_v62  ;;  %v3556_v30 = vrot.slane %v3542_v19, %v11343_v5  ;;  %v12717_v52 = vrot.slane %v10085_v62, %v11343_v5 }
  0xe7   : > { %v5486_v18 = vcombine.low %v3575_v58, %v3582_v8  ;;  %v12720_v57 = vrot.slane %v10086_v2, %v11343_v5  ;;  %3203 = vrot.lane.b32.xlu1 %v2979_v10, %s11222_s16  ;;  %v3591_v42 = vcombine.low %v3582_v8, %v3589_v45  ;;  %v12724_v55 = vrot.slane %v3590_v12, %v11343_v5  ;;  %v12752_v12 = vpop.permute.xlu1 %3769 }
  0xe8   : > { %v5487_v48 = vcombine.low %v3589_v45, %v3617_v61  ;;  %v12727_v23 = vrot.slane %v811_v43, %v11343_v5  ;;  %v3557_v39 = vcombine.low %v12400_v59, %v3556_v30  ;;  %v849_v40 = vcombine.high %v10087_v56, %v10087_v56 }
  0xe9   : > { %v5494_v28 = vrot.slane %v5486_v18, %v11343_v5  ;;  %v12732_v62 = vrot.slane %v10087_v56, %v11343_v5  ;;  %v3605_v37 = vrot.slane %v3591_v42, %v11343_v5  ;;  %v3895_v45 = vcombine.low %v12522_v44, %v12534_v60 }
  0xea   : > { %5643 = vrot.lane.b32.xlu0 %v5485_v1, %s11221_s14  ;;  %v5501_v10 = vrot.slane %v5487_v48, %v11343_v5  ;;  %v3608_v58 = vcombine.low %v12717_v52, %v12727_v23  ;;  %v10224_v32 = vcombine.high %v12717_v52, %v12727_v23  ;;  %v12742_v19 = vrot.slane %v849_v40, %v11343_v5  ;;  %v12762_v48 = vpop.permute.xlu0 %5635 }
  0xeb   : > { %v3912_v59 = vcombine.low %v12720_v57, %v12732_v62  ;;  %v12750_v1 = vcombine.high %v12717_v52, %v12717_v52  ;;  %3205 = vrot.lane.b32.xlu1 %v3028_v53, %s11222_s16  ;;  %v3606_v43 = vcombine.low %v12724_v55, %v3605_v37  ;;  %16923 = vst [vmem:[#allocation33_spill] sm:$0xff] %v12762_v48  ;;  %v1597_v40 = vshrl.u32 %v12570_v21, 16 }
  0xec   : > { %v5502_v56 = vcombine.low %v5494_v28, %v5501_v10  ;;  %v12757_v18 = vrot.slane %v3608_v58, %v11343_v5  ;;  %v12760_v30 = vrot.slane %v10224_v32, %v11343_v5  ;;  %v3902_v60 = vrot.slane %v3895_v45, %v11343_v5 }
  0xed   : > { %v3919_v44 = vrot.slane %v3912_v59, %v11343_v5  ;;  %v12768_v42 = vcombine.high %v12727_v23, %v12727_v23  ;;  %v1022_v53 = vcombine.high %v10086_v2, %v10086_v2  ;;  %v1602_v10 = vshll.u32 %v12717_v52, 16 }
  0xee   : > { %5645 = vrot.lane.b32.xlu0 %v5502_v56, %s11221_s14  ;;  %v3639_v28 = vcombine.low %v3617_v61, %v12757_v18  ;;  %v1605_v37 = vshrl.u32 %v12717_v52, 16  ;;  %v3903_v32 = vcombine.low %v3582_v8, %v3902_v60  ;;  %v1610_v45 = vshll.u32 %v12727_v23, 16 }
  0xef   : > { %v3920_v58 = vcombine.low %v12760_v30, %v3919_v44  ;;  %v12777_v59 = vrot.slane %v1022_v53, %v11343_v5  ;;  %3783 = vrot.lane.b32.xlu1 %v3606_v43, %s11218_s9  ;;  %v12786_v61 = vsel %vm11642_vm14, %v1597_v40, %v1602_v10  ;;  %v1613_v56 = vshrl.u32 %v12727_v23, 16  ;;  %v12797_v53 = vpop.permute.xlu1 %4012 }
  0xf0   : > { %v12782_v2 = vrot.slane %v3639_v28, %v11343_v5  ;;  %v1618_v17 = vshll.u32 %v12750_v1, 16  ;;  %v3910_v44 = vrot.slane %v3903_v32, %v11343_v5  ;;  %v12794_v60 = vsel %vm11642_vm14, %v1605_v37, %v1610_v45  ;;  %v12807_v32 = vpop.permute.xlu0 %3191 }
  0xf1   : > { %v3927_v8 = vrot.slane %v3920_v58, %v11343_v5  ;;  %v1621_v43 = vshrl.u32 %v12750_v1, 16  ;;  %v1626_v40 = vshll.u32 %v12768_v42, 16  ;;  %v1629_v10 = vshrl.u32 %v12768_v42, 16 }
  0xf2   : > { %3781 = vrot.lane.b32.xlu0 %v3557_v39, %s11218_s9  ;;  %v12802_v28 = vsel %vm11642_vm14, %v1613_v56, %v1618_v17  ;;  %v1634_v58 = vshll.u32 %v12720_v57, 16  ;;  %v3911_v45 = vcombine.low %v12724_v55, %v3910_v44  ;;  %v1637_v33 = vshrl.u32 %v12720_v57, 16 }
  0xf3   : > { %v3928_v37 = vcombine.low %v12782_v2, %v3927_v8  ;;  %v1642_v39 = vshll.u32 %v12777_v59, 16  ;;  %v12815_v17 = vsel %vm11642_vm14, %v1621_v43, %v1626_v40  ;;  %v1646_v22 = vshrl.u32 %v12732_v62, 16 }
  0xf4   : > { %v12819_v56 = vsel %vm11642_vm14, %v1629_v10, %v1634_v58  ;;  %v1651_v34 = vshll.u32 %v12742_v19, 16  ;;  %v4377_v8 = vcombine.low %v12640_v50, %v12786_v61  ;;  %v4378_v44 = vcombine.low %v12794_v60, %v12802_v28 }
  0xf5   : > { %4024 = vrot.lane.b32.xlu1 %v3928_v37, %s11217_s30  ;;  %v12826_v55 = vsel %vm11642_vm14, %v1637_v33, %v1642_v39  ;;  %v4379_v43 = vcombine.low %v12815_v17, %v12819_v56  ;;  %v4328_v10 = vcombine.low %v12656_v31, %v12591_v7  ;;  %v4329_v33 = vcombine.low %v12596_v6, %v12607_v16 }
  0xf6   : > { %4022 = vrot.lane.b32.xlu0 %v3911_v45, %s11217_s30  ;;  %v12837_v40 = vsel %vm11642_vm14, %v1646_v22, %v1651_v34  ;;  %v4330_v50 = vcombine.low %v12615_v47, %v12619_v13  ;;  %v4387_v37 = vrot.slane %v4377_v8, %v11343_v5  ;;  %v4394_v45 = vrot.slane %v4378_v44, %v11343_v5  ;;  %v12850_v22 = vpop.permute.xlu1 %5089  ;;  %v12857_v47 = vpop.permute.xlu0 %3193 }
  0xf7   : > { %v4380_v58 = vcombine.low %v12826_v55, %v12837_v40  ;;  %v4401_v34 = vrot.slane %v4379_v43, %v11343_v5  ;;  %v4331_v7 = vcombine.low %v12623_v51, %v12631_v49  ;;  %v4338_v6 = vrot.slane %v4328_v10, %v11343_v5 }
  0xf8   : > { %v4345_v16 = vrot.slane %v4329_v33, %v11343_v5  ;;  %v4352_v13 = vrot.slane %v4330_v50, %v11343_v5  ;;  %v4409_v39 = vcombine.low %v4387_v37, %v4394_v45  ;;  %v2476_v8 = vcombine.low %v12570_v21, %v12717_v52  ;;  %v10088_v33 = vld.sshfl [vmem:[%s11348_s29 + $0x64] sm:$0x33 pattern:$0x75316420] }
  0xf9   : > { %v4408_v31 = vrot.slane %v4380_v58, %v11343_v5  ;;  %v2477_v44 = vcombine.low %v12727_v23, %v12750_v1  ;;  %v4359_v51 = vrot.slane %v4331_v7, %v11343_v5  ;;  %v2478_v43 = vcombine.low %v12768_v42, %v12720_v57  ;;  %v10089_v52 = vld.sshfl [vmem:[%s11348_s29 + $0x68] sm:$0x11 pattern:$0x75316420] }
  0xfa   : > { %v4360_v49 = vcombine.low %v4338_v6, %v4345_v16  ;;  %v4779_v10 = vcombine.low %v12777_v59, %v12742_v19  ;;  %v4417_v58 = vrot.slane %v4409_v39, %v11343_v5  ;;  %v12872_v37 = vrot.slane %v2476_v8, %v11343_v5  ;;  %v10090_v16 = vld.sshfl [vmem:[%s11348_s29 + $0x6c] sm:$0x33 pattern:$0x75316420]  ;;  %v12889_v39 = vpop.permute.xlu1 %4590 }
  0xfb   : > { %v4410_v50 = vcombine.low %v4401_v34, %v4408_v31  ;;  %v12875_v21 = vrot.slane %v2477_v44, %v11343_v5  ;;  %v4361_v23 = vcombine.low %v4352_v13, %v4359_v51  ;;  %v12880_v45 = vrot.slane %v2478_v43, %v11343_v5 }
  0xfc   : > { %16924 = vst [vmem:[#allocation34_spill] sm:$0xff] %v12872_v37  ;;  %v4368_v1 = vrot.slane %v4360_v49, %v11343_v5  ;;  %v4786_v42 = vrot.slane %v4779_v10, %v11343_v5  ;;  %v4754_v6 = vcombine.low %v12513_v11, %v12587_v26  ;;  %v873_v31 = vcombine.high %v10088_v33, %v10088_v33  ;;  %v12899_v49 = vpop.permute.xlu0 %4588 }
  0xfd   : > { %16925 = vst [vmem:[#allocation35_spill] sm:$0xff] %v12875_v21  ;;  %16926 = vst [vmem:[#allocation36_spill] sm:$0xff] %v12880_v45  ;;  %v4424_v7 = vrot.slane %v4410_v50, %v11343_v5  ;;  %v4787_v34 = vcombine.low %v12872_v37, %v12875_v21  ;;  %v4375_v13 = vrot.slane %v4361_v23, %v11343_v5 }
  0xfe   : > { %v4788_v8 = vcombine.low %v12880_v45, %v4786_v42  ;;  %v12894_v44 = vrot.slane %v10088_v33, %v11343_v5  ;;  %v12897_v51 = vrot.slane %v10089_v52, %v11343_v5  ;;  %v4761_v11 = vrot.slane %v4754_v6, %v11343_v5 }
  0xff   : > { %v4425_v43 = vcombine.low %v4417_v58, %v4424_v7  ;;  %v4795_v10 = vrot.slane %v4787_v34, %v11343_v5  ;;  %v12904_v26 = vrot.slane %v873_v31, %v11343_v5  ;;  %v4376_v50 = vcombine.low %v4368_v1, %v4375_v13 }
 0x100   : > { %v4802_v23 = vrot.slane %v4788_v8, %v11343_v5  ;;  %v911_v42 = vcombine.high %v10090_v16, %v10090_v16  ;;  %v12908_v33 = vrot.slane %v10090_v16, %v11343_v5  ;;  %v4763_v21 = vcombine.low %v4761_v11, %v12573_v46 }
 0x101   : > { %4602 = vrot.lane.b32.xlu1 %v4425_v43, %s11223_s17  ;;  %v10215_v58 = vcombine.high %v12732_v62, %v12742_v19  ;;  %v2526_v7 = vcombine.low %v12894_v44, %v12904_v26  ;;  %v10216_v34 = vcombine.high %v12894_v44, %v12904_v26  ;;  %4600 = vrot.lane.b32.xlu0 %v4376_v50, %s11223_s17  ;;  %v12936_v50 = vpop.permute.xlu1 %5379  ;;  %v1675_v3 = vshll.u32 %v12894_v44, 16 }
 0x102   : > { %v4803_v1 = vcombine.low %v4795_v10, %v4802_v23  ;;  %v12920_v6 = vrot.slane %v911_v42, %v11343_v5  ;;  %v2573_v16 = vcombine.low %v12897_v51, %v12908_v33  ;;  %v2524_v31 = vcombine.low %v12732_v62, %v12742_v19  ;;  %16930 = vst [vmem:[#allocation40_spill] sm:$0xff] %v12936_v50 }
 0x103   : > { %v4777_v13 = vrot.slane %v4763_v21, %v11343_v5  ;;  %v12928_v8 = vrot.slane %v10215_v58, %v11343_v5  ;;  %v12931_v43 = vrot.slane %v2526_v7, %v11343_v5  ;;  %v12934_v11 = vrot.slane %v10216_v34, %v11343_v5  ;;  %v12952_v7 = vpop.permute.xlu0 %5377 }
 0x104   : > { %v12939_v23 = vrot.slane %v2573_v16, %v11343_v5  ;;  %v12942_v42 = vrot.slane %v2524_v31, %v11343_v5  ;;  %v12946_v21 = vcombine.high %v12732_v62, %v12732_v62  ;;  %v12950_v58 = vcombine.high %v12742_v19, %v12742_v19  ;;  %16933 = vst [vmem:[#allocation43_spill] sm:$0xff] %v12952_v7 }
 0x105   : > { %16927 = vst [vmem:[#allocation37_spill] sm:$0xff] %v12928_v8  ;;  %16928 = vst [vmem:[#allocation38_spill] sm:$0xff] %v12931_v43  ;;  %4924 = vrot.lane.b32.xlu1 %v4803_v1, %s11220_s13  ;;  %v4778_v34 = vcombine.low %v12579_v4, %v4777_v13  ;;  %v4812_v16 = vcombine.low %v12928_v8, %v12931_v43  ;;  %v12960_v31 = vcombine.high %v12894_v44, %v12894_v44 }
 0x106   : > { %16929 = vst [vmem:[#allocation39_spill] sm:$0xff] %v12934_v11  ;;  %16931 = vst [vmem:[#allocation41_spill] sm:$0xff] %v12939_v23  ;;  %v12964_v62 = vcombine.high %v12904_v26, %v12904_v26  ;;  %v4997_v46 = vcombine.low %v12934_v11, %v12939_v23  ;;  %v4988_v37 = vcombine.low %v12880_v45, %v12942_v42  ;;  %v1662_v4 = vshrl.u32 %v12946_v21, 16 }
 0x107   : > { %16932 = vst [vmem:[#allocation42_spill] sm:$0xff] %v12942_v42  ;;  %v1030_v1 = vcombine.high %v10089_v52, %v10089_v52  ;;  %4922 = vrot.lane.b32.xlu0 %v4778_v34, %s11220_s13  ;;  %v12973_v13 = vrot.slane %v4812_v16, %v11343_v5  ;;  %v1667_v43 = vshll.u32 %v12950_v58, 16  ;;  %v1670_v8 = vshrl.u32 %v12950_v58, 16  ;;  %v12999_v50 = vpop.permute.xlu0 %5637 }
 0x108   : > { %v5004_v48 = vrot.slane %v4997_v46, %v11343_v5  ;;  %v4995_v23 = vrot.slane %v4988_v37, %v11343_v5  ;;  %v1678_v52 = vshrl.u32 %v12894_v44, 16  ;;  %v1683_v45 = vshll.u32 %v12904_v26, 16  ;;  %v12994_v46 = vpop.permute.xlu1 %3195  ;;  %16936 = vst [vmem:[#allocation46_spill] sm:$0xff] %v12999_v50 }
 0x109   : > { %16934 = vst [vmem:[#allocation44_spill] sm:$0xff] %v12973_v13  ;;  %v12981_v42 = vrot.slane %v1030_v1, %v11343_v5  ;;  %v12986_v34 = vsel %vm11642_vm14, %v1662_v4, %v1667_v43  ;;  %v12990_v16 = vsel %vm11642_vm14, %v1670_v8, %v1675_v3  ;;  %v1686_v11 = vshrl.u32 %v12904_v26, 16  ;;  %16935 = vst [vmem:[#allocation45_spill] sm:$0xff] %v12994_v46 }
 0x10a   : > { %v5005_v37 = vcombine.low %v12973_v13, %v5004_v48  ;;  %v4996_v1 = vcombine.low %v4795_v10, %v4995_v23  ;;  %v1691_v7 = vshll.u32 %v12960_v31, 16  ;;  %v1694_v0 = vshrl.u32 %v12960_v31, 16 }
 0x10b   : > { %v13003_v43 = vsel %vm11642_vm14, %v1678_v52, %v1683_v45  ;;  %v1699_v3 = vshll.u32 %v12964_v62, 16  ;;  %v1702_v8 = vshrl.u32 %v12964_v62, 16  ;;  %v1707_v4 = vshll.u32 %v12897_v51, 16 }
 0x10c   : > { %5101 = vrot.lane.b32.xlu1 %v5005_v37, %s16873_s12  ;;  %5099 = vrot.lane.b32.xlu0 %v4996_v1, %s16873_s12  ;;  %v13012_v48 = vsel %vm11642_vm14, %v1686_v11, %v1691_v7  ;;  %v1710_v10 = vshrl.u32 %v12897_v51, 16  ;;  %v1715_v23 = vshll.u32 %v12981_v42, 16  ;;  %v1719_v45 = vshrl.u32 %v12908_v33, 16 }
 0x10d   : > { %16937 = vst [vmem:[#allocation47_spill] sm:$0xff] %v13012_v48  ;;  %v13019_v52 = vsel %vm11642_vm14, %v1694_v0, %v1699_v3  ;;  %v13023_v13 = vsel %vm11642_vm14, %v1702_v8, %v1707_v4  ;;  %v1724_v37 = vshll.u32 %v12920_v6, 16  ;;  %v3079_v11 = vcombine.low %v12986_v34, %v12990_v16 }
 0x10e   : > { %16938 = vst [vmem:[#allocation48_spill] sm:$0xff] %v13023_v13  ;;  %v13030_v7 = vsel %vm11642_vm14, %v1710_v10, %v1715_v23  ;;  %v3080_v1 = vcombine.low %v13003_v43, %v13012_v48  ;;  %v3081_v0 = vcombine.low %v13019_v52, %v13023_v13  ;;  %v1654_v3 = vshrl.u32 %v12742_v19, 16  ;;  %v13045_v23 = vpop.permute.xlu1 %3197 }
 0x10f   : > { %v13039_v8 = vsel %vm11642_vm14, %v1719_v45, %v1724_v37  ;;  %v3095_v4 = vrot.slane %v3079_v11, %v11343_v5  ;;  %v1659_v50 = vshll.u32 %v12946_v21, 16  ;;  %v3030_v10 = vcombine.low %v12786_v61, %v12794_v60  ;;  %16939 = vst [vmem:[#allocation49_spill] sm:$0xff] %v13045_v23  ;;  %v13053_v37 = vpop.permute.xlu0 %3773 }
 0x110   : > { %v3102_v46 = vrot.slane %v3080_v1, %v11343_v5  ;;  %v3109_v48 = vrot.slane %v3081_v0, %v11343_v5  ;;  %v3127_v13 = vcombine.low %v13030_v7, %v13039_v8  ;;  %v3031_v45 = vcombine.low %v12802_v28, %v12815_v17  ;;  %16940 = vst [vmem:[#allocation50_spill] sm:$0xff] %v13053_v37 }
 0x111   : > { %v13057_v11 = vsel %vm11642_vm14, %v1654_v3, %v1659_v50  ;;  %v3032_v61 = vcombine.low %v12819_v56, %v12826_v55  ;;  %v3046_v60 = vrot.slane %v3030_v10, %v11343_v5  ;;  %v3610_v1 = vcombine.low %v12720_v57, %v12777_v59 }
 0x112   : > { %v13065_v0 = vrot.slane %v3127_v13, %v11343_v5  ;;  %v5230_v23 = vcombine.low %v3095_v4, %v3102_v46  ;;  %v3053_v28 = vrot.slane %v3031_v45, %v11343_v5  ;;  %v3078_v17 = vcombine.low %v12837_v40, %v13057_v11 }
 0x113   : > { %v3060_v50 = vrot.slane %v3032_v61, %v11343_v5  ;;  %v3061_v3 = vcombine.low %v12664_v36, %v3046_v60  ;;  %v13073_v56 = vrot.slane %v3610_v1, %v11343_v5  ;;  %v3656_v55 = vcombine.low %v12742_v19, %v12946_v21  ;;  %v13084_v1 = vpop.permute.xlu1 %3775 }
 0x114   : > { %16941 = vst [vmem:[#allocation51_spill] sm:$0xff] %v13065_v0  ;;  %v5231_v57 = vcombine.low %v3109_v48, %v13065_v0  ;;  %v5238_v59 = vrot.slane %v5230_v23, %v11343_v5  ;;  %v3088_v13 = vrot.slane %v3078_v17, %v11343_v5  ;;  %v5213_v10 = vcombine.low %v3046_v60, %v3053_v28  ;;  %v13088_v23 = vpop.permute.xlu0 %4014 }
 0x115   : > { %v3062_v45 = vcombine.low %v3053_v28, %v3060_v50  ;;  %v3069_v40 = vrot.slane %v3061_v3, %v11343_v5  ;;  %v3666_v61 = vrot.slane %v3656_v55, %v11343_v5  ;;  %v5503_v36 = vcombine.low %v12757_v18, %v12760_v30  ;;  %16942 = vst [vmem:[#allocation52_spill] sm:$0xff] %v13084_v1 }
 0x116   : > { %v5245_v37 = vrot.slane %v5231_v57, %v11343_v5  ;;  %v5214_v19 = vcombine.low %v3060_v50, %v3088_v13  ;;  %v5221_v21 = vrot.slane %v5213_v10, %v11343_v5  ;;  %v3110_v0 = vcombine.low %v3088_v13, %v3095_v4 }
 0x117   : > { %v3076_v60 = vrot.slane %v3062_v45, %v11343_v5  ;;  %v5504_v28 = vcombine.low %v13073_v56, %v3666_v61  ;;  %v5511_v17 = vrot.slane %v5503_v36, %v11343_v5  ;;  %v3111_v3 = vcombine.low %v3102_v46, %v3109_v48 }
 0x118   : > { %v5246_v55 = vcombine.low %v5238_v59, %v5245_v37  ;;  %v5228_v18 = vrot.slane %v5214_v19, %v11343_v5  ;;  %v3118_v1 = vrot.slane %v3110_v0, %v11343_v5  ;;  %v3657_v50 = vcombine.low %v12950_v58, %v12894_v44 }
 0x119   : > { %v3077_v57 = vcombine.low %v3069_v40, %v3076_v60  ;;  %v5518_v4 = vrot.slane %v5504_v28, %v11343_v5  ;;  %v3125_v13 = vrot.slane %v3111_v3, %v11343_v5  ;;  %v3658_v10 = vcombine.low %v12904_v26, %v12960_v31  ;;  %v13110_v40 = vpop.permute.xlu1 %4016 }
 0x11a   : > { %5391 = vrot.lane.b32.xlu1 %v5246_v55, %s11224_s18  ;;  %v5229_v45 = vcombine.low %v5221_v21, %v5228_v18  ;;  %v3659_v46 = vcombine.low %v12964_v62, %v12897_v51  ;;  %v3673_v48 = vrot.slane %v3657_v50, %v11343_v5  ;;  %v3705_v37 = vcombine.low %v12981_v42, %v12920_v6 }
 0x11b   : > { %v5519_v44 = vcombine.low %v5511_v17, %v5518_v4  ;;  %v3126_v58 = vcombine.low %v3118_v1, %v3125_v13  ;;  %v3680_v0 = vrot.slane %v3658_v10, %v11343_v5  ;;  %v2083_v59 = vcombine.low %v11484_v24, %v11500_v35  ;;  %v13121_v1 = vpop.permute.xlu0 %4592 }
 0x11c   : > { %5389 = vrot.lane.b32.xlu0 %v5229_v45, %s11224_s18  ;;  %v3687_v26 = vrot.slane %v3659_v46, %v11343_v5  ;;  %v13115_v31 = vrot.slane %v3705_v37, %v11343_v5  ;;  %v10207_v62 = vcombine.high %v11484_v24, %v11500_v35  ;;  %v2085_v36 = vcombine.low %v11507_v38, %v11514_v41  ;;  %v10091_v45 = vld.sshfl [vmem:[%s11348_s29 + $0x70] sm:$0x33 pattern:$0x75316420] }
 0x11d   : > { %v5520_v19 = vcombine.low %v3673_v48, %v3680_v0  ;;  %v10208_v21 = vcombine.high %v11507_v38, %v11514_v41  ;;  %v2093_v60 = vrot.slane %v2083_v59, %v11343_v5  ;;  %v3688_v55 = vcombine.low %v3666_v61, %v3673_v48  ;;  %v13143_v46 = vpop.permute.xlu1 %4594 }
 0x11e   : > { %3207 = vrot.lane.b32.xlu1 %v3077_v57, %s11222_s16  ;;  %v5521_v28 = vcombine.low %v3687_v26, %v13115_v31  ;;  %v2100_v17 = vrot.slane %v10207_v62, %v11343_v5  ;;  %v2107_v24 = vrot.slane %v2085_v36, %v11343_v5  ;;  %v3689_v18 = vcombine.low %v3680_v0, %v3687_v26 }
 0x11f   : > { %v5528_v35 = vrot.slane %v5520_v19, %v11343_v5  ;;  %v2114_v3 = vrot.slane %v10208_v21, %v11343_v5  ;;  %v3640_v50 = vcombine.low %v12760_v30, %v13073_v56  ;;  %v2132_v57 = vcombine.low %v11363_v15, %v11353_v9  ;;  %v13149_v15 = vpop.permute.xlu0 %4914 }
 0x120   : > { %5647 = vrot.lane.b32.xlu0 %v5519_v44, %s11221_s14  ;;  %v5535_v38 = vrot.slane %v5521_v28, %v11343_v5  ;;  %v2115_v41 = vcombine.low %v2093_v60, %v2100_v17  ;;  %v3696_v13 = vrot.slane %v3688_v55, %v11343_v5  ;;  %v3703_v10 = vrot.slane %v3689_v18, %v11343_v5 }
 0x121   : > { %v2116_v4 = vcombine.low %v2107_v24, %v2114_v3  ;;  %v2165_v61 = vcombine.low %v11474_v14, %v11481_v20  ;;  %v3654_v30 = vrot.slane %v3640_v50, %v11343_v5  ;;  %v2142_v9 = vrot.slane %v2132_v57, %v11343_v5  ;;  %v16943_v20 = vld [vmem:[#allocation10_spill] sm:$0xff]  ;;  %v13174_v24 = vpop.permute.xlu1 %4916  ;;  %v13189_v50 = vld.sshfl [vmem:[%s11348_s29 + $0x74] sm:$0x11 pattern:$0x75316420] }
 0x122   : > { %3209 = vrot.lane.b32.xlu1 %v3126_v58, %s11222_s16  ;;  %v5536_v48 = vcombine.low %v5528_v35, %v5535_v38  ;;  %v2123_v37 = vrot.slane %v2115_v41, %v11343_v5  ;;  %v3704_v44 = vcombine.low %v3696_v13, %v3703_v10  ;;  %v935_v59 = vcombine.high %v10091_v45, %v10091_v45 }
 0x123   : > { %v2130_v56 = vrot.slane %v2116_v4, %v11343_v5  ;;  %v2179_v0 = vrot.slane %v2165_v61, %v11343_v5  ;;  %v3655_v14 = vcombine.low %v12782_v2, %v3654_v30  ;;  %v2164_v58 = vcombine.low %v2142_v9, %v16943_v20  ;;  %v13183_v18 = vpop.permute.xlu0 %5091 }
 0x124   : > { %5649 = vrot.lane.b32.xlu0 %v5536_v48, %s11221_s14  ;;  %v13157_v26 = vrot.slane %v10091_v45, %v11343_v5  ;;  %v10225_v36 = vcombine.high %v12908_v33, %v12920_v6  ;;  %v3929_v19 = vcombine.low %v12908_v33, %v12920_v6  ;;  %v13166_v2 = vrot.slane %v935_v59, %v11343_v5 }
 0x125   : > { %v2131_v62 = vcombine.low %v2123_v37, %v2130_v56  ;;  %v2172_v21 = vrot.slane %v2164_v58, %v11343_v5  ;;  %v13197_v57 = vcombine.high %v12920_v6, %v12920_v6  ;;  %v1727_v30 = vshrl.u32 %v12920_v6, 16  ;;  %v13236_v56 = vpop.permute.xlu1 %5093 }
 0x126   : > { %3787 = vrot.lane.b32.xlu1 %v3704_v44, %s11218_s9  ;;  %v13171_v28 = vrot.slane %v10225_v36, %v11343_v5  ;;  %v3936_v17 = vrot.slane %v3929_v19, %v11343_v5  ;;  %v3707_v55 = vcombine.low %v13157_v26, %v13166_v2  ;;  %v1751_v36 = vshrl.u32 %v13157_v26, 16 }
 0x127   : > { %v5662_v60 = vsel %vm5659_vm15, %v2131_v62, %v12807_v32  ;;  %v2180_v3 = vcombine.low %v2172_v21, %v2179_v0  ;;  %v10226_v32 = vcombine.high %v13157_v26, %v13166_v2  ;;  %v1743_v20 = vshrl.u32 %v13197_v57, 16  ;;  %v13245_v58 = vpop.permute.xlu0 %5381 }
 0x128   : > { %v5698_v35 = vsel %vm5696_vm0, %v5662_v60, %v12752_v12  ;;  %3785 = vrot.lane.b32.xlu0 %v3655_v14, %s11218_s9  ;;  %v3937_v38 = vcombine.low %v3936_v17, %v13171_v28  ;;  %v13193_v12 = vcombine.high %v12908_v33, %v12908_v33  ;;  %v13202_v13 = vrot.slane %v3707_v55, %v11343_v5 }
 0x129   : > { %v5723_v41 = vsel %vm5721_vm1, %v5698_v35, %v12652_v25  ;;  %v5665_v4 = vsel %vm5659_vm15, %v2180_v3, %v12857_v47  ;;  %v13205_v10 = vrot.slane %v10226_v32, %v11343_v5  ;;  %v13216_v47 = vcombine.high %v13157_v26, %v13157_v26 }
 0x12a   : > { %v5748_v25 = vsel %vm5746_vm2, %v5723_v41, %v12899_v49  ;;  %v5700_v33 = vsel %vm5696_vm0, %v5665_v4, %v12680_v27  ;;  %v3944_v61 = vrot.slane %v3937_v38, %v11343_v5  ;;  %v13225_v27 = vcombine.high %v13166_v2, %v13166_v2 }
 0x12b   : > { %v5773_v45 = vsel %vm5771_vm3, %v5748_v25, %v12713_v54  ;;  %v5725_v48 = vsel %vm5721_vm1, %v5700_v33, %v12797_v53  ;;  %v3738_v37 = vcombine.low %v13202_v13, %v13205_v10  ;;  %v13229_v49 = vrot.slane %v13189_v50, %v11343_v5 }
 0x12c   : > { %4026 = vrot.lane.b32.xlu0 %v3704_v44, %s11217_s30  ;;  %v5750_v54 = vsel %vm5746_vm2, %v5725_v48, %v12889_v39  ;;  %v1732_v53 = vshll.u32 %v13193_v12, 16  ;;  %v1735_v9 = vshrl.u32 %v13193_v12, 16  ;;  %v1740_v14 = vshll.u32 %v13197_v57, 16 }
 0x12d   : > { %v13239_v44 = vrot.slane %v3738_v37, %v11343_v5  ;;  %v5775_v0 = vsel %vm5771_vm3, %v5750_v54, %v12707_v29  ;;  %v1748_v62 = vshll.u32 %v13157_v26, 16  ;;  %v16944_v29 = vld [vmem:[#allocation40_spill] sm:$0xff]  ;;  %v1759_v35 = vshrl.u32 %v13166_v2, 16  ;;  %v13290_v37 = vpop.permute.xlu1 %5383 }
 0x12e   : > { %v5800_v39 = vsel %vm5796_vm4, %v5775_v0, %v12850_v22  ;;  %v13251_v59 = vsel %vm11642_vm14, %v1727_v30, %v1732_v53  ;;  %v13262_v60 = vsel %vm11642_vm14, %v1735_v9, %v1740_v14  ;;  %v1756_v22 = vshll.u32 %v13166_v2, 16  ;;  %v13304_v9 = vpop.permute.xlu0 %5639  ;;  %v16945_v14 = vld [vmem:[#allocation47_spill] sm:$0xff] }
 0x12f   : > { %v3945_v19 = vcombine.low %v3944_v61, %v13239_v44  ;;  %v13258_v21 = vsel %vm5821_vm5, %v5800_v39, %v16944_v29  ;;  %v13267_v17 = vsel %vm11642_vm14, %v1743_v20, %v1748_v62  ;;  %v1764_v3 = vshll.u32 %v13216_v47, 16  ;;  %v16946_v62 = vld [vmem:[#allocation48_spill] sm:$0xff] }
 0x130   : > { %v1767_v55 = vshrl.u32 %v13216_v47, 16  ;;  %v13275_v32 = vsel %vm11642_vm14, %v1751_v36, %v1756_v22  ;;  %v1772_v38 = vshll.u32 %v13225_v27, 16  ;;  %v1775_v41 = vshrl.u32 %v13225_v27, 16 }
 0x131   : > { %4028 = vrot.lane.b32.xlu1 %v3945_v19, %s11217_s30  ;;  %v1780_v4 = vshll.u32 %v13229_v49, 16  ;;  %v13282_v25 = vsel %vm11642_vm14, %v1759_v35, %v1764_v3  ;;  %v4475_v33 = vcombine.low %v13039_v8, %v13251_v59  ;;  %v4476_v61 = vcombine.low %v13262_v60, %v13267_v17  ;;  %v16947_v35 = vld [vmem:[#allocation6_spill] sm:$0xff]  ;;  %v16948_v3 = vld [vmem:[#allocation11_spill] sm:$0xff] }
 0x132   : > { %v4426_v48 = vcombine.low %v13057_v11, %v12986_v34  ;;  %v13294_v54 = vsel %vm11642_vm14, %v1767_v55, %v1772_v38  ;;  %v4477_v53 = vcombine.low %v13275_v32, %v13282_v25  ;;  %v4427_v8 = vcombine.low %v12990_v16, %v13003_v43 }
 0x133   : > { %v13298_v30 = vsel %vm11642_vm14, %v1775_v41, %v1780_v4  ;;  %v4485_v11 = vrot.slane %v4475_v33, %v11343_v5  ;;  %v4492_v0 = vrot.slane %v4476_v61, %v11343_v5  ;;  %v4428_v20 = vcombine.low %v16945_v14, %v13019_v52  ;;  %v10692_v52 = vld [vmem:[%s16732_s1 + $0x10] ss:$0 sps:$4 sm:$0x33]   ;;  %v16951_v61 = vld [vmem:[#allocation32_spill] sm:$0xff]  ;;  %v13333_v14 = vpop.permute.xlu1 %3199 }
 0x134   : > { %v4478_v34 = vcombine.low %v13294_v54, %v13298_v30  ;;  %v4499_v39 = vrot.slane %v4477_v53, %v11343_v5  ;;  %v4429_v36 = vcombine.low %v16946_v62, %v13030_v7  ;;  %v4436_v19 = vrot.slane %v4426_v48, %v11343_v5  ;;  %v16949_v7 = vld [vmem:[#allocation8_spill] sm:$0xff]  ;;  %v16950_v4 = vld [vmem:[#allocation7_spill] sm:$0xff]  ;;  %10525 = vmatprep.subr.msk.bf16.mxu0 %vm5916_vm6, %v10692_v52 }
 0x135   : > { %v4443_v16 = vrot.slane %v4427_v8, %v11343_v5  ;;  %v4507_v29 = vcombine.low %v4485_v11, %v4492_v0  ;;  %v4450_v22 = vrot.slane %v4428_v20, %v11343_v5  ;;  %v2213_v55 = vcombine.low %v16948_v3, %v16947_v35  ;;  %v16952_v11 = vld [vmem:[#allocation43_spill] sm:$0xff] }
 0x136   : > { %v4506_v43 = vrot.slane %v4478_v34, %v11343_v5  ;;  %v4457_v38 = vrot.slane %v4429_v36, %v11343_v5  ;;  %v2214_v33 = vcombine.low %v16950_v4, %v16949_v7  ;;  %v5798_v48 = vsel %vm5796_vm4, %v5773_v45, %v16951_v61 }
 0x137   : > { %v4458_v41 = vcombine.low %v4436_v19, %v4443_v16  ;;  %v4515_v8 = vrot.slane %v4507_v29, %v11343_v5  ;;  %v2221_v34 = vrot.slane %v2213_v55, %v11343_v5  ;;  %v5823_v0 = vsel %vm5821_vm5, %v5798_v48, %v16952_v11  ;;  %v13337_v19 = vpop.permute.xlu0 %5641  ;;  %v13372_v7 = vpop.permute.xlu1 %3201  ;;  %v16960_v48 = vld [vmem:[#allocation33_spill] sm:$0xff] }
 0x138   : > { %v4508_v53 = vcombine.low %v4499_v39, %v4506_v43  ;;  %v4459_v20 = vcombine.low %v4450_v22, %v4457_v38  ;;  %v2228_v36 = vrot.slane %v2214_v33, %v11343_v5  ;;  %v2574_v39 = vcombine.low %v12920_v6, %v13193_v12  ;;  %v16956_v12 = vld [vmem:[#allocation45_spill] sm:$0xff]  ;;  %16958 = vst [vmem:[#allocation6_spill] sm:$0xff] %v13372_v7  ;;  %v16959_v33 = vld [vmem:[#allocation39_spill] sm:$0xff] }
 0x139   : > { %v4466_v62 = vrot.slane %v4458_v41, %v11343_v5  ;;  %v2575_v16 = vcombine.low %v13197_v57, %v13157_v26  ;;  %v2576_v43 = vcombine.low %v13166_v2, %v13216_v47  ;;  %v2622_v35 = vcombine.low %v13225_v27, %v13229_v49 }
 0x13a   : > { %v4522_v45 = vrot.slane %v4508_v53, %v11343_v5  ;;  %v4473_v29 = vrot.slane %v4459_v20, %v11343_v5  ;;  %v2229_v22 = vcombine.low %v2221_v34, %v2228_v36  ;;  %v4804_v3 = vcombine.low %v12897_v51, %v12981_v42  ;;  %v10183_v42 = vld.sshfl [vmem:[%s11348_s29 + $0x78] sm:$0x33 pattern:$0x75316420] }
 0x13b   : > { %v13353_v38 = vrot.slane %v2574_v39, %v11343_v5  ;;  %v13356_v6 = vrot.slane %v2575_v16, %v11343_v5  ;;  %v13359_v26 = vrot.slane %v2576_v43, %v11343_v5  ;;  %v13364_v47 = vrot.slane %v2622_v35, %v11343_v5  ;;  %v13382_v11 = vpop.permute.xlu0 %3777  ;;  %v16961_v20 = vld [vmem:[#allocation12_spill] sm:$0xff]  ;;  %v16964_v39 = vld [vmem:[#allocation13_spill] sm:$0xff]  ;;  %v16965_v43 = vld [vmem:[#allocation46_spill] sm:$0xff] }
 0x13c   : > { %v4523_v55 = vcombine.low %v4515_v8, %v4522_v45  ;;  %v4474_v2 = vcombine.low %v4466_v62, %v4473_v29  ;;  %v5668_v57 = vsel %vm5659_vm15, %v2229_v22, %v16956_v12  ;;  %v4811_v51 = vrot.slane %v4804_v3, %v11343_v5  ;;  %v10184_v8 = vld.sshfl [vmem:[%s11348_s29 + $0x7c] sm:$0x33 pattern:$0x75316420]  ;;  %v16962_v62 = vld [vmem:[#allocation9_spill] sm:$0xff]  ;;  %v16963_v45 = vld [vmem:[#allocation14_spill] sm:$0xff] }
 0x13d   : > { %16953 = vst [vmem:[#allocation10_spill] sm:$0xff] %v13353_v38  ;;  %16954 = vst [vmem:[#allocation40_spill] sm:$0xff] %v13356_v6  ;;  %v4829_v27 = vcombine.low %v13353_v38, %v13356_v6  ;;  %v5918_v41 = vsel %vm5916_vm6, %v10692_v52, 0  ;;  %v4830_v4 = vcombine.low %v13359_v26, %v13364_v47  ;;  %v5848_v53 = vsel %vm5846_vm7, %v5823_v0, %v16960_v48 }
 0x13e   : > { %16955 = vst [vmem:[#allocation47_spill] sm:$0xff] %v13359_v26  ;;  %16957 = vst [vmem:[#allocation48_spill] sm:$0xff] %v13364_v47  ;;  %4606 = vrot.lane.b32.xlu1 %v4523_v55, %s11223_s17  ;;  %4604 = vrot.lane.b32.xlu0 %v4474_v2, %s11223_s17  ;;  %v4813_v61 = vcombine.low %v16959_v33, %v4811_v51  ;;  %v2262_v36 = vcombine.low %v16962_v62, %v16961_v20  ;;  %v13416_v20 = vld.sshfl [vmem:[%s11348_s29 + $0x80] sm:$0x11 pattern:$0x75316420]  ;;  %v13426_v62 = vpop.permute.xlu1 %3779 }
 0x13f   : > { %10446 = vmatpush3.bf16.msra.mxu0 %v5918_v41  ;;  %v4837_v52 = vrot.slane %v4829_v27, %v11343_v5  ;;  %10447 = vmatprep.mubr.msk.bf16.mxu0 %vm5891_vm8, %v5848_v53  ;;  %v2263_v16 = vcombine.low %v16964_v39, %v16963_v45  ;;  %v5850_v29 = vsel %vm5846_vm7, %v13258_v21, %v16965_v43  ;;  %v16966_v27 = vld [vmem:[#allocation44_spill] sm:$0xff]  ;;  %v16970_v43 = vld [vmem:[#allocation49_spill] sm:$0xff] }
 0x140   : > { %v4844_v0 = vrot.slane %v4830_v4, %v11343_v5  ;;  %v4827_v22 = vrot.slane %v4813_v61, %v11343_v5  ;;  %v1801_v35 = vcombine.high %v10183_v42, %v10183_v42  ;;  %v13396_v3 = vrot.slane %v10183_v42, %v11343_v5  ;;  %v16967_v61 = vld [vmem:[#allocation50_spill] sm:$0xff]  ;;  %16968 = vst [vmem:[#allocation11_spill] sm:$0xff] %v13426_v62 }
 0x141   : > { %v2270_v55 = vrot.slane %v2262_v36, %v11343_v5  ;;  %v2277_v2 = vrot.slane %v2263_v16, %v11343_v5  ;;  %v1825_v12 = vcombine.high %v10184_v8, %v10184_v8  ;;  %v13401_v51 = vrot.slane %v10184_v8, %v11343_v5  ;;  %v13439_v16 = vpop.permute.xlu0 %4018 }
 0x142   : > { %10448 = vmatmul.mubr.msk.bf16.vlgmr.msra.gmra.mrb[0].mxu0 %vm5891_vm8, %v5850_v29  ;;  %v4845_v21 = vcombine.low %v4837_v52, %v4844_v0  ;;  %v4828_v41 = vcombine.low %v16966_v27, %v4827_v22  ;;  %v13406_v4 = vrot.slane %v1801_v35, %v11343_v5  ;;  %v13410_v42 = vsel %vm5696_vm0, %v5668_v57, %v16967_v61  ;;  %v13476_v26 = vpop.permute.xlu1 %4020 }
 0x143   : > { %v2278_v48 = vcombine.low %v2270_v55, %v2277_v2  ;;  %v13413_v53 = vrot.slane %v1825_v12, %v11343_v5  ;;  %v13420_v8 = vcombine.high %v13396_v3, %v13396_v3  ;;  %v13424_v52 = vcombine.high %v13401_v51, %v13401_v51  ;;  %16969 = vst [vmem:[#allocation8_spill] sm:$0xff] %v13439_v16  ;;  %v16971_v12 = vld [vmem:[#allocation52_spill] sm:$0xff] }
 0x144   : > { %4928 = vrot.lane.b32.xlu1 %v4845_v21, %s11220_s13  ;;  %4926 = vrot.lane.b32.xlu0 %v4828_v41, %s11220_s13  ;;  %v10227_v57 = vcombine.high %v13396_v3, %v13406_v4  ;;  %v5006_v36 = vcombine.low %v13396_v3, %v13406_v4  ;;  %v13436_v45 = vcombine.high %v13406_v4, %v13406_v4  ;;  %v1865_v39 = vshrl.u32 %v13396_v3, 16 }
 0x145   : > { %v5671_v29 = vsel %vm5659_vm15, %v2278_v48, %v16970_v43  ;;  %v4848_v0 = vcombine.low %v13401_v51, %v13413_v53  ;;  %v10228_v22 = vcombine.high %v13401_v51, %v13413_v53  ;;  %v13449_v35 = vcombine.high %v13413_v53, %v13413_v53  ;;  %16972 = vst [vmem:[#allocation7_spill] sm:$0xff] %v13476_v26 }
 0x146   : > { %v13452_v55 = vrot.slane %v10227_v57, %v11343_v5  ;;  %v5013_v2 = vrot.slane %v5006_v36, %v11343_v5  ;;  %v5704_v27 = vsel %vm5696_vm0, %v5671_v29, %v16971_v12  ;;  %v13459_v41 = vrot.slane %v13416_v20, %v11343_v5 }
 0x147   : > { %v4870_v61 = vrot.slane %v4848_v0, %v11343_v5  ;;  %v4877_v48 = vrot.slane %v10228_v22, %v11343_v5  ;;  %v1870_v43 = vshll.u32 %v13406_v4, 16  ;;  %v1873_v34 = vshrl.u32 %v13406_v4, 16 }
 0x148   : > { %v5014_v57 = vcombine.low %v5013_v2, %v13452_v55  ;;  %5103 = vrot.lane.b32.xlu0 %v4845_v21, %s16873_s12  ;;  %v1878_v36 = vshll.u32 %v13420_v8, 16  ;;  %v1881_v29 = vshrl.u32 %v13420_v8, 16  ;;  %v1886_v12 = vshll.u32 %v13436_v45, 16 }
 0x149   : > { %v4879_v47 = vcombine.low %v4870_v61, %v4877_v48  ;;  %v13472_v0 = vsel %vm11642_vm14, %v1865_v39, %v1870_v43  ;;  %v1889_v22 = vshrl.u32 %v13436_v45, 16  ;;  %v1894_v6 = vshll.u32 %v13401_v51, 16  ;;  %v13488_v39 = vpop.permute.xlu0 %4596 }
 0x14a   : > { %v5021_v2 = vrot.slane %v5014_v57, %v11343_v5  ;;  %v13481_v21 = vsel %vm11642_vm14, %v1873_v34, %v1878_v36  ;;  %v13485_v38 = vsel %vm11642_vm14, %v1881_v29, %v1886_v12  ;;  %v1897_v61 = vshrl.u32 %v13401_v51, 16  ;;  %16973 = vst [vmem:[#allocation32_spill] sm:$0xff] %v13488_v39 }
 0x14b   : > { %v13491_v48 = vrot.slane %v4879_v47, %v11343_v5  ;;  %v13495_v43 = vsel %vm11642_vm14, %v1889_v22, %v1894_v6  ;;  %v1902_v57 = vshll.u32 %v13413_v53, 16  ;;  %v1905_v34 = vshrl.u32 %v13413_v53, 16 }
 0x14c   : > { %v1910_v36 = vshll.u32 %v13424_v52, 16  ;;  %v1913_v29 = vshrl.u32 %v13424_v52, 16  ;;  %v1918_v12 = vshll.u32 %v13449_v35, 16  ;;  %v1921_v33 = vshrl.u32 %v13449_v35, 16 }
 0x14d   : > { %16974 = vst [vmem:[#allocation43_spill] sm:$0xff] %v13491_v48  ;;  %v5022_v39 = vcombine.low %v5021_v2, %v13491_v48  ;;  %v13506_v47 = vsel %vm11642_vm14, %v1897_v61, %v1902_v57  ;;  %v1926_v6 = vshll.u32 %v13459_v41, 16  ;;  %v5264_v22 = vcombine.low %v13472_v0, %v13481_v21 }
 0x14e   : > { %v13513_v16 = vsel %vm11642_vm14, %v1905_v34, %v1910_v36  ;;  %v13517_v26 = vsel %vm11642_vm14, %v1913_v29, %v1918_v12  ;;  %v5265_v2 = vcombine.low %v13485_v38, %v13495_v43  ;;  %v1038_v61 = vcombine.high %v13189_v50, %v13189_v50  ;;  %v13533_v12 = vpop.permute.xlu1 %4598 }
 0x14f   : > { %5105 = vrot.lane.b32.xlu1 %v5022_v39, %s16873_s12  ;;  %v13526_v57 = vsel %vm11642_vm14, %v1921_v33, %v1926_v6  ;;  %v5266_v34 = vcombine.low %v13506_v47, %v13513_v16  ;;  %v5274_v36 = vrot.slane %v5264_v22, %v11343_v5  ;;  %v3128_v29 = vcombine.low %v13251_v59, %v13262_v60  ;;  %v13543_v6 = vpop.permute.xlu0 %4918 }
 0x150   : > { %16975 = vst [vmem:[#allocation45_spill] sm:$0xff] %v13533_v12  ;;  %v5267_v62 = vcombine.low %v13517_v26, %v13526_v57  ;;  %v5281_v50 = vrot.slane %v5265_v2, %v11343_v5  ;;  %v13539_v39 = vrot.slane %v1038_v61, %v11343_v5  ;;  %v3129_v33 = vcombine.low %v13267_v17, %v13275_v32 }
 0x151   : > { %v5288_v22 = vrot.slane %v5266_v34, %v11343_v5  ;;  %v3130_v59 = vcombine.low %v13282_v25, %v13294_v54  ;;  %v3144_v60 = vrot.slane %v3128_v29, %v11343_v5  ;;  %v5729_v12 = vsel %vm5721_vm1, %v5704_v27, %v13110_v40  ;;  %v16976_v34 = vld [vmem:[#allocation51_spill] sm:$0xff] }
 0x152   : > { %v5295_v2 = vrot.slane %v5267_v62, %v11343_v5  ;;  %v5296_v48 = vcombine.low %v5274_v36, %v5281_v50  ;;  %v1788_v61 = vshll.u32 %v13539_v39, 16  ;;  %v3151_v7 = vrot.slane %v3129_v33, %v11343_v5 }
 0x153   : > { %v3158_v17 = vrot.slane %v3130_v59, %v11343_v5  ;;  %v5727_v32 = vsel %vm5721_vm1, %v13410_v42, %v13088_v23  ;;  %v3159_v25 = vcombine.low %v16976_v34, %v3144_v60  ;;  %v3754_v54 = vcombine.low %v13229_v49, %v13539_v39  ;;  %v13574_v59 = vpop.permute.xlu1 %4920 }
 0x154   : > { %v5297_v29 = vcombine.low %v5288_v22, %v5295_v2  ;;  %v5304_v40 = vrot.slane %v5296_v48, %v11343_v5  ;;  %v16977_v62 = vshrl.u32 %v13229_v49, 16  ;;  %v5247_v36 = vcombine.low %v3144_v60, %v3151_v7 }
 0x155   : > { %v3160_v33 = vcombine.low %v3151_v7, %v3158_v17  ;;  %v3167_v23 = vrot.slane %v3159_v25, %v11343_v5  ;;  %v13572_v42 = vrot.slane %v3754_v54, %v11343_v5  ;;  %v5537_v2 = vcombine.low %v13171_v28, %v13202_v13 }
 0x156   : > { %v13566_v27 = vsel %vm11642_vm14, %v16977_v62, %v1788_v61  ;;  %v5311_v48 = vrot.slane %v5297_v29, %v11343_v5  ;;  %v5255_v22 = vrot.slane %v5247_v36, %v11343_v5  ;;  %v5754_v60 = vsel %vm5746_vm2, %v5729_v12, %v13143_v46  ;;  %v13582_v61 = vpop.permute.xlu0 %5095 }
 0x157   : > { %v3176_v50 = vcombine.low %v13298_v30, %v13566_v27  ;;  %v3174_v7 = vrot.slane %v3160_v33, %v11343_v5  ;;  %v5538_v34 = vcombine.low %v13205_v10, %v13572_v42  ;;  %v5752_v25 = vsel %vm5746_vm2, %v5727_v32, %v13121_v1  ;;  %v13609_v33 = vpop.permute.xlu1 %5097 }
 0x158   : > { %v5312_v54 = vcombine.low %v5304_v40, %v5311_v48  ;;  %v5545_v29 = vrot.slane %v5537_v2, %v11343_v5  ;;  %v3947_v13 = vcombine.low %v13406_v4, %v13420_v8  ;;  %v3948_v46 = vcombine.low %v13436_v45, %v13401_v51 }
 0x159   : > { %v3183_v30 = vrot.slane %v3176_v50, %v11343_v5  ;;  %v3175_v62 = vcombine.low %v3167_v23, %v3174_v7  ;;  %v5552_v36 = vrot.slane %v5538_v34, %v11343_v5  ;;  %v3949_v1 = vcombine.low %v13413_v53, %v13424_v52  ;;  %v10195_v34 = vld.sshfl [vmem:[%s11348_s29 + $0x84] sm:$0x33 pattern:$0x75316420] }
 0x15a   : > { %5395 = vrot.lane.b32.xlu1 %v5312_v54, %s11224_s18  ;;  %v3963_v10 = vrot.slane %v3947_v13, %v11343_v5  ;;  %v3970_v32 = vrot.slane %v3948_v46, %v11343_v5  ;;  %v3995_v8 = vcombine.low %v13449_v35, %v13459_v41  ;;  %v5777_v40 = vsel %vm5771_vm3, %v5752_v25, %v13149_v15  ;;  %v13617_v48 = vpop.permute.xlu0 %5385 }
 0x15b   : > { %v5248_v12 = vcombine.low %v3158_v17, %v3183_v30  ;;  %v3190_v50 = vrot.slane %v3183_v30, %v11343_v5  ;;  %v5553_v45 = vcombine.low %v5545_v29, %v5552_v36  ;;  %v5779_v17 = vsel %vm5771_vm3, %v5754_v60, %v13174_v24 }
 0x15c   : > { %v3977_v53 = vrot.slane %v3949_v1, %v11343_v5  ;;  %v13613_v52 = vrot.slane %v3995_v8, %v11343_v5  ;;  %v5554_v23 = vcombine.low %v3963_v10, %v3970_v32  ;;  %v3768_v35 = vrot.slane %v13572_v42, %v11343_v5 }
 0x15d   : > { %v5262_v51 = vrot.slane %v5248_v12, %v11343_v5  ;;  %v3737_v24 = vcombine.low %v13115_v31, %v13171_v28  ;;  %v5804_v15 = vsel %vm5796_vm4, %v5779_v17, %v13236_v56  ;;  %v5802_v60 = vsel %vm5796_vm4, %v5777_v40, %v13183_v18  ;;  %v13653_v12 = vpop.permute.xlu1 %5387 }
 0x15e   : > { %3211 = vrot.lane.b32.xlu1 %v3175_v62, %s11222_s16  ;;  %v5555_v30 = vcombine.low %v3977_v53, %v13613_v52  ;;  %v5562_v7 = vrot.slane %v5554_v23, %v11343_v5  ;;  %v4009_v42 = vrot.slane %v13613_v52, %v11343_v5  ;;  %v3979_v28 = vcombine.low %v3970_v32, %v3977_v53  ;;  %v16978_v53 = vld [vmem:[#allocation16_spill] sm:$0xff]  ;;  %v16981_v52 = vld [vmem:[#allocation22_spill] sm:$0xff] }
 0x15f   : > { %v5263_v2 = vcombine.low %v5255_v22, %v5262_v51  ;;  %v3946_v22 = vcombine.low %v13229_v49, %v13396_v3  ;;  %v3745_v31 = vrot.slane %v3737_v24, %v11343_v5  ;;  %v13637_v18 = vsel %vm5821_vm5, %v5804_v15, %v13290_v37 }
 0x160   : > { %v5827_v56 = vsel %vm5821_vm5, %v5802_v60, %v13245_v58  ;;  %v5569_v25 = vrot.slane %v5555_v30, %v11343_v5  ;;  %v1856_v49 = vcombine.high %v13416_v20, %v13416_v20  ;;  %v1929_v3 = vshrl.u32 %v13459_v41, 16 }
 0x161   : > { %5393 = vrot.lane.b32.xlu0 %v5263_v2, %s11224_s18  ;;  %v3956_v54 = vrot.slane %v3946_v22, %v11343_v5  ;;  %v3753_v29 = vcombine.low %v3745_v31, %v13239_v44  ;;  %v13648_v13 = vrot.slane %v3979_v28, %v11343_v5  ;;  %v1947_v46 = vcombine.high %v10195_v34, %v10195_v34  ;;  %v13661_v44 = vpop.permute.xlu0 %5643  ;;  %v13699_v60 = vpop.permute.xlu1 %3203 }
 0x162   : > { %v13651_v37 = vrot.slane %v10195_v34, %v11343_v5  ;;  %3213 = vrot.lane.b32.xlu1 %v3190_v50, %s11222_s16  ;;  %v5570_v58 = vcombine.low %v5562_v7, %v5569_v25  ;;  %v13657_v36 = vrot.slane %v1856_v49, %v11343_v5  ;;  %v4524_v20 = vcombine.low %v13566_v27, %v13472_v0  ;;  %v10196_v49 = vld.sshfl [vmem:[%s11348_s29 + $0x88] sm:$0x33 pattern:$0x75316420] }
 0x163   : > { %v3978_v62 = vcombine.low %v3956_v54, %v3963_v10  ;;  %v13665_v1 = vrot.slane %v1947_v46, %v11343_v5  ;;  %v4525_v50 = vcombine.low %v13481_v21, %v13485_v38  ;;  %v4526_v10 = vcombine.low %v13495_v43, %v13506_v47  ;;  %v16979_v38 = vld [vmem:[#allocation15_spill] sm:$0xff] }
 0x164   : > { %v2011_v32 = vshrl.u32 %v13651_v37, 16  ;;  %v1934_v51 = vshll.u32 %v13657_v36, 16  ;;  %v4527_v0 = vcombine.low %v13513_v16, %v13517_v26  ;;  %v4534_v27 = vrot.slane %v4524_v20, %v11343_v5  ;;  %v16980_v16 = vld [vmem:[#allocation17_spill] sm:$0xff] }
 0x165   : > { %5651 = vrot.lane.b32.xlu0 %v5553_v45, %s11221_s14  ;;  %v3986_v8 = vrot.slane %v3978_v62, %v11343_v5  ;;  %v2016_v45 = vshll.u32 %v13665_v1, 16  ;;  %v4541_v17 = vrot.slane %v4525_v50, %v11343_v5  ;;  %v4548_v40 = vrot.slane %v4526_v10, %v11343_v5  ;;  %v13706_v31 = vpop.permute.xlu0 %5645  ;;  %v16985_v62 = vld [vmem:[#allocation20_spill] sm:$0xff] }
 0x166   : > { %v2311_v21 = vcombine.low %v16979_v38, %v16978_v53  ;;  %3791 = vrot.lane.b32.xlu1 %v3768_v35, %s11218_s9  ;;  %v13686_v47 = vsel %vm11642_vm14, %v1929_v3, %v1934_v51  ;;  %v4555_v26 = vrot.slane %v4527_v0, %v11343_v5  ;;  %v2312_v23 = vcombine.low %v16981_v52, %v16980_v16  ;;  %v16986_v52 = vld [vmem:[#allocation6_spill] sm:$0xff] }
 0x167   : > { %v3994_v43 = vcombine.low %v3986_v8, %v13648_v13  ;;  %v13694_v2 = vsel %vm11642_vm14, %v2011_v32, %v2016_v45  ;;  %v4573_v35 = vcombine.low %v13526_v57, %v13686_v47  ;;  %v4556_v24 = vcombine.low %v4534_v27, %v4541_v17  ;;  %v16983_v13 = vld [vmem:[#allocation18_spill] sm:$0xff] }
 0x168   : > { %v2319_v15 = vrot.slane %v2311_v21, %v11343_v5  ;;  %v5313_v30 = vcombine.low %v13686_v47, %v13694_v2  ;;  %v4557_v7 = vcombine.low %v4548_v40, %v4555_v26  ;;  %v2326_v22 = vrot.slane %v2312_v23, %v11343_v5  ;;  %v10197_v32 = vld.sshfl [vmem:[%s11348_s29 + $0x8c] sm:$0x11 pattern:$0x75316420]  ;;  %v13740_v40 = vpop.permute.xlu1 %3205  ;;  %s7519_s29 = scalar_select %p7518_p13, 1, 0 }
 0x169   : > { %5653 = vrot.lane.b32.xlu0 %v5570_v58, %s11221_s14  ;;  %v5852_v34 = vsel %vm5846_vm7, %v5827_v56, %v13304_v9  ;;  %v4580_v28 = vrot.slane %v4573_v35, %v11343_v5  ;;  %v4564_v57 = vrot.slane %v4556_v24, %v11343_v5  ;;  %v4895_v25 = vcombine.low %v13459_v41, %v13657_v36  ;;  %v16982_v56 = vld [vmem:[#allocation19_spill] sm:$0xff]  ;;  %v16984_v58 = vld [vmem:[#allocation21_spill] sm:$0xff]  ;;  %v13750_v38 = vpop.permute.xlu0 %3781 }
 0x16a   : > { %v4846_v54 = vcombine.low %v13539_v39, %v13406_v4  ;;  %10451 = vmatprep.mubr.msk.bf16.mxu0 %vm5891_vm8, %v5852_v34  ;;  %4032 = vrot.lane.b32.xlu1 %v4009_v42, %s11217_s30  ;;  %v4571_v3 = vrot.slane %v4557_v7, %v11343_v5  ;;  %v2327_v9 = vcombine.low %v2319_v15, %v2326_v22  ;;  %v16987_v15 = vld [vmem:[#allocation43_spill] sm:$0xff] }
 0x16b   : > { %v2360_v46 = vcombine.low %v16983_v13, %v16982_v56  ;;  %v2361_v20 = vcombine.low %v16985_v62, %v16984_v58  ;;  %v4587_v50 = vrot.slane %v4580_v28, %v11343_v5  ;;  %v4902_v4 = vrot.slane %v4895_v25, %v11343_v5  ;;  %v16988_v34 = vld [vmem:[#allocation11_spill] sm:$0xff] }
 0x16c   : > { %v4856_v39 = vrot.slane %v4846_v54, %v11343_v5  ;;  %v5854_v42 = vsel %vm5846_vm7, %v13637_v18, %v13337_v19  ;;  %v4572_v10 = vcombine.low %v4564_v57, %v4571_v3  ;;  %v5674_v8 = vsel %vm5659_vm15, %v2327_v9, %v13333_v14  ;;  %v13782_v13 = vpop.permute.xlu1 %3783 }
 0x16d   : > { %3789 = vrot.lane.b32.xlu0 %v3753_v29, %s11218_s9  ;;  %v2368_v51 = vrot.slane %v2360_v46, %v11343_v5  ;;  %v2375_v0 = vrot.slane %v2361_v20, %v11343_v5  ;;  %10452 = vmatmul.mubr.msk.bf16.gmra.mrb[4].mxu0 %vm5891_vm8, %v5854_v42  ;;  %v4909_v29 = vrot.slane %v4902_v4, %v11343_v5 }
 0x16e   : > { %v4878_v27 = vcombine.low %v4856_v39, %v13452_v55  ;;  %v1971_v45 = vcombine.high %v10196_v49, %v10196_v49  ;;  %v13738_v17 = vrot.slane %v10197_v32, %v11343_v5  ;;  %4610 = vrot.lane.b32.xlu1 %v4587_v50, %s11223_s17  ;;  %v1962_v14 = vcombine.high %v13651_v37, %v13651_v37  ;;  %v13787_v50 = vpop.permute.xlu0 %4022 }
 0x16f   : > { %v2376_v19 = vcombine.low %v2368_v51, %v2375_v0  ;;  %v1963_v18 = vcombine.high %v13665_v1, %v13665_v1  ;;  %v13748_v53 = vrot.slane %v10196_v49, %v11343_v5  ;;  %v5023_v26 = vcombine.low %v13459_v41, %v13651_v37 }
 0x170   : > { %v4886_v55 = vrot.slane %v4878_v27, %v11343_v5  ;;  %v13755_v21 = vrot.slane %v1971_v45, %v11343_v5  ;;  %v13761_v16 = vsel %vm5696_vm0, %v5674_v8, %v13382_v11  ;;  %v2002_v54 = vcombine.high %v10197_v32, %v10197_v32 }
 0x171   : > { %4030 = vrot.lane.b32.xlu0 %v3994_v43, %s11217_s30  ;;  %v5677_v23 = vsel %vm5659_vm15, %v2376_v19, %v16986_v52  ;;  %v1986_v35 = vcombine.high %v13748_v53, %v13748_v53  ;;  %v5024_v43 = vcombine.low %v13665_v1, %v1962_v14  ;;  %v5025_v24 = vcombine.low %v1963_v18, %v13748_v53 }
 0x172   : > { %v4894_v7 = vcombine.low %v4886_v55, %v16987_v15  ;;  %v1987_v22 = vcombine.high %v13755_v21, %v13755_v21  ;;  %v5033_v41 = vrot.slane %v5023_v26, %v11343_v5  ;;  %v5708_v11 = vsel %vm5696_vm0, %v5677_v23, %v16988_v34  ;;  %4932 = vrot.lane.b32.xlu1 %v4909_v29, %s11220_s13 }
 0x173   : > { %v5026_v28 = vcombine.low %v13755_v21, %v1986_v35  ;;  %v5040_v57 = vrot.slane %v5024_v43, %v11343_v5  ;;  %v5047_v25 = vrot.slane %v5025_v24, %v11343_v5  ;;  %v2072_v56 = vshll.u32 %v13738_v17, 16 }
 0x174   : > { %v2064_v49 = vshll.u32 %v1987_v22, 16  ;;  %v5072_v3 = vcombine.low %v1987_v22, %v13738_v17  ;;  %v2067_v9 = vshrl.u32 %v1987_v22, 16  ;;  %v2009_v62 = vrot.slane %v2002_v54, %v11343_v5 }
 0x175   : > { %4608 = vrot.lane.b32.xlu0 %v4572_v10, %s11223_s17  ;;  %v5054_v46 = vrot.slane %v5026_v28, %v11343_v5  ;;  %v5055_v58 = vcombine.low %v5033_v41, %v5040_v57  ;;  %v2075_v20 = vshrl.u32 %v13738_v17, 16  ;;  %v2019_v39 = vshrl.u32 %v13665_v1, 16  ;;  %v13812_v28 = vpop.permute.xlu0 %4600 }
 0x176   : > { %v5079_v32 = vrot.slane %v5072_v3, %v11343_v5  ;;  %v2074_v4 = vsel %vm11642_vm14, %v2067_v9, %v2072_v56  ;;  %v2024_v42 = vshll.u32 %v1962_v14, 16  ;;  %v2080_v51 = vshll.u32 %v2009_v62, 16 }
 0x177   : > { %v5056_v10 = vcombine.low %v5047_v25, %v5054_v46  ;;  %v5063_v8 = vrot.slane %v5055_v58, %v11343_v5  ;;  %v2027_v0 = vshrl.u32 %v1962_v14, 16  ;;  %v2032_v45 = vshll.u32 %v1963_v18, 16  ;;  %v16989_v46 = vld [vmem:[#allocation7_spill] sm:$0xff] }
 0x178   : > { %v5086_v29 = vrot.slane %v5079_v32, %v11343_v5  ;;  %v2026_v27 = vsel %vm11642_vm14, %v2019_v39, %v2024_v42  ;;  %v2035_v19 = vshrl.u32 %v1963_v18, 16  ;;  %v2082_v26 = vsel %vm11642_vm14, %v2075_v20, %v2080_v51  ;;  %v13808_v18 = vpop.permute.xlu1 %4024  ;;  %v16990_v39 = vld [vmem:[#allocation8_spill] sm:$0xff] }
 0x179   : > { %4930 = vrot.lane.b32.xlu0 %v4894_v7, %s11220_s13  ;;  %v5070_v55 = vrot.slane %v5056_v10, %v11343_v5  ;;  %v2040_v52 = vshll.u32 %v13748_v53, 16  ;;  %v2043_v23 = vshrl.u32 %v13748_v53, 16  ;;  %v5362_v14 = vcombine.low %v2074_v4, %v2082_v26  ;;  %v4923_v51 = vpop.permute.xlu0 %4922 }
 0x17a   : > { %5109 = vrot.lane.b32.xlu1 %v5086_v29, %s16873_s12  ;;  %v2034_v43 = vsel %vm11642_vm14, %v2027_v0, %v2032_v45  ;;  %v2048_v24 = vshll.u32 %v13755_v21, 16  ;;  %v2051_v15 = vshrl.u32 %v13755_v21, 16  ;;  %v2056_v41 = vshll.u32 %v1986_v35, 16 }
 0x17b   : > { %v5071_v7 = vcombine.low %v5063_v8, %v5070_v55  ;;  %v2042_v22 = vsel %vm11642_vm14, %v2035_v19, %v2040_v52  ;;  %v2059_v34 = vshrl.u32 %v1986_v35, 16  ;;  %v5369_v57 = vrot.slane %v5362_v14, %v11343_v5  ;;  %v16992_v19 = vld [vmem:[#allocation32_spill] sm:$0xff] }
 0x17c   : > { %v2050_v25 = vsel %vm11642_vm14, %v2043_v23, %v2048_v24  ;;  %v5314_v54 = vcombine.low %v2026_v27, %v2034_v43  ;;  %v5323_v3 = vrot.slane %v5313_v30, %v11343_v5  ;;  %v2058_v9 = vsel %vm11642_vm14, %v2051_v15, %v2056_v41  ;;  %v13845_v8 = vpop.permute.xlu1 %4602 }
 0x17d   : > { %5107 = vrot.lane.b32.xlu0 %v5071_v7, %s16873_s12  ;;  %v2066_v35 = vsel %vm11642_vm14, %v2059_v34, %v2064_v49  ;;  %v5315_v56 = vcombine.low %v2042_v22, %v2050_v25  ;;  %v5733_v58 = vsel %vm5721_vm1, %v5708_v11, %v16989_v46  ;;  %v5376_v20 = vrot.slane %v5369_v57, %v11343_v5  ;;  %v16994_v22 = vld [vmem:[#allocation23_spill] sm:$0xff]  ;;  %v16996_v25 = vld [vmem:[#allocation25_spill] sm:$0xff]  ;;  %v16999_v46 = vld [vmem:[#allocation30_spill] sm:$0xff] }
 0x17e   : > { %v5316_v32 = vcombine.low %v2058_v9, %v2066_v35  ;;  %v5330_v4 = vrot.slane %v5314_v54, %v11343_v5  ;;  %v5731_v47 = vsel %vm5721_vm1, %v13761_v16, %v16990_v39  ;;  %v5620_v30 = vcombine.low %v13738_v17, %v2009_v62  ;;  %v16997_v35 = vld [vmem:[#allocation27_spill] sm:$0xff]  ;;  %vm6547_vm14 = vmor %vm6545_vm12, %vm6546_vm11 }
 0x17f   : > { %v5337_v2 = vrot.slane %v5315_v56, %v11343_v5  ;;  %v5571_v63 = vcombine.low %v13657_v36, %v13665_v1  ;;  %v10229_v49 = vcombine.high %v13651_v37, %v13665_v1  ;;  %5399 = vrot.lane.b32.xlu1 %v5376_v20, %s11224_s18  ;;  %v5573_v10 = vcombine.low %v13748_v53, %v13755_v21  ;;  %v16991_v37 = vld [vmem:[#allocation45_spill] sm:$0xff]  ;;  %vm14074_vm9 = vmor %vm6547_vm14, %vm6548_vm13 }
 0x180   : > { %v5344_v11 = vrot.slane %v5316_v32, %v11343_v5  ;;  %v5345_v42 = vcombine.low %v5323_v3, %v5330_v4  ;;  %v10230_v16 = vcombine.high %v13748_v53, %v13755_v21  ;;  %v5627_v17 = vrot.slane %v5620_v30, %v11343_v5  ;;  %v4925_v3 = vpop.permute.xlu1 %4924  ;;  %v5100_v32 = vpop.permute.xlu0 %5099 }
 0x181   : > { %v5581_v36 = vrot.slane %v5571_v63, %v11343_v5  ;;  %v5588_v62 = vrot.slane %v10229_v49, %v11343_v5  ;;  %v5758_v1 = vsel %vm5746_vm2, %v5733_v58, %v16991_v37  ;;  %v5595_v27 = vrot.slane %v5573_v10, %v11343_v5  ;;  %v17000_v58 = vld [vmem:[#allocation28_spill] sm:$0xff] }
 0x182   : > { %v5346_v0 = vcombine.low %v5337_v2, %v5344_v11  ;;  %v5353_v29 = vrot.slane %v5345_v42, %v11343_v5  ;;  %v5602_v45 = vrot.slane %v10230_v16, %v11343_v5  ;;  %v5634_v53 = vrot.slane %v5627_v17, %v11343_v5 }
 0x183   : > { %v5603_v21 = vcombine.low %v5581_v36, %v5588_v62  ;;  %v5756_v55 = vsel %vm5746_vm2, %v5731_v47, %v16992_v19  ;;  %v5783_v26 = vsel %vm5771_vm3, %v5758_v1, %v13574_v59  ;;  %v16993_v59 = vld [vmem:[#allocation24_spill] sm:$0xff]  ;;  %v2459_v20 = vcombine.low %v17000_v58, %v16999_v46  ;;  %v17001_v1 = vld [vmem:[#allocation5_spill] sm:$0xff] }
 0x184   : > { %v5360_v52 = vrot.slane %v5346_v0, %v11343_v5  ;;  %v5604_v23 = vcombine.low %v5595_v27, %v5602_v45  ;;  %v5781_v14 = vsel %vm5771_vm3, %v5756_v55, %v13543_v6  ;;  %v5808_v43 = vsel %vm5796_vm4, %v5783_v26, %v13609_v33  ;;  %5657 = vrot.lane.b32.xlu1 %v5634_v53, %s11221_s14  ;;  %v16995_v33 = vld [vmem:[#allocation29_spill] sm:$0xff]  ;;  %v5102_v42 = vpop.permute.xlu1 %5101 }
 0x185   : > { %v5611_v24 = vrot.slane %v5603_v21, %v11343_v5  ;;  %v5806_v15 = vsel %vm5796_vm4, %v5781_v14, %v13582_v61  ;;  %v5833_v7 = vsel %vm5821_vm5, %v5808_v43, %v13653_v12  ;;  %v2409_v41 = vcombine.low %v16994_v22, %v16993_v59  ;;  %v16998_v12 = vld [vmem:[#allocation26_spill] sm:$0xff] }
 0x186   : > { %v5361_v34 = vcombine.low %v5353_v29, %v5360_v52  ;;  %v5618_v57 = vrot.slane %v5604_v23, %v11343_v5  ;;  %v5831_v6 = vsel %vm5821_vm5, %v5806_v15, %v13617_v48  ;;  %v2410_v54 = vcombine.low %v16996_v25, %v16995_v33  ;;  %v17004_v25 = vld [vmem:[#allocation36_spill] sm:$0xff] }
 0x187   : > { %v2417_v9 = vrot.slane %v2409_v41, %v11343_v5  ;;  %v5856_v61 = vsel %vm5846_vm7, %v5831_v6, %v13661_v44  ;;  %v2458_v56 = vcombine.low %v16998_v12, %v16997_v35  ;;  %v5858_v39 = vsel %vm5846_vm7, %v5833_v7, %v13706_v31  ;;  %v10254_v31 = vld [vmem:[%s16733_s2] ss:$0 sm:$0xff]  ;;  %v17003_v6 = vld [vmem:[#allocation31_spill] sm:$0xff] }
 0x188   : > { %5397 = vrot.lane.b32.xlu0 %v5361_v34, %s11224_s18  ;;  %v5619_v4 = vcombine.low %v5611_v24, %v5618_v57  ;;  %v2424_v48 = vrot.slane %v2410_v54, %v11343_v5  ;;  %10455 = vmatprep.mubr.msk.bf16.mxu0 %vm5891_vm8, %v5856_v61  ;;  %v2473_v44 = vrot.slane %v2459_v20, %v11343_v5  ;;  %v11225_v30 = vmov 1983009808   ;;  %v17002_v57 = vld [vmem:[#allocation34_spill] sm:$0xff]  ;;  %v17005_v54 = vld [vmem:[#allocation35_spill] sm:$0xff] }
 0x189   : > { %v2466_v47 = vrot.slane %v2458_v56, %v11343_v5  ;;  %10456 = vmatmul.mubr.msk.bf16.gmra.mrb[8].mxu0 %vm5891_vm8, %v5858_v39  ;;  %v6073_v63 = vunpack.c.l.s4 %v11225_v30  ;;  %v6756_v62 = vcombine.high %v10254_v31, %v10254_v31  ;;  %v2507_v33 = vcombine.low %v17003_v6, %v17002_v57  ;;  %v17007_v61 = vld [vmem:[#allocation42_spill] sm:$0xff]  ;;  %v17008_v12 = vld [vmem:[#allocation39_spill] sm:$0xff] }
 0x18a   : > { %v2425_v2 = vcombine.low %v2417_v9, %v2424_v48  ;;  %v17006_v9 = vld [vmem:[#allocation37_spill] sm:$0xff]  ;;  %v17009_v56 = vld [vmem:[#allocation38_spill] sm:$0xff] }
 0x18b   : > { %v2474_v49 = vcombine.low %v2466_v47, %v2473_v44  ;;  %v6074_v10 = vunpack.c.0.s8 %v6073_v63  ;;  %v2556_v35 = vcombine.low %v17007_v61, %v17006_v9  ;;  %v2557_v46 = vcombine.low %v17009_v56, %v17008_v12 }
 0x18c   : > { %5655 = vrot.lane.b32.xlu0 %v5619_v4, %s11221_s14  ;;  %v5680_v11 = vsel %vm5659_vm15, %v2425_v2, %v13699_v60  ;;  %v5392_v19 = vpop.permute.xlu1 %5391 }
 0x18d   : > { %v5683_v16 = vsel %vm5659_vm15, %v2474_v49, %v13740_v40  ;;  %v5710_v17 = vsel %vm5696_vm0, %v5680_v11, %v13750_v38  ;;  %v13906_v0 = vsub.s32 %v6074_v10, %v17001_v1  ;;  %v2564_v48 = vrot.slane %v2556_v35, %v11343_v5 }
 0x18e   : > { %v5390_v36 = vpop.permute.xlu0 %5389  ;;  %v5735_v37 = vsel %vm5721_vm1, %v5710_v17, %v13787_v50  ;;  %v5712_v29 = vsel %vm5696_vm0, %v5683_v16, %v13782_v13  ;;  %v2571_v39 = vrot.slane %v2557_v46, %v11343_v5 }
 0x18f   : > { %v5760_v60 = vsel %vm5746_vm2, %v5735_v37, %v13812_v28  ;;  %v6763_v40 = vrot.slane %v10254_v31, %v13906_v0  ;;  %v5737_v38 = vsel %vm5721_vm1, %v5712_v29, %v13808_v18  ;;  %v6770_v50 = vrot.slane %v6756_v62, %v13906_v0 }
 0x190   : > { %v5785_v27 = vsel %vm5771_vm3, %v5760_v60, %v4923_v51  ;;  %v5762_v21 = vsel %vm5746_vm2, %v5737_v38, %v13845_v8  ;;  %v3208_v14 = vpop.permute.xlu1 %3207  ;;  %v2572_v30 = vcombine.low %v2564_v48, %v2571_v39 }
 0x191   : > { %v5810_v45 = vsel %vm5796_vm4, %v5785_v27, %v5100_v32  ;;  %v6771_v55 = vcombine.high %v6763_v40, %v6763_v40  ;;  %6773 = vrot.lane.b32.xlu0 %v6763_v40, %s11223_s17  ;;  %v5787_v13 = vsel %vm5771_vm3, %v5762_v21, %v4925_v3  ;;  %v6772_v26 = vcombine.high %v6770_v50, %v6770_v50 }
 0x192   : > { %v5648_v53 = vpop.permute.xlu0 %5647  ;;  %v5835_v28 = vsel %vm5821_vm5, %v5810_v45, %v5390_v36  ;;  %v5812_v18 = vsel %vm5796_vm4, %v5787_v13, %v5102_v42  ;;  %v2508_v3 = vcombine.low %v17005_v54, %v17004_v25  ;;  %v2515_v32 = vrot.slane %v2507_v33, %v11343_v5 }
 0x193   : > { %v5860_v51 = vsel %vm5846_vm7, %v5835_v28, %v5648_v53  ;;  %6775 = vrot.lane.b32.xlu1 %v6771_v55, %s11223_s17  ;;  %v5837_v52 = vsel %vm5821_vm5, %v5812_v18, %v5392_v19 }
 0x194   : > { %10459 = vmatprep.mubr.msk.bf16.mxu0 %vm5891_vm8, %v5860_v51  ;;  %v3210_v43 = vpop.permute.xlu1 %3209  ;;  %v2522_v4 = vrot.slane %v2508_v3, %v11343_v5 }
 0x195   : > { %6777 = vrot.lane.b32.xlu0 %v6770_v50, %s11223_s17  ;;  %v5689_v42 = vsel %vm5659_vm15, %v2572_v30, %v3210_v43  ;;  %v17012_v43 = vld [vmem:[#allocation47_spill] sm:$0xff] }
 0x196   : > { %v5650_v8 = vpop.permute.xlu0 %5649  ;;  %v2523_v47 = vcombine.low %v2515_v32, %v2522_v4 }
 0x197   : > { %v5862_v23 = vsel %vm5846_vm7, %v5837_v52, %v5650_v8  ;;  %6779 = vrot.lane.b32.xlu1 %v6772_v26, %s11223_s17  ;;  %v17010_v8 = vld [vmem:[#allocation10_spill] sm:$0xff] }
 0x198   : > { %10460 = vmatmul.mubr.msk.bf16.gmra.mrb[12].mxu0 %vm5891_vm8, %v5862_v23  ;;  %v3788_v24 = vpop.permute.xlu1 %3787  ;;  %v5686_v63 = vsel %vm5659_vm15, %v2523_v47, %v3208_v14  ;;  %v17011_v23 = vld [vmem:[#allocation41_spill] sm:$0xff] }
 0x199   : > { %v5716_v36 = vsel %vm5696_vm0, %v5689_v42, %v3788_v24  ;;  %v2605_v14 = vcombine.low %v17011_v23, %v17010_v8  ;;  %v17013_v24 = vld [vmem:[#allocation40_spill] sm:$0xff] }
 0x19a   : > { %v3786_v15 = vpop.permute.xlu0 %3785 }
 0x19b   : > { %v5714_v49 = vsel %vm5696_vm0, %v5686_v63, %v3786_v15  ;;  %v2606_v15 = vcombine.low %v17013_v24, %v17012_v43 }
 0x19e   : > { %v4027_v59 = vpop.permute.xlu0 %4026 }
 0x19f   : > { %v5739_v10 = vsel %vm5721_vm1, %v5714_v49, %v4027_v59 }
 0x1a3   : > { %v4029_v7 = vpop.permute.xlu1 %4028 }
 0x1a4   : > { %v5741_v60 = vsel %vm5721_vm1, %v5716_v36, %v4029_v7 }
 0x1b0   : > { %v4607_v22 = vpop.permute.xlu1 %4606  ;;  %v4605_v41 = vpop.permute.xlu0 %4604 }
 0x1b1   : > { %v5764_v16 = vsel %vm5746_vm2, %v5739_v10, %v4605_v41  ;;  %v5766_v40 = vsel %vm5746_vm2, %v5741_v60, %v4607_v22  ;;  %v2613_v22 = vrot.slane %v2605_v14, %v11343_v5  ;;  %v2620_v41 = vrot.slane %v2606_v15, %v11343_v5 }
 0x1b3   : > { %v2621_v6 = vcombine.low %v2613_v22, %v2620_v41 }
 0x1b6   : > { %v4929_v34 = vpop.permute.xlu1 %4928  ;;  %v4927_v58 = vpop.permute.xlu0 %4926 }
 0x1b7   : > { %v5789_v17 = vsel %vm5771_vm3, %v5764_v16, %v4927_v58  ;;  %v5791_v45 = vsel %vm5771_vm3, %v5766_v40, %v4929_v34  ;;  %v17014_v34 = vld [vmem:[#allocation48_spill] sm:$0xff] }
 0x1b8   : > { %v2636_v57 = vrot.slane %v17014_v34, %v11343_v5 }
 0x1ba   : > { %v5104_v44 = vpop.permute.xlu0 %5103 }
 0x1bb   : > { %v5814_v62 = vsel %vm5796_vm4, %v5789_v17, %v5104_v44 }
 0x1c1   : > { %v5106_v20 = vpop.permute.xlu1 %5105 }
 0x1c2   : > { %v5816_v53 = vsel %vm5796_vm4, %v5791_v45, %v5106_v20 }
 0x1cc   : > { %v5396_v2 = vpop.permute.xlu1 %5395 }
 0x1cd   : > { %v5841_v21 = vsel %vm5821_vm5, %v5816_v53, %v5396_v2 }
 0x1d0   : > { %v3212_v11 = vpop.permute.xlu1 %3211 }
 0x1d1   : > { %v5692_v3 = vsel %vm5659_vm15, %v2621_v6, %v3212_v11 }
 0x1d3   : > { %v5394_v31 = vpop.permute.xlu0 %5393 }
 0x1d4   : > { %v3214_v37 = vpop.permute.xlu1 %3213  ;;  %v5839_v29 = vsel %vm5821_vm5, %v5814_v62, %v5394_v31 }
 0x1d5   : > { %v5695_v25 = vsel %vm5659_vm15, %v2636_v57, %v3214_v37 }
 0x1d7   : > { %v5652_v27 = vpop.permute.xlu0 %5651 }
 0x1d8   : > { %v5864_v38 = vsel %vm5846_vm7, %v5839_v29, %v5652_v27  ;;  %v3792_v50 = vpop.permute.xlu1 %3791 }
 0x1d9   : > { %10463 = vmatprep.mubr.msk.bf16.mxu0 %vm5891_vm8, %v5864_v38  ;;  %v5720_v9 = vsel %vm5696_vm0, %v5695_v25, %v3792_v50 }
 0x1db   : > { %v5654_v19 = vpop.permute.xlu0 %5653 }
 0x1dc   : > { %v5866_v28 = vsel %vm5846_vm7, %v5841_v21, %v5654_v19  ;;  %v4033_v55 = vpop.permute.xlu1 %4032 }
 0x1dd   : > { %10464 = vmatmul.mubr.msk.bf16.gmra.mrb[16].mxu0 %vm5891_vm8, %v5866_v28  ;;  %v5745_v35 = vsel %vm5721_vm1, %v5720_v9, %v4033_v55 }
 0x1df   : > { %v3790_v13 = vpop.permute.xlu0 %3789 }
 0x1e0   : > { %v4611_v18 = vpop.permute.xlu1 %4610  ;;  %v5718_v61 = vsel %vm5696_vm0, %v5692_v3, %v3790_v13 }
 0x1e1   : > { %v5770_v56 = vsel %vm5746_vm2, %v5745_v35, %v4611_v18 }
 0x1e3   : > { %v4031_v51 = vpop.permute.xlu0 %4030 }
 0x1e4   : > { %v4933_v52 = vpop.permute.xlu1 %4932  ;;  %v5743_v12 = vsel %vm5721_vm1, %v5718_v61, %v4031_v51  ;;  %v17020_v61 = vmov 0 }
 0x1e5   : > { %v5795_v58 = vsel %vm5771_vm3, %v5770_v56, %v4933_v52  ;;  %v17021_v61 = vsel %vm14074_vm9, 4294967295, %v17020_v61 }
 0x1e6   : > { %17022 = vst [vmem:[#allocation46_spill] sm:$0xff] %v17021_v61 }
 0x1e7   : > { %v4609_v26 = vpop.permute.xlu0 %4608 }
 0x1e8   : > { %v5768_v5 = vsel %vm5746_vm2, %v5743_v12, %v4609_v26 }
 0x1eb   : > { %v4931_v7 = vpop.permute.xlu0 %4930 }
 0x1ec   : > { %v5110_v59 = vpop.permute.xlu1 %5109  ;;  %v5793_v32 = vsel %vm5771_vm3, %v5768_v5, %v4931_v7 }
 0x1ed   : > { %v5820_v4 = vsel %vm5796_vm4, %v5795_v58, %v5110_v59 }
 0x1ef   : > { %v5108_v33 = vpop.permute.xlu0 %5107 }
 0x1f0   : > { %v5818_v48 = vsel %vm5796_vm4, %v5793_v32, %v5108_v33 }
 0x1f1   : > { %v5400_v54 = vpop.permute.xlu1 %5399 }
 0x1f2   : > { %v5845_v39 = vsel %vm5821_vm5, %v5820_v4, %v5400_v54 }
 0x1f6   : > { %v5658_v20 = vpop.permute.xlu1 %5657 }
 0x1f7   : > { %v5870_v44 = vsel %vm5846_vm7, %v5845_v39, %v5658_v20 }
 0x1fa   : > { %v5398_v46 = vpop.permute.xlu0 %5397 }
 0x1fb   : > { %v5843_v47 = vsel %vm5821_vm5, %v5818_v48, %v5398_v46 }
 0x1fe   : > { %v5656_v2 = vpop.permute.xlu0 %5655 }
 0x1ff   : > { %v5868_v30 = vsel %vm5846_vm7, %v5843_v47, %v5656_v2 }
 0x200   : > { %10467 = vmatprep.mubr.msk.bf16.mxu0 %vm5891_vm8, %v5868_v30 }
 0x201   : > { %10468 = vmatmul.mubr.msk.bf16.gmra.mrb[20].mxu0 %vm5891_vm8, %v5870_v44 }
 0x203   : > { %v14007_v29 = vpop.permute.xlu0 %6773 }
 0x205   : > { %v13999_v62 = vpop.permute.xlu1 %6775 }
 0x207   : > { %v14036_v23 = vpop.permute.xlu0 %6777 }
 0x209   : > { %v14060_v6 = vpop.permute.xlu1 %6779 }
 0x215   : > { %v10449_v63 = vpop.f32.mrb[0].mxu0 }
 0x216   : > { %v6105_v49 = vcombine.high %v10449_v63, %v10449_v63  ;;  %v5954_v11 = vpop.f32.mrb[1].mxu0  ;;  %v6112_v27 = vrot.slane %v10449_v63, %v13906_v0 }
 0x217   : > { %v13989_v42 = vrot.slane %v5954_v11, %v13906_v0  ;;  %v10450_v10 = vpop.f32.mrb[2].mxu0  ;;  %v6071_v59 = vcombine.high %v5954_v11, %v5954_v11 }
 0x218   : > { %v13992_v31 = vrot.slane %v6105_v49, %v13906_v0  ;;  %v6122_v16 = vcombine.high %v10450_v10, %v10450_v10  ;;  %v13995_v17 = vrot.slane %v10450_v10, %v13906_v0  ;;  %v13997_v36 = vpop.f32.mrb[3].mxu0  ;;  %v14030_v55 = vcombine.high %v6112_v27, %v6112_v27 }
 0x219   : > { %v6086_v37 = vcombine.high %v13989_v42, %v13989_v42  ;;  %v6095_v53 = vrot.slane %v13997_v36, %v13906_v0  ;;  %v14053_v7 = vadd.f32 %v14007_v29, %v6112_v27  ;;  %v6085_v56 = vrot.slane %v6071_v59, %v13906_v0 }
 0x21a   : > { %17015 = vst [vmem:[#allocation33_spill] sm:$0xff] %v13992_v31  ;;  %17016 = vst [vmem:[#allocation12_spill] sm:$0xff] %v13995_v17  ;;  %v14005_v60 = vadd.f32 %v13999_v62, %v13992_v31  ;;  %v6136_v38 = vrot.slane %v6122_v16, %v13906_v0  ;;  %v14016_v45 = vcombine.high %v13995_v17, %v13995_v17 }
 0x21b   : > { %v14011_v40 = vadd.f32 %v13999_v62, %v6086_v37  ;;  %17018 = vst [vmem:[#allocation14_spill] sm:$0xff] %v14030_v55  ;;  %v6103_v8 = vcombine.high %v6095_v53, %v6095_v53  ;;  %v14040_v14 = vcombine.high %v13992_v31, %v13992_v31  ;;  %v14043_v43 = vadd.f32 %v14007_v29, %v6095_v53 }
 0x21c   : > { %17017 = vst [vmem:[#allocation9_spill] sm:$0xff] %v14016_v45  ;;  %v10265_v50 = vmul.f32 -1.442695, %v14005_v60  ;;  %v14021_v21 = vcombine.high %v6136_v38, %v6136_v38  ;;  %v14025_v19 = vadd.f32 %v14007_v29, %v14016_v45  ;;  %v14028_v28 = vadd.f32 %v13999_v62, %v6136_v38 }
 0x21d   : > { %v10256_v13 = vmul.f32 -1.442695, %v14011_v40  ;;  %v16785_v51 = vrot.slane %v14016_v45, 7  ;;  %v6564_v18 = vrot.slane %v6136_v38, 7  ;;  %17019 = vst [vmem:[#allocation13_spill] sm:$0xff] %v14040_v14  ;;  %v14050_v15 = vadd.f32 %v13999_v62, %v6103_v8 }
 0x21e   : > { %v10268_v26 = vmul.f32 -1.442695, %v14025_v19  ;;  %v10269_v52 = vmul.f32 -1.442695, %v14028_v28  ;;  %10696 = vpow2.f32 %v10265_v50  ;;  %v14047_v24 = vadd.f32 %v14036_v23, %v14021_v21 }
 0x21f   : > { %v6563_v22 = vrot.slane %v16785_v51, 2  ;;  %v10259_v41 = vmul.f32 -1.442695, %v14043_v43  ;;  %v6566_v34 = vrot.slane %v6564_v18, 2  ;;  %v10260_v57 = vmul.f32 -1.442695, %v14050_v15 }
 0x220   : > { %10698 = vpow2.f32 %v10268_v26  ;;  %v14064_v33 = vadd.f32 %v14007_v29, %v14030_v55  ;;  %v6567_v25 = vrot.slane %v14021_v21, 7  ;;  %v10270_v54 = vmul.f32 -1.442695, %v14047_v24 }
 0x221   : > { %10700 = vpow2.f32 %v10269_v52  ;;  %v14070_v3 = vadd.f32 %v14036_v23, %v14040_v14  ;;  %v10263_v9 = vmul.f32 -1.442695, %v14053_v7  ;;  %v14080_v35 = vadd.f32 %v14060_v6, %v13995_v17 }
 0x222   : > { %10702 = vpow2.f32 %v10256_v13  ;;  %v14084_v12 = vsel %vm14074_vm9, %v6563_v22, %v6564_v18  ;;  %v10264_v46 = vmul.f32 -1.442695, %v14064_v33  ;;  %v14093_v58 = vsel %vm14074_vm9, %v6566_v34, %v6567_v25 }
 0x223   : > { %10704 = vpow2.f32 %v10259_v41  ;;  %17023 = vst [vmem:[#allocation44_spill] sm:$0xff] %v14084_v12  ;;  %v10266_v5 = vmul.f32 -1.442695, %v14070_v3  ;;  %17024 = vst [vmem:[#allocation50_spill] sm:$0xff] %v14093_v58  ;;  %v10267_v32 = vmul.f32 -1.442695, %v14080_v35  ;;  %v14098_v4 = vadd.f32 %v14007_v29, %v13989_v42 }
 0x224   : > { %10706 = vpow2.f32 %v10260_v57  ;;  %v14101_v39 = vadd.f32 %v14036_v23, %v6085_v56  ;;  %v6088_v49 = vcombine.high %v13997_v36, %v13997_v36  ;;  %v6087_v50 = vcombine.high %v6085_v56, %v6085_v56 }
 0x225   : > { %10708 = vpow2.f32 %v10270_v54  ;;  %v10255_v10 = vmul.f32 -1.442695, %v14098_v4 }
 0x226   : > { %10710 = vpow2.f32 %v10263_v9  ;;  %v10257_v16 = vmul.f32 -1.442695, %v14101_v39  ;;  %v6102_v27 = vrot.slane %v6088_v49, %v13906_v0  ;;  %v14109_v22 = vadd.f32 %v14060_v6, %v6087_v50 }
 0x227   : > { %10712 = vpow2.f32 %v10264_v46  ;;  %v14139_v50 = vrot.slane %v6567_v25, 2 }
 0x228   : > { %v10697_v20 = vpop.eup %10696  ;;  %10714 = vpow2.f32 %v10266_v5  ;;  %v6104_v26 = vcombine.high %v6102_v27, %v6102_v27  ;;  %v14112_v41 = vadd.f32 %v14036_v23, %v6102_v27  ;;  %v16786_v5 = vrot.slane %v13992_v31, 7 }
 0x229   : > { %v7155_v30 = vadd.f32 1.0, %v10697_v20  ;;  %10716 = vpow2.f32 %v10267_v32  ;;  %v16784_v20 = vrot.slane %v13995_v17, 7  ;;  %v10258_v32 = vmul.f32 -1.442695, %v14109_v22  ;;  %17027 = vst [vmem:[#allocation51_spill] sm:$0xff] %v14139_v50 }
 0x22a   : > { %v10699_v48 = vpop.eup %10698  ;;  %v14115_v56 = vadd.f32 %v14060_v6, %v6104_v26 }
 0x22b   : > { %v10701_v47 = vpop.eup %10700  ;;  %v7158_v44 = vadd.f32 1.0, %v10699_v48  ;;  %v14132_v27 = vrot.slane %v16784_v20, 2 }
 0x22c   : > { %v10703_v2 = vpop.eup %10702  ;;  %v7159_v63 = vadd.f32 1.0, %v10701_v47  ;;  %v10261_v47 = vmul.f32 -1.442695, %v14112_v41 }
 0x22d   : > { %v10705_v11 = vpop.eup %10704  ;;  %10718 = vrcp.f32 %v7158_v44  ;;  %v7146_v37 = vadd.f32 1.0, %v10703_v2  ;;  %17026 = vst [vmem:[#allocation52_spill] sm:$0xff] %v14132_v27 }
 0x22e   : > { %v10707_v42 = vpop.eup %10706  ;;  %10720 = vrcp.f32 %v7159_v63  ;;  %v7149_v13 = vadd.f32 1.0, %v10705_v11 }
 0x22f   : > { %10722 = vrcp.f32 %v7155_v30  ;;  %v7150_v38 = vadd.f32 1.0, %v10707_v42  ;;  %v10709_v53 = vpop.eup %10708 }
 0x230   : > { %10724 = vpow2.f32 %v10255_v10  ;;  %v10711_v18 = vpop.eup %10710  ;;  %v7160_v52 = vadd.f32 1.0, %v10709_v53  ;;  %v10262_v10 = vmul.f32 -1.442695, %v14115_v56 }
 0x231   : > { %10726 = vpow2.f32 %v10257_v16  ;;  %v10713_v36 = vpop.eup %10712  ;;  %v7153_v59 = vadd.f32 1.0, %v10711_v18  ;;  %v14127_v16 = vrot.slane %v16786_v5, 2 }
 0x232   : > { %10728 = vrcp.f32 %v7146_v37  ;;  %v10715_v8 = vpop.eup %10714  ;;  %v7154_v57 = vadd.f32 1.0, %v10713_v36 }
 0x233   : > { %10730 = vrcp.f32 %v7150_v38  ;;  %v10717_v34 = vpop.eup %10716  ;;  %v7156_v9 = vadd.f32 1.0, %v10715_v8  ;;  %17025 = vst [vmem:[#allocation49_spill] sm:$0xff] %v14127_v16 }
 0x234   : > { %10732 = vrcp.f32 %v7149_v13  ;;  %v7157_v30 = vadd.f32 1.0, %v10717_v34 }
 0x235   : > { %10734 = vrcp.f32 %v7160_v52 }
 0x236   : > { %10736 = vrcp.f32 %v7153_v59 }
 0x237   : > { %v10719_v54 = vpop.eup %10718  ;;  %10738 = vrcp.f32 %v7154_v57 }
 0x238   : > { %v10721_v46 = vpop.eup %10720  ;;  %v7428_v49 = vmul.f32 %v10719_v54, %v14025_v19  ;;  %10740 = vrcp.f32 %v7156_v9 }
 0x239   : > { %v10723_v48 = vpop.eup %10722  ;;  %v7429_v11 = vmul.f32 %v10721_v46, %v14028_v28  ;;  %10742 = vpow2.f32 %v10258_v32 }
 0x23a   : > { %v10725_v44 = vpop.eup %10724  ;;  %v14135_v19 = vmul.f32 %v10723_v48, %v14005_v60  ;;  %10744 = vpow2.f32 %v10261_v47 }
 0x23b   : > { %v10727_v63 = vpop.eup %10726  ;;  %v7145_v53 = vadd.f32 1.0, %v10725_v44  ;;  %10746 = vrcp.f32 %v7157_v30  ;;  %v7707_v8 = vcombine.low %v7428_v49, %v7429_v11 }
 0x23c   : > { %v10729_v42 = vpop.eup %10728  ;;  %v7147_v52 = vadd.f32 1.0, %v10727_v63  ;;  %10748 = vpow2.f32 %v10262_v10 }
 0x23d   : > { %v10731_v38 = vpop.eup %10730  ;;  %v14162_v32 = vmul.f32 %v10729_v42, %v14011_v40  ;;  %10750 = vrcp.f32 %v7145_v53  ;;  %v14201_v53 = vrot.slane %v7707_v8, %v13906_v0 }
 0x23e   : > { %v10733_v13 = vpop.eup %10732  ;;  %v7420_v57 = vmul.f32 %v10731_v38, %v14050_v15  ;;  %10752 = vrcp.f32 %v7147_v52 }
 0x23f   : > { %v10735_v46 = vpop.eup %10734  ;;  %v7419_v48 = vmul.f32 %v10733_v13, %v14043_v43 }
 0x240   : > { %v10453_v28 = vpop.f32.mrb[4].mxu0  ;;  %v10737_v47 = vpop.eup %10736 }
 0x241   : > { %v6173_v18 = vcombine.high %v10453_v28, %v10453_v28  ;;  %v14142_v36 = vrot.slane %v10453_v28, %v13906_v0  ;;  %v5970_v26 = vpop.f32.mrb[5].mxu0  ;;  %v10739_v10 = vpop.eup %10738  ;;  %v7666_v42 = vcombine.low %v7419_v48, %v7420_v57  ;;  %v14198_v28 = vmul.f32 %v10735_v46, %v14047_v24 }
 0x242   : > { %v6139_v59 = vcombine.high %v5970_v26, %v5970_v26  ;;  %v14145_v60 = vrot.slane %v5970_v26, %v13906_v0  ;;  %v10454_v34 = vpop.f32.mrb[6].mxu0  ;;  %v10741_v13 = vpop.eup %10740  ;;  %v14206_v52 = vmul.f32 %v10737_v47, %v14053_v7  ;;  %v14239_v57 = vmul.f32 %v10739_v10, %v14064_v33 }
 0x243   : > { %17028 = vst [vmem:[#allocation16_spill] sm:$0xff] %v14142_v36  ;;  %v14149_v21 = vrot.slane %v6173_v18, %v13906_v0  ;;  %v14153_v25 = vcombine.high %v14142_v36, %v14142_v36  ;;  %v14157_v54 = vadd.f32 %v14036_v23, %v14142_v36  ;;  %v14159_v9 = vpop.f32.mrb[7].mxu0  ;;  %v6190_v37 = vcombine.high %v10454_v34, %v10454_v34 }
 0x244   : > { %17029 = vst [vmem:[#allocation15_spill] sm:$0xff] %v14145_v60  ;;  %v14166_v15 = vrot.slane %v6139_v59, %v13906_v0  ;;  %v14174_v30 = vcombine.high %v14145_v60, %v14145_v60  ;;  %v14178_v63 = vadd.f32 %v14060_v6, %v14145_v60  ;;  %v14208_v59 = vpop.eup %10742  ;;  %v14232_v2 = vrot.slane %v10454_v34, %v13906_v0 }
 0x245   : > { %17030 = vst [vmem:[#allocation17_spill] sm:$0xff] %v14149_v21  ;;  %17031 = vst [vmem:[#allocation22_spill] sm:$0xff] %v14153_v25  ;;  %v14170_v44 = vcombine.high %v14149_v21, %v14149_v21  ;;  %v14182_v40 = vadd.f32 %v14060_v6, %v14153_v25  ;;  %v14186_v43 = vadd.f32 %v14007_v29, %v14149_v21  ;;  %v10279_v49 = vmul.f32 -1.442695, %v14157_v54  ;;  %v14217_v46 = vpop.eup %10744 }
 0x246   : > { %17032 = vst [vmem:[#allocation19_spill] sm:$0xff] %v14166_v15  ;;  %17034 = vst [vmem:[#allocation21_spill] sm:$0xff] %v14174_v30  ;;  %v14191_v11 = vcombine.high %v14166_v15, %v14166_v15  ;;  %v14215_v8 = vadd.f32 %v14007_v29, %v14174_v30  ;;  %v10271_v47 = vmul.f32 -1.442695, %v14178_v63  ;;  %v14228_v20 = vpop.eup %10746  ;;  %v14247_v34 = vcombine.high %v14232_v2, %v14232_v2 }
 0x247   : > { %17033 = vst [vmem:[#allocation18_spill] sm:$0xff] %v14170_v44  ;;  %v14195_v38 = vadd.f32 %v14007_v29, %v14170_v44  ;;  %10754 = vpow2.f32 %v10279_v49  ;;  %v10280_v18 = vmul.f32 -1.442695, %v14182_v40  ;;  %v10281_v26 = vmul.f32 -1.442695, %v14186_v43  ;;  %17036 = vst [vmem:[#allocation6_spill] sm:$0xff] %v14232_v2 }
 0x248   : > { %17035 = vst [vmem:[#allocation20_spill] sm:$0xff] %v14191_v11  ;;  %v14221_v49 = vadd.f32 %v14007_v29, %v14166_v15  ;;  %v14225_v7 = vadd.f32 %v13999_v62, %v14191_v11  ;;  %v10272_v51 = vmul.f32 -1.442695, %v14215_v8  ;;  %17038 = vst [vmem:[#allocation11_spill] sm:$0xff] %v14247_v34  ;;  %v14256_v33 = vadd.f32 %v13999_v62, %v14232_v2 }
 0x249   : > { %v10282_v24 = vmul.f32 -1.442695, %v14195_v38  ;;  %10756 = vpow2.f32 %v10280_v18  ;;  %v14234_v18 = vpop.eup %10748  ;;  %v14259_v10 = vmul.f32 %v10741_v13, %v14070_v3  ;;  %v17041_v45 = vrot.slane %v14153_v25, 7 }
 0x24a   : > { %10758 = vpow2.f32 %v10281_v26  ;;  %v10273_v5 = vmul.f32 -1.442695, %v14221_v49  ;;  %v10274_v48 = vmul.f32 -1.442695, %v14225_v7  ;;  %v14243_v26 = vrot.slane %v6190_v37, %v13906_v0  ;;  %v14249_v27 = vpop.eup %10750 }
 0x24b   : > { %10760 = vpow2.f32 %v10282_v24  ;;  %v14252_v24 = vrot.slane %v7666_v42, %v13906_v0  ;;  %v17039_v37 = vrot.slane %v14142_v36, 7  ;;  %v14269_v16 = vrot.slane %v17041_v45, 2 }
 0x24c   : > { %10762 = vpow2.f32 %v10271_v47  ;;  %17037 = vst [vmem:[#allocation43_spill] sm:$0xff] %v14243_v26  ;;  %v14261_v47 = vpop.eup %10752  ;;  %v14278_v3 = vadd.f32 %v14060_v6, %v14243_v26  ;;  %v6156_v13 = vcombine.high %v14159_v9, %v14159_v9  ;;  %v17043_v45 = vrot.slane %v14145_v60, 7 }
 0x24d   : > { %10764 = vpow2.f32 %v10272_v51  ;;  %v14265_v17 = vrot.slane %v17039_v37, 2  ;;  %17042 = vst [vmem:[#allocation8_spill] sm:$0xff] %v14269_v16  ;;  %v14274_v51 = vadd.f32 %v14036_v23, %v14247_v34  ;;  %v14297_v37 = vrot.slane %v14159_v9, %v13906_v0 }
 0x24e   : > { %10766 = vpow2.f32 %v10273_v5  ;;  %v14285_v36 = vrot.slane %v17043_v45, 2  ;;  %v14289_v5 = vcombine.high %v14243_v26, %v14243_v26  ;;  %v14304_v16 = vrot.slane %v6156_v13, %v13906_v0 }
 0x24f   : > { %17040 = vst [vmem:[#allocation7_spill] sm:$0xff] %v14265_v17  ;;  %10768 = vpow2.f32 %v10274_v48  ;;  %v10283_v48 = vmul.f32 -1.442695, %v14256_v33  ;;  %v10284_v21 = vmul.f32 -1.442695, %v14274_v51  ;;  %17046 = vst [vmem:[#allocation24_spill] sm:$0xff] %v14297_v37  ;;  %v14325_v9 = vadd.f32 %v14036_v23, %v14297_v37 }
 0x250   : > { %17044 = vst [vmem:[#allocation45_spill] sm:$0xff] %v14285_v36  ;;  %17045 = vst [vmem:[#allocation32_spill] sm:$0xff] %v14289_v5  ;;  %v10285_v17 = vmul.f32 -1.442695, %v14278_v3  ;;  %v17048_v25 = vrot.slane %v14232_v2, 7 }
 0x251   : > { %v10755_v42 = vpop.eup %10754  ;;  %10770 = vpow2.f32 %v10283_v48  ;;  %17047 = vst [vmem:[#allocation23_spill] sm:$0xff] %v14304_v16 }
 0x252   : > { %v7169_v44 = vadd.f32 1.0, %v10755_v42  ;;  %10772 = vpow2.f32 %v10284_v21  ;;  %v14309_v42 = vadd.f32 %v14007_v29, %v14289_v5  ;;  %v14313_v55 = vrot.slane %v17048_v25, 2 }
 0x253   : > { %v10757_v14 = vpop.eup %10756  ;;  %v14317_v21 = vcombine.high %v14297_v37, %v14297_v37 }
 0x254   : > { %v10759_v12 = vpop.eup %10758  ;;  %v7170_v58 = vadd.f32 1.0, %v10757_v14  ;;  %10774 = vrcp.f32 %v7169_v44  ;;  %17049 = vst [vmem:[#allocation29_spill] sm:$0xff] %v14313_v55  ;;  %v17051_v44 = vrot.slane %v14247_v34, 7  ;;  %v14330_v55 = vcombine.high %v14304_v16, %v14304_v16 }
 0x255   : > { %v10761_v45 = vpop.eup %10760  ;;  %v7171_v48 = vadd.f32 1.0, %v10759_v12  ;;  %10776 = vpow2.f32 %v10285_v17  ;;  %17050 = vst [vmem:[#allocation25_spill] sm:$0xff] %v14317_v21 }
 0x256   : > { %v10763_v13 = vpop.eup %10762  ;;  %v7172_v14 = vadd.f32 1.0, %v10761_v45  ;;  %10778 = vrcp.f32 %v7170_v58  ;;  %v14321_v31 = vrot.slane %v17051_v44, 2  ;;  %v17053_v45 = vrot.slane %v14243_v26, 7 }
 0x257   : > { %v10765_v12 = vpop.eup %10764  ;;  %10780 = vrcp.f32 %v7171_v48  ;;  %v7161_v25 = vadd.f32 1.0, %v10763_v13  ;;  %v14339_v48 = vadd.f32 %v14060_v6, %v14317_v21  ;;  %v14343_v13 = vadd.f32 %v14007_v29, %v14304_v16 }
 0x258   : > { %17052 = vst [vmem:[#allocation27_spill] sm:$0xff] %v14321_v31  ;;  %v10767_v2 = vpop.eup %10766  ;;  %10782 = vrcp.f32 %v7172_v14  ;;  %v7162_v58 = vadd.f32 1.0, %v10765_v12  ;;  %v14334_v44 = vrot.slane %v17053_v45, 2  ;;  %v10286_v31 = vmul.f32 -1.442695, %v14309_v42 }
 0x259   : > { %v10769_v34 = vpop.eup %10768  ;;  %v7163_v15 = vadd.f32 1.0, %v10767_v2  ;;  %10784 = vrcp.f32 %v7161_v25  ;;  %v10275_v14 = vmul.f32 -1.442695, %v14325_v9  ;;  %v7427_v12 = vmul.f32 %v14228_v20, %v14080_v35 }
 0x25a   : > { %17054 = vst [vmem:[#allocation26_spill] sm:$0xff] %v14334_v44  ;;  %v7164_v17 = vadd.f32 1.0, %v10769_v34  ;;  %10786 = vrcp.f32 %v7162_v58  ;;  %v14351_v2 = vadd.f32 %v13999_v62, %v14330_v55  ;;  %v7690_v25 = vcombine.low %v14239_v57, %v14135_v19 }
 0x25b   : > { %10788 = vrcp.f32 %v7163_v15  ;;  %v10771_v26 = vpop.eup %10770  ;;  %v7691_v5 = vcombine.low %v14259_v10, %v7427_v12  ;;  %v10276_v45 = vmul.f32 -1.442695, %v14339_v48  ;;  %v10277_v11 = vmul.f32 -1.442695, %v14343_v13 }
 0x25c   : > { %v10457_v44 = vpop.f32.mrb[8].mxu0  ;;  %10790 = vrcp.f32 %v7164_v17  ;;  %v10773_v20 = vpop.eup %10772  ;;  %v7173_v15 = vadd.f32 1.0, %v10771_v26  ;;  %v7698_v17 = vrot.slane %v7690_v25, %v13906_v0  ;;  %v7689_v26 = vrot.slane %v14206_v52, %v13906_v0 }
 0x25d   : > { %v14358_v35 = vpop.f32.mrb[9].mxu0  ;;  %10792 = vpow2.f32 %v10286_v31  ;;  %v7174_v57 = vadd.f32 1.0, %v10773_v20  ;;  %v7705_v58 = vrot.slane %v7691_v5, %v13906_v0  ;;  %v10278_v31 = vmul.f32 -1.442695, %v14351_v2 }
 0x25e   : > { %v14362_v36 = vpop.f32.mrb[10].mxu0  ;;  %v10775_v19 = vpop.eup %10774  ;;  %10794 = vpow2.f32 %v10275_v14  ;;  %v6241_v12 = vcombine.high %v10457_v44, %v10457_v44  ;;  %v14372_v14 = vrot.slane %v10457_v44, %v13906_v0  ;;  %v7148_v20 = vadd.f32 1.0, %v14208_v59 }
 0x25f   : > { %v14366_v34 = vpop.f32.mrb[11].mxu0  ;;  %v10777_v10 = vpop.eup %10776  ;;  %10796 = vrcp.f32 %v7173_v15  ;;  %v7706_v50 = vcombine.low %v7698_v17, %v7705_v58  ;;  %v7415_v15 = vmul.f32 %v14249_v27, %v14098_v4  ;;  %v17056_v52 = vrot.slane %v14297_v37, 7 }
 0x260   : > { %v10779_v30 = vpop.eup %10778  ;;  %v7175_v61 = vadd.f32 1.0, %v10777_v10  ;;  %10798 = vrcp.f32 %v7174_v57  ;;  %17055 = vst [vmem:[#allocation30_spill] sm:$0xff] %v14372_v14  ;;  %v7151_v58 = vadd.f32 1.0, %v14217_v46  ;;  %v14397_v27 = vcombine.high %v14372_v14, %v14372_v14 }
 0x261   : > { %v10781_v25 = vpop.eup %10780  ;;  %10800 = vpow2.f32 %v10276_v45  ;;  %v14380_v1 = vrot.slane %v17056_v52, 2  ;;  %v10615_v57 = vpack.i.bf16 %v7689_v26, %v7706_v50  ;;  %v14384_v17 = vmul.f32 %v10779_v30, %v14182_v40 }
 0x262   : > { %v10783_v60 = vpop.eup %10782  ;;  %10802 = vrcp.f32 %v7175_v61  ;;  %v7152_v45 = vadd.f32 1.0, %v14234_v18  ;;  %v7649_v59 = vcombine.low %v7415_v15, %v14162_v32  ;;  %v14393_v61 = vrot.slane %v6241_v12, %v13906_v0  ;;  %17059 = vst [vmem:[#allocation31_spill] sm:$0xff] %v14397_v27 }
 0x263   : > { %17057 = vst [vmem:[#allocation28_spill] sm:$0xff] %v14380_v1  ;;  %v10785_v44 = vpop.eup %10784  ;;  %10804 = vpow2.f32 %v10277_v11  ;;  %10616 = vrot.lane.b32.xlu1 %v10615_v57, %s11226_s20  ;;  %v17060_v30 = vrot.slane %v14317_v21, 7  ;;  %v17062_v32 = vrot.slane %v14304_v16, 7  ;;  %v16809_v11 = vrot.slane %v14372_v14, 7 }
 0x264   : > { %v10787_v10 = vpop.eup %10786  ;;  %v14389_v4 = vmul.f32 %v10785_v44, %v14178_v63  ;;  %10806 = vpow2.f32 %v10278_v31  ;;  %17058 = vst [vmem:[#allocation34_spill] sm:$0xff] %v14393_v61  ;;  %v14409_v18 = vmul.f32 %v10775_v19, %v14157_v54  ;;  %v14415_v26 = vmul.f32 %v14261_v47, %v14101_v39 }
 0x265   : > { %v10789_v50 = vpop.eup %10788  ;;  %v14401_v40 = vrot.slane %v17060_v30, 2  ;;  %v14405_v63 = vrot.slane %v17062_v32, 2  ;;  %10808 = vrcp.f32 %v7148_v20  ;;  %v14418_v15 = vmul.f32 %v10781_v25, %v14186_v43 }
 0x266   : > { %v10791_v46 = vpop.eup %10790  ;;  %10810 = vrcp.f32 %v7151_v58  ;;  %v14421_v20 = vrot.slane %v7649_v59, %v13906_v0  ;;  %v14425_v54 = vadd.f32 %v14007_v29, %v14372_v14  ;;  %v14430_v57 = vmul.f32 %v10783_v60, %v14195_v38 }
 0x267   : > { %17061 = vst [vmem:[#allocation36_spill] sm:$0xff] %v14401_v40  ;;  %v10793_v12 = vpop.eup %10792  ;;  %10812 = vrcp.f32 %v7152_v45  ;;  %v14434_v39 = vcombine.high %v14393_v61, %v14393_v61  ;;  %v14438_v43 = vadd.f32 %v13999_v62, %v14397_v27  ;;  %v14442_v25 = vrot.slane %v16809_v11, 2 }
 0x268   : > { %v10795_v19 = vpop.eup %10794  ;;  %v10295_v44 = vmul.f32 -1.442695, %v14425_v54  ;;  %v6207_v60 = vcombine.high %v14358_v35, %v14358_v35  ;;  %v14455_v32 = vadd.f32 %v14036_v23, %v14393_v61  ;;  %v14461_v31 = vmul.f32 %v10787_v10, %v14215_v8 }
 0x269   : > { %17063 = vst [vmem:[#allocation35_spill] sm:$0xff] %v14434_v39  ;;  %v10797_v47 = vpop.eup %10796  ;;  %17064 = vst [vmem:[#allocation37_spill] sm:$0xff] %v14442_v25  ;;  %v7165_v30 = vadd.f32 1.0, %v10795_v19  ;;  %v10296_v11 = vmul.f32 -1.442695, %v14438_v43  ;;  %v7176_v58 = vadd.f32 1.0, %v10793_v12  ;;  %v14474_v40 = vadd.f32 %v14060_v6, %v14434_v39 }
 0x26a   : > { %v10799_v45 = vpop.eup %10798  ;;  %v14451_v59 = vmul.f32 %v10797_v47, %v14256_v33  ;;  %v14466_v33 = vrot.slane %v14358_v35, %v13906_v0  ;;  %10814 = vpow2.f32 %v10295_v44  ;;  %v14479_v12 = vmul.f32 %v10789_v50, %v14221_v49 }
 0x26b   : > { %v14448_v38 = vpop.f32.mrb[12].mxu0  ;;  %v10801_v52 = vpop.eup %10800  ;;  %10816 = vpow2.f32 %v10296_v11  ;;  %v14483_v14 = vrot.slane %v6207_v60, %v13906_v0  ;;  %v17067_v25 = vrot.slane %v14397_v27, 7  ;;  %v10297_v1 = vmul.f32 -1.442695, %v14455_v32 }
 0x26c   : > { %v14458_v5 = vpop.f32.mrb[13].mxu0  ;;  %17065 = vst [vmem:[#allocation42_spill] sm:$0xff] %v14466_v33  ;;  %v10803_v47 = vpop.eup %10802  ;;  %v7166_v37 = vadd.f32 1.0, %v10801_v52  ;;  %v14486_v52 = vmul.f32 %v10791_v46, %v14225_v7  ;;  %10818 = vrcp.f32 %v7165_v30  ;;  %v17069_v50 = vrot.slane %v14393_v61, 7 }
 0x26d   : > { %v14468_v19 = vpop.f32.mrb[14].mxu0  ;;  %v10805_v10 = vpop.eup %10804  ;;  %17066 = vst [vmem:[#allocation39_spill] sm:$0xff] %v14483_v14  ;;  %v14490_v44 = vrot.slane %v17067_v25, 2  ;;  %10820 = vrcp.f32 %v7176_v58  ;;  %v14499_v60 = vcombine.high %v14466_v33, %v14466_v33  ;;  %v14502_v46 = vmul.f32 %v10799_v45, %v14274_v51 }
 0x26e   : > { %v14476_v8 = vpop.f32.mrb[15].mxu0  ;;  %v10807_v16 = vpop.eup %10806  ;;  %v7167_v49 = vadd.f32 1.0, %v10805_v10  ;;  %v14495_v11 = vrot.slane %v17069_v50, 2  ;;  %10822 = vrcp.f32 %v7166_v37  ;;  %v10298_v30 = vmul.f32 -1.442695, %v14474_v40 }
 0x26f   : > { %17068 = vst [vmem:[#allocation38_spill] sm:$0xff] %v14490_v44  ;;  %v10809_v21 = vpop.eup %10808  ;;  %17071 = vst [vmem:[#allocation41_spill] sm:$0xff] %v14499_v60  ;;  %v14507_v58 = vmul.f32 %v10803_v47, %v14278_v3  ;;  %v7168_v10 = vadd.f32 1.0, %v10807_v16  ;;  %v14511_v50 = vcombine.high %v14483_v14, %v14483_v14  ;;  %10824 = vpow2.f32 %v10297_v1 }
 0x270   : > { %17070 = vst [vmem:[#allocation10_spill] sm:$0xff] %v14495_v11  ;;  %v10811_v7 = vpop.eup %10810  ;;  %v7418_v25 = vmul.f32 %v10809_v21, %v14109_v22  ;;  %v14515_v11 = vadd.f32 %v13999_v62, %v14466_v33  ;;  %10826 = vrcp.f32 %v7167_v49  ;;  %v14522_v3 = vadd.f32 %v14036_v23, %v14499_v60 }
 0x271   : > { %v10813_v35 = vpop.eup %10812  ;;  %17072 = vst [vmem:[#allocation47_spill] sm:$0xff] %v14511_v50  ;;  %v7421_v51 = vmul.f32 %v10811_v7, %v14112_v41  ;;  %v14526_v16 = vadd.f32 %v14060_v6, %v14483_v14  ;;  %10828 = vpow2.f32 %v10298_v30  ;;  %v6258_v41 = vcombine.high %v14362_v36, %v14362_v36 }
 0x272   : > { %v7422_v37 = vmul.f32 %v10813_v35, %v14115_v56  ;;  %v7650_v22 = vcombine.low %v14415_v26, %v7418_v25  ;;  %v10287_v21 = vmul.f32 -1.442695, %v14515_v11  ;;  %v10288_v1 = vmul.f32 -1.442695, %v14522_v3 }
 0x273   : > { %v10289_v56 = vmul.f32 -1.442695, %v14526_v16  ;;  %v14536_v26 = vrot.slane %v14362_v36, %v13906_v0 }
 0x274   : > { %v7664_v45 = vrot.slane %v7650_v22, %v13906_v0  ;;  %v7667_v47 = vcombine.low %v7421_v51, %v7422_v37  ;;  %10830 = vpow2.f32 %v10287_v21  ;;  %v10815_v35 = vpop.eup %10814  ;;  %v14544_v37 = vadd.f32 %v14007_v29, %v14511_v50 }
 0x275   : > { %17073 = vst [vmem:[#allocation40_spill] sm:$0xff] %v14536_v26  ;;  %10832 = vrcp.f32 %v7168_v10  ;;  %v10817_v30 = vpop.eup %10816  ;;  %v14547_v22 = vrot.slane %v6258_v41, %v13906_v0 }
 0x276   : > { %v7681_v49 = vrot.slane %v7667_v47, %v13906_v0  ;;  %10834 = vpow2.f32 %v10288_v1  ;;  %v10819_v36 = vpop.eup %10818  ;;  %v7665_v10 = vcombine.low %v14421_v20, %v7664_v45  ;;  %v7185_v47 = vadd.f32 1.0, %v10815_v35 }
 0x277   : > { %17074 = vst [vmem:[#allocation48_spill] sm:$0xff] %v14547_v22  ;;  %10836 = vpow2.f32 %v10289_v56  ;;  %v10821_v7 = vpop.eup %10820  ;;  %v7186_v44 = vadd.f32 1.0, %v10817_v30  ;;  %v14557_v1 = vcombine.high %v14536_v26, %v14536_v26  ;;  %v17076_v20 = vrot.slane %v14466_v33, 7 }
 0x278   : > { %v7682_v21 = vcombine.low %v14252_v24, %v7681_v49  ;;  %v10823_v41 = vpop.eup %10822  ;;  %v17078_v24 = vrot.slane %v14483_v14, 7  ;;  %v14569_v35 = vcombine.high %v14547_v22, %v14547_v22  ;;  %v14572_v49 = vmul.f32 %v10819_v36, %v14325_v9 }
 0x279   : > { %17075 = vst [vmem:[#allocation53_spill] sm:$0xff] %v14557_v1  ;;  %v14561_v45 = vrot.slane %v17076_v20, 2  ;;  %v17081_v30 = vrot.slane %v14499_v60, 7  ;;  %v10825_v20 = vpop.eup %10824  ;;  %10838 = vrcp.f32 %v7185_v47  ;;  %v14587_v9 = vadd.f32 %v14007_v29, %v14536_v26 }
 0x27a   : > { %v10620_v61 = vpack.i.bf16 %v7682_v21, %v7665_v10  ;;  %v14565_v56 = vrot.slane %v17078_v24, 2  ;;  %17080 = vst [vmem:[#allocation56_spill] sm:$0xff] %v14569_v35  ;;  %v10290_v21 = vmul.f32 -1.442695, %v14544_v37  ;;  %v14582_v24 = vmul.f32 %v10821_v7, %v14309_v42  ;;  %v10827_v36 = vpop.eup %10826 }
 0x27b   : > { %17077 = vst [vmem:[#allocation54_spill] sm:$0xff] %v14561_v45  ;;  %v14576_v25 = vrot.slane %v17081_v30, 2  ;;  %v14590_v30 = vmul.f32 %v10823_v41, %v14339_v48  ;;  %10840 = vrcp.f32 %v7186_v44  ;;  %v14594_v10 = vadd.f32 %v14007_v29, %v14557_v1  ;;  %v10829_v42 = vpop.eup %10828 }
 0x27c   : > { %17079 = vst [vmem:[#allocation55_spill] sm:$0xff] %v14565_v56  ;;  %10621 = vrot.lane.b32.xlu0 %v10620_v61, %s11226_s20  ;;  %v14598_v61 = vadd.f32 %v13999_v62, %v14547_v22  ;;  %v14602_v7 = vadd.f32 %v14036_v23, %v14569_v35  ;;  %v10299_v47 = vmul.f32 -1.442695, %v14587_v9  ;;  %v6224_v48 = vcombine.high %v14366_v34, %v14366_v34 }
 0x27d   : > { %17082 = vst [vmem:[#allocation57_spill] sm:$0xff] %v14576_v25  ;;  %v14609_v44 = vrot.slane %v14366_v34, %v13906_v0  ;;  %v7187_v51 = vadd.f32 1.0, %v10825_v20  ;;  %10842 = vpow2.f32 %v10290_v21  ;;  %v10300_v26 = vmul.f32 -1.442695, %v14594_v10 }
 0x27e   : > { %v10831_v41 = vpop.eup %10830  ;;  %v10301_v27 = vmul.f32 -1.442695, %v14598_v61  ;;  %10844 = vpow2.f32 %v10299_v47  ;;  %v14614_v25 = vrot.slane %v6224_v48, %v13906_v0  ;;  %v7188_v34 = vadd.f32 1.0, %v10829_v42 }
 0x27f   : > { %17083 = vst [vmem:[#allocation58_spill] sm:$0xff] %v14609_v44  ;;  %v10833_v56 = vpop.eup %10832  ;;  %v7177_v50 = vadd.f32 1.0, %v10831_v41  ;;  %v14618_v14 = vcombine.high %v14609_v44, %v14609_v44  ;;  %10846 = vpow2.f32 %v10300_v26  ;;  %v10302_v60 = vmul.f32 -1.442695, %v14602_v7 }
 0x280   : > { %17084 = vst [vmem:[#allocation59_spill] sm:$0xff] %v14614_v25  ;;  %v10835_v39 = vpop.eup %10834  ;;  %v14625_v47 = vcombine.high %v14614_v25, %v14614_v25  ;;  %v14629_v48 = vadd.f32 %v14007_v29, %v14609_v44  ;;  %v7438_v41 = vmul.f32 %v10833_v56, %v14351_v2  ;;  %v17087_v21 = vcombine.low %v14198_v28, %v14389_v4 }
 0x281   : > { %17085 = vst [vmem:[#allocation60_spill] sm:$0xff] %v14618_v14  ;;  %v10837_v20 = vpop.eup %10836  ;;  %10848 = vrcp.f32 %v7177_v50  ;;  %v7178_v42 = vadd.f32 1.0, %v10835_v39  ;;  %v14634_v45 = vadd.f32 %v13999_v62, %v14618_v14  ;;  %v7437_v50 = vmul.f32 %v10827_v36, %v14343_v13 }
 0x282   : > { %17086 = vst [vmem:[#allocation61_spill] sm:$0xff] %v14625_v47  ;;  %10850 = vpow2.f32 %v10301_v27  ;;  %v7179_v26 = vadd.f32 1.0, %v10837_v20  ;;  %v7722_v1 = vrot.slane %v17087_v21, %v13906_v0  ;;  %v7732_v33 = vcombine.low %v14572_v49, %v14590_v30 }
 0x283   : > { %10852 = vrcp.f32 %v7187_v51  ;;  %v14646_v27 = vadd.f32 %v14036_v23, %v14614_v25  ;;  %v10839_v39 = vpop.eup %10838  ;;  %v17088_v13 = vrot.slane %v14547_v22, 7  ;;  %v14654_v28 = vadd.f32 %v14060_v6, %v14625_v47 }
 0x284   : > { %10854 = vrcp.f32 %v7188_v34  ;;  %v10291_v4 = vmul.f32 -1.442695, %v14629_v48  ;;  %v7748_v49 = vcombine.low %v7437_v50, %v7438_v41  ;;  %v10292_v36 = vmul.f32 -1.442695, %v14634_v45 }
 0x285   : > { %v14650_v51 = vrot.slane %v17088_v13, 2  ;;  %10856 = vpow2.f32 %v10302_v60  ;;  %v10841_v56 = vpop.eup %10840  ;;  %v10293_v30 = vmul.f32 -1.442695, %v14646_v27  ;;  %v10294_v34 = vmul.f32 -1.442695, %v14654_v28 }
 0x286   : > { %10858 = vrcp.f32 %v7178_v42  ;;  %v7723_v21 = vcombine.low %v14201_v53, %v7722_v1  ;;  %v7730_v60 = vrot.slane %v14461_v31, %v13906_v0  ;;  %v17090_v41 = vcombine.low %v14430_v57, %v14451_v59 }
 0x287   : > { %17089 = vst [vmem:[#allocation62_spill] sm:$0xff] %v14650_v51  ;;  %10860 = vrcp.f32 %v7179_v26  ;;  %v10843_v20 = vpop.eup %10842  ;;  %v17091_v50 = vcombine.low %v14502_v46, %v14507_v58  ;;  %v16825_v53 = vrot.slane %v14618_v14, 7  ;;  %v17092_v31 = vcombine.low %v14479_v12, %v14486_v52 }
 0x288   : > { %10862 = vpow2.f32 %v10291_v4  ;;  %v7780_v42 = vrot.slane %v17090_v41, %v13906_v0  ;;  %v10845_v2 = vpop.eup %10844  ;;  %v10625_v1 = vpack.i.bf16 %v7730_v60, %v7723_v21  ;;  %v7771_v57 = vrot.slane %v14418_v15, %v13906_v0 }
 0x289   : > { %v7787_v26 = vrot.slane %v17091_v50, %v13906_v0  ;;  %10864 = vpow2.f32 %v10292_v36  ;;  %v7739_v4 = vrot.slane %v17092_v31, %v13906_v0  ;;  %v10847_v13 = vpop.eup %10846  ;;  %v7746_v41 = vrot.slane %v7732_v33, %v13906_v0 }
 0x28a   : > { %10866 = vpow2.f32 %v10293_v30  ;;  %v7190_v58 = vadd.f32 1.0, %v10847_v13  ;;  %v16824_v50 = vrot.slane %v14614_v25, 7  ;;  %10626 = vrot.lane.b32.xlu0 %v10625_v1, %s11226_s20  ;;  %v7756_v36 = vrot.slane %v7748_v49, %v13906_v0 }
 0x28b   : > { %v7788_v59 = vcombine.low %v7780_v42, %v7787_v26  ;;  %v10849_v46 = vpop.eup %10848  ;;  %10868 = vpow2.f32 %v10294_v34  ;;  %v7180_v12 = vadd.f32 1.0, %v10843_v20  ;;  %v7747_v60 = vcombine.low %v7739_v4, %v7746_v41 }
 0x28c   : > { %v10851_v21 = vpop.eup %10850  ;;  %v14684_v52 = vmul.f32 %v10849_v46, %v14515_v11  ;;  %v14687_v42 = vmul.f32 %v10839_v39, %v14425_v54  ;;  %v17093_v34 = vcombine.low %v14409_v18, %v14384_v17  ;;  %v6309_v49 = vcombine.high %v14448_v38, %v14448_v38 }
 0x28d   : > { %v10630_v30 = vpack.i.bf16 %v7788_v59, %v7771_v57  ;;  %v10853_v15 = vpop.eup %10852  ;;  %v7191_v33 = vadd.f32 1.0, %v10851_v21  ;;  %v7189_v20 = vadd.f32 1.0, %v10845_v2  ;;  %v14699_v1 = vrot.slane %v16825_v53, 2 }
 0x28e   : > { %v7763_v13 = vrot.slane %v17093_v34, %v13906_v0  ;;  %v10855_v26 = vpop.eup %10854  ;;  %v14703_v54 = vrot.slane %v14448_v38, %v13906_v0  ;;  %10870 = vrcp.f32 %v7190_v58  ;;  %v14708_v31 = vrot.slane %v6309_v49, %v13906_v0 }
 0x28f   : > { %17094 = vst [vmem:[#allocation63_spill] sm:$0xff] %v14699_v1  ;;  %v10857_v39 = vpop.eup %10856  ;;  %10631 = vrot.lane.b32.xlu0 %v10630_v30, %s11226_s20  ;;  %v14711_v2 = vmul.f32 %v10841_v56, %v14438_v43  ;;  %10872 = vrcp.f32 %v7180_v12  ;;  %v14726_v43 = vmul.f32 %v10855_v26, %v14474_v40  ;;  %v14730_v56 = vrot.slane %v16824_v50, 2 }
 0x290   : > { %17095 = vst [vmem:[#allocation64_spill] sm:$0xff] %v14703_v54  ;;  %v7764_v18 = vcombine.low %v7756_v36, %v7763_v13  ;;  %17096 = vst [vmem:[#allocation65_spill] sm:$0xff] %v14708_v31  ;;  %v10859_v4 = vpop.eup %10858  ;;  %v7192_v57 = vadd.f32 1.0, %v10857_v39  ;;  %v14715_v38 = vcombine.high %v14703_v54, %v14703_v54  ;;  %10874 = vrcp.f32 %v7191_v33 }
 0x291   : > { %v10861_v59 = vpop.eup %10860  ;;  %v14719_v46 = vcombine.high %v14708_v31, %v14708_v31  ;;  %v14723_v58 = vadd.f32 %v14036_v23, %v14703_v54  ;;  %10876 = vrcp.f32 %v7189_v20  ;;  %17099 = vst [vmem:[#allocation68_spill] sm:$0xff] %v14730_v56  ;;  %v14737_v30 = vmul.f32 %v10859_v4, %v14522_v3 }
 0x292   : > { %17097 = vst [vmem:[#allocation66_spill] sm:$0xff] %v14715_v38  ;;  %v10635_v41 = vpack.i.bf16 %v7764_v18, %v7747_v60  ;;  %v10863_v36 = vpop.eup %10862  ;;  %v14734_v21 = vadd.f32 %v14060_v6, %v14715_v38  ;;  %v14742_v40 = vadd.f32 %v14007_v29, %v14708_v31  ;;  %v6275_v33 = vcombine.high %v14458_v5, %v14458_v5 }
 0x293   : > { %17098 = vst [vmem:[#allocation67_spill] sm:$0xff] %v14719_v46  ;;  %v10865_v12 = vpop.eup %10864  ;;  %v7181_v60 = vadd.f32 1.0, %v10863_v36  ;;  %v14747_v13 = vmul.f32 %v10861_v59, %v14526_v16  ;;  %10878 = vrcp.f32 %v7192_v57  ;;  %v14751_v3 = vadd.f32 %v13999_v62, %v14719_v46 }
 0x294   : > { %10636 = vrot.lane.b32.xlu1 %v10635_v41, %s11226_s20  ;;  %v10867_v34 = vpop.eup %10866  ;;  %v7182_v49 = vadd.f32 1.0, %v10865_v12  ;;  %v16826_v39 = vrot.slane %v14703_v54, 7  ;;  %v10311_v18 = vmul.f32 -1.442695, %v14723_v58  ;;  %v10312_v41 = vmul.f32 -1.442695, %v14734_v21 }
 0x295   : > { %v10869_v26 = vpop.eup %10868  ;;  %v7183_v20 = vadd.f32 1.0, %v10867_v34  ;;  %10880 = vrcp.f32 %v7181_v60  ;;  %v14758_v16 = vrot.slane %v14458_v5, %v13906_v0  ;;  %v14761_v57 = vmul.f32 %v10853_v15, %v14455_v32 }
 0x296   : > { %v7184_v4 = vadd.f32 1.0, %v10869_v26  ;;  %10882 = vrcp.f32 %v7182_v49  ;;  %v10313_v59 = vmul.f32 -1.442695, %v14742_v40  ;;  %v14765_v36 = vrot.slane %v6275_v33, %v13906_v0 }
 0x297   : > { %17100 = vst [vmem:[#allocation69_spill] sm:$0xff] %v14758_v16  ;;  %10884 = vrcp.f32 %v7183_v20  ;;  %v10314_v60 = vmul.f32 -1.442695, %v14751_v3  ;;  %v14772_v34 = vcombine.high %v14758_v16, %v14758_v16  ;;  %v14782_v33 = vadd.f32 %v14060_v6, %v14758_v16 }
 0x298   : > { %17101 = vst [vmem:[#allocation70_spill] sm:$0xff] %v14765_v36  ;;  %10886 = vrcp.f32 %v7184_v4  ;;  %v10871_v5 = vpop.eup %10870  ;;  %v14778_v15 = vcombine.high %v14765_v36, %v14765_v36  ;;  %v14788_v20 = vrot.slane %v16826_v39, 2  ;;  %v6326_v17 = vcombine.high %v14468_v19, %v14468_v19 }
 0x299   : > { %17102 = vst [vmem:[#allocation71_spill] sm:$0xff] %v14772_v34  ;;  %10888 = vpow2.f32 %v10311_v18  ;;  %v10873_v49 = vpop.eup %10872  ;;  %v14794_v53 = vadd.f32 %v14007_v29, %v14772_v34  ;;  %v14799_v12 = vmul.f32 %v10871_v5, %v14594_v10  ;;  %v10303_v11 = vmul.f32 -1.442695, %v14782_v33 }
 0x29a   : > { %17103 = vst [vmem:[#allocation72_spill] sm:$0xff] %v14778_v15  ;;  %17104 = vst [vmem:[#allocation73_spill] sm:$0xff] %v14788_v20  ;;  %10890 = vpow2.f32 %v10312_v41  ;;  %v10875_v18 = vpop.eup %10874  ;;  %v14804_v41 = vadd.f32 %v13999_v62, %v14765_v36  ;;  %v14809_v26 = vadd.f32 %v14036_v23, %v14778_v15  ;;  %v14820_v39 = vrot.slane %v14468_v19, %v13906_v0 }
 0x29b   : > { %10892 = vpow2.f32 %v10313_v59  ;;  %v10877_v32 = vpop.eup %10876  ;;  %v10304_v4 = vmul.f32 -1.442695, %v14794_v53  ;;  %v14814_v10 = vmul.f32 %v10875_v18, %v14598_v61  ;;  %v17106_v54 = vrot.slane %v14715_v38, 7 }
 0x29c   : > { %10894 = vpow2.f32 %v10314_v60  ;;  %v10305_v5 = vmul.f32 -1.442695, %v14804_v41  ;;  %17105 = vst [vmem:[#allocation74_spill] sm:$0xff] %v14820_v39  ;;  %v17108_v51 = vrot.slane %v14708_v31, 7  ;;  %v14832_v60 = vmul.f32 %v10877_v32, %v14587_v9 }
 0x29d   : > { %v10879_v50 = vpop.eup %10878  ;;  %v14824_v20 = vrot.slane %v17106_v54, 2  ;;  %10896 = vpow2.f32 %v10303_v11  ;;  %v14835_v19 = vrot.slane %v6326_v17, %v13906_v0  ;;  %v14839_v38 = vcombine.high %v14820_v39, %v14820_v39 }
 0x29e   : > { %v14828_v35 = vrot.slane %v17108_v51, 2  ;;  %10898 = vpow2.f32 %v10304_v4  ;;  %v17114_v61 = vrot.slane %v14765_v36, 7  ;;  %v10306_v9 = vmul.f32 -1.442695, %v14809_v26 }
 0x29f   : > { %v10881_v59 = vpop.eup %10880  ;;  %17107 = vst [vmem:[#allocation75_spill] sm:$0xff] %v14824_v20  ;;  %17110 = vst [vmem:[#allocation77_spill] sm:$0xff] %v14835_v19  ;;  %v17112_v20 = vrot.slane %v14758_v16, 7  ;;  %10900 = vpow2.f32 %v10305_v5  ;;  %v17116_v4 = vrot.slane %v14772_v34, 7  ;;  %v6292_v5 = vcombine.high %v14476_v8, %v14476_v8 }
 0x2a0   : > { %17109 = vst [vmem:[#allocation76_spill] sm:$0xff] %v14828_v35  ;;  %v10883_v18 = vpop.eup %10882  ;;  %17111 = vst [vmem:[#allocation78_spill] sm:$0xff] %v14839_v38  ;;  %v14847_v11 = vrot.slane %v17114_v61, 2  ;;  %v14862_v61 = vadd.f32 %v14036_v23, %v14820_v39  ;;  %v14868_v17 = vrot.slane %v14476_v8, %v13906_v0  ;;  %v7451_v35 = vmul.f32 %v10881_v59, %v14629_v48 }
 0x2a1   : > { %v10885_v54 = vpop.eup %10884  ;;  %v14843_v51 = vrot.slane %v17112_v20, 2  ;;  %v14854_v31 = vrot.slane %v17116_v4, 2  ;;  %v14858_v20 = vmul.f32 %v10879_v50, %v14602_v7  ;;  %v14871_v4 = vmul.f32 %v10873_v49, %v14544_v37 }
 0x2a2   : > { %17115 = vst [vmem:[#allocation80_spill] sm:$0xff] %v14847_v11  ;;  %v10887_v32 = vpop.eup %10886  ;;  %17118 = vst [vmem:[#allocation82_spill] sm:$0xff] %v14868_v17  ;;  %v14876_v50 = vcombine.high %v14835_v19, %v14835_v19  ;;  %v7452_v22 = vmul.f32 %v10883_v18, %v14634_v45  ;;  %10902 = vpow2.f32 %v10306_v9  ;;  %v14888_v36 = vrot.slane %v6292_v5, %v13906_v0 }
 0x2a3   : > { %17113 = vst [vmem:[#allocation79_spill] sm:$0xff] %v14843_v51  ;;  %17117 = vst [vmem:[#allocation81_spill] sm:$0xff] %v14854_v31  ;;  %v10889_v46 = vpop.eup %10888  ;;  %v14880_v51 = vadd.f32 %v14060_v6, %v14839_v38  ;;  %v7454_v11 = vmul.f32 %v10887_v32, %v14654_v28  ;;  %v7453_v45 = vmul.f32 %v10885_v54, %v14646_v27 }
 0x2a4   : > { %v10891_v16 = vpop.eup %10890  ;;  %v7201_v7 = vadd.f32 1.0, %v10889_v46  ;;  %17119 = vst [vmem:[#allocation83_spill] sm:$0xff] %v14876_v50  ;;  %v10315_v46 = vmul.f32 -1.442695, %v14862_v61  ;;  %17120 = vst [vmem:[#allocation84_spill] sm:$0xff] %v14888_v36  ;;  %v14897_v28 = vcombine.high %v14868_v17, %v14868_v17  ;;  %v14901_v18 = vadd.f32 %v14007_v29, %v14876_v50 }
 0x2a5   : > { %v10893_v34 = vpop.eup %10892  ;;  %v7202_v8 = vadd.f32 1.0, %v10891_v16  ;;  %v10316_v31 = vmul.f32 -1.442695, %v14880_v51  ;;  %v14893_v16 = vadd.f32 %v14007_v29, %v14835_v19  ;;  %v14905_v9 = vcombine.high %v14888_v36, %v14888_v36 }
 0x2a6   : > { %v10895_v49 = vpop.eup %10894  ;;  %v7203_v48 = vadd.f32 1.0, %v10893_v34  ;;  %10904 = vrcp.f32 %v7201_v7  ;;  %17121 = vst [vmem:[#allocation85_spill] sm:$0xff] %v14897_v28  ;;  %v14909_v27 = vadd.f32 %v14060_v6, %v14868_v17  ;;  %v7813_v32 = vcombine.low %v7451_v35, %v7452_v22 }
 0x2a7   : > { %v7204_v59 = vadd.f32 1.0, %v10895_v49  ;;  %10906 = vrcp.f32 %v7202_v8  ;;  %v10897_v34 = vpop.eup %10896  ;;  %17122 = vst [vmem:[#allocation86_spill] sm:$0xff] %v14905_v9  ;;  %v14913_v7 = vadd.f32 %v14007_v29, %v14888_v36  ;;  %v7814_v49 = vcombine.low %v7453_v45, %v7454_v11 }
 0x2a8   : > { %10908 = vrcp.f32 %v7203_v48  ;;  %v10899_v54 = vpop.eup %10898  ;;  %v7193_v5 = vadd.f32 1.0, %v10897_v34  ;;  %v10317_v22 = vmul.f32 -1.442695, %v14893_v16  ;;  %v10318_v35 = vmul.f32 -1.442695, %v14901_v18 }
 0x2a9   : > { %10910 = vrcp.f32 %v7204_v59  ;;  %v10901_v8 = vpop.eup %10900  ;;  %v7194_v48 = vadd.f32 1.0, %v10899_v54  ;;  %v14917_v59 = vadd.f32 %v14007_v29, %v14897_v28  ;;  %v10307_v11 = vmul.f32 -1.442695, %v14909_v27 }
 0x2aa   : > { %10912 = vpow2.f32 %v10315_v46  ;;  %v7195_v37 = vadd.f32 1.0, %v10901_v8  ;;  %v14924_v46 = vadd.f32 %v13999_v62, %v14905_v9  ;;  %v10309_v34 = vmul.f32 -1.442695, %v14913_v7 }
 0x2ab   : > { %10914 = vpow2.f32 %v10316_v31  ;;  %v10308_v45 = vmul.f32 -1.442695, %v14917_v59  ;;  %v17123_v54 = vcombine.low %v14582_v24, %v14684_v52  ;;  %v17124_v8 = vcombine.low %v14737_v30, %v14747_v13 }
 0x2ac   : > { %10916 = vrcp.f32 %v7193_v5  ;;  %v10903_v56 = vpop.eup %10902  ;;  %v7812_v1 = vrot.slane %v14871_v4, %v13906_v0  ;;  %v7821_v25 = vrot.slane %v7813_v32, %v13906_v0  ;;  %v7828_v44 = vrot.slane %v7814_v49, %v13906_v0 }
 0x2ad   : > { %10918 = vrcp.f32 %v7194_v48  ;;  %v7797_v5 = vrot.slane %v17123_v54, %v13906_v0  ;;  %v7804_v48 = vrot.slane %v17124_v8, %v13906_v0  ;;  %v17125_v30 = vcombine.low %v14687_v42, %v14711_v2 }
 0x2ae   : > { %10920 = vrcp.f32 %v7195_v37  ;;  %v17126_v37 = vcombine.low %v14761_v57, %v14726_v43  ;;  %v10310_v49 = vmul.f32 -1.442695, %v14924_v46  ;;  %v7829_v8 = vcombine.low %v7821_v25, %v7828_v44 }
 0x2af   : > { %10922 = vpow2.f32 %v10317_v22  ;;  %v7805_v52 = vcombine.low %v7797_v5, %v7804_v48  ;;  %v7838_v13 = vrot.slane %v17125_v30, %v13906_v0  ;;  %v16845_v5 = vrot.slane %v14868_v17, 7 }
 0x2b0   : > { %v10465_v31 = vpop.f32.mrb[16].mxu0  ;;  %v10905_v24 = vpop.eup %10904  ;;  %v7845_v54 = vrot.slane %v17126_v37, %v13906_v0  ;;  %10924 = vpow2.f32 %v10318_v35  ;;  %v17128_v37 = vrot.slane %v14820_v39, 7 }
 0x2b1   : > { %v14937_v15 = vpop.f32.mrb[17].mxu0  ;;  %v10907_v32 = vpop.eup %10906  ;;  %v6377_v47 = vcombine.high %v10465_v31, %v10465_v31  ;;  %10926 = vpow2.f32 %v10307_v11  ;;  %v10640_v48 = vpack.i.bf16 %v7812_v1, %v7805_v52  ;;  %v14960_v57 = vrot.slane %v10465_v31, %v13906_v0 }
 0x2b2   : > { %v14943_v14 = vpop.f32.mrb[18].mxu0  ;;  %v10909_v22 = vpop.eup %10908  ;;  %v7846_v42 = vcombine.low %v7838_v13, %v7845_v54  ;;  %10928 = vpow2.f32 %v10308_v45  ;;  %v14964_v25 = vrot.slane %v17128_v37, 2  ;;  %v14971_v52 = vmul.f32 %v10907_v32, %v14734_v21 }
 0x2b3   : > { %v14953_v4 = vpop.f32.mrb[19].mxu0  ;;  %v10911_v2 = vpop.eup %10910  ;;  %17127 = vst [vmem:[#allocation87_spill] sm:$0xff] %v14960_v57  ;;  %10930 = vpow2.f32 %v10309_v34  ;;  %10641 = vrot.lane.b32.xlu1 %v10640_v48, %s11226_s20  ;;  %v14968_v1 = vrot.slane %v6377_v47, %v13906_v0  ;;  %v7196_v45 = vadd.f32 1.0, %v10903_v56  ;;  %v17131_v31 = vrot.slane %v14839_v38, 7 }
 0x2b4   : > { %v10913_v35 = vpop.eup %10912  ;;  %17129 = vst [vmem:[#allocation88_spill] sm:$0xff] %v14964_v25  ;;  %v10645_v44 = vpack.i.bf16 %v7846_v42, %v7829_v8  ;;  %10932 = vpow2.f32 %v10310_v49  ;;  %v14978_v37 = vmul.f32 %v10911_v2, %v14751_v3  ;;  %v14982_v8 = vrot.slane %v16845_v5, 2 }
 0x2b5   : > { %17130 = vst [vmem:[#allocation89_spill] sm:$0xff] %v14968_v1  ;;  %v10915_v11 = vpop.eup %10914  ;;  %v14975_v13 = vrot.slane %v17131_v31, 2  ;;  %v14987_v56 = vmul.f32 %v10905_v24, %v14723_v58  ;;  %v7205_v49 = vadd.f32 1.0, %v10913_v35  ;;  %v14994_v3 = vcombine.high %v14960_v57, %v14960_v57 }
 0x2b6   : > { %v10917_v54 = vpop.eup %10916  ;;  %v7206_v34 = vadd.f32 1.0, %v10915_v11  ;;  %17133 = vst [vmem:[#allocation91_spill] sm:$0xff] %v14982_v8  ;;  %10646 = vrot.lane.b32.xlu0 %v10645_v44, %s11226_s20  ;;  %v14997_v48 = vmul.f32 %v10909_v22, %v14742_v40  ;;  %v15002_v2 = vcombine.high %v14968_v1, %v14968_v1  ;;  %v15006_v58 = vadd.f32 %v14007_v29, %v14960_v57 }
 0x2b7   : > { %17132 = vst [vmem:[#allocation90_spill] sm:$0xff] %v14975_v13  ;;  %v10919_v21 = vpop.eup %10918  ;;  %v14990_v32 = vmul.f32 %v10917_v54, %v14782_v33  ;;  %17134 = vst [vmem:[#allocation92_spill] sm:$0xff] %v14994_v3  ;;  %10934 = vrcp.f32 %v7196_v45  ;;  %v15019_v45 = vadd.f32 %v13999_v62, %v14994_v3  ;;  %v6343_v47 = vcombine.high %v14937_v15, %v14937_v15 }
 0x2b8   : > { %17135 = vst [vmem:[#allocation93_spill] sm:$0xff] %v15002_v2  ;;  %v10921_v33 = vpop.eup %10920  ;;  %10936 = vrcp.f32 %v7206_v34  ;;  %v10327_v31 = vmul.f32 -1.442695, %v15006_v58  ;;  %v15025_v42 = vadd.f32 %v14036_v23, %v14968_v1  ;;  %v15029_v34 = vadd.f32 %v14060_v6, %v15002_v2 }
 0x2b9   : > { %v10923_v22 = vpop.eup %10922  ;;  %10938 = vrcp.f32 %v7205_v49  ;;  %v15033_v11 = vrot.slane %v14937_v15, %v13906_v0  ;;  %v15036_v5 = vrot.slane %v6343_v47, %v13906_v0  ;;  %v16848_v35 = vrot.slane %v14968_v1, 7 }
 0x2ba   : > { %v10925_v54 = vpop.eup %10924  ;;  %v7207_v43 = vadd.f32 1.0, %v10923_v22  ;;  %10940 = vpow2.f32 %v10327_v31  ;;  %v10329_v47 = vmul.f32 -1.442695, %v15025_v42  ;;  %v6394_v24 = vcombine.high %v14943_v14, %v14943_v14 }
 0x2bb   : > { %v10927_v40 = vpop.eup %10926  ;;  %v7208_v30 = vadd.f32 1.0, %v10925_v54  ;;  %17136 = vst [vmem:[#allocation94_spill] sm:$0xff] %v15033_v11  ;;  %17137 = vst [vmem:[#allocation95_spill] sm:$0xff] %v15036_v5  ;;  %v17149_v25 = vrot.slane %v15036_v5, 7 }
 0x2bc   : > { %v10929_v22 = vpop.eup %10928  ;;  %10942 = vrcp.f32 %v7207_v43  ;;  %v7197_v49 = vadd.f32 1.0, %v10927_v40  ;;  %v10328_v43 = vmul.f32 -1.442695, %v15019_v45  ;;  %v15043_v40 = vcombine.high %v15033_v11, %v15033_v11 }
 0x2bd   : > { %v10931_v54 = vpop.eup %10930  ;;  %10944 = vrcp.f32 %v7208_v30  ;;  %v7198_v44 = vadd.f32 1.0, %v10929_v22  ;;  %v15048_v30 = vcombine.high %v15036_v5, %v15036_v5  ;;  %v10330_v22 = vmul.f32 -1.442695, %v15029_v34 }
 0x2be   : > { %v10933_v57 = vpop.eup %10932  ;;  %v7199_v50 = vadd.f32 1.0, %v10931_v54  ;;  %10946 = vrcp.f32 %v7197_v49  ;;  %17138 = vst [vmem:[#allocation96_spill] sm:$0xff] %v15043_v40  ;;  %v15054_v49 = vadd.f32 %v13999_v62, %v15033_v11  ;;  %v15057_v54 = vmul.f32 %v10919_v21, %v14794_v53 }
 0x2bf   : > { %v7200_v15 = vadd.f32 1.0, %v10933_v57  ;;  %10948 = vrcp.f32 %v7198_v44  ;;  %17139 = vst [vmem:[#allocation97_spill] sm:$0xff] %v15048_v30  ;;  %v15060_v57 = vmul.f32 %v10921_v33, %v14804_v41  ;;  %v15064_v44 = vrot.slane %v16848_v35, 2 }
 0x2c0   : > { %10950 = vrcp.f32 %v7199_v50  ;;  %v15068_v31 = vadd.f32 %v14036_v23, %v15043_v40  ;;  %v15074_v53 = vrot.slane %v14943_v14, %v13906_v0  ;;  %v15078_v21 = vadd.f32 %v14060_v6, %v15036_v5 }
 0x2c1   : > { %10952 = vrcp.f32 %v7200_v15  ;;  %17140 = vst [vmem:[#allocation98_spill] sm:$0xff] %v15064_v44  ;;  %v10935_v50 = vpop.eup %10934  ;;  %v15082_v33 = vadd.f32 %v14007_v29, %v15048_v30  ;;  %v15099_v44 = vrot.slane %v6394_v24, %v13906_v0  ;;  %v17145_v24 = vrot.slane %v15033_v11, 7 }
 0x2c2   : > { %10954 = vpow2.f32 %v10328_v43  ;;  %17141 = vst [vmem:[#allocation99_spill] sm:$0xff] %v15074_v53  ;;  %v10937_v41 = vpop.eup %10936  ;;  %v10319_v43 = vmul.f32 -1.442695, %v15054_v49  ;;  %v10320_v14 = vmul.f32 -1.442695, %v15068_v31  ;;  %v15127_v38 = vrot.slane %v17149_v25, 2 }
 0x2c3   : > { %10956 = vpow2.f32 %v10329_v47  ;;  %v10939_v15 = vpop.eup %10938  ;;  %v10321_v2 = vmul.f32 -1.442695, %v15078_v21  ;;  %v10322_v36 = vmul.f32 -1.442695, %v15082_v33  ;;  %v15092_v13 = vmul.f32 %v10937_v41, %v14880_v51  ;;  %17144 = vst [vmem:[#allocation101_spill] sm:$0xff] %v15099_v44 }
 0x2c4   : > { %10958 = vpow2.f32 %v10330_v22  ;;  %v10941_v1 = vpop.eup %10940  ;;  %v17142_v22 = vrot.slane %v14994_v3, 7  ;;  %v15104_v47 = vmul.f32 %v10935_v50, %v14809_v26  ;;  %v15108_v51 = vcombine.high %v15074_v53, %v15074_v53  ;;  %17150 = vst [vmem:[#allocation104_spill] sm:$0xff] %v15127_v38 }
 0x2c5   : > { %10960 = vpow2.f32 %v10319_v43  ;;  %v6360_v3 = vcombine.high %v14953_v4, %v14953_v4 }
 0x2c6   : > { %v10943_v9 = vpop.eup %10942  ;;  %v15096_v19 = vrot.slane %v17142_v22, 2  ;;  %10962 = vpow2.f32 %v10320_v14  ;;  %v15111_v22 = vmul.f32 %v10939_v15, %v14862_v61  ;;  %v7217_v14 = vadd.f32 1.0, %v10941_v1 }
 0x2c7   : > { %v10945_v35 = vpop.eup %10944  ;;  %10964 = vpow2.f32 %v10321_v2  ;;  %v17147_v2 = vrot.slane %v15043_v40, 7  ;;  %v15133_v15 = vcombine.high %v15099_v44, %v15099_v44  ;;  %v15171_v40 = vadd.f32 %v14036_v23, %v15099_v44 }
 0x2c8   : > { %17143 = vst [vmem:[#allocation100_spill] sm:$0xff] %v15096_v19  ;;  %v10947_v41 = vpop.eup %10946  ;;  %v15115_v19 = vrot.slane %v17145_v24, 2  ;;  %10966 = vpow2.f32 %v10322_v36 }
 0x2c9   : > { %v10949_v43 = vpop.eup %10948  ;;  %v15119_v26 = vmul.f32 %v10947_v41, %v14909_v27  ;;  %v15123_v50 = vrot.slane %v17147_v2, 2  ;;  %17151 = vst [vmem:[#allocation105_spill] sm:$0xff] %v15133_v15  ;;  %v15138_v41 = vadd.f32 %v14007_v29, %v15074_v53  ;;  %v15141_v2 = vmul.f32 %v10943_v9, %v14893_v16 }
 0x2ca   : > { %17146 = vst [vmem:[#allocation102_spill] sm:$0xff] %v15115_v19  ;;  %v10951_v61 = vpop.eup %10950  ;;  %10968 = vrcp.f32 %v7217_v14  ;;  %v15149_v27 = vmul.f32 %v10945_v35, %v14901_v18  ;;  %v15155_v9 = vadd.f32 %v13999_v62, %v15108_v51  ;;  %v17152_v35 = vrot.slane %v15074_v53, 7 }
 0x2cb   : > { %17148 = vst [vmem:[#allocation103_spill] sm:$0xff] %v15123_v50  ;;  %v10953_v24 = vpop.eup %10952  ;;  %v7872_v36 = vcombine.low %v15104_v47, %v15119_v26  ;;  %v10331_v50 = vmul.f32 -1.442695, %v15138_v41  ;;  %v15159_v47 = vrot.slane %v14953_v4, %v13906_v0  ;;  %v15162_v26 = vrot.slane %v6360_v3, %v13906_v0 }
 0x2cc   : > { %v10955_v1 = vpop.eup %10954  ;;  %v15166_v38 = vrot.slane %v17152_v35, 2  ;;  %v15175_v4 = vadd.f32 %v14060_v6, %v15133_v15  ;;  %v7468_v11 = vmul.f32 %v10949_v43, %v14917_v59 }
 0x2cd   : > { %v10957_v5 = vpop.eup %10956  ;;  %v7218_v16 = vadd.f32 1.0, %v10955_v1  ;;  %10970 = vpow2.f32 %v10331_v50  ;;  %v15180_v25 = vcombine.high %v15159_v47, %v15159_v47  ;;  %v15185_v53 = vcombine.high %v15162_v26, %v15162_v26 }
 0x2ce   : > { %v10959_v14 = vpop.eup %10958  ;;  %v7219_v18 = vadd.f32 1.0, %v10957_v5  ;;  %17153 = vst [vmem:[#allocation106_spill] sm:$0xff] %v15166_v38  ;;  %v7470_v5 = vmul.f32 %v10953_v24, %v14924_v46  ;;  %v7469_v46 = vmul.f32 %v10951_v61, %v14913_v7  ;;  %v15195_v15 = vadd.f32 %v13999_v62, %v15159_v47 }
 0x2cf   : > { %v10961_v1 = vpop.eup %10960  ;;  %v7220_v19 = vadd.f32 1.0, %v10959_v14  ;;  %10972 = vrcp.f32 %v7218_v16  ;;  %v10332_v14 = vmul.f32 -1.442695, %v15155_v9  ;;  %17154 = vst [vmem:[#allocation107_spill] sm:$0xff] %v15185_v53  ;;  %v15199_v7 = vadd.f32 %v14036_v23, %v15180_v25 }
 0x2d0   : > { %v10963_v3 = vpop.eup %10962  ;;  %10974 = vrcp.f32 %v7219_v18  ;;  %v7209_v35 = vadd.f32 1.0, %v10961_v1  ;;  %v7895_v44 = vcombine.low %v7469_v46, %v7470_v5  ;;  %v15203_v59 = vadd.f32 %v14060_v6, %v15162_v26 }
 0x2d1   : > { %v10965_v50 = vpop.eup %10964  ;;  %10976 = vrcp.f32 %v7220_v19  ;;  %v7210_v16 = vadd.f32 1.0, %v10963_v3  ;;  %v10333_v19 = vmul.f32 -1.442695, %v15171_v40  ;;  %v10334_v3 = vmul.f32 -1.442695, %v15175_v4 }
 0x2d2   : > { %v7211_v24 = vadd.f32 1.0, %v10965_v50  ;;  %10978 = vrcp.f32 %v7209_v35  ;;  %v10967_v1 = vpop.eup %10966  ;;  %v15209_v61 = vadd.f32 %v14007_v29, %v15185_v53  ;;  %v10323_v35 = vmul.f32 -1.442695, %v15195_v15 }
 0x2d3   : > { %10980 = vrcp.f32 %v7210_v16  ;;  %v7212_v50 = vadd.f32 1.0, %v10967_v1  ;;  %v10324_v16 = vmul.f32 -1.442695, %v15199_v7  ;;  %v17155_v46 = vcombine.low %v14799_v12, %v14814_v10 }
 0x2d4   : > { %v10469_v38 = vpop.f32.mrb[20].mxu0  ;;  %10982 = vrcp.f32 %v7211_v24  ;;  %v10969_v5 = vpop.eup %10968  ;;  %v10325_v39 = vmul.f32 -1.442695, %v15203_v59  ;;  %v7886_v8 = vrot.slane %v7872_v36, %v13906_v0  ;;  %v10326_v12 = vmul.f32 -1.442695, %v15209_v61 }
 0x2d5   : > { %v15189_v18 = vpop.f32.mrb[21].mxu0  ;;  %10984 = vpow2.f32 %v10332_v14  ;;  %v7862_v24 = vrot.slane %v17155_v46, %v13906_v0  ;;  %v17156_v14 = vcombine.low %v14858_v20, %v14990_v32  ;;  %v7903_v46 = vrot.slane %v7895_v44, %v13906_v0 }
 0x2d6   : > { %v10470_v30 = vpop.f32.mrb[22].mxu0  ;;  %10986 = vpow2.f32 %v10333_v19  ;;  %v7894_v32 = vrot.slane %v7468_v11, %v13906_v0  ;;  %v17158_v19 = vcombine.low %v14987_v56, %v14971_v52  ;;  %v15245_v52 = vmul.f32 %v10969_v5, %v15006_v58 }
 0x2d7   : > { %v15205_v43 = vpop.f32.mrb[23].mxu0  ;;  %v7853_v30 = vrot.slane %v14832_v60, %v13906_v0  ;;  %v7869_v53 = vrot.slane %v17156_v14, %v13906_v0  ;;  %v17157_v60 = vcombine.low %v15057_v54, %v15060_v57  ;;  %v10971_v28 = vpop.eup %10970  ;;  %10988 = vpow2.f32 %v10334_v3 }
 0x2d8   : > { %10990 = vpow2.f32 %v10323_v35  ;;  %v7910_v54 = vrot.slane %v17158_v19, %v13906_v0  ;;  %v7221_v14 = vadd.f32 1.0, %v10971_v28  ;;  %v16875_v28 = vrot.slane %v15159_v47, 7 }
 0x2d9   : > { %v7879_v1 = vrot.slane %v17157_v60, %v13906_v0  ;;  %v7870_v10 = vcombine.low %v7862_v24, %v7869_v53  ;;  %v10973_v17 = vpop.eup %10972  ;;  %10992 = vpow2.f32 %v10324_v16  ;;  %v17159_v53 = vcombine.low %v14997_v48, %v14978_v37 }
 0x2da   : > { %v10975_v57 = vpop.eup %10974  ;;  %10994 = vrcp.f32 %v7212_v50  ;;  %v7911_v24 = vcombine.low %v7903_v46, %v7910_v54  ;;  %v17161_v37 = vcombine.low %v15111_v22, %v15092_v13  ;;  %v6451_v58 = vrot.slane %v10469_v38, %v13906_v0 }
 0x2db   : > { %v7887_v20 = vcombine.low %v7879_v1, %v7886_v8  ;;  %v10650_v36 = vpack.i.bf16 %v7870_v10, %v7853_v30  ;;  %v7920_v3 = vrot.slane %v17159_v53, %v13906_v0  ;;  %v10977_v44 = vpop.eup %10976  ;;  %v17160_v8 = vrot.slane %v15108_v51, 7 }
 0x2dc   : > { %v10979_v60 = vpop.eup %10978  ;;  %10996 = vpow2.f32 %v10325_v39  ;;  %v7927_v56 = vrot.slane %v17161_v37, %v13906_v0  ;;  %v6411_v39 = vcombine.high %v15189_v18, %v15189_v18  ;;  %v15261_v50 = vmul.f32 %v10973_v17, %v15019_v45 }
 0x2dd   : > { %v15242_v35 = vrot.slane %v17160_v8, 2  ;;  %v10655_v11 = vpack.i.bf16 %v7894_v32, %v7887_v20  ;;  %10651 = vrot.lane.b32.xlu1 %v10650_v36, %s11226_s20  ;;  %v10981_v48 = vpop.eup %10980  ;;  %v15254_v30 = vmul.f32 %v10979_v60, %v15054_v49  ;;  %10998 = vpow2.f32 %v10326_v12 }
 0x2de   : > { %v10983_v5 = vpop.eup %10982  ;;  %11000 = vrcp.f32 %v7221_v14  ;;  %v7928_v13 = vcombine.low %v7920_v3, %v7927_v56  ;;  %v15265_v22 = vrot.slane %v15189_v18, %v13906_v0  ;;  %v15268_v16 = vmul.f32 %v10975_v57, %v15025_v42 }
 0x2df   : > { %10656 = vrot.lane.b32.xlu0 %v10655_v11, %s11226_s20  ;;  %v10985_v49 = vpop.eup %10984  ;;  %v7936_v38 = vcombine.low %v15149_v27, %v15254_v30  ;;  %v6452_v1 = vcombine.high %v6451_v58, %v6451_v58  ;;  %v15273_v12 = vadd.f32 %v14060_v6, %v6451_v58  ;;  %v6425_v45 = vrot.slane %v6411_v39, %v13906_v0 }
 0x2e0   : > { %v7222_v10 = vadd.f32 1.0, %v10985_v49  ;;  %v10660_v17 = vpack.i.bf16 %v7928_v13, %v7911_v24  ;;  %v6426_v46 = vcombine.high %v15265_v22, %v15265_v22  ;;  %v10987_v18 = vpop.eup %10986  ;;  %v15280_v20 = vmul.f32 %v10977_v44, %v15029_v34  ;;  %v15316_v13 = vpop.permute.xlu1 %10616 }
 0x2e1   : > { %v15283_v42 = vmul.f32 %v10981_v48, %v15068_v31  ;;  %v15286_v32 = vadd.f32 %v14007_v29, %v6452_v1  ;;  %v10343_v19 = vmul.f32 -1.442695, %v15273_v12  ;;  %v10989_v54 = vpop.eup %10988  ;;  %v15290_v57 = vmul.f32 %v10983_v5, %v15078_v21 }
 0x2e2   : > { %v7223_v14 = vadd.f32 1.0, %v10987_v18  ;;  %11002 = vrcp.f32 %v7222_v10  ;;  %10661 = vrot.lane.b32.xlu1 %v10660_v17, %s11226_s20  ;;  %v6427_v36 = vcombine.high %v6425_v45, %v6425_v45  ;;  %v10991_v34 = vpop.eup %10990  ;;  %v7224_v53 = vadd.f32 1.0, %v10989_v54  ;;  %v17162_v17 = vld [vmem:[#allocation5_spill] sm:$0xff] }
 0x2e3   : > { %11004 = vpow2.f32 %v10343_v19  ;;  %v10344_v31 = vmul.f32 -1.442695, %v15286_v32  ;;  %v15296_v3 = vadd.f32 %v14007_v29, %v15265_v22  ;;  %v10993_v44 = vpop.eup %10992  ;;  %v7213_v8 = vadd.f32 1.0, %v10991_v34 }
 0x2e4   : > { %11006 = vrcp.f32 %v7223_v14  ;;  %v15299_v21 = vadd.f32 %v14007_v29, %v6426_v46  ;;  %v15302_v11 = vadd.f32 %v13999_v62, %v6425_v45  ;;  %v10995_v24 = vpop.eup %10994  ;;  %v7977_v60 = vcombine.low %v15245_v52, %v15261_v50 }
 0x2e5   : > { %v7978_v37 = vcombine.low %v15268_v16, %v15280_v20  ;;  %11008 = vrcp.f32 %v7224_v53  ;;  %v7214_v56 = vadd.f32 1.0, %v10993_v44  ;;  %v7937_v58 = vcombine.low %v15283_v42, %v15290_v57 }
 0x2e6   : > { %v10997_v48 = vpop.eup %10996  ;;  %11010 = vrcp.f32 %v7213_v8  ;;  %v15313_v39 = vadd.f32 %v14036_v23, %v6427_v36  ;;  %v10335_v5 = vmul.f32 -1.442695, %v15296_v3  ;;  %v10336_v10 = vmul.f32 -1.442695, %v15299_v21 }
 0x2e7   : > { %v10999_v49 = vpop.eup %10998  ;;  %v7215_v1 = vadd.f32 1.0, %v10997_v48  ;;  %11012 = vrcp.f32 %v7214_v56  ;;  %v15320_v45 = vadd.s32 16, %v17162_v17  ;;  %v10337_v19 = vmul.f32 -1.442695, %v15302_v11 }
 0x2e8   : > { %v11001_v46 = vpop.eup %11000  ;;  %v7216_v18 = vadd.f32 1.0, %v10999_v49  ;;  %11014 = vpow2.f32 %v10344_v31  ;;  %v7520_v54 = vstv %s7519_s29  ;;  %v10619_v36 = vunpack.i.h.bf16 %v15316_v13  ;;  %s7529_s29 = scalar_select %p7528_p0, 1, 0 }
 0x2e9   : > { %11016 = vrcp.f32 %v7215_v1  ;;  %vm7514_vm10 = vcmp.eq.s32.totalorder %v15320_v45, 17  ;;  %vm15324_vm11 = vcmp.eq.s32.totalorder %v7520_v54, 1  ;;  %v10338_v34 = vmul.f32 -1.442695, %v15313_v39 }
 0x2ea   : > { %11018 = vrcp.f32 %v7216_v18  ;;  %vm7524_vm12 = vmor %vm7514_vm10, %vm15324_vm11  ;;  %v6428_v53 = vcombine.high %v15205_v43, %v15205_v43  ;;  %v6435_v31 = vrot.slane %v15205_v43, %v13906_v0  ;;  %v15339_v44 = vmul.f32 %v11001_v46, %v15138_v41 }
 0x2eb   : > { %v7482_v8 = vmul.f32 %v10995_v24, %v15082_v33  ;;  %11020 = vpow2.f32 %v10335_v5  ;;  %vm7509_vm13 = vcmp.eq.s32.totalorder %v17162_v17, 0  ;;  %v8151_v48 = vsel %vm7524_vm12, 0.0, %v10619_v36 }
 0x2ec   : > { %v11003_v56 = vpop.eup %11002  ;;  %11022 = vpow2.f32 %v10336_v10  ;;  %v10618_v49 = vunpack.i.l.bf16 %v15316_v13  ;;  %v6442_v1 = vrot.slane %v6428_v53, %v13906_v0  ;;  %v6443_v54 = vcombine.high %v6435_v31, %v6435_v31  ;;  %vm7522_vm14 = vmor %vm7509_vm13, %vm15324_vm11 }
 0x2ed   : > { %v11005_v18 = vpop.eup %11004  ;;  %11024 = vpow2.f32 %v10337_v19  ;;  %v15346_v43 = vadd.f32 %v14060_v6, %v6435_v31  ;;  %v7935_v41 = vrot.slane %v15141_v2, %v13906_v0  ;;  %v15351_v24 = vmul.f32 %v11003_v56, %v15155_v9 }
 0x2ee   : > { %v11007_v33 = vpop.eup %11006  ;;  %v7233_v5 = vadd.f32 1.0, %v11005_v18  ;;  %11026 = vpow2.f32 %v10338_v34  ;;  %v10622_v10 = vpop.permute.xlu0 %10621  ;;  %v7944_v46 = vrot.slane %v7936_v38, %v13906_v0  ;;  %v15358_v6 = vpack.c.bf16 %v8151_v48, %v8151_v48 }
 0x2ef   : > { %v11009_v19 = vpop.eup %11008  ;;  %v7493_v36 = vmul.f32 %v11007_v33, %v15171_v40  ;;  %v6444_v53 = vcombine.high %v6442_v1, %v6442_v1  ;;  %v15361_v2 = vadd.f32 %v14007_v29, %v6443_v54  ;;  %v15365_v34 = vadd.f32 %v13999_v62, %v6442_v1 }
 0x2f0   : > { %v11011_v31 = vpop.eup %11010  ;;  %v7494_v9 = vmul.f32 %v11009_v19, %v15175_v4  ;;  %11028 = vrcp.f32 %v7233_v5  ;;  %v10339_v56 = vmul.f32 -1.442695, %v15346_v43  ;;  %v10624_v48 = vunpack.i.h.bf16 %v10622_v10 }
 0x2f1   : > { %v11013_v27 = vpop.eup %11012  ;;  %v7483_v30 = vmul.f32 %v11011_v31, %v15195_v15  ;;  %v15370_v40 = vadd.f32 %v14036_v23, %v6444_v53  ;;  %v10340_v38 = vmul.f32 -1.442695, %v15361_v2  ;;  %v7994_v18 = vcombine.low %v15339_v44, %v15351_v24 }
 0x2f2   : > { %v11015_v29 = vpop.eup %11014  ;;  %v7484_v4 = vmul.f32 %v11013_v27, %v15199_v7  ;;  %11030 = vpow2.f32 %v10339_v56  ;;  %v10341_v62 = vmul.f32 -1.442695, %v15365_v34  ;;  %v7995_v5 = vcombine.low %v7493_v36, %v7494_v9 }
 0x2f3   : > { %v11017_v1 = vpop.eup %11016  ;;  %v7953_v54 = vcombine.low %v7482_v8, %v7483_v30  ;;  %v7234_v33 = vadd.f32 1.0, %v11015_v29  ;;  %11032 = vpow2.f32 %v10340_v38  ;;  %v10342_v15 = vmul.f32 -1.442695, %v15370_v40 }
 0x2f4   : > { %v11019_v23 = vpop.eup %11018  ;;  %v7485_v19 = vmul.f32 %v11017_v1, %v15203_v59  ;;  %11034 = vpow2.f32 %v10341_v62  ;;  %v10623_v7 = vunpack.i.l.bf16 %v10622_v10  ;;  %v8150_v8 = vsel %vm15324_vm11, 0.0, %v10624_v48 }
 0x2f5   : > { %v11021_v44 = vpop.eup %11020  ;;  %11036 = vrcp.f32 %v7234_v33  ;;  %v7951_v24 = vrot.slane %v7937_v58, %v13906_v0  ;;  %v7486_v36 = vmul.f32 %v11019_v23, %v15209_v61  ;;  %v7961_v9 = vrot.slane %v7953_v54, %v13906_v0 }
 0x2f6   : > { %v11023_v59 = vpop.eup %11022  ;;  %v7954_v53 = vcombine.low %v7484_v4, %v7485_v19  ;;  %v7225_v31 = vadd.f32 1.0, %v11021_v44  ;;  %11038 = vpow2.f32 %v10342_v15  ;;  %v8149_v27 = vsel %vm7522_vm14, 0.0, %v10623_v7 }
 0x2f7   : > { %v11025_v56 = vpop.eup %11024  ;;  %v7226_v10 = vadd.f32 1.0, %v11023_v59  ;;  %v7952_v30 = vcombine.low %v7944_v46, %v7951_v24  ;;  %v7976_v14 = vrot.slane %v7486_v36, %v13906_v0  ;;  %v7985_v61 = vrot.slane %v7977_v60, %v13906_v0 }
 0x2f8   : > { %v11027_v38 = vpop.eup %11026  ;;  %v7227_v48 = vadd.f32 1.0, %v11025_v56  ;;  %11040 = vrcp.f32 %v7225_v31  ;;  %v7968_v42 = vrot.slane %v7954_v53, %v13906_v0  ;;  %v7992_v46 = vrot.slane %v7978_v37, %v13906_v0 }
 0x2f9   : > { %v7228_v57 = vadd.f32 1.0, %v11027_v38  ;;  %11042 = vrcp.f32 %v7226_v10  ;;  %v10665_v58 = vpack.i.bf16 %v7952_v30, %v7935_v41  ;;  %v8002_v62 = vrot.slane %v7994_v18, %v13906_v0 }
 0x2fa   : > { %v11029_v29 = vpop.eup %11028  ;;  %11044 = vrcp.f32 %v7227_v48  ;;  %v7969_v4 = vcombine.low %v7961_v9, %v7968_v42  ;;  %v8009_v1 = vrot.slane %v7995_v5, %v13906_v0  ;;  %v16876_v54 = vrot.slane %v15180_v25, 7 }
 0x2fb   : > { %v16872_v52 = vrot.slane %v15162_v26, 7  ;;  %11046 = vrcp.f32 %v7228_v57  ;;  %v8152_v50 = vsel %vm7509_vm13, 0.0, %v10618_v49  ;;  %10666 = vrot.lane.b32.xlu0 %v10665_v58, %s11226_s20  ;;  %v15410_v20 = vpack.c.bf16 %v8150_v8, %v8149_v27 }
 0x2fc   : > { %v11031_v16 = vpop.eup %11030  ;;  %v10670_v60 = vpack.i.bf16 %v7976_v14, %v7969_v4  ;;  %v7993_v37 = vcombine.low %v7985_v61, %v7992_v46  ;;  %v8010_v41 = vcombine.low %v8002_v62, %v8009_v1  ;;  %v10627_v18 = vpop.permute.xlu0 %10626  ;;  %v8208_v15 = vshll.u32 %v15358_v6, 16 }
 0x2fd   : > { %v11033_v33 = vpop.eup %11032  ;;  %v7229_v23 = vadd.f32 1.0, %v11031_v16  ;;  %v10629_v5 = vunpack.i.h.bf16 %v10627_v18  ;;  %v10628_v19 = vunpack.i.l.bf16 %v10627_v18  ;;  %v8314_v13 = vrot.slane %v15358_v6, 1  ;;  %v17174_v6 = vld [vmem:[#allocation33_spill] sm:$0xff] }
 0x2fe   : > { %v11035_v7 = vpop.eup %11034  ;;  %v7230_v44 = vadd.f32 1.0, %v11033_v33  ;;  %10671 = vrot.lane.b32.xlu1 %v10670_v60, %s11226_s20  ;;  %v10675_v49 = vpack.i.bf16 %v8010_v41, %v7993_v37  ;;  %vm8312_vm11 = vcmask 1046528   ;;  %v8313_v56 = vrot.slane %v15410_v20, 1 }
 0x2ff   : > { %v11037_v8 = vpop.eup %11036  ;;  %v7231_v24 = vadd.f32 1.0, %v11035_v7  ;;  %11048 = vrcp.f32 %v7229_v23  ;;  %v8154_v36 = vsel %vm7514_vm10, 0.0, %v10629_v5  ;;  %v15417_v59 = vpack.c.bf16 %v10628_v19, %v8152_v50 }
 0x300   : > { %v11039_v53 = vpop.eup %11038  ;;  %11050 = vrcp.f32 %v7230_v44  ;;  %10676 = vrot.lane.b32.xlu0 %v10675_v49, %s11226_s20  ;;  %v8182_v31 = vpack.c.bf16 %v8154_v36, %v8154_v36  ;;  %v8203_v10 = vshll.u32 %v15410_v20, 16  ;;  %v15423_v27 = vmul.f32 %v11037_v8, %v15286_v32 }
 0x301   : > { %v10632_v9 = vpop.permute.xlu0 %10631  ;;  %v7232_v30 = vadd.f32 1.0, %v11039_v53  ;;  %11052 = vrcp.f32 %v7231_v24  ;;  %v15426_v48 = vmul.f32 %v11029_v29, %v15273_v12  ;;  %vm8199_vm12 = vsmask.f32 7424  ;;  %v17165_v53 = vld [vmem:[#allocation15_spill] sm:$0xff] }
 0x302   : > { %v10633_v14 = vunpack.i.l.bf16 %v10632_v9  ;;  %v11041_v38 = vpop.eup %11040  ;;  %v8317_v42 = vrot.slane %v8182_v31, 1  ;;  %v10634_v61 = vunpack.i.h.bf16 %v10632_v9  ;;  %v8316_v32 = vrot.slane %v15417_v59, 1  ;;  %v17167_v9 = vld [vmem:[#allocation51_spill] sm:$0xff] }
 0x303   : > { %v11043_v57 = vpop.eup %11042  ;;  %v15429_v58 = vmul.f32 %v11041_v38, %v15296_v3  ;;  %11054 = vrcp.f32 %v7232_v30  ;;  %v15436_v12 = vsel %vm8312_vm11, %v8313_v56, %v8314_v13  ;;  %v8201_v29 = vshrl.u32 %v15410_v20, 16  ;;  %v17169_v30 = vld [vmem:[#allocation21_spill] sm:$0xff] }
 0x304   : > { %v8157_v46 = vsel %vm7514_vm10, 0.0, %v10633_v14  ;;  %v11045_v4 = vpop.eup %11044  ;;  %v7496_v62 = vmul.f32 %v11043_v57, %v15299_v21  ;;  %v8205_v50 = vrot.slane %v8203_v10, 1  ;;  %v8058_v3 = vrot.slane %v15423_v27, %v13906_v0  ;;  %v17171_v38 = vld [vmem:[#allocation45_spill] sm:$0xff]  ;;  %v17173_v57 = vld [vmem:[#allocation44_spill] sm:$0xff] }
 0x305   : > { %v11047_v16 = vpop.eup %11046  ;;  %v7497_v60 = vmul.f32 %v11045_v4, %v15302_v11  ;;  %v8220_v18 = vshll.u32 %v8182_v31, 16  ;;  %v15444_v33 = vsel %vm7509_vm13, 0.0, %v10634_v61  ;;  %v15446_v21 = vpack.c.bf16 %v8157_v46, %v8157_v46  ;;  %v17172_v61 = vld [vmem:[#allocation50_spill] sm:$0xff]  ;;  %v17210_v27 = vld [vmem:[#allocation24_spill] sm:$0xff] }
 0x306   : > { %v10637_v1 = vpop.permute.xlu1 %10636  ;;  %v8215_v23 = vshll.u32 %v15417_v59, 16  ;;  %v8017_v19 = vrot.slane %v15429_v58, %v13906_v0  ;;  %v15454_v7 = vsel %vm8312_vm11, %v8316_v32, %v8317_v42  ;;  %v8213_v11 = vshrl.u32 %v15417_v59, 16 }
 0x307   : > { %v10639_v37 = vunpack.i.h.bf16 %v10637_v1  ;;  %v10638_v41 = vunpack.i.l.bf16 %v10637_v1  ;;  %v8018_v13 = vcombine.low %v7496_v62, %v7497_v60  ;;  %v7498_v44 = vmul.f32 %v11047_v16, %v15313_v39 }
 0x308   : > { %v8217_v8 = vrot.slane %v8215_v23, 1  ;;  %v8206_v36 = vor.u32 %v8205_v50, %v8201_v29  ;;  %v17166_v31 = vrot.slane %v17165_v53, 7  ;;  %v17170_v14 = vrot.slane %v17169_v30, 7  ;;  %v17178_v30 = vld [vmem:[#allocation13_spill] sm:$0xff] }
 0x309   : > { %v8155_v5 = vsel %vm7509_vm13, 0.0, %v10638_v41  ;;  %v11049_v24 = vpop.eup %11048  ;;  %v9081_v39 = vcombine.low %v17173_v57, %v17172_v61  ;;  %v8232_v32 = vshll.u32 %v15446_v21, 16  ;;  %v8320_v4 = vrot.slane %v15446_v21, 1 }
 0x30a   : > { %v15458_v49 = vpack.c.bf16 %v10639_v37, %v8155_v5  ;;  %v6571_v10 = vsel %vm14074_vm9, %v17167_v9, %v17166_v31  ;;  %v6574_v42 = vsel %vm14074_vm9, %v17171_v38, %v17170_v14  ;;  %v11051_v58 = vpop.eup %11050  ;;  %v7499_v46 = vmul.f32 %v11049_v24, %v15346_v43  ;;  %v17180_v38 = vld [vmem:[#allocation49_spill] sm:$0xff] }
 0x30b   : > { %v8222_v62 = vrot.slane %v8220_v18, 1  ;;  %v11053_v1 = vpop.eup %11052  ;;  %v7500_v29 = vmul.f32 %v11051_v58, %v15361_v2  ;;  %v8218_v50 = vor.u32 %v8217_v8, %v8213_v11  ;;  %v8210_v16 = vrot.slane %v8208_v15, 1  ;;  %v17176_v11 = vld [vmem:[#allocation14_spill] sm:$0xff] }
 0x30c   : > { %v9082_v60 = vcombine.low %v6571_v10, %v6574_v42  ;;  %v7501_v37 = vmul.f32 %v11053_v1, %v15365_v34  ;;  %v8019_v41 = vcombine.low %v7498_v44, %v7499_v46  ;;  %v8026_v23 = vrot.slane %v8018_v13, %v13906_v0 }
 0x30d   : > { %v8227_v43 = vshll.u32 %v15458_v49, 16  ;;  %v11055_v5 = vpop.eup %11054  ;;  %v15482_v24 = vsel %vm8199_vm12, %v8206_v36, %v8210_v16  ;;  %v15485_v18 = vrot.slane %v9081_v39, %v13906_v0  ;;  %v17175_v15 = vrot.slane %v17174_v6, 7 }
 0x30e   : > { %v15488_v2 = vrot.slane %v9082_v60, %v13906_v0  ;;  %v17177_v8 = vrot.slane %v17176_v11, 9  ;;  %v7502_v13 = vmul.f32 %v11055_v5, %v15370_v40  ;;  %v8033_v44 = vrot.slane %v8019_v41, %v13906_v0 }
 0x30f   : > { %v8035_v53 = vcombine.low %v7500_v29, %v7501_v37  ;;  %v8319_v36 = vrot.slane %v15458_v49, 1  ;;  %v15500_v31 = vsel %vm8199_vm12, %v8218_v50, %v8222_v62  ;;  %v8225_v9 = vshrl.u32 %v15458_v49, 16  ;;  %v17182_v62 = vld [vmem:[#allocation9_spill] sm:$0xff]  ;;  %v17184_v29 = vld [vmem:[#allocation52_spill] sm:$0xff] }
 0x310   : > { %v6553_v34 = vsel %vm14074_vm9, %v17177_v8, %v17175_v15  ;;  %v17179_v14 = vrot.slane %v17178_v30, 7  ;;  %v8036_v40 = vcombine.low %v7502_v13, %v15426_v48  ;;  %v8034_v61 = vcombine.low %v8026_v23, %v8033_v44  ;;  %v17186_v23 = vld [vmem:[#allocation12_spill] sm:$0xff]  ;;  %v17191_v44 = vld [vmem:[#allocation7_spill] sm:$0xff] }
 0x311   : > { %v15511_v57 = vrot.slane %v8227_v43, 1  ;;  %v8043_v46 = vrot.slane %v8035_v53, %v13906_v0  ;;  %v17183_v1 = vrot.slane %v17182_v62, 7  ;;  %v17185_v60 = vrot.slane %v14330_v55, 7  ;;  %v17194_v30 = vld [vmem:[#allocation8_spill] sm:$0xff]  ;;  %v17199_v62 = vld [vmem:[#allocation19_spill] sm:$0xff] }
 0x312   : > { %v6556_v42 = vsel %vm14074_vm9, %v17180_v38, %v17179_v14  ;;  %v17181_v39 = vmov %v17179_v14  ;;  %v10680_v37 = vpack.i.bf16 %v8034_v61, %v8017_v19  ;;  %v8050_v41 = vrot.slane %v8036_v40, %v13906_v0  ;;  %v17192_v19 = vld [vmem:[#allocation17_spill] sm:$0xff]  ;;  %v17195_v38 = vld [vmem:[#allocation16_spill] sm:$0xff] }
 0x313   : > { %v6557_v58 = vrot.slane %v17181_v39, 2  ;;  %v6562_v50 = vsel %vm14074_vm9, %v17184_v29, %v17183_v1  ;;  %v9064_v16 = vcombine.low %v6553_v34, %v6556_v42  ;;  %v6590_v48 = vsel %vm14074_vm9, %v14405_v63, %v17185_v60  ;;  %v17189_v34 = vld [vmem:[#allocation22_spill] sm:$0xff]  ;;  %v17197_v39 = vld [vmem:[#allocation20_spill] sm:$0xff] }
 0x314   : > { %v17187_v43 = vrot.slane %v17186_v23, 7  ;;  %v17188_v6 = vmov %v17185_v60  ;;  %v17190_v13 = vrot.slane %v17189_v34, 7  ;;  %v17193_v53 = vrot.slane %v17192_v19, 7  ;;  %10681 = vrot.lane.b32.xlu1 %v10680_v37, %s11226_s20  ;;  %v17202_v37 = vld [vmem:[#allocation25_spill] sm:$0xff]  ;;  %v17204_v23 = vld [vmem:[#allocation28_spill] sm:$0xff] }
 0x315   : > { %v6591_v15 = vrot.slane %v17188_v6, 2  ;;  %v15534_v8 = vrot.slane %v9064_v16, %v13906_v0  ;;  %v8051_v55 = vcombine.low %v8043_v46, %v8050_v41  ;;  %v17196_v42 = vrot.slane %v17195_v38, 7  ;;  %v17207_v34 = vld [vmem:[#allocation36_spill] sm:$0xff]  ;;  %v17212_v38 = vld [vmem:[#allocation42_spill] sm:$0xff] }
 0x316   : > { %v6559_v5 = vsel %vm14074_vm9, %v6557_v58, %v17187_v43  ;;  %v6596_v63 = vsel %vm14074_vm9, %v17191_v44, %v17190_v13  ;;  %v6599_v14 = vsel %vm14074_vm9, %v17194_v30, %v17193_v53  ;;  %v17198_v58 = vrot.slane %v17197_v39, 7  ;;  %v17208_v13 = vld [vmem:[#allocation32_spill] sm:$0xff] }
 0x317   : > { %v9065_v11 = vcombine.low %v6559_v5, %v6562_v50  ;;  %v6593_v40 = vsel %vm14074_vm9, %v6591_v15, %v17196_v42  ;;  %v9116_v61 = vcombine.low %v6596_v63, %v6599_v14  ;;  %v17200_v1 = vrot.slane %v17199_v62, 9  ;;  %v17205_v15 = vld [vmem:[#allocation23_spill] sm:$0xff] }
 0x318   : > { %v9115_v16 = vcombine.low %v6590_v48, %v6593_v40  ;;  %v17201_v60 = vmov %v17198_v58  ;;  %v17203_v41 = vrot.slane %v17202_v37, 7  ;;  %v10685_v5 = vpack.i.bf16 %v8058_v3, %v8051_v55  ;;  %8403 = vrot.lane.b32.xlu1 %v15417_v59, %s11217_s30 }
 0x319   : > { %v6578_v29 = vsel %vm14074_vm9, %v17200_v1, %v17198_v58  ;;  %v15558_v50 = vrot.slane %v9065_v11, %v13906_v0  ;;  %v6579_v46 = vrot.slane %v17201_v60, 2  ;;  %v15571_v6 = vrot.slane %v9116_v61, %v13906_v0  ;;  %v17214_v61 = vld [vmem:[#allocation41_spill] sm:$0xff]  ;;  %v17216_v58 = vld [vmem:[#allocation54_spill] sm:$0xff]  ;;  %v17217_v1 = vld [vmem:[#allocation35_spill] sm:$0xff] }
 0x31a   : > { %v6584_v43 = vsel %vm14074_vm9, %v17204_v23, %v17203_v41  ;;  %v17206_v11 = vrot.slane %v17205_v15, 7  ;;  %v17209_v44 = vrot.slane %v17208_v13, 7  ;;  %v15583_v53 = vrot.slane %v9115_v16, %v13906_v0  ;;  %10686 = vrot.lane.b32.xlu0 %v10685_v5, %s11226_s20  ;;  %v17221_v23 = vld [vmem:[#allocation57_spill] sm:$0xff]  ;;  %v17222_v5 = vld [vmem:[#allocation47_spill] sm:$0xff]  ;;  %s11228_s20 = smov 120  }
 0x31b   : > { %v17211_v3 = vrot.slane %v17210_v27, 7  ;;  %v17213_v42 = vrot.slane %v17212_v38, 7  ;;  %v17215_v39 = vrot.slane %v17214_v61, 7  ;;  %v17218_v16 = vrot.slane %v17217_v1, 7  ;;  %v17225_v27 = vld [vmem:[#allocation6_spill] sm:$0xff] }
 0x31c   : > { %v6587_v48 = vsel %vm14074_vm9, %v17207_v34, %v17206_v11  ;;  %v6613_v63 = vrot.slane %v17209_v44, 2  ;;  %v17223_v15 = vrot.slane %v17222_v5, 7  ;;  %v17224_v11 = vld [vmem:[#allocation55_spill] sm:$0xff]  ;;  %8387 = vrot.lane.b32.xlu1 %v15436_v12, %s11218_s9 }
 0x31d   : > { %v6581_v30 = vsel %vm14074_vm9, %v6579_v46, %v17211_v3  ;;  %v9099_v14 = vcombine.low %v6584_v43, %v6587_v48  ;;  %v6618_v62 = vsel %vm14074_vm9, %v17216_v58, %v17215_v39  ;;  %v6647_v60 = vrot.slane %v17218_v16, 2  ;;  %v17231_v39 = vld [vmem:[#allocation29_spill] sm:$0xff]  ;;  %v17232_v16 = vld [vmem:[#allocation43_spill] sm:$0xff] }
 0x31e   : > { %v9098_v55 = vcombine.low %v6578_v29, %v6581_v30  ;;  %v6615_v40 = vsel %vm14074_vm9, %v6613_v63, %v17213_v42  ;;  %v17219_v29 = vld [vmem:[#allocation39_spill] sm:$0xff]  ;;  %v6624_v34 = vsel %vm14074_vm9, %v17224_v11, %v17223_v15  ;;  %v17226_v3 = vrot.slane %v17225_v27, 7  ;;  %v17227_v30 = vld [vmem:[#allocation18_spill] sm:$0xff]  ;;  %v17239_v15 = vld [vmem:[#allocation37_spill] sm:$0xff]  ;;  %8389 = vrot.lane.b32.xlu0 %v15454_v7, %s11218_s9 }
 0x31f   : > { %v15606_v37 = vrot.slane %v9099_v14, %v13906_v0  ;;  %v17220_v41 = vrot.slane %v17219_v29, 7  ;;  %v9149_v44 = vcombine.low %v6615_v40, %v6618_v62  ;;  %v17228_v14 = vrot.slane %v17227_v30, 9  ;;  %v17229_v42 = vld [vmem:[#allocation11_spill] sm:$0xff]  ;;  %v17236_v62 = vld [vmem:[#allocation26_spill] sm:$0xff]  ;;  %v17301_v46 = vld [vmem:[#allocation77_spill] sm:$0xff] }
 0x320   : > { %v15619_v48 = vrot.slane %v9098_v55, %v13906_v0  ;;  %v17230_v61 = vrot.slane %v17229_v42, 7  ;;  %v17233_v29 = vrot.slane %v17232_v16, 7  ;;  %v17235_v40 = vrot.slane %v17208_v13, 7  ;;  %8435 = vrot.lane.b32.xlu1 %v15454_v7, %s11220_s13  ;;  %v17287_v7 = vld [vmem:[#allocation67_spill] sm:$0xff] }
 0x321   : > { %v6621_v43 = vsel %vm14074_vm9, %v17221_v23, %v17220_v41  ;;  %v6603_v38 = vsel %vm14074_vm9, %v17228_v14, %v17226_v3  ;;  %v17234_v41 = vld [vmem:[#allocation27_spill] sm:$0xff]  ;;  %v15654_v13 = vrot.slane %v9149_v44, %v13906_v0  ;;  %v17240_v3 = vld [vmem:[#allocation61_spill] sm:$0xff]  ;;  %v17302_v21 = vrot.slane %v17301_v46, 7 }
 0x322   : > { %v9150_v63 = vcombine.low %v6621_v43, %v6624_v34  ;;  %v6606_v58 = vsel %vm14074_vm9, %v17231_v39, %v17230_v61  ;;  %v6609_v55 = vsel %vm14074_vm9, %v17234_v41, %v17233_v29  ;;  %v6612_v23 = vsel %vm14074_vm9, %v17236_v62, %v17235_v40  ;;  %v17237_v43 = vld [vmem:[#allocation31_spill] sm:$0xff]  ;;  %v17242_v39 = vld [vmem:[#allocation34_spill] sm:$0xff]  ;;  %v17247_v62 = vld [vmem:[#allocation40_spill] sm:$0xff]  ;;  %8405 = vrot.lane.b32.xlu0 %v15458_v49, %s11217_s30 }
 0x323   : > { %v17238_v5 = vrot.slane %v17237_v43, 7  ;;  %v17241_v30 = vrot.slane %v17240_v3, 7  ;;  %v9132_v42 = vcombine.low %v6603_v38, %v6606_v58  ;;  %v9133_v61 = vcombine.low %v6609_v55, %v6612_v23  ;;  %v17244_v29 = vld [vmem:[#allocation38_spill] sm:$0xff]  ;;  %v17249_v55 = vld [vmem:[#allocation60_spill] sm:$0xff] }
 0x324   : > { %v15657_v27 = vrot.slane %v9150_v63, %v13906_v0  ;;  %v17243_v16 = vrot.slane %v17242_v39, 7  ;;  %v17245_v41 = vrot.slane %v17217_v1, 7  ;;  %v17246_v40 = vld [vmem:[#allocation10_spill] sm:$0xff]  ;;  %v17248_v43 = vrot.slane %v17247_v62, 7  ;;  %8371 = vrot.lane.b32.xlu1 %v15482_v24, %s11222_s16  ;;  %v17289_v34 = vld [vmem:[#allocation76_spill] sm:$0xff] }
 0x325   : > { %v6640_v11 = vsel %vm14074_vm9, %v17239_v15, %v17238_v5  ;;  %v6635_v14 = vrot.slane %v17241_v30, 2  ;;  %v17250_v23 = vrot.slane %v17249_v55, 7  ;;  %v17251_v5 = vld [vmem:[#allocation58_spill] sm:$0xff]  ;;  %v15684_v30 = vrot.slane %v9132_v42, %v13906_v0 }
 0x326   : > { %v6643_v12 = vsel %vm14074_vm9, %v17244_v29, %v17243_v16  ;;  %v6646_v44 = vsel %vm14074_vm9, %v17246_v40, %v17245_v41  ;;  %v6649_v38 = vsel %vm14074_vm9, %v6647_v60, %v17248_v43  ;;  %v17252_v15 = vrot.slane %v17251_v5, 9  ;;  %v17253_v29 = vld [vmem:[#allocation59_spill] sm:$0xff]  ;;  %8373 = vrot.lane.b32.xlu0 %v15500_v31, %s11222_s16 }
 0x327   : > { %v9183_v58 = vcombine.low %v6640_v11, %v6643_v12  ;;  %v15687_v39 = vrot.slane %v9133_v61, %v13906_v0  ;;  %v9184_v16 = vcombine.low %v6646_v44, %v6649_v38  ;;  %v17254_v41 = vrot.slane %v17253_v29, 7  ;;  %v17255_v40 = vld [vmem:[#allocation63_spill] sm:$0xff]  ;;  %v17257_v61 = vld [vmem:[#allocation68_spill] sm:$0xff]  ;;  %v17258_v44 = vld [vmem:[#allocation30_spill] sm:$0xff] }
 0x328   : > { %v6628_v1 = vsel %vm14074_vm9, %v17252_v15, %v17250_v23  ;;  %v17256_v42 = vrot.slane %v17240_v3, 7  ;;  %v17259_v62 = vrot.slane %v17258_v44, 7  ;;  %v17260_v38 = vld [vmem:[#allocation72_spill] sm:$0xff]  ;;  %v17262_v15 = vld [vmem:[#allocation70_spill] sm:$0xff]  ;;  %v15766_v24 = vsel %vm8312_vm11, %v8319_v36, %v8320_v4  ;;  %v10647_v36 = vpop.permute.xlu0 %10646  ;;  %8451 = vrot.lane.b32.xlu1 %v15458_v49, %s16873_s12 }
 0x329   : > { %v6631_v60 = vsel %vm14074_vm9, %v17255_v40, %v17254_v41  ;;  %v15699_v11 = vrot.slane %v9183_v58, %v13906_v0  ;;  %v17261_v55 = vrot.slane %v17260_v38, 7  ;;  %v15715_v58 = vrot.slane %v9184_v16, %v13906_v0  ;;  %v17264_v41 = vld [vmem:[#allocation81_spill] sm:$0xff]  ;;  %v17267_v44 = vld [vmem:[#allocation82_spill] sm:$0xff] }
 0x32a   : > { %v6634_v12 = vsel %vm14074_vm9, %v17257_v61, %v17256_v42  ;;  %v6637_v43 = vsel %vm14074_vm9, %v6635_v14, %v17259_v62  ;;  %v9166_v5 = vcombine.low %v6628_v1, %v6631_v60  ;;  %v17263_v29 = vrot.slane %v17262_v15, 7  ;;  %v17266_v14 = vld [vmem:[#allocation80_spill] sm:$0xff]  ;;  %v17271_v60 = vld [vmem:[#allocation91_spill] sm:$0xff]  ;;  %8437 = vrot.lane.b32.xlu0 %v15766_v24, %s11220_s13 }
 0x32b   : > { %v6669_v23 = vrot.slane %v17261_v55, 2  ;;  %v9167_v3 = vcombine.low %v6634_v12, %v6637_v43  ;;  %v17265_v42 = vmov %v17261_v55  ;;  %v17268_v62 = vrot.slane %v17267_v44, 7  ;;  %v17269_v55 = vld [vmem:[#allocation85_spill] sm:$0xff] }
 0x32c   : > { %v6665_v40 = vsel %vm14074_vm9, %v17264_v41, %v17263_v29  ;;  %v6668_v61 = vsel %vm14074_vm9, %v17266_v14, %v17265_v42  ;;  %v17270_v1 = vrot.slane %v17269_v55, 7  ;;  %v15739_v38 = vrot.slane %v9166_v5, %v13906_v0  ;;  %v17272_v41 = vld [vmem:[#allocation48_spill] sm:$0xff]  ;;  %v17274_v14 = vld [vmem:[#allocation53_spill] sm:$0xff]  ;;  %8419 = vrot.lane.b32.xlu1 %v15500_v31, %s11223_s17 }
 0x32d   : > { %v6671_v16 = vsel %vm14074_vm9, %v6669_v23, %v17268_v62  ;;  %v15742_v15 = vrot.slane %v9167_v3, %v13906_v0  ;;  %v9217_v29 = vcombine.low %v6665_v40, %v6668_v61  ;;  %v17273_v42 = vrot.slane %v17272_v41, 7  ;;  %v17276_v5 = vld [vmem:[#allocation56_spill] sm:$0xff] }
 0x32e   : > { %v6674_v12 = vsel %vm14074_vm9, %v17271_v60, %v17270_v1  ;;  %v17275_v44 = vrot.slane %v17274_v14, 9  ;;  %v17277_v55 = vrot.slane %v17276_v5, 7  ;;  %v17278_v1 = vld [vmem:[#allocation62_spill] sm:$0xff]  ;;  %v17288_v63 = vrot.slane %v17287_v7, 7 }
 0x32f   : > { %v9218_v23 = vcombine.low %v6671_v16, %v6674_v12  ;;  %v10642_v16 = vpop.permute.xlu1 %10641  ;;  %v17280_v12 = vld [vmem:[#allocation71_spill] sm:$0xff]  ;;  %v15783_v60 = vrot.slane %v9217_v29, %v13906_v0  ;;  %v8230_v29 = vor.u32 %v15511_v57, %v8225_v9  ;;  %v6716_v9 = vrot.slane %v16875_v28, 2 }
 0x330   : > { %v6653_v62 = vsel %vm14074_vm9, %v17275_v44, %v17273_v42  ;;  %v6656_v3 = vsel %vm14074_vm9, %v17278_v1, %v17277_v55  ;;  %v17279_v40 = vmov %v17277_v55  ;;  %v17281_v41 = vrot.slane %v17280_v12, 7  ;;  %v17282_v42 = vld [vmem:[#allocation79_spill] sm:$0xff]  ;;  %8483 = vrot.lane.b32.xlu1 %v15766_v24, %s11221_s14 }
 0x331   : > { %v6657_v61 = vrot.slane %v17279_v40, 2  ;;  %v9200_v44 = vcombine.low %v6653_v62, %v6656_v3  ;;  %v10644_v5 = vunpack.i.h.bf16 %v10642_v16  ;;  %v10643_v55 = vunpack.i.l.bf16 %v10642_v16  ;;  %v17284_v40 = vld [vmem:[#allocation69_spill] sm:$0xff]  ;;  %17286 = vst [vmem:[#allocation15_spill] sm:$0xff] %v15783_v60  ;;  %v17297_v57 = vld [vmem:[#allocation107_spill] sm:$0xff] }
 0x332   : > { %v6662_v14 = vsel %vm14074_vm9, %v17282_v42, %v17281_v41  ;;  %v15776_v1 = vrot.slane %v9218_v23, %v13906_v0  ;;  %v17285_v43 = vrot.slane %v17284_v40, 7  ;;  %v6690_v62 = vsel %vm14074_vm9, %v17289_v34, %v17288_v63  ;;  %v17293_v41 = vld [vmem:[#allocation74_spill] sm:$0xff] }
 0x333   : > { %v17290_v3 = vmov %v17288_v63  ;;  %v15805_v34 = vrot.slane %v9200_v44, %v13906_v0  ;;  %v10648_v63 = vunpack.i.l.bf16 %v10647_v36  ;;  %v6723_v44 = vrot.slane %v17297_v57, 7  ;;  %v17300_v57 = vld [vmem:[#allocation88_spill] sm:$0xff] }
 0x334   : > { %17283 = vst [vmem:[#allocation5_spill] sm:$0xff] %v15776_v1  ;;  %v6659_v4 = vsel %vm14074_vm9, %v6657_v61, %v17285_v43  ;;  %v6691_v23 = vrot.slane %v17290_v3, 2  ;;  %v8160_v43 = vsel %vm7514_vm10, 0.0, %v10644_v5  ;;  %v15797_v61 = vpack.c.bf16 %v10643_v55, %v15444_v33  ;;  %8391 = vrot.lane.b32.xlu1 %v15766_v24, %s11218_s9 }
 0x335   : > { %v9201_v12 = vcombine.low %v6659_v4, %v6662_v14  ;;  %17291 = vst [vmem:[#allocation51_spill] sm:$0xff] %v15805_v34  ;;  %v17294_v33 = vrot.slane %v17293_v41, 7  ;;  %v17295_v14 = vld [vmem:[#allocation101_spill] sm:$0xff]  ;;  %v15823_v40 = vpack.c.bf16 %v8160_v43, %v8160_v43  ;;  %v6722_v3 = vrot.slane %v16872_v52, 2  ;;  %v17298_v43 = vld [vmem:[#allocation78_spill] sm:$0xff]  ;;  %v17314_v34 = vld [vmem:[#allocation75_spill] sm:$0xff] }
 0x336   : > { %v17296_v5 = vrot.slane %v17295_v14, 7  ;;  %v10693_v4 = vld [vmem:[%s16734_s3] sm:$0xff]   ;;  %8453 = vrot.lane.b32.xlu0 %v15797_v61, %s16873_s12  ;;  %v10649_v10 = vunpack.i.h.bf16 %v10647_v36  ;;  %v8322_v31 = vrot.slane %v15797_v61, 1  ;;  %v8239_v46 = vshll.u32 %v15797_v61, 16  ;;  %s17354_s12 = smov 24  }
 0x337   : > { %v15810_v16 = vrot.slane %v9201_v12, %v13906_v0  ;;  %v6693_v42 = vsel %vm14074_vm9, %v6691_v23, %v17294_v33  ;;  %v6719_v12 = vrot.slane %v16876_v54, 2  ;;  %v8234_v23 = vrot.slane %v8232_v32, 1  ;;  %v17303_v32 = vld [vmem:[#allocation90_spill] sm:$0xff]  ;;  %10471 = vmatprep.subr.bf16.mxu0 %v10693_v4  ;;  %10519 = vmatprep.subr.bf16.mxu1 %v10693_v4 }
 0x338   : > { %v15818_v55 = vrot.slane %v17296_v5, 2  ;;  %v17299_v5 = vrot.slane %v17298_v43, 7  ;;  %v6699_v41 = vsel %vm14074_vm9, %v17303_v32, %v17302_v21  ;;  %v9251_v19 = vcombine.low %v6690_v62, %v6693_v42  ;;  %10472 = vmatpush3.bf16.msra.mxu0 %v10693_v4  ;;  %v10694_v62 = vld [vmem:[%s16734_s3 + $0x8] sm:$0xff]   ;;  %10522 = vmatpush3.bf16.msra.mxu1 %v10693_v4 }
 0x339   : > { %17292 = vst [vmem:[#allocation46_spill] sm:$0xff] %v15810_v16  ;;  %v8161_v33 = vsel %vm7509_vm13, 0.0, %v10648_v63  ;;  %v15854_v52 = vsel %vm8199_vm12, %v8230_v29, %v8234_v23  ;;  %v8323_v43 = vrot.slane %v15823_v40, 1  ;;  %v10695_v29 = vld [vmem:[%s16734_s3 + $0x10] ss:$0 sps:$4 sm:$0x33]   ;;  %10473 = vmatprep.subr.bf16.mxu0 %v10694_v62  ;;  %10520 = vmatprep.subr.bf16.mxu1 %v10694_v62 }
 0x33a   : > { %v6696_v7 = vsel %vm14074_vm9, %v17300_v57, %v17299_v5  ;;  %v15863_v63 = vrot.slane %v9251_v19, %v13906_v0  ;;  %v17304_v42 = vld [vmem:[#allocation86_spill] sm:$0xff]  ;;  %v17306_v5 = vld [vmem:[#allocation84_spill] sm:$0xff]  ;;  %8421 = vrot.lane.b32.xlu0 %v15854_v52, %s11223_s17  ;;  %8407 = vrot.lane.b32.xlu1 %v15797_v61, %s11217_s30 }
 0x33b   : > { %v9252_v36 = vcombine.low %v6696_v7, %v6699_v41  ;;  %v17305_v23 = vrot.slane %v17304_v42, 7  ;;  %v17307_v57 = vrot.slane %v17306_v5, 9  ;;  %v17309_v54 = vld [vmem:[#allocation66_spill] sm:$0xff]  ;;  %v17311_v7 = vld [vmem:[#allocation73_spill] sm:$0xff]  ;;  %v8244_v5 = vshll.u32 %v15823_v40, 16 }
 0x33c   : > { %v17310_v4 = vrot.slane %v17309_v54, 7  ;;  %v17312_v41 = vld [vmem:[#allocation65_spill] sm:$0xff]  ;;  %v8237_v54 = vshrl.u32 %v15797_v61, 16  ;;  %10474 = vmatpush3.bf16.msra.mxu0 %v10694_v62  ;;  %10523 = vmatpush3.bf16.msra.mxu1 %v10694_v62 }
 0x33d   : > { %v6678_v21 = vsel %vm14074_vm9, %v17307_v57, %v17305_v23  ;;  %v17308_v32 = vmov %v17305_v23  ;;  %v17313_v16 = vrot.slane %v17312_v41, 7  ;;  %v15893_v42 = vrot.slane %v9252_v36, %v13906_v0  ;;  %v17317_v40 = vld [vmem:[#allocation97_spill] sm:$0xff]  ;;  %10526 = vmatprep.subr.msk.bf16.mxu0 %vm5916_vm6, %v10695_v29  ;;  %10527 = vmatprep.subr.msk.bf16.mxu1 %vm5916_vm6, %v10695_v29 }
 0x33e   : > { %v6679_v28 = vrot.slane %v17308_v32, 2  ;;  %v6684_v19 = vsel %vm14074_vm9, %v17311_v7, %v17310_v4  ;;  %v15895_v57 = vpack.c.bf16 %v10649_v10, %v8161_v33  ;;  %v17315_v32 = vld [vmem:[#allocation64_spill] sm:$0xff]  ;;  %v17318_v4 = vrot.slane %v17317_v40, 7  ;;  %8375 = vrot.lane.b32.xlu0 %v15854_v52, %s11222_s16  ;;  %8467 = vrot.lane.b32.xlu1 %v15854_v52, %s11224_s18 }
 0x33f   : > { %v6687_v1 = vsel %vm14074_vm9, %v17314_v34, %v17313_v16  ;;  %v17316_v34 = vrot.slane %v17315_v32, 7  ;;  %v17319_v41 = vrot.slane %v15180_v25, 7  ;;  %v8324_v36 = vsel %vm8312_vm11, %v8322_v31, %v8323_v43  ;;  %v17324_v32 = vld [vmem:[#allocation94_spill] sm:$0xff] }
 0x340   : > { %v9235_v23 = vcombine.low %v6684_v19, %v6687_v1  ;;  %v6713_v7 = vrot.slane %v17318_v4, 2  ;;  %v8241_v1 = vrot.slane %v8239_v46, 1  ;;  %v17321_v43 = vrot.slane %v15162_v26, 7 }
 0x341   : > { %v6681_v16 = vsel %vm14074_vm9, %v6679_v28, %v17316_v34  ;;  %v6718_v60 = vsel %vm14074_vm9, %v6716_v9, %v17319_v41  ;;  %v8671_v28 = vsel %vm5916_vm6, %v10695_v29, 0  ;;  %v17320_v9 = vrot.slane %v15159_v47, 7  ;;  %v17330_v41 = vld [vmem:[#allocation102_spill] sm:$0xff] }
 0x342   : > { %v9234_v33 = vcombine.low %v6678_v21, %v6681_v16  ;;  %v15914_v25 = vrot.slane %v9235_v23, %v13906_v0  ;;  %v6721_v46 = vsel %vm14074_vm9, %v6719_v12, %v17321_v43  ;;  %v6724_v47 = vsel %vm14074_vm9, %v6722_v3, %v6723_v44  ;;  %v17322_v21 = vld [vmem:[#allocation105_spill] sm:$0xff]  ;;  %v17326_v12 = vld [vmem:[#allocation83_spill] sm:$0xff]  ;;  %10476 = vmatpush3.bf16.msra.mxu0 %v8671_v28 }
 0x343   : > { %v6715_v31 = vsel %vm14074_vm9, %v6713_v7, %v17320_v9  ;;  %v17323_v19 = vrot.slane %v17322_v21, 7  ;;  %v9286_v26 = vcombine.low %v6721_v46, %v6724_v47  ;;  %v17325_v34 = vrot.slane %v17324_v32, 7  ;;  %v17328_v7 = vld [vmem:[#allocation96_spill] sm:$0xff]  ;;  %v17331_v9 = vld [vmem:[#allocation95_spill] sm:$0xff]  ;;  %10524 = vmatpush3.bf16.msra.mxu1 %v8671_v28  ;;  %v17336_v32 = vld [vmem:[#allocation93_spill] sm:$0xff]  ;;  %8393 = vrot.lane.b32.xlu0 %v8324_v36, %s11218_s9 }
 0x344   : > { %v15929_v62 = vrot.slane %v9234_v33, %v13906_v0  ;;  %v9285_v29 = vcombine.low %v6715_v31, %v6718_v60  ;;  %v17327_v16 = vrot.slane %v17326_v12, 9  ;;  %v17329_v24 = vrot.slane %v17328_v7, 7  ;;  %v17333_v60 = vld [vmem:[#allocation103_spill] sm:$0xff]  ;;  %v17335_v47 = vld [vmem:[#allocation104_spill] sm:$0xff]  ;;  %8485 = vrot.lane.b32.xlu1 %v8324_v36, %s11221_s14 }
 0x345   : > { %v6747_v23 = vrot.slane %v17323_v19, 2  ;;  %v17332_v44 = vrot.slane %v17331_v9, 7  ;;  %v17334_v46 = vrot.slane %v17317_v40, 7  ;;  %v8246_v40 = vrot.slane %v8244_v5, 1 }
 0x346   : > { %v6703_v4 = vsel %vm14074_vm9, %v17327_v16, %v17325_v34  ;;  %v6706_v33 = vsel %vm14074_vm9, %v17330_v41, %v17329_v24  ;;  %v15954_v43 = vrot.slane %v9285_v29, %v13906_v0  ;;  %v17337_v34 = vrot.slane %v17336_v32, 7  ;;  %v17339_v41 = vld [vmem:[#allocation106_spill] sm:$0xff] }
 0x347   : > { %v6709_v3 = vsel %vm14074_vm9, %v17333_v60, %v17332_v44  ;;  %v6712_v19 = vsel %vm14074_vm9, %v17335_v47, %v17334_v46  ;;  %v15964_v16 = vrot.slane %v9286_v26, %v13906_v0  ;;  %v9268_v7 = vcombine.low %v6703_v4, %v6706_v33  ;;  %v17345_v47 = vld [vmem:[#allocation87_spill] sm:$0xff]  ;;  %8409 = vrot.lane.b32.xlu0 %v15895_v57, %s11217_s30 }
 0x348   : > { %v6735_v12 = vrot.slane %v17337_v34, 2  ;;  %v9269_v28 = vcombine.low %v6709_v3, %v6712_v19  ;;  %v17338_v24 = vrot.slane %v15108_v51, 7  ;;  %v17340_v9 = vrot.slane %v17295_v14, 7  ;;  %v17343_v3 = vld [vmem:[#allocation92_spill] sm:$0xff]  ;;  %v17347_v19 = vld [vmem:[#allocation89_spill] sm:$0xff]  ;;  %8439 = vrot.lane.b32.xlu1 %v8324_v36, %s11220_s13 }
 0x349   : > { %v17341_v4 = vrot.slane %v17322_v21, 7  ;;  %v17342_v33 = vrot.slane %v15265_v22, 7  ;;  %v15991_v14 = vrot.slane %v9268_v7, %v13906_v0  ;;  %v17344_v46 = vrot.slane %v17343_v3, 7  ;;  %v17349_v34 = vld [vmem:[#allocation100_spill] sm:$0xff] }
 0x34a   : > { %v6740_v29 = vsel %vm14074_vm9, %v17339_v41, %v17338_v24  ;;  %v6743_v26 = vsel %vm14074_vm9, %v15242_v35, %v17340_v9  ;;  %v15994_v60 = vrot.slane %v9269_v28, %v13906_v0  ;;  %v17350_v7 = vrot.slane %v17336_v32, 7  ;;  %v17351_v41 = vld [vmem:[#allocation98_spill] sm:$0xff] }
 0x34b   : > { %v6746_v51 = vsel %vm14074_vm9, %v15818_v55, %v17341_v4  ;;  %v6749_v44 = vsel %vm14074_vm9, %v6747_v23, %v17342_v33  ;;  %v9319_v35 = vcombine.low %v6740_v29, %v6743_v26  ;;  %v17346_v55 = vrot.slane %v17345_v47, 9  ;;  %v17352_v26 = vld [vmem:[#allocation99_spill] sm:$0xff] }
 0x34c   : > { %v9320_v21 = vcombine.low %v6746_v51, %v6749_v44  ;;  %v17348_v23 = vrot.slane %v17347_v19, 7  ;;  %v6734_v28 = vsel %vm14074_vm9, %v17351_v41, %v17350_v7  ;;  %v8242_v29 = vor.u32 %v8241_v1, %v8237_v54  ;;  %8455 = vrot.lane.b32.xlu1 %v15895_v57, %s17354_s12 }
 0x34d   : > { %v6728_v22 = vsel %vm14074_vm9, %v17346_v55, %v17344_v46  ;;  %v17353_v4 = vrot.slane %v17352_v26, 7  ;;  %v16023_v32 = vrot.slane %v9319_v35, %v13906_v0  ;;  %v8251_v19 = vshll.u32 %v15895_v57, 16 }
 0x34e   : > { %v6731_v24 = vsel %vm14074_vm9, %v17349_v34, %v17348_v23  ;;  %v16026_v54 = vrot.slane %v9320_v21, %v13906_v0  ;;  %v8247_v3 = vsel %vm8199_vm12, %v8242_v29, %v8246_v40  ;;  %v8249_v29 = vshrl.u32 %v15895_v57, 16 }
 0x34f   : > { %v6737_v51 = vsel %vm14074_vm9, %v6735_v12, %v17353_v4  ;;  %v9302_v33 = vcombine.low %v6728_v22, %v6731_v24  ;;  %8469 = vrot.lane.b32.xlu0 %v8247_v3, %s11224_s18  ;;  %v8325_v22 = vrot.slane %v15895_v57, 1  ;;  %v8253_v41 = vrot.slane %v8251_v19, 1 }
 0x350   : > { %v9303_v1 = vcombine.low %v6734_v28, %v6737_v51  ;;  %8423 = vrot.lane.b32.xlu1 %v8247_v3, %s11223_s17 }
 0x351   : > { %v16031_v56 = vrot.slane %v9302_v33, %v13906_v0  ;;  %v10657_v46 = vpop.permute.xlu0 %10656  ;;  %v8254_v51 = vor.u32 %v8253_v41, %v8249_v29 }
 0x352   : > { %v16034_v12 = vrot.slane %v9303_v1, %v13906_v0  ;;  %v10652_v0 = vpop.permute.xlu1 %10651  ;;  %v10658_v23 = vunpack.i.l.bf16 %v10657_v46  ;;  %v10659_v24 = vunpack.i.h.bf16 %v10657_v46 }
 0x353   : > { %8377 = vrot.lane.b32.xlu0 %v8247_v3, %s11222_s16  ;;  %v10653_v35 = vunpack.i.l.bf16 %v10652_v0  ;;  %v10654_v47 = vunpack.i.h.bf16 %v10652_v0 }
 0x354   : > { %v8166_v4 = vsel %vm7514_vm10, 0.0, %v10659_v24 }
 0x355   : > { %v8163_v40 = vsel %vm7514_vm10, 0.0, %v10653_v35  ;;  %v8164_v7 = vsel %vm7509_vm13, 0.0, %v10654_v47  ;;  %v8190_v33 = vpack.c.bf16 %v8166_v4, %v8166_v4 }
 0x356   : > { %v8188_v21 = vpack.c.bf16 %v8163_v40, %v8163_v40  ;;  %v16055_v28 = vpack.c.bf16 %v10658_v23, %v8164_v7  ;;  %v10662_v3 = vpop.permute.xlu1 %10661 }
 0x357   : > { %v8329_v0 = vrot.slane %v8190_v33, 1  ;;  %v10663_v35 = vunpack.i.l.bf16 %v10662_v3 }
 0x358   : > { %v8326_v55 = vrot.slane %v8188_v21, 1  ;;  %v8256_v36 = vshll.u32 %v8188_v21, 16  ;;  %v8328_v40 = vrot.slane %v16055_v28, 1  ;;  %v10664_v21 = vunpack.i.h.bf16 %v10662_v3 }
 0x359   : > { %v8167_v46 = vsel %vm7509_vm13, 0.0, %v10663_v35  ;;  %v8263_v19 = vshll.u32 %v16055_v28, 16 }
 0x35a   : > { %v8327_v34 = vsel %vm8312_vm11, %v8325_v22, %v8326_v55  ;;  %v8258_v26 = vrot.slane %v8256_v36, 1  ;;  %v8330_v47 = vsel %vm8312_vm11, %v8328_v40, %v8329_v0  ;;  %v16075_v55 = vpack.c.bf16 %v10664_v21, %v8167_v46 }
 0x35b   : > { %8441 = vrot.lane.b32.xlu0 %v8327_v34, %s11220_s13  ;;  %8487 = vrot.lane.b32.xlu1 %v8327_v34, %s11221_s14  ;;  %v8265_v7 = vrot.slane %v8263_v19, 1 }
 0x35c   : > { %v8259_v1 = vsel %vm8199_vm12, %v8254_v51, %v8258_v26  ;;  %v8331_v29 = vrot.slane %v16075_v55, 1  ;;  %v8261_v26 = vshrl.u32 %v16055_v28, 16 }
 0x35e   : > { %v8266_v51 = vor.u32 %v8265_v7, %v8261_v26 }
 0x35f   : > { %8457 = vrot.lane.b32.xlu0 %v16055_v28, %s17354_s12  ;;  %8395 = vrot.lane.b32.xlu1 %v8327_v34, %s11218_s9  ;;  %v8268_v34 = vshll.u32 %v8190_v33, 16 }
 0x363   : > { %8425 = vrot.lane.b32.xlu0 %v8259_v1, %s11223_s17  ;;  %8411 = vrot.lane.b32.xlu1 %v16055_v28, %s11217_s30 }
 0x367   : > { %8379 = vrot.lane.b32.xlu0 %v8259_v1, %s11222_s16  ;;  %8471 = vrot.lane.b32.xlu1 %v8259_v1, %s11224_s18  ;;  %v8270_v1 = vrot.slane %v8268_v34, 1 }
 0x369   : > { %v8271_v35 = vsel %vm8199_vm12, %v8266_v51, %v8270_v1 }
 0x36b   : > { %8397 = vrot.lane.b32.xlu0 %v8330_v47, %s11218_s9  ;;  %8489 = vrot.lane.b32.xlu1 %v8330_v47, %s11221_s14 }
 0x36d   : > { %v10667_v22 = vpop.permute.xlu0 %10666 }
 0x36e   : > { %v10668_v23 = vunpack.i.l.bf16 %v10667_v22  ;;  %v10669_v3 = vunpack.i.h.bf16 %v10667_v22  ;;  %v8275_v22 = vshll.u32 %v16075_v55, 16 }
 0x36f   : > { %8413 = vrot.lane.b32.xlu0 %v16075_v55, %s11217_s30  ;;  %8443 = vrot.lane.b32.xlu1 %v8330_v47, %s11220_s13 }
 0x370   : > { %v8169_v36 = vsel %vm7514_vm10, 0.0, %v10668_v23  ;;  %v10672_v0 = vpop.permute.xlu1 %10671  ;;  %v8170_v21 = vsel %vm7509_vm13, 0.0, %v10669_v3 }
 0x371   : > { %v8192_v24 = vpack.c.bf16 %v8169_v36, %v8169_v36  ;;  %v10673_v40 = vunpack.i.l.bf16 %v10672_v0  ;;  %v10674_v47 = vunpack.i.h.bf16 %v10672_v0 }
 0x372   : > { %v10677_v33 = vpop.permute.xlu0 %10676 }
 0x373   : > { %8459 = vrot.lane.b32.xlu1 %v16075_v55, %s17354_s12  ;;  %v8332_v41 = vrot.slane %v8192_v24, 1  ;;  %v10678_v46 = vunpack.i.l.bf16 %v10677_v33  ;;  %v16098_v19 = vpack.c.bf16 %v10673_v40, %v8170_v21  ;;  %v10679_v23 = vunpack.i.h.bf16 %v10677_v33 }
 0x374   : > { %v8280_v36 = vshll.u32 %v8192_v24, 16  ;;  %v8172_v7 = vsel %vm7514_vm10, 0.0, %v10674_v47 }
 0x375   : > { %v8333_v4 = vsel %vm8312_vm11, %v8331_v29, %v8332_v41  ;;  %v8173_v34 = vsel %vm7509_vm13, 0.0, %v10678_v46  ;;  %v8277_v41 = vrot.slane %v8275_v22, 1  ;;  %v8194_v26 = vpack.c.bf16 %v8172_v7, %v8172_v7 }
 0x376   : > { %8445 = vrot.lane.b32.xlu0 %v8333_v4, %s11220_s13  ;;  %v8195_v29 = vpack.c.bf16 %v10679_v23, %v8173_v34  ;;  %v8282_v51 = vrot.slane %v8280_v36, 1  ;;  %v8334_v0 = vrot.slane %v16098_v19, 1  ;;  %v8287_v21 = vshll.u32 %v16098_v19, 16 }
 0x377   : > { %8491 = vrot.lane.b32.xlu1 %v8333_v4, %s11221_s14  ;;  %v8292_v23 = vshll.u32 %v8194_v26, 16 }
 0x378   : > { %v8289_v34 = vrot.slane %v8287_v21, 1  ;;  %v8351_v44 = vrot.slane %v8195_v29, 1 }
 0x379   : > { %v8294_v5 = vrot.slane %v8292_v23, 1  ;;  %v8338_v23 = vshrl.u32 %v8195_v29, 16 }
 0x37a   : > { %8473 = vrot.lane.b32.xlu0 %v8271_v35, %s11224_s18 }
 0x37b   : > { %8399 = vrot.lane.b32.xlu1 %v8333_v4, %s11218_s9  ;;  %v8273_v4 = vshrl.u32 %v16075_v55, 16 }
 0x37d   : > { %v8278_v1 = vor.u32 %v8277_v41, %v8273_v4  ;;  %v7530_v4 = vstv %s7529_s29  ;;  %s266_s29 = sand.u32 1, %s11190_s22  }
 0x37e   : > { %8381 = vrot.lane.b32.xlu0 %v8271_v35, %s11222_s16  ;;  %vm16125_vm6 = vcmp.eq.s32.totalorder %v7530_v4, 1 }
 0x37f   : > { %8427 = vrot.lane.b32.xlu1 %v8271_v35, %s11223_s17  ;;  %v8335_v35 = vrot.slane %v8194_v26, 1  ;;  %v8283_v33 = vsel %vm8199_vm12, %v8278_v1, %v8282_v51  ;;  %v8285_v1 = vshrl.u32 %v16098_v19, 16  ;;  %vm7538_vm9 = vmor %vm7509_vm13, %vm16125_vm6 }
 0x380   : > { %vm7540_vm13 = vmor %vm7514_vm10, %vm16125_vm6 }
 0x381   : > { %v8336_v36 = vsel %vm8312_vm11, %v8334_v0, %v8335_v35  ;;  %v8290_v9 = vor.u32 %v8289_v34, %v8285_v1 }
 0x382   : > { %8461 = vrot.lane.b32.xlu0 %v16098_v19, %s17354_s12 }
 0x383   : > { %8415 = vrot.lane.b32.xlu1 %v16098_v19, %s11217_s30 }
 0x386   : > { %8417 = vrot.lane.b32.xlu0 %v8195_v29, %s11217_s30  ;;  %v10682_v24 = vpop.permute.xlu1 %10681 }
 0x387   : > { %8463 = vrot.lane.b32.xlu1 %v8195_v29, %s17354_s12  ;;  %v10683_v3 = vunpack.i.l.bf16 %v10682_v24  ;;  %v10684_v31 = vunpack.i.h.bf16 %v10682_v24 }
 0x389   : > { %v8175_v40 = vsel %vm7514_vm10, 0.0, %v10683_v3  ;;  %v8340_v3 = vshll.u32 %v8195_v29, 16  ;;  %v8176_v24 = vsel %vm7538_vm9, 0.0, %v10684_v31  ;;  %vm8915_vm10 = vcmask 1043456  }
 0x38a   : > { %8429 = vrot.lane.b32.xlu0 %v8283_v33, %s11223_s17  ;;  %v16119_v47 = vpop.permute.xlu1 %8403  ;;  %v8196_v22 = vpack.c.bf16 %v8175_v40, %v8175_v40 }
 0x38b   : > { %8475 = vrot.lane.b32.xlu1 %v8283_v33, %s11224_s18  ;;  %v8342_v21 = vrot.slane %v8340_v3, 1 }
 0x38c   : > { %v10687_v46 = vpop.permute.xlu0 %10686  ;;  %v8352_v51 = vrot.slane %v8196_v22, 1  ;;  %v8345_v52 = vshll.u32 %v8196_v22, 16  ;;  %v8295_v22 = vsel %vm8199_vm12, %v8290_v9, %v8294_v5 }
 0x38d   : > { %v10688_v0 = vunpack.i.l.bf16 %v10687_v46  ;;  %v10689_v1 = vunpack.i.h.bf16 %v10687_v46 }
 0x38e   : > { %8383 = vrot.lane.b32.xlu0 %v8283_v33, %s11222_s16  ;;  %v8388_v41 = vpop.permute.xlu1 %8387  ;;  %v8353_v40 = vsel %vm8312_vm11, %v8351_v44, %v8352_v51  ;;  %v8347_v34 = vrot.slane %v8345_v52, 1  ;;  %v8343_v51 = vor.u32 %v8342_v21, %v8338_v23 }
 0x38f   : > { %8493 = vrot.lane.b32.xlu1 %v8336_v36, %s11221_s14  ;;  %v8177_v4 = vsel %vm16125_vm6, 0.0, %v10688_v0  ;;  %v8178_v29 = vsel %vm7540_vm13, 0.0, %v10689_v1 }
 0x390   : > { %v8390_v7 = vpop.permute.xlu0 %8389  ;;  %v8197_v17 = vpack.c.bf16 %v8177_v4, %v8176_v24  ;;  %v8348_v5 = vsel %vm8199_vm12, %v8343_v51, %v8347_v34  ;;  %v8198_v26 = vpack.c.bf16 %v8178_v29, %v8178_v29 }
 0x392   : > { %8401 = vrot.lane.b32.xlu0 %v8336_v36, %s11218_s9  ;;  %v8436_v33 = vpop.permute.xlu1 %8435  ;;  %v8357_v3 = vshll.u32 %v8197_v17, 16  ;;  %v8362_v34 = vshll.u32 %v8198_v26, 16  ;;  %v8355_v4 = vshrl.u32 %v8197_v17, 16 }
 0x393   : > { %8447 = vrot.lane.b32.xlu1 %v8336_v36, %s11220_s13 }
 0x394   : > { %v8406_v35 = vpop.permute.xlu0 %8405  ;;  %v8359_v0 = vrot.slane %v8357_v3, 1  ;;  %v8369_v3 = vrot.slane %v8198_v26, 1 }
 0x396   : > { %8449 = vrot.lane.b32.xlu0 %v8353_v40, %s11220_s13  ;;  %v8372_v44 = vpop.permute.xlu1 %8371  ;;  %v8360_v24 = vor.u32 %v8359_v0, %v8355_v4  ;;  %s10060_s13 = sshll.u32 %s266_s29, 7 }
 0x397   : > { %8431 = vrot.lane.b32.xlu1 %v8295_v22, %s11223_s17  ;;  %v8500_v45 = vsel %vm5659_vm15, %v15410_v20, %v8372_v44  ;;  %v8364_v44 = vrot.slane %v8362_v34, 1 }
 0x398   : > { %v8374_v36 = vpop.permute.xlu0 %8373  ;;  %v8516_v51 = vsel %vm5696_vm0, %v8500_v45, %v8388_v41  ;;  %v8368_v41 = vrot.slane %v8197_v17, 1 }
 0x399   : > { %v8532_v20 = vsel %vm5721_vm1, %v8516_v51, %v16119_v47  ;;  %v8365_v10 = vsel %vm8199_vm12, %v8360_v24, %v8364_v44 }
 0x39a   : > { %8477 = vrot.lane.b32.xlu0 %v8295_v22, %s11224_s18  ;;  %v8452_v52 = vpop.permute.xlu1 %8451  ;;  %v8370_v47 = vsel %vm8312_vm11, %v8368_v41, %v8369_v3 }
 0x39b   : > { %8479 = vrot.lane.b32.xlu1 %v8348_v5, %s11224_s18 }
 0x39c   : > { %v8438_v9 = vpop.permute.xlu0 %8437 }
 0x39e   : > { %8385 = vrot.lane.b32.xlu0 %v8295_v22, %s11222_s16  ;;  %v8420_v46 = vpop.permute.xlu1 %8419  ;;  %v8502_v22 = vsel %vm5659_vm15, %v15417_v59, %v8374_v36 }
 0x39f   : > { %8495 = vrot.lane.b32.xlu1 %v8353_v40, %s11221_s14  ;;  %v8548_v29 = vsel %vm5746_vm2, %v8532_v20, %v8420_v46 }
 0x3a0   : > { %v8564_v45 = vsel %vm5771_vm3, %v8548_v29, %v8436_v33 }
 0x3a1   : > { %v8580_v46 = vsel %vm5796_vm4, %v8564_v45, %v8452_v52 }
 0x3a2   : > { %8433 = vrot.lane.b32.xlu0 %v8348_v5, %s11223_s17  ;;  %v8484_v23 = vpop.permute.xlu1 %8483  ;;  %v8518_v5 = vsel %vm5696_vm0, %v8502_v22, %v8390_v7 }
 0x3a3   : > { %v8534_v0 = vsel %vm5721_vm1, %v8518_v5, %v8406_v35 }
 0x3a6   : > { %8465 = vrot.lane.b32.xlu0 %v8197_v17, %s17354_s12  ;;  %v8392_v1 = vpop.permute.xlu1 %8391  ;;  %s11229_s12 = smov 116  }
 0x3a8   : > { %v8454_v31 = vpop.permute.xlu0 %8453 }
 0x3aa   : > { %8481 = vrot.lane.b32.xlu0 %v8365_v10, %s11224_s18 }
 0x3ac   : > { %v8422_v21 = vpop.permute.xlu0 %8421  ;;  %v8408_v36 = vpop.permute.xlu1 %8407 }
 0x3ad   : > { %v8550_v4 = vsel %vm5746_vm2, %v8534_v0, %v8422_v21 }
 0x3ae   : > { %8497 = vrot.lane.b32.xlu0 %v8370_v47, %s11221_s14  ;;  %v8566_v17 = vsel %vm5771_vm3, %v8550_v4, %v8438_v9  ;;  %s10393_s14 = sshll.u32 %s11202_s25, 5 }
 0x3af   : > { %v8582_v35 = vsel %vm5796_vm4, %v8566_v17, %v8454_v31 }
 0x3b0   : > { %v8376_v40 = vpop.permute.xlu0 %8375  ;;  %v8468_v26 = vpop.permute.xlu1 %8467 }
 0x3b1   : > { %v8596_v10 = vsel %vm5821_vm5, %v8580_v46, %v8468_v26 }
 0x3b2   : > { %v8612_v34 = vsel %vm5846_vm7, %v8596_v10, %v8484_v23  ;;  %v8504_v23 = vsel %vm5659_vm15, %v15458_v49, %v8376_v40 }
 0x3b3   : > { %10477 = vmatprep.mubr.msk.bf16.mxu0 %vm5891_vm8, %v8612_v34  ;;  %v8520_v29 = vsel %vm5696_vm0, %v8504_v23, %v8392_v1 }
 0x3b4   : > { %v8536_v41 = vsel %vm5721_vm1, %v8520_v29, %v8408_v36 }
 0x3b5   : > { %v8394_v59 = vpop.permute.xlu0 %8393 }
 0x3b6   : > { %v8486_v21 = vpop.permute.xlu1 %8485 }
 0x3b9   : > { %v8410_v7 = vpop.permute.xlu0 %8409 }
 0x3ba   : > { %v8440_v52 = vpop.permute.xlu1 %8439 }
 0x3be   : > { %v8456_v24 = vpop.permute.xlu1 %8455 }
 0x3c1   : > { %v8470_v33 = vpop.permute.xlu0 %8469 }
 0x3c2   : > { %v8598_v51 = vsel %vm5821_vm5, %v8582_v35, %v8470_v33  ;;  %v8424_v20 = vpop.permute.xlu1 %8423 }
 0x3c3   : > { %v8614_v22 = vsel %vm5846_vm7, %v8598_v51, %v8486_v21  ;;  %v8552_v45 = vsel %vm5746_vm2, %v8536_v41, %v8424_v20 }
 0x3c4   : > { %10478 = vmatmul.mubr.msk.bf16.vlgmr.msra.gmra.mrb[24].mxu0 %vm5891_vm8, %v8614_v22  ;;  %v8568_v4 = vsel %vm5771_vm3, %v8552_v45, %v8440_v52 }
 0x3c5   : > { %v8378_v9 = vpop.permute.xlu0 %8377  ;;  %v8584_v46 = vsel %vm5796_vm4, %v8568_v4, %v8456_v24 }
 0x3c6   : > { %v8506_v36 = vsel %vm5659_vm15, %v15797_v61, %v8378_v9 }
 0x3c7   : > { %v8522_v35 = vsel %vm5696_vm0, %v8506_v36, %v8394_v59 }
 0x3c8   : > { %v8538_v51 = vsel %vm5721_vm1, %v8522_v35, %v8410_v7 }
 0x3cd   : > { %v8442_v44 = vpop.permute.xlu0 %8441  ;;  %v8488_v5 = vpop.permute.xlu1 %8487 }
 0x3d1   : > { %v8458_v31 = vpop.permute.xlu0 %8457  ;;  %v8396_v3 = vpop.permute.xlu1 %8395 }
 0x3d5   : > { %v8412_v0 = vpop.permute.xlu1 %8411  ;;  %v8426_v47 = vpop.permute.xlu0 %8425 }
 0x3d6   : > { %v8554_v22 = vsel %vm5746_vm2, %v8538_v51, %v8426_v47 }
 0x3d7   : > { %v8570_v20 = vsel %vm5771_vm3, %v8554_v22, %v8442_v44 }
 0x3d9   : > { %v8472_v26 = vpop.permute.xlu1 %8471  ;;  %v8380_v49 = vpop.permute.xlu0 %8379 }
 0x3da   : > { %v8600_v17 = vsel %vm5821_vm5, %v8584_v46, %v8472_v26  ;;  %v8508_v59 = vsel %vm5659_vm15, %v15895_v57, %v8380_v49 }
 0x3db   : > { %v8616_v10 = vsel %vm5846_vm7, %v8600_v17, %v8488_v5  ;;  %v8586_v5 = vsel %vm5796_vm4, %v8570_v20, %v8458_v31  ;;  %v8524_v45 = vsel %vm5696_vm0, %v8508_v59, %v8396_v3 }
 0x3dc   : > { %10481 = vmatprep.mubr.msk.bf16.mxu1 %vm5891_vm8, %v8616_v10  ;;  %v8540_v44 = vsel %vm5721_vm1, %v8524_v45, %v8412_v0 }
 0x3dd   : > { %v8490_v40 = vpop.permute.xlu1 %8489  ;;  %v8398_v1 = vpop.permute.xlu0 %8397 }
 0x3e1   : > { %v8444_v34 = vpop.permute.xlu1 %8443  ;;  %v8414_v33 = vpop.permute.xlu0 %8413 }
 0x3e5   : > { %v8460_v21 = vpop.permute.xlu1 %8459 }
 0x3e8   : > { %v8446_v52 = vpop.permute.xlu0 %8445 }
 0x3e9   : > { %v8492_v24 = vpop.permute.xlu1 %8491 }
 0x3ec   : > { %v8474_v23 = vpop.permute.xlu0 %8473 }
 0x3ed   : > { %v8400_v29 = vpop.permute.xlu1 %8399  ;;  %v8602_v41 = vsel %vm5821_vm5, %v8586_v5, %v8474_v23 }
 0x3ee   : > { %v8618_v61 = vsel %vm5846_vm7, %v8602_v41, %v8490_v40 }
 0x3ef   : > { %10482 = vmatmul.mubr.msk.bf16.vlgmr.msra.gmra.mrb[0].mxu1 %vm5891_vm8, %v8618_v61 }
 0x3f0   : > { %v8382_v7 = vpop.permute.xlu0 %8381 }
 0x3f1   : > { %v8428_v9 = vpop.permute.xlu1 %8427  ;;  %v8510_v3 = vsel %vm5659_vm15, %v16055_v28, %v8382_v7 }
 0x3f2   : > { %v8556_v31 = vsel %vm5746_vm2, %v8540_v44, %v8428_v9  ;;  %v8526_v51 = vsel %vm5696_vm0, %v8510_v3, %v8398_v1 }
 0x3f3   : > { %v8572_v17 = vsel %vm5771_vm3, %v8556_v31, %v8444_v34 }
 0x3f4   : > { %v8462_v4 = vpop.permute.xlu0 %8461  ;;  %v8588_v40 = vsel %vm5796_vm4, %v8572_v17, %v8460_v21  ;;  %v8542_v21 = vsel %vm5721_vm1, %v8526_v51, %v8414_v33  ;;  %v16243_v51 = vld [vmem:[%s16735_s4] ss:$0 sm:$0xff] }
 0x3f5   : > { %v8416_v47 = vpop.permute.xlu1 %8415 }
 0x3f8   : > { %v8418_v46 = vpop.permute.xlu0 %8417 }
 0x3f9   : > { %v8464_v26 = vpop.permute.xlu1 %8463 }
 0x3fc   : > { %v8430_v10 = vpop.permute.xlu0 %8429 }
 0x3fd   : > { %v8476_v57 = vpop.permute.xlu1 %8475 }
 0x3fe   : > { %v8604_v49 = vsel %vm5821_vm5, %v8588_v40, %v8476_v57 }
 0x3ff   : > { %v8620_v36 = vsel %vm5846_vm7, %v8604_v49, %v8492_v24  ;;  %v8558_v24 = vsel %vm5746_vm2, %v8542_v21, %v8430_v10 }
 0x400   : > { %10485 = vmatprep.mubr.msk.bf16.mxu1 %vm5891_vm8, %v8620_v36  ;;  %v8384_v0 = vpop.permute.xlu0 %8383  ;;  %v8574_v61 = vsel %vm5771_vm3, %v8558_v24, %v8446_v52  ;;  %v8866_v36 = vld [vmem:[%s16736_s5] sm:$0xf] }
 0x401   : > { %v8494_v35 = vpop.permute.xlu1 %8493  ;;  %v8512_v34 = vsel %vm5659_vm15, %v16075_v55, %v8384_v0  ;;  %v8590_v55 = vsel %vm5796_vm4, %v8574_v61, %v8462_v4  ;;  %10493 = vmatprep.subr.msk.mxu1 %vm8915_vm10, %v8866_v36 }
 0x402   : > { %v8528_v5 = vsel %vm5696_vm0, %v8512_v34, %v8400_v29  ;;  %10494 = vmatpush3.msk.msra.mxu1 %vm8915_vm10, %v8866_v36 }
 0x403   : > { %v8544_v28 = vsel %vm5721_vm1, %v8528_v5, %v8416_v47 }
 0x404   : > { %v8402_v22 = vpop.permute.xlu0 %8401 }
 0x405   : > { %v8448_v20 = vpop.permute.xlu1 %8447 }
 0x408   : > { %v8450_v23 = vpop.permute.xlu0 %8449 }
 0x409   : > { %v8432_v41 = vpop.permute.xlu1 %8431 }
 0x40a   : > { %v8560_v59 = vsel %vm5746_vm2, %v8544_v28, %v8432_v41 }
 0x40b   : > { %v8576_v1 = vsel %vm5771_vm3, %v8560_v59, %v8448_v20 }
 0x40c   : > { %v8478_v7 = vpop.permute.xlu0 %8477  ;;  %v8592_v29 = vsel %vm5796_vm4, %v8576_v1, %v8464_v26 }
 0x40d   : > { %v8480_v9 = vpop.permute.xlu1 %8479  ;;  %v8606_v33 = vsel %vm5821_vm5, %v8590_v55, %v8478_v7 }
 0x40e   : > { %v8622_v45 = vsel %vm5846_vm7, %v8606_v33, %v8494_v35  ;;  %v8608_v47 = vsel %vm5821_vm5, %v8592_v29, %v8480_v9 }
 0x40f   : > { %10486 = vmatmul.mubr.msk.bf16.gmra.mrb[4].mxu1 %vm5891_vm8, %v8622_v45 }
 0x410   : > { %v8386_v44 = vpop.permute.xlu0 %8385 }
 0x411   : > { %v8496_v52 = vpop.permute.xlu1 %8495  ;;  %v8514_v17 = vsel %vm5659_vm15, %v16098_v19, %v8386_v44 }
 0x412   : > { %v8624_v31 = vsel %vm5846_vm7, %v8608_v47, %v8496_v52  ;;  %v8530_v10 = vsel %vm5696_vm0, %v8514_v17, %v8402_v22 }
 0x413   : > { %10489 = vmatprep.mubr.msk.bf16.mxu1 %vm5891_vm8, %v8624_v31  ;;  %v8546_v26 = vsel %vm5721_vm1, %v8530_v10, %v8418_v46 }
 0x414   : > { %v8434_v4 = vpop.permute.xlu0 %8433 }
 0x415   : > { %v8562_v57 = vsel %vm5746_vm2, %v8546_v26, %v8434_v4 }
 0x416   : > { %v8578_v3 = vsel %vm5771_vm3, %v8562_v57, %v8450_v23 }
 0x418   : > { %v8466_v40 = vpop.permute.xlu0 %8465 }
 0x419   : > { %v8594_v19 = vsel %vm5796_vm4, %v8578_v3, %v8466_v40 }
 0x41c   : > { %v8482_v49 = vpop.permute.xlu0 %8481 }
 0x41d   : > { %v8610_v0 = vsel %vm5821_vm5, %v8594_v19, %v8482_v49 }
 0x420   : > { %v8498_v35 = vpop.permute.xlu0 %8497 }
 0x421   : > { %v8626_v46 = vsel %vm5846_vm7, %v8610_v0, %v8498_v35 }
 0x422   : > { %10490 = vmatmul.mubr.msk.bf16.gmra.mrb[8].mxu1 %vm5891_vm8, %v8626_v46 }
 0x497   : > { %v10479_v34 = vpop.f32.mrb[24].mxu0 }
 0x498   : > { %v8716_v22 = vadd.f32 %v10479_v34, %v16243_v51  ;;  %v8707_v20 = vpop.f32.mrb[25].mxu0 }
 0x499   : > { %v8708_v21 = vadd.f32 %v16243_v51, %v8707_v20  ;;  %v10480_v5 = vpop.f32.mrb[26].mxu0 }
 0x49a   : > { %v10359_v24 = vmul.f32 -1.442695, %v8716_v22  ;;  %v8719_v23 = vadd.f32 %v10480_v5, %v16243_v51  ;;  %v8710_v28 = vpop.f32.mrb[27].mxu0 }
 0x49b   : > { %v10357_v41 = vmul.f32 -1.442695, %v8708_v21  ;;  %v8711_v61 = vadd.f32 %v16243_v51, %v8710_v28 }
 0x49c   : > { %11056 = vpow2.f32 %v10359_v24  ;;  %v10360_v59 = vmul.f32 -1.442695, %v8719_v23 }
 0x49d   : > { %11058 = vpow2.f32 %v10357_v41  ;;  %v10358_v1 = vmul.f32 -1.442695, %v8711_v61 }
 0x49e   : > { %11060 = vpow2.f32 %v10360_v59 }
 0x49f   : > { %11062 = vpow2.f32 %v10358_v1 }
 0x4a6   : > { %v11057_v55 = vpop.eup %11056 }
 0x4a7   : > { %v11059_v7 = vpop.eup %11058  ;;  %v8820_v45 = vadd.f32 1.0, %v11057_v55 }
 0x4a8   : > { %v11061_v9 = vpop.eup %11060  ;;  %v8818_v33 = vadd.f32 1.0, %v11059_v7 }
 0x4a9   : > { %v11063_v29 = vpop.eup %11062  ;;  %v8821_v44 = vadd.f32 1.0, %v11061_v9 }
 0x4aa   : > { %11064 = vrcp.f32 %v8818_v33  ;;  %v8819_v47 = vadd.f32 1.0, %v11063_v29 }
 0x4ac   : > { %11066 = vrcp.f32 %v8819_v47 }
 0x4ad   : > { %11068 = vrcp.f32 %v8820_v45 }
 0x4ae   : > { %11070 = vrcp.f32 %v8821_v44 }
 0x4b4   : > { %v11065_v52 = vpop.eup %11064 }
 0x4b5   : > { %10495 = vmatprep.mubr.msk.f32.mxu1 %vm5659_vm15, %v11065_v52 }
 0x4b6   : > { %v11067_v31 = vpop.eup %11066 }
 0x4b7   : > { %v11069_v17 = vpop.eup %11068  ;;  %10496 = vmatmul.mubr.msk.f32.vlgmr.msra.gmra.mrb[12].mxu1 %vm5659_vm15, %v11067_v31 }
 0x4b8   : > { %10498 = vmatprep.mubr.msk.f32.mxu1 %vm5659_vm15, %v11069_v17  ;;  %v11071_v4 = vpop.eup %11070 }
 0x4bb   : > { %10499 = vmatmul.mubr.msk.f32.gmra.mrb[14].mxu1 %vm5659_vm15, %v11071_v4 }
 0x4c2   : > { %v10483_v10 = vpop.f32.mrb[0].mxu1 }
 0x4c3   : > { %v8732_v26 = vadd.f32 %v10483_v10, %v16243_v51  ;;  %v8723_v40 = vpop.f32.mrb[1].mxu1 }
 0x4c4   : > { %v8724_v57 = vadd.f32 %v16243_v51, %v8723_v40  ;;  %v10484_v49 = vpop.f32.mrb[2].mxu1 }
 0x4c5   : > { %v10363_v36 = vmul.f32 -1.442695, %v8732_v26  ;;  %v8735_v3 = vadd.f32 %v10484_v49, %v16243_v51  ;;  %v8726_v19 = vpop.f32.mrb[3].mxu1 }
 0x4c6   : > { %v10361_v0 = vmul.f32 -1.442695, %v8724_v57  ;;  %v8727_v35 = vadd.f32 %v16243_v51, %v8726_v19 }
 0x4c7   : > { %11072 = vpow2.f32 %v10363_v36  ;;  %v10364_v46 = vmul.f32 -1.442695, %v8735_v3 }
 0x4c8   : > { %11074 = vpow2.f32 %v10361_v0  ;;  %v10362_v34 = vmul.f32 -1.442695, %v8727_v35 }
 0x4c9   : > { %11076 = vpow2.f32 %v10364_v46 }
 0x4ca   : > { %11078 = vpow2.f32 %v10362_v34 }
 0x4d1   : > { %v11073_v22 = vpop.eup %11072 }
 0x4d2   : > { %v11075_v20 = vpop.eup %11074  ;;  %v8824_v23 = vadd.f32 1.0, %v11073_v22 }
 0x4d3   : > { %v11077_v21 = vpop.eup %11076  ;;  %v8822_v5 = vadd.f32 1.0, %v11075_v20 }
 0x4d4   : > { %v11079_v24 = vpop.eup %11078  ;;  %v8825_v41 = vadd.f32 1.0, %v11077_v21 }
 0x4d5   : > { %11080 = vrcp.f32 %v8822_v5  ;;  %v8823_v28 = vadd.f32 1.0, %v11079_v24 }
 0x4d7   : > { %11082 = vrcp.f32 %v8823_v28 }
 0x4d8   : > { %11084 = vrcp.f32 %v8824_v23 }
 0x4d9   : > { %11086 = vrcp.f32 %v8825_v41 }
 0x4df   : > { %v11081_v61 = vpop.eup %11080 }
 0x4e0   : > { %10501 = vmatprep.mubr.msk.f32.mxu1 %vm5659_vm15, %v11081_v61 }
 0x4e1   : > { %v11083_v59 = vpop.eup %11082 }
 0x4e2   : > { %v11085_v1 = vpop.eup %11084  ;;  %v10487_v55 = vpop.f32.mrb[4].mxu1  ;;  %10502 = vmatmul.mubr.msk.f32.gmra.mrb[16].mxu1 %vm5659_vm15, %v11083_v59 }
 0x4e3   : > { %v8748_v7 = vadd.f32 %v10487_v55, %v16243_v51  ;;  %v8739_v9 = vpop.f32.mrb[5].mxu1  ;;  %10504 = vmatprep.mubr.msk.f32.mxu1 %vm5659_vm15, %v11085_v1  ;;  %v11087_v45 = vpop.eup %11086 }
 0x4e4   : > { %v8740_v33 = vadd.f32 %v16243_v51, %v8739_v9  ;;  %v10488_v29 = vpop.f32.mrb[6].mxu1 }
 0x4e5   : > { %v10367_v47 = vmul.f32 -1.442695, %v8748_v7  ;;  %v8751_v44 = vadd.f32 %v10488_v29, %v16243_v51  ;;  %v8742_v52 = vpop.f32.mrb[7].mxu1 }
 0x4e6   : > { %v10365_v31 = vmul.f32 -1.442695, %v8740_v33  ;;  %v8743_v17 = vadd.f32 %v16243_v51, %v8742_v52  ;;  %10505 = vmatmul.mubr.msk.f32.gmra.mrb[18].mxu1 %vm5659_vm15, %v11087_v45 }
 0x4e7   : > { %11088 = vpow2.f32 %v10367_v47  ;;  %v10368_v4 = vmul.f32 -1.442695, %v8751_v44 }
 0x4e8   : > { %11090 = vpow2.f32 %v10365_v31  ;;  %v10366_v10 = vmul.f32 -1.442695, %v8743_v17 }
 0x4e9   : > { %11092 = vpow2.f32 %v10368_v4 }
 0x4ea   : > { %11094 = vpow2.f32 %v10366_v10 }
 0x4f1   : > { %v11089_v26 = vpop.eup %11088 }
 0x4f2   : > { %v11091_v40 = vpop.eup %11090  ;;  %v8828_v3 = vadd.f32 1.0, %v11089_v26 }
 0x4f3   : > { %v11093_v57 = vpop.eup %11092  ;;  %v8826_v49 = vadd.f32 1.0, %v11091_v40  ;;  %v17357_v40 = vcombine.low %v15485_v18, %v15488_v2 }
 0x4f4   : > { %v11095_v36 = vpop.eup %11094  ;;  %v8829_v19 = vadd.f32 1.0, %v11093_v57 }
 0x4f5   : > { %11096 = vrcp.f32 %v8826_v49  ;;  %v8827_v0 = vadd.f32 1.0, %v11095_v36  ;;  %v10491_v35 = vpop.f32.mrb[8].mxu1  ;;  %v17358_v36 = vcombine.low %v15534_v8, %v15558_v50 }
 0x4f6   : > { %v8764_v46 = vadd.f32 %v10491_v35, %v16243_v51  ;;  %v8755_v34 = vpop.f32.mrb[9].mxu1  ;;  %v17360_v35 = vcombine.low %v15619_v48, %v15606_v37  ;;  %v17362_v48 = vcombine.low %v15684_v30, %v15687_v39  ;;  %v17365_v39 = vld [vmem:[#allocation15_spill] sm:$0xff] }
 0x4f7   : > { %11098 = vrcp.f32 %v8827_v0  ;;  %v8756_v22 = vadd.f32 %v16243_v51, %v8755_v34  ;;  %v10492_v20 = vpop.f32.mrb[10].mxu1  ;;  %v17359_v0 = vcombine.low %v15583_v53, %v15571_v6  ;;  %v17361_v6 = vcombine.low %v15654_v13, %v15657_v27 }
 0x4f8   : > { %11100 = vrcp.f32 %v8828_v3  ;;  %v10371_v21 = vmul.f32 -1.442695, %v8764_v46  ;;  %v8767_v5 = vadd.f32 %v10492_v20, %v16243_v51  ;;  %v8758_v24 = vpop.f32.mrb[11].mxu1  ;;  %v17364_v27 = vcombine.low %v15739_v38, %v15742_v15 }
 0x4f9   : > { %11102 = vrcp.f32 %v8829_v19  ;;  %v10369_v23 = vmul.f32 -1.442695, %v8756_v22  ;;  %v8759_v28 = vadd.f32 %v16243_v51, %v8758_v24  ;;  %v17363_v22 = vcombine.low %v15699_v11, %v15715_v58  ;;  %v17366_v11 = vld [vmem:[#allocation5_spill] sm:$0xff]  ;;  %v17369_v24 = vld [vmem:[#allocation46_spill] sm:$0xff] }
 0x4fa   : > { %11104 = vpow2.f32 %v10371_v21  ;;  %v10372_v41 = vmul.f32 -1.442695, %v8767_v5  ;;  %v17367_v58 = vcombine.low %v17365_v39, %v17366_v11  ;;  %v17368_v5 = vld [vmem:[#allocation51_spill] sm:$0xff] }
 0x4fb   : > { %11106 = vpow2.f32 %v10369_v23  ;;  %v10370_v61 = vmul.f32 -1.442695, %v8759_v28  ;;  %v17370_v23 = vcombine.low %v17368_v5, %v17369_v24 }
 0x4fc   : > { %11108 = vpow2.f32 %v10372_v41 }
 0x4fd   : > { %11110 = vpow2.f32 %v10370_v61  ;;  %v17371_v61 = vcombine.low %v15863_v63, %v15893_v42  ;;  %v17373_v42 = vcombine.low %v15954_v43, %v15964_v16  ;;  %v17376_v16 = vcombine.low %v16031_v56, %v16034_v12 }
 0x4ff   : > { %v11097_v59 = vpop.eup %11096 }
 0x500   : > { %10507 = vmatprep.mubr.msk.f32.mxu1 %vm5659_vm15, %v11097_v59 }
 0x501   : > { %v11099_v1 = vpop.eup %11098 }
 0x502   : > { %v11101_v55 = vpop.eup %11100  ;;  %10508 = vmatmul.mubr.msk.f32.gmra.mrb[20].mxu1 %vm5659_vm15, %v11099_v1 }
 0x503   : > { %v11103_v7 = vpop.eup %11102  ;;  %10510 = vmatprep.mubr.msk.f32.mxu1 %vm5659_vm15, %v11101_v55  ;;  %v17372_v55 = vcombine.low %v15929_v62, %v15914_v25 }
 0x504   : > { %v11105_v9 = vpop.eup %11104 }
 0x505   : > { %v11107_v33 = vpop.eup %11106  ;;  %v8832_v47 = vadd.f32 1.0, %v11105_v9  ;;  %v17374_v9 = vcombine.low %v15991_v14, %v15994_v60 }
 0x506   : > { %v11109_v29 = vpop.eup %11108  ;;  %v8830_v51 = vadd.f32 1.0, %v11107_v33  ;;  %10511 = vmatmul.mubr.msk.f32.gmra.mrb[22].mxu1 %vm5659_vm15, %v11103_v7 }
 0x507   : > { %v11111_v45 = vpop.eup %11110  ;;  %v8833_v52 = vadd.f32 1.0, %v11109_v29 }
 0x508   : > { %11112 = vrcp.f32 %v8830_v51  ;;  %v8831_v44 = vadd.f32 1.0, %v11111_v45  ;;  %v17375_v51 = vcombine.low %v16023_v32, %v16026_v54 }
 0x50a   : > { %11114 = vrcp.f32 %v8831_v44 }
 0x50b   : > { %11116 = vrcp.f32 %v8832_v47 }
 0x50c   : > { %11118 = vrcp.f32 %v8833_v52 }
 0x512   : > { %v11113_v31 = vpop.eup %11112 }
 0x513   : > { %10513 = vmatprep.mubr.msk.f32.mxu1 %vm5659_vm15, %v11113_v31 }
 0x514   : > { %v11115_v17 = vpop.eup %11114 }
 0x515   : > { %v11117_v4 = vpop.eup %11116  ;;  %10514 = vmatmul.mubr.msk.f32.gmra.mrb[24].mxu1 %vm5659_vm15, %v11115_v17 }
 0x516   : > { %10516 = vmatprep.mubr.msk.f32.mxu1 %vm5659_vm15, %v11117_v4  ;;  %v11119_v10 = vpop.eup %11118 }
 0x519   : > { %10517 = vmatmul.mubr.msk.f32.gmra.mrb[26].mxu1 %vm5659_vm15, %v11119_v10 }
 0x58a   : > { %v10497_v26 = vpop.f32.mrb[12].mxu1 }
 0x58b   : > { %v16280_v57 = vmul.f32 %v10497_v26, %v17357_v40  ;;  %v8985_v49 = vpop.f32.mrb[13].mxu1 }
 0x58c   : > { %v16285_v3 = vmul.f32 %v17358_v36, %v8985_v49 }
 0x58d   : > { %9386 = vrot.lane.b32.xlu0 %v16280_v57, %s11227_s19 }
 0x58e   : > { %9384 = vrot.lane.b32.xlu1 %v16285_v3, %s11227_s19  ;;  %v10500_v19 = vpop.f32.mrb[14].mxu1 }
 0x58f   : > { %v16294_v18 = vmul.f32 %v10500_v19, %v17359_v0  ;;  %v8995_v2 = vpop.f32.mrb[15].mxu1 }
 0x590   : > { %v16299_v8 = vmul.f32 %v17360_v35, %v8995_v2 }
 0x591   : > { %9450 = vrot.lane.b32.xlu0 %v16280_v57, %s11228_s20 }
 0x592   : > { %9448 = vrot.lane.b32.xlu1 %v16285_v3, %s11228_s20 }
 0x595   : > { %9514 = vrot.lane.b32.xlu0 %v16280_v57, %s11229_s12 }
 0x596   : > { %9512 = vrot.lane.b32.xlu1 %v16285_v3, %s11229_s12 }
 0x599   : > { %9390 = vrot.lane.b32.xlu0 %v16294_v18, %s11227_s19 }
 0x59a   : > { %9388 = vrot.lane.b32.xlu1 %v16299_v8, %s11227_s19 }
 0x59d   : > { %9454 = vrot.lane.b32.xlu0 %v16294_v18, %s11228_s20 }
 0x59e   : > { %9452 = vrot.lane.b32.xlu1 %v16299_v8, %s11228_s20 }
 0x5a1   : > { %9518 = vrot.lane.b32.xlu0 %v16294_v18, %s11229_s12 }
 0x5a2   : > { %9516 = vrot.lane.b32.xlu1 %v16299_v8, %s11229_s12 }
 0x5b5   : > { %v10503_v50 = vpop.f32.mrb[16].mxu1 }
 0x5b6   : > { %v16324_v53 = vmul.f32 %v10503_v50, %v17361_v6  ;;  %v9005_v37 = vpop.f32.mrb[17].mxu1 }
 0x5b7   : > { %v16329_v46 = vmul.f32 %v17362_v48, %v9005_v37 }
 0x5b8   : > { %9394 = vrot.lane.b32.xlu0 %v16324_v53, %s11227_s19 }
 0x5b9   : > { %9392 = vrot.lane.b32.xlu1 %v16329_v46, %s11227_s19  ;;  %v10506_v34 = vpop.f32.mrb[18].mxu1 }
 0x5ba   : > { %v16338_v20 = vmul.f32 %v10506_v34, %v17363_v22  ;;  %v9015_v13 = vpop.f32.mrb[19].mxu1 }
 0x5bb   : > { %v16343_v21 = vmul.f32 %v17364_v27, %v9015_v13 }
 0x5bc   : > { %9458 = vrot.lane.b32.xlu0 %v16324_v53, %s11228_s20 }
 0x5bd   : > { %9456 = vrot.lane.b32.xlu1 %v16329_v46, %s11228_s20 }
 0x5c0   : > { %9522 = vrot.lane.b32.xlu0 %v16324_v53, %s11229_s12 }
 0x5c1   : > { %9520 = vrot.lane.b32.xlu1 %v16329_v46, %s11229_s12 }
 0x5c4   : > { %9398 = vrot.lane.b32.xlu0 %v16338_v20, %s11227_s19 }
 0x5c5   : > { %9396 = vrot.lane.b32.xlu1 %v16343_v21, %s11227_s19 }
 0x5c8   : > { %9462 = vrot.lane.b32.xlu0 %v16338_v20, %s11228_s20 }
 0x5c9   : > { %9460 = vrot.lane.b32.xlu1 %v16343_v21, %s11228_s20 }
 0x5cc   : > { %9526 = vrot.lane.b32.xlu0 %v16338_v20, %s11229_s12 }
 0x5cd   : > { %9524 = vrot.lane.b32.xlu1 %v16343_v21, %s11229_s12 }
 0x5d5   : > { %v10509_v30 = vpop.f32.mrb[20].mxu1 }
 0x5d6   : > { %v16368_v38 = vmul.f32 %v10509_v30, %v17367_v58  ;;  %v9025_v15 = vpop.f32.mrb[21].mxu1 }
 0x5d7   : > { %v16373_v28 = vmul.f32 %v17370_v23, %v9025_v15 }
 0x5d8   : > { %9402 = vrot.lane.b32.xlu0 %v16368_v38, %s11227_s19 }
 0x5d9   : > { %9400 = vrot.lane.b32.xlu1 %v16373_v28, %s11227_s19  ;;  %v10512_v41 = vpop.f32.mrb[22].mxu1 }
 0x5da   : > { %v16382_v59 = vmul.f32 %v10512_v41, %v17371_v61  ;;  %v9035_v1 = vpop.f32.mrb[23].mxu1 }
 0x5db   : > { %v16387_v7 = vmul.f32 %v17372_v55, %v9035_v1 }
 0x5dc   : > { %9466 = vrot.lane.b32.xlu0 %v16368_v38, %s11228_s20 }
 0x5dd   : > { %9464 = vrot.lane.b32.xlu1 %v16373_v28, %s11228_s20 }
 0x5e0   : > { %9530 = vrot.lane.b32.xlu0 %v16368_v38, %s11229_s12 }
 0x5e1   : > { %9528 = vrot.lane.b32.xlu1 %v16373_v28, %s11229_s12 }
 0x5e4   : > { %9406 = vrot.lane.b32.xlu0 %v16382_v59, %s11227_s19 }
 0x5e5   : > { %9404 = vrot.lane.b32.xlu1 %v16387_v7, %s11227_s19 }
 0x5e8   : > { %9470 = vrot.lane.b32.xlu0 %v16382_v59, %s11228_s20  ;;  %v10515_v63 = vpop.f32.mrb[24].mxu1 }
 0x5e9   : > { %v16406_v25 = vmul.f32 %v10515_v63, %v17373_v42  ;;  %9468 = vrot.lane.b32.xlu1 %v16387_v7, %s11228_s20  ;;  %v9045_v62 = vpop.f32.mrb[25].mxu1 }
 0x5ea   : > { %v16413_v33 = vmul.f32 %v17374_v9, %v9045_v62 }
 0x5ec   : > { %9534 = vrot.lane.b32.xlu0 %v16382_v59, %s11229_s12  ;;  %v10518_v29 = vpop.f32.mrb[26].mxu1 }
 0x5ed   : > { %v16420_v45 = vmul.f32 %v10518_v29, %v17375_v51  ;;  %9532 = vrot.lane.b32.xlu1 %v16387_v7, %s11229_s12  ;;  %v9055_v43 = vpop.f32.mrb[27].mxu1 }
 0x5ee   : > { %v16427_v47 = vmul.f32 %v17376_v16, %v9055_v43 }
 0x5f0   : > { %9410 = vrot.lane.b32.xlu0 %v16406_v25, %s11227_s19 }
 0x5f1   : > { %9408 = vrot.lane.b32.xlu1 %v16413_v33, %s11227_s19 }
 0x5f4   : > { %9474 = vrot.lane.b32.xlu0 %v16406_v25, %s11228_s20 }
 0x5f5   : > { %9472 = vrot.lane.b32.xlu1 %v16413_v33, %s11228_s20 }
 0x5f8   : > { %9538 = vrot.lane.b32.xlu0 %v16406_v25, %s11229_s12 }
 0x5f9   : > { %9536 = vrot.lane.b32.xlu1 %v16413_v33, %s11229_s12 }
 0x5fc   : > { %9414 = vrot.lane.b32.xlu0 %v16420_v45, %s11227_s19 }
 0x5fd   : > { %9412 = vrot.lane.b32.xlu1 %v16427_v47, %s11227_s19 }
 0x5ff   : > { %v9387_v14 = vpop.permute.xlu0 %9386 }
 0x600   : > { %v9385_v60 = vpop.permute.xlu1 %9384  ;;  %v9433_v32 = vadd.f32 %v9387_v14, %v16280_v57  ;;  %9478 = vrot.lane.b32.xlu0 %v16420_v45, %s11228_s20  ;;  %v9577_v35 = vsub.f32 %v16280_v57, %v9387_v14 }
 0x601   : > { %v9432_v54 = vadd.f32 %v9385_v60, %v16285_v3  ;;  %9476 = vrot.lane.b32.xlu1 %v16427_v47, %s11228_s20  ;;  %v9576_v6 = vsub.f32 %v16285_v3, %v9385_v60 }
 0x603   : > { %v9451_v44 = vpop.permute.xlu0 %9450 }
 0x604   : > { %v9497_v56 = vadd.f32 %v9451_v44, %v9433_v32  ;;  %v9449_v12 = vpop.permute.xlu1 %9448  ;;  %v9593_v37 = vadd.f32 %v9577_v35, %v9451_v44  ;;  %9542 = vrot.lane.b32.xlu0 %v16420_v45, %s11229_s12  ;;  %v9625_v57 = vsub.f32 %v9433_v32, %v9451_v44  ;;  %v9657_v15 = vsub.f32 %v9577_v35, %v9451_v44 }
 0x605   : > { %v9496_v52 = vadd.f32 %v9449_v12, %v9432_v54  ;;  %v9592_v34 = vadd.f32 %v9576_v6, %v9449_v12  ;;  %9540 = vrot.lane.b32.xlu1 %v16427_v47, %s11229_s12  ;;  %v9624_v3 = vsub.f32 %v9432_v54, %v9449_v12  ;;  %v9656_v5 = vsub.f32 %v9576_v6, %v9449_v12  ;;  %s16678_s12 = scalar_lea.sflag [#allocation3], %s266_s29 }
 0x607   : > { %v9515_v31 = vpop.permute.xlu0 %9514 }
 0x608   : > { %v16443_v17 = vadd.f32 %v9515_v31, %v9497_v56  ;;  %v9513_v4 = vpop.permute.xlu1 %9512  ;;  %v9609_v27 = vsub.f32 %v9593_v37, %v9515_v31  ;;  %v9641_v11 = vsub.f32 %v9625_v57, %v9515_v31  ;;  %v9673_v24 = vadd.f32 %v9657_v15, %v9515_v31 }
 0x609   : > { %v16445_v10 = vadd.f32 %v9513_v4, %v9496_v52  ;;  %v9608_v39 = vsub.f32 %v9592_v34, %v9513_v4  ;;  %v9640_v58 = vsub.f32 %v9624_v3, %v9513_v4  ;;  %v9672_v41 = vadd.f32 %v9656_v5, %v9513_v4 }
 0x60a   : > { %9706 = vrot.lane.b32.xlu0 %v9609_v27, %s11222_s16 }
 0x60b   : > { %v9391_v26 = vpop.permute.xlu0 %9390  ;;  %9704 = vrot.lane.b32.xlu1 %v9608_v39, %s11222_s16 }
 0x60c   : > { %v9389_v40 = vpop.permute.xlu1 %9388  ;;  %v9435_v49 = vadd.f32 %v9391_v26, %v16294_v18  ;;  %v9579_v23 = vsub.f32 %v16294_v18, %v9391_v26 }
 0x60d   : > { %v9434_v36 = vadd.f32 %v9389_v40, %v16299_v8  ;;  %v9578_v61 = vsub.f32 %v16299_v8, %v9389_v40 }
 0x60e   : > { %9770 = vrot.lane.b32.xlu0 %v9641_v11, %s11218_s9 }
 0x60f   : > { %v9455_v19 = vpop.permute.xlu0 %9454  ;;  %9768 = vrot.lane.b32.xlu1 %v9640_v58, %s11218_s9 }
 0x610   : > { %v9499_v0 = vadd.f32 %v9455_v19, %v9435_v49  ;;  %v9453_v2 = vpop.permute.xlu1 %9452  ;;  %v9595_v1 = vadd.f32 %v9579_v23, %v9455_v19  ;;  %v9627_v62 = vsub.f32 %v9435_v49, %v9455_v19  ;;  %v9659_v18 = vsub.f32 %v9579_v23, %v9455_v19 }
 0x611   : > { %v9498_v50 = vadd.f32 %v9453_v2, %v9434_v36  ;;  %v9594_v55 = vadd.f32 %v9578_v61, %v9453_v2  ;;  %v9626_v9 = vsub.f32 %v9434_v36, %v9453_v2  ;;  %v9658_v8 = vsub.f32 %v9578_v61, %v9453_v2 }
 0x612   : > { %9834 = vrot.lane.b32.xlu0 %v9673_v24, %s11217_s30 }
 0x613   : > { %v9519_v48 = vpop.permute.xlu0 %9518  ;;  %9832 = vrot.lane.b32.xlu1 %v9672_v41, %s11217_s30 }
 0x614   : > { %v16463_v22 = vadd.f32 %v9519_v48, %v9499_v0  ;;  %v9517_v13 = vpop.permute.xlu1 %9516  ;;  %v9611_v63 = vsub.f32 %v9595_v1, %v9519_v48  ;;  %v9643_v29 = vsub.f32 %v9627_v62, %v9519_v48  ;;  %v9675_v43 = vadd.f32 %v9659_v18, %v9519_v48 }
 0x615   : > { %v16465_v30 = vadd.f32 %v9517_v13, %v9498_v50  ;;  %v9610_v42 = vsub.f32 %v9594_v55, %v9517_v13  ;;  %v9642_v51 = vsub.f32 %v9626_v9, %v9517_v13  ;;  %v9674_v16 = vadd.f32 %v9658_v8, %v9517_v13 }
 0x616   : > { %9710 = vrot.lane.b32.xlu0 %v9611_v63, %s11222_s16 }
 0x617   : > { %9708 = vrot.lane.b32.xlu1 %v9610_v42, %s11222_s16 }
 0x61a   : > { %9774 = vrot.lane.b32.xlu0 %v9643_v29, %s11218_s9 }
 0x61b   : > { %9772 = vrot.lane.b32.xlu1 %v9642_v51, %s11218_s9 }
 0x61e   : > { %9838 = vrot.lane.b32.xlu0 %v9675_v43, %s11217_s30 }
 0x61f   : > { %9836 = vrot.lane.b32.xlu1 %v9674_v16, %s11217_s30 }
 0x62a   : > { %v9395_v14 = vpop.permute.xlu0 %9394 }
 0x62b   : > { %v9393_v60 = vpop.permute.xlu1 %9392  ;;  %v9437_v32 = vadd.f32 %v9395_v14, %v16324_v53  ;;  %v9581_v56 = vsub.f32 %v16324_v53, %v9395_v14 }
 0x62c   : > { %v9436_v54 = vadd.f32 %v9393_v60, %v16329_v46  ;;  %v9580_v31 = vsub.f32 %v16329_v46, %v9393_v60 }
 0x62e   : > { %v9459_v44 = vpop.permute.xlu0 %9458 }
 0x62f   : > { %v9501_v12 = vadd.f32 %v9459_v44, %v9437_v32  ;;  %v9457_v52 = vpop.permute.xlu1 %9456  ;;  %v9597_v26 = vadd.f32 %v9581_v56, %v9459_v44  ;;  %v9629_v50 = vsub.f32 %v9437_v32, %v9459_v44  ;;  %v9661_v34 = vsub.f32 %v9581_v56, %v9459_v44 }
 0x630   : > { %v9500_v4 = vadd.f32 %v9457_v52, %v9436_v54  ;;  %v9596_v40 = vadd.f32 %v9580_v31, %v9457_v52  ;;  %v9628_v6 = vsub.f32 %v9436_v54, %v9457_v52  ;;  %v9660_v27 = vsub.f32 %v9580_v31, %v9457_v52 }
 0x632   : > { %v9523_v49 = vpop.permute.xlu0 %9522 }
 0x633   : > { %v16485_v36 = vadd.f32 %v9523_v49, %v9501_v12  ;;  %v9613_v19 = vsub.f32 %v9597_v26, %v9523_v49  ;;  %v9521_v0 = vpop.permute.xlu1 %9520  ;;  %v9645_v37 = vsub.f32 %v9629_v50, %v9523_v49  ;;  %v9677_v3 = vadd.f32 %v9661_v34, %v9523_v49 }
 0x634   : > { %v16487_v2 = vadd.f32 %v9521_v0, %v9500_v4  ;;  %v9612_v35 = vsub.f32 %v9596_v40, %v9521_v0  ;;  %v9644_v48 = vsub.f32 %v9628_v6, %v9521_v0  ;;  %v9676_v5 = vadd.f32 %v9660_v27, %v9521_v0 }
 0x635   : > { %9714 = vrot.lane.b32.xlu0 %v9613_v19, %s11222_s16 }
 0x636   : > { %v9399_v53 = vpop.permute.xlu0 %9398  ;;  %9712 = vrot.lane.b32.xlu1 %v9612_v35, %s11222_s16 }
 0x637   : > { %v9397_v46 = vpop.permute.xlu1 %9396  ;;  %v9439_v13 = vadd.f32 %v9399_v53, %v16338_v20  ;;  %v9583_v11 = vsub.f32 %v16338_v20, %v9399_v53 }
 0x638   : > { %v9438_v39 = vadd.f32 %v9397_v46, %v16343_v21  ;;  %v9582_v24 = vsub.f32 %v16343_v21, %v9397_v46 }
 0x639   : > { %9778 = vrot.lane.b32.xlu0 %v9645_v37, %s11218_s9 }
 0x63a   : > { %v9463_v57 = vpop.permute.xlu0 %9462  ;;  %9776 = vrot.lane.b32.xlu1 %v9644_v48, %s11218_s9 }
 0x63b   : > { %v9503_v58 = vadd.f32 %v9463_v57, %v9439_v13  ;;  %v9461_v15 = vpop.permute.xlu1 %9460  ;;  %v9599_v41 = vadd.f32 %v9583_v11, %v9463_v57  ;;  %v9631_v9 = vsub.f32 %v9439_v13, %v9463_v57  ;;  %v9663_v18 = vsub.f32 %v9583_v11, %v9463_v57 }
 0x63c   : > { %v9502_v23 = vadd.f32 %v9461_v15, %v9438_v39  ;;  %v9598_v61 = vadd.f32 %v9582_v24, %v9461_v15  ;;  %v9630_v29 = vsub.f32 %v9438_v39, %v9461_v15  ;;  %v9662_v8 = vsub.f32 %v9582_v24, %v9461_v15 }
 0x63d   : > { %9842 = vrot.lane.b32.xlu0 %v9677_v3, %s11217_s30 }
 0x63e   : > { %v9527_v1 = vpop.permute.xlu0 %9526  ;;  %9840 = vrot.lane.b32.xlu1 %v9676_v5, %s11217_s30 }
 0x63f   : > { %v16499_v55 = vadd.f32 %v9527_v1, %v9503_v58  ;;  %v9615_v63 = vsub.f32 %v9599_v41, %v9527_v1  ;;  %v9525_v42 = vpop.permute.xlu1 %9524  ;;  %v9647_v21 = vsub.f32 %v9631_v9, %v9527_v1  ;;  %v9679_v43 = vadd.f32 %v9663_v18, %v9527_v1 }
 0x640   : > { %v16501_v62 = vadd.f32 %v9525_v42, %v9502_v23  ;;  %v9614_v20 = vsub.f32 %v9598_v61, %v9525_v42  ;;  %v9646_v51 = vsub.f32 %v9630_v29, %v9525_v42  ;;  %v9678_v16 = vadd.f32 %v9662_v8, %v9525_v42 }
 0x641   : > { %9718 = vrot.lane.b32.xlu0 %v9615_v63, %s11222_s16 }
 0x642   : > { %9716 = vrot.lane.b32.xlu1 %v9614_v20, %s11222_s16 }
 0x645   : > { %9782 = vrot.lane.b32.xlu0 %v9647_v21, %s11218_s9 }
 0x646   : > { %9780 = vrot.lane.b32.xlu1 %v9646_v51, %s11218_s9 }
 0x649   : > { %9846 = vrot.lane.b32.xlu0 %v9679_v43, %s11217_s30 }
 0x64a   : > { %v9403_v14 = vpop.permute.xlu0 %9402  ;;  %9844 = vrot.lane.b32.xlu1 %v9678_v16, %s11217_s30 }
 0x64b   : > { %v9401_v60 = vpop.permute.xlu1 %9400  ;;  %v9441_v32 = vadd.f32 %v9403_v14, %v16368_v38  ;;  %v9585_v56 = vsub.f32 %v16368_v38, %v9403_v14 }
 0x64c   : > { %v9440_v54 = vadd.f32 %v9401_v60, %v16373_v28  ;;  %v9584_v31 = vsub.f32 %v16373_v28, %v9401_v60 }
 0x64e   : > { %v9467_v44 = vpop.permute.xlu0 %9466 }
 0x64f   : > { %v9505_v12 = vadd.f32 %v9467_v44, %v9441_v32  ;;  %v9465_v52 = vpop.permute.xlu1 %9464  ;;  %v9601_v26 = vadd.f32 %v9585_v56, %v9467_v44  ;;  %v9633_v53 = vsub.f32 %v9441_v32, %v9467_v44  ;;  %v9665_v34 = vsub.f32 %v9585_v56, %v9467_v44 }
 0x650   : > { %v9504_v4 = vadd.f32 %v9465_v52, %v9440_v54  ;;  %v9600_v40 = vadd.f32 %v9584_v31, %v9465_v52  ;;  %v9632_v37 = vsub.f32 %v9440_v54, %v9465_v52  ;;  %v9664_v27 = vsub.f32 %v9584_v31, %v9465_v52 }
 0x652   : > { %v9531_v49 = vpop.permute.xlu0 %9530 }
 0x653   : > { %v16513_v19 = vadd.f32 %v9531_v49, %v9505_v12  ;;  %v9617_v0 = vsub.f32 %v9601_v26, %v9531_v49  ;;  %v9529_v35 = vpop.permute.xlu1 %9528  ;;  %v9649_v46 = vsub.f32 %v9633_v53, %v9531_v49  ;;  %v9681_v3 = vadd.f32 %v9665_v34, %v9531_v49 }
 0x654   : > { %v16515_v50 = vadd.f32 %v9529_v35, %v9504_v4  ;;  %v9616_v6 = vsub.f32 %v9600_v40, %v9529_v35  ;;  %v9648_v48 = vsub.f32 %v9632_v37, %v9529_v35  ;;  %v9680_v5 = vadd.f32 %v9664_v27, %v9529_v35 }
 0x655   : > { %9722 = vrot.lane.b32.xlu0 %v9617_v0, %s11222_s16 }
 0x656   : > { %v9407_v38 = vpop.permute.xlu0 %9406  ;;  %9720 = vrot.lane.b32.xlu1 %v9616_v6, %s11222_s16 }
 0x657   : > { %v9405_v28 = vpop.permute.xlu1 %9404  ;;  %v9443_v13 = vadd.f32 %v9407_v38, %v16382_v59  ;;  %v9587_v11 = vsub.f32 %v16382_v59, %v9407_v38 }
 0x658   : > { %v9442_v39 = vadd.f32 %v9405_v28, %v16387_v7  ;;  %v9586_v24 = vsub.f32 %v16387_v7, %v9405_v28 }
 0x659   : > { %9786 = vrot.lane.b32.xlu0 %v9649_v46, %s11218_s9 }
 0x65a   : > { %v9471_v57 = vpop.permute.xlu0 %9470  ;;  %9784 = vrot.lane.b32.xlu1 %v9648_v48, %s11218_s9 }
 0x65b   : > { %v9507_v58 = vadd.f32 %v9471_v57, %v9443_v13  ;;  %v9469_v15 = vpop.permute.xlu1 %9468  ;;  %v9603_v41 = vadd.f32 %v9587_v11, %v9471_v57  ;;  %v9635_v29 = vsub.f32 %v9443_v13, %v9471_v57  ;;  %v9667_v43 = vsub.f32 %v9587_v11, %v9471_v57 }
 0x65c   : > { %v9506_v23 = vadd.f32 %v9469_v15, %v9442_v39  ;;  %v9602_v61 = vadd.f32 %v9586_v24, %v9469_v15  ;;  %v9634_v21 = vsub.f32 %v9442_v39, %v9469_v15  ;;  %v9666_v14 = vsub.f32 %v9586_v24, %v9469_v15 }
 0x65d   : > { %9850 = vrot.lane.b32.xlu0 %v9681_v3, %s11217_s30 }
 0x65e   : > { %v9535_v1 = vpop.permute.xlu0 %9534  ;;  %9848 = vrot.lane.b32.xlu1 %v9680_v5, %s11217_s30 }
 0x65f   : > { %v16527_v63 = vadd.f32 %v9535_v1, %v9507_v58  ;;  %v9619_v42 = vsub.f32 %v9603_v41, %v9535_v1  ;;  %v9533_v20 = vpop.permute.xlu1 %9532  ;;  %v9651_v51 = vsub.f32 %v9635_v29, %v9535_v1  ;;  %v9683_v54 = vadd.f32 %v9667_v43, %v9535_v1 }
 0x660   : > { %v16529_v9 = vadd.f32 %v9533_v20, %v9506_v23  ;;  %v9618_v59 = vsub.f32 %v9602_v61, %v9533_v20  ;;  %v9650_v8 = vsub.f32 %v9634_v21, %v9533_v20  ;;  %v9682_v52 = vadd.f32 %v9666_v14, %v9533_v20 }
 0x661   : > { %9726 = vrot.lane.b32.xlu0 %v9619_v42, %s11222_s16 }
 0x662   : > { %v9411_v7 = vpop.permute.xlu0 %9410  ;;  %9724 = vrot.lane.b32.xlu1 %v9618_v59, %s11222_s16 }
 0x663   : > { %v9409_v18 = vpop.permute.xlu1 %9408  ;;  %v9445_v16 = vadd.f32 %v9411_v7, %v16406_v25  ;;  %v9589_v44 = vsub.f32 %v16406_v25, %v9411_v7 }
 0x664   : > { %v9444_v60 = vadd.f32 %v9409_v18, %v16413_v33  ;;  %v9588_v31 = vsub.f32 %v16413_v33, %v9409_v18 }
 0x665   : > { %9790 = vrot.lane.b32.xlu0 %v9651_v51, %s11218_s9 }
 0x666   : > { %v9475_v32 = vpop.permute.xlu0 %9474  ;;  %9788 = vrot.lane.b32.xlu1 %v9650_v8, %s11218_s9 }
 0x667   : > { %v9509_v56 = vadd.f32 %v9475_v32, %v9445_v16  ;;  %v9473_v12 = vpop.permute.xlu1 %9472  ;;  %v9605_v26 = vadd.f32 %v9589_v44, %v9475_v32  ;;  %v9637_v37 = vsub.f32 %v9445_v16, %v9475_v32  ;;  %v9669_v34 = vsub.f32 %v9589_v44, %v9475_v32 }
 0x668   : > { %v9508_v4 = vadd.f32 %v9473_v12, %v9444_v60  ;;  %v9604_v40 = vadd.f32 %v9588_v31, %v9473_v12  ;;  %v9636_v38 = vsub.f32 %v9444_v60, %v9473_v12  ;;  %v9668_v27 = vsub.f32 %v9588_v31, %v9473_v12 }
 0x669   : > { %9854 = vrot.lane.b32.xlu0 %v9683_v54, %s11217_s30 }
 0x66a   : > { %v9539_v49 = vpop.permute.xlu0 %9538  ;;  %9852 = vrot.lane.b32.xlu1 %v9682_v52, %s11217_s30 }
 0x66b   : > { %v16541_v0 = vadd.f32 %v9539_v49, %v9509_v56  ;;  %v9621_v35 = vsub.f32 %v9605_v26, %v9539_v49  ;;  %v9537_v6 = vpop.permute.xlu1 %9536  ;;  %v9653_v46 = vsub.f32 %v9637_v37, %v9539_v49  ;;  %v9685_v3 = vadd.f32 %v9669_v34, %v9539_v49 }
 0x66c   : > { %v16543_v53 = vadd.f32 %v9537_v6, %v9508_v4  ;;  %v9620_v25 = vsub.f32 %v9604_v40, %v9537_v6  ;;  %v9652_v48 = vsub.f32 %v9636_v38, %v9537_v6  ;;  %v9684_v5 = vadd.f32 %v9668_v27, %v9537_v6 }
 0x66d   : > { %9730 = vrot.lane.b32.xlu0 %v9621_v35, %s11222_s16 }
 0x66e   : > { %v9415_v33 = vpop.permute.xlu0 %9414  ;;  %9728 = vrot.lane.b32.xlu1 %v9620_v25, %s11222_s16 }
 0x66f   : > { %v9413_v28 = vpop.permute.xlu1 %9412  ;;  %v9447_v13 = vadd.f32 %v9415_v33, %v16420_v45  ;;  %v9591_v11 = vsub.f32 %v16420_v45, %v9415_v33 }
 0x670   : > { %v9446_v39 = vadd.f32 %v9413_v28, %v16427_v47  ;;  %v9590_v24 = vsub.f32 %v16427_v47, %v9413_v28 }
 0x671   : > { %9794 = vrot.lane.b32.xlu0 %v9653_v46, %s11218_s9 }
 0x672   : > { %v9479_v57 = vpop.permute.xlu0 %9478  ;;  %9792 = vrot.lane.b32.xlu1 %v9652_v48, %s11218_s9 }
 0x673   : > { %v9511_v58 = vadd.f32 %v9479_v57, %v9447_v13  ;;  %v9477_v15 = vpop.permute.xlu1 %9476  ;;  %v9607_v41 = vadd.f32 %v9591_v11, %v9479_v57  ;;  %v9639_v21 = vsub.f32 %v9447_v13, %v9479_v57  ;;  %v9671_v43 = vsub.f32 %v9591_v11, %v9479_v57 }
 0x674   : > { %v9510_v23 = vadd.f32 %v9477_v15, %v9446_v39  ;;  %v9606_v61 = vadd.f32 %v9590_v24, %v9477_v15  ;;  %v9638_v47 = vsub.f32 %v9446_v39, %v9477_v15  ;;  %v9670_v16 = vsub.f32 %v9590_v24, %v9477_v15 }
 0x675   : > { %9858 = vrot.lane.b32.xlu0 %v9685_v3, %s11217_s30 }
 0x676   : > { %v9543_v1 = vpop.permute.xlu0 %9542  ;;  %9856 = vrot.lane.b32.xlu1 %v9684_v5, %s11217_s30 }
 0x677   : > { %v16555_v42 = vadd.f32 %v9543_v1, %v9511_v58  ;;  %v9623_v20 = vsub.f32 %v9607_v41, %v9543_v1  ;;  %v9541_v59 = vpop.permute.xlu1 %9540  ;;  %v9655_v51 = vsub.f32 %v9639_v21, %v9543_v1  ;;  %v9687_v60 = vadd.f32 %v9671_v43, %v9543_v1 }
 0x678   : > { %v16557_v29 = vadd.f32 %v9541_v59, %v9510_v23  ;;  %v9622_v45 = vsub.f32 %v9606_v61, %v9541_v59  ;;  %v9654_v8 = vsub.f32 %v9638_v47, %v9541_v59  ;;  %v9686_v54 = vadd.f32 %v9670_v16, %v9541_v59 }
 0x679   : > { %9734 = vrot.lane.b32.xlu0 %v9623_v20, %s11222_s16 }
 0x67a   : > { %9732 = vrot.lane.b32.xlu1 %v9622_v45, %s11222_s16  ;;  %s16576_s16 = scalar_lea.vmem [#allocation2], %s10060_s13 }
 0x67b   : > { %s9977_s18 = sshll.u32 %s16576_s16, 4  ;;  %s16665_s18 = int_to_ptr.vmem [resolvable:$true] %s9977_s18 }
 0x67c   : > { %v9707_v7 = vpop.permute.xlu0 %9706  ;;  %s11120_s13 = scalar_lea.vmem %s16665_s18, 2048 }
 0x67d   : > { %v9705_v18 = vpop.permute.xlu1 %9704  ;;  %9798 = vrot.lane.b32.xlu0 %v9655_v51, %s11218_s9  ;;  %v9881_v44 = vsel %vm5659_vm15, %v16443_v17, %v9707_v7  ;;  %p11121_p1 = scmp.ne.s32.totalorder %s16665_s18, %s11120_s13 }
 0x67e   : > { %9796 = vrot.lane.b32.xlu1 %v9654_v8, %s11218_s9  ;;  %v9880_v56 = vsel %vm5659_vm15, %v16445_v10, %v9705_v18 }
 0x67f   : > { %p11122_p2 = pnand %p11121_p1, %p11318_p3 }
 0x680   : > { %v9771_v14 = vpop.permute.xlu0 %9770 }
 0x681   : > { %v9769_v32 = vpop.permute.xlu1 %9768  ;;  %9862 = vrot.lane.b32.xlu0 %v9687_v60, %s11217_s30  ;;  %v9897_v12 = vsel %vm5696_vm0, %v9881_v44, %v9771_v14  ;;  %p11123_p4 = pneg %p11122_p2 }
 0x682   : > { %9860 = vrot.lane.b32.xlu1 %v9686_v54, %s11217_s30  ;;  %v9896_v31 = vsel %vm5696_vm0, %v9880_v56, %v9769_v32  ;;  %s10397_s30 = sshll.u32 %s11198_s24, 4 }
 0x683   : > { %s9974_s17 = sadd.s32 %s10397_s30, %s10393_s14  ;;  %s11230_s30 = smov [#allocation2]  }
 0x684   : > { %v9835_v52 = vpop.permute.xlu0 %9834  ;;  %s10394_s19 = sshll.u32 %s9974_s17, 7  ;;  %s11124_s14 = sshll.u32 %s11230_s30, 4  ;;  %s11125_s14 = int_to_ptr.vmem [resolvable:$false] %s11124_s14 }
 0x685   : > { %v9913_v4 = vsel %vm5721_vm1, %v9897_v12, %v9835_v52  ;;  %v9833_v26 = vpop.permute.xlu1 %9832  ;;  %s16670_s20 = scalar_lea.hbm %s16737_s6, %s10394_s19  ;;  %s11126_s17 = scalar_lea.vmem %s11125_s14, 4096 }
 0x686   : > { %v9929_v40 = vmul.f32 0.5, %v9913_v4  ;;  %v9912_v49 = vsel %vm5721_vm1, %v9896_v31, %v9833_v26  ;;  %p11127_p5 = scmp.lt.s32.totalorder %s16665_s18, %s11125_s14  ;;  %p11128_p6 = scmp.lt.s32.totalorder %s11126_s17, %s11120_s13 }
 0x687   : > { %v9928_v35 = vmul.f32 0.5, %v9912_v49 }
 0x688   : > { %9945 = vst.msk [vmem:[%s16576_s16 + $0x8] sm:$0xff] %vm5746_vm2, %v9929_v40  ;;  %v9711_v17 = vpop.permute.xlu0 %9710  ;;  %p11129_p7 = por %p11128_p6, %p11127_p5 }
 0x689   : > { %9944 = vst.msk [vmem:[%s16576_s16] sm:$0xff] %vm5746_vm2, %v9928_v35  ;;  %v9709_v10 = vpop.permute.xlu1 %9708  ;;  %v9883_v37 = vsel %vm5659_vm15, %v16463_v22, %v9711_v17 }
 0x68a   : > { %v9882_v38 = vsel %vm5659_vm15, %v16465_v30, %v9709_v10  ;;  %p11130_p9 = pnand %p11129_p7, %p11123_p4 }
 0x68c   : > { %v9775_v6 = vpop.permute.xlu0 %9774 }
 0x68d   : > { %v9773_v25 = vpop.permute.xlu1 %9772  ;;  %v9899_v33 = vsel %vm5696_vm0, %v9883_v37, %v9775_v6 }
 0x68e   : > { %v9898_v28 = vsel %vm5696_vm0, %v9882_v38, %v9773_v25 }
 0x690   : > { %v9839_v46 = vpop.permute.xlu0 %9838 }
 0x691   : > { %v9915_v48 = vsel %vm5721_vm1, %v9899_v33, %v9839_v46  ;;  %v9837_v34 = vpop.permute.xlu1 %9836 }
 0x692   : > { %v9931_v13 = vmul.f32 0.5, %v9915_v48  ;;  %v9914_v27 = vsel %vm5721_vm1, %v9898_v28, %v9837_v34 }
 0x693   : > { %v9930_v39 = vmul.f32 0.5, %v9914_v27 }
 0x694   : > { %9947 = vst.msk [vmem:[%s16576_s16 + $0x18] sm:$0xff] %vm5746_vm2, %v9931_v13 }
 0x695   : > { %9946 = vst.msk [vmem:[%s16576_s16 + $0x10] sm:$0xff] %vm5746_vm2, %v9930_v39 }
 0x6a7   : > { %v9715_v22 = vpop.permute.xlu0 %9714 }
 0x6a8   : > { %v9713_v30 = vpop.permute.xlu1 %9712  ;;  %v9885_v11 = vsel %vm5659_vm15, %v16485_v36, %v9715_v22 }
 0x6a9   : > { %v9884_v58 = vsel %vm5659_vm15, %v16487_v2, %v9713_v30 }
 0x6ab   : > { %v9779_v57 = vpop.permute.xlu0 %9778 }
 0x6ac   : > { %v9777_v3 = vpop.permute.xlu1 %9776  ;;  %v9901_v15 = vsel %vm5696_vm0, %v9885_v11, %v9779_v57 }
 0x6ad   : > { %v9900_v24 = vsel %vm5696_vm0, %v9884_v58, %v9777_v3 }
 0x6af   : > { %v9843_v5 = vpop.permute.xlu0 %9842 }
 0x6b0   : > { %v9917_v23 = vsel %vm5721_vm1, %v9901_v15, %v9843_v5  ;;  %v9841_v41 = vpop.permute.xlu1 %9840 }
 0x6b1   : > { %v9933_v61 = vmul.f32 0.5, %v9917_v23  ;;  %v9916_v1 = vsel %vm5721_vm1, %v9900_v24, %v9841_v41 }
 0x6b2   : > { %v9932_v20 = vmul.f32 0.5, %v9916_v1 }
 0x6b3   : > { %9949 = vst.msk [vmem:[%s16576_s16 + $0x28] sm:$0xff] %vm5746_vm2, %v9933_v61  ;;  %v9719_v59 = vpop.permute.xlu0 %9718 }
 0x6b4   : > { %9948 = vst.msk [vmem:[%s16576_s16 + $0x20] sm:$0xff] %vm5746_vm2, %v9932_v20  ;;  %v9717_v36 = vpop.permute.xlu1 %9716  ;;  %v9887_v21 = vsel %vm5659_vm15, %v16499_v55, %v9719_v59 }
 0x6b5   : > { %v9886_v47 = vsel %vm5659_vm15, %v16501_v62, %v9717_v36 }
 0x6b7   : > { %v9783_v2 = vpop.permute.xlu0 %9782 }
 0x6b8   : > { %v9781_v45 = vpop.permute.xlu1 %9780  ;;  %v9903_v7 = vsel %vm5696_vm0, %v9887_v21, %v9783_v2 }
 0x6b9   : > { %v9902_v18 = vsel %vm5696_vm0, %v9886_v47, %v9781_v45 }
 0x6bb   : > { %v9847_v51 = vpop.permute.xlu0 %9846 }
 0x6bc   : > { %v9919_v8 = vsel %vm5721_vm1, %v9903_v7, %v9847_v51  ;;  %v9845_v43 = vpop.permute.xlu1 %9844 }
 0x6bd   : > { %v9935_v16 = vmul.f32 0.5, %v9919_v8  ;;  %v9918_v14 = vsel %vm5721_vm1, %v9902_v18, %v9845_v43 }
 0x6be   : > { %v9934_v60 = vmul.f32 0.5, %v9918_v14 }
 0x6bf   : > { %9951 = vst.msk [vmem:[%s16576_s16 + $0x38] sm:$0xff] %vm5746_vm2, %v9935_v16 }
 0x6c0   : > { %9950 = vst.msk [vmem:[%s16576_s16 + $0x30] sm:$0xff] %vm5746_vm2, %v9934_v60 }
 0x6c7   : > { %v9723_v55 = vpop.permute.xlu0 %9722 }
 0x6c8   : > { %v9721_v62 = vpop.permute.xlu1 %9720  ;;  %v9889_v44 = vsel %vm5659_vm15, %v16513_v19, %v9723_v55 }
 0x6c9   : > { %v9888_v56 = vsel %vm5659_vm15, %v16515_v50, %v9721_v62 }
 0x6cb   : > { %v9787_v32 = vpop.permute.xlu0 %9786 }
 0x6cc   : > { %v9785_v54 = vpop.permute.xlu1 %9784  ;;  %v9905_v12 = vsel %vm5696_vm0, %v9889_v44, %v9787_v32 }
 0x6cd   : > { %v9904_v31 = vsel %vm5696_vm0, %v9888_v56, %v9785_v54 }
 0x6cf   : > { %v9851_v52 = vpop.permute.xlu0 %9850 }
 0x6d0   : > { %v9921_v4 = vsel %vm5721_vm1, %v9905_v12, %v9851_v52  ;;  %v9849_v26 = vpop.permute.xlu1 %9848 }
 0x6d1   : > { %v9937_v40 = vmul.f32 0.5, %v9921_v4  ;;  %v9920_v49 = vsel %vm5721_vm1, %v9904_v31, %v9849_v26 }
 0x6d2   : > { %v9936_v35 = vmul.f32 0.5, %v9920_v49 }
 0x6d3   : > { %9953 = vst.msk [vmem:[%s16576_s16 + $0x48] sm:$0xff] %vm5746_vm2, %v9937_v40  ;;  %v9727_v17 = vpop.permute.xlu0 %9726 }
 0x6d4   : > { %9952 = vst.msk [vmem:[%s16576_s16 + $0x40] sm:$0xff] %vm5746_vm2, %v9936_v35  ;;  %v9725_v19 = vpop.permute.xlu1 %9724  ;;  %v9891_v6 = vsel %vm5659_vm15, %v16527_v63, %v9727_v17 }
 0x6d5   : > { %v9890_v25 = vsel %vm5659_vm15, %v16529_v9, %v9725_v19 }
 0x6d7   : > { %v9791_v50 = vpop.permute.xlu0 %9790 }
 0x6d8   : > { %v9789_v10 = vpop.permute.xlu1 %9788  ;;  %v9907_v37 = vsel %vm5696_vm0, %v9891_v6, %v9791_v50 }
 0x6d9   : > { %v9906_v33 = vsel %vm5696_vm0, %v9890_v25, %v9789_v10 }
 0x6db   : > { %v9855_v38 = vpop.permute.xlu0 %9854 }
 0x6dc   : > { %v9923_v46 = vsel %vm5721_vm1, %v9907_v37, %v9855_v38  ;;  %v9853_v28 = vpop.permute.xlu1 %9852 }
 0x6dd   : > { %v9939_v48 = vmul.f32 0.5, %v9923_v46  ;;  %v9922_v34 = vsel %vm5721_vm1, %v9906_v33, %v9853_v28 }
 0x6de   : > { %v9938_v13 = vmul.f32 0.5, %v9922_v34 }
 0x6df   : > { %9955 = vst.msk [vmem:[%s16576_s16 + $0x58] sm:$0xff] %vm5746_vm2, %v9939_v48  ;;  %v9731_v27 = vpop.permute.xlu0 %9730 }
 0x6e0   : > { %9954 = vst.msk [vmem:[%s16576_s16 + $0x50] sm:$0xff] %vm5746_vm2, %v9938_v13  ;;  %v9729_v63 = vpop.permute.xlu1 %9728  ;;  %v9893_v22 = vsel %vm5659_vm15, %v16541_v0, %v9731_v27 }
 0x6e1   : > { %v9892_v30 = vsel %vm5659_vm15, %v16543_v53, %v9729_v63 }
 0x6e3   : > { %v9795_v9 = vpop.permute.xlu0 %9794 }
 0x6e4   : > { %v9793_v39 = vpop.permute.xlu1 %9792  ;;  %v9909_v57 = vsel %vm5696_vm0, %v9893_v22, %v9795_v9 }
 0x6e5   : > { %v9908_v11 = vsel %vm5696_vm0, %v9892_v30, %v9793_v39 }
 0x6e7   : > { %v9859_v3 = vpop.permute.xlu0 %9858 }
 0x6e8   : > { %v9925_v58 = vsel %vm5721_vm1, %v9909_v57, %v9859_v3  ;;  %v9857_v15 = vpop.permute.xlu1 %9856 }
 0x6e9   : > { %v9941_v5 = vmul.f32 0.5, %v9925_v58  ;;  %v9924_v24 = vsel %vm5721_vm1, %v9908_v11, %v9857_v15 }
 0x6ea   : > { %v9940_v23 = vmul.f32 0.5, %v9924_v24 }
 0x6eb   : > { %9957 = vst.msk [vmem:[%s16576_s16 + $0x68] sm:$0xff] %vm5746_vm2, %v9941_v5  ;;  %v9735_v41 = vpop.permute.xlu0 %9734 }
 0x6ec   : > { %9956 = vst.msk [vmem:[%s16576_s16 + $0x60] sm:$0xff] %vm5746_vm2, %v9940_v23  ;;  %v9733_v0 = vpop.permute.xlu1 %9732  ;;  %v9895_v1 = vsel %vm5659_vm15, %v16555_v42, %v9735_v41 }
 0x6ed   : > { %v9894_v20 = vsel %vm5659_vm15, %v16557_v29, %v9733_v0 }
 0x6ef   : > { %v9799_v53 = vpop.permute.xlu0 %9798 }
 0x6f0   : > { %v9797_v61 = vpop.permute.xlu1 %9796  ;;  %v9911_v59 = vsel %vm5696_vm0, %v9895_v1, %v9799_v53 }
 0x6f1   : > { %v9910_v2 = vsel %vm5696_vm0, %v9894_v20, %v9797_v61 }
 0x6f3   : > { %v9863_v36 = vpop.permute.xlu0 %9862 }
 0x6f4   : > { %v9927_v45 = vsel %vm5721_vm1, %v9911_v59, %v9863_v36  ;;  %v9861_v21 = vpop.permute.xlu1 %9860 }
 0x6f5   : > { %v9943_v47 = vmul.f32 0.5, %v9927_v45  ;;  %v9926_v7 = vsel %vm5721_vm1, %v9910_v2, %v9861_v21 }
 0x6f6   : > { %v9942_v42 = vmul.f32 0.5, %v9926_v7 }
 0x6f7   : > { %9959 = vst.msk [vmem:[%s16576_s16 + $0x78] sm:$0xff] %vm5746_vm2, %v9943_v47 }
 0x6f8   : > { %9958 = vst.msk [vmem:[%s16576_s16 + $0x70] sm:$0xff] %vm5746_vm2, %v9942_v42 }
 0x6f9   : > { %11133 = shalt.err (!%p11130_p9)
}
 0x6fa   : > { %s11134_s29 = scalar_lea.hbm %s16670_s20, 2048  ;;  %s11138_s24 = scalar_lea.hbm %s16737_s6, 8192 }
 0x6fb   : > { %p11135_p10 = scmp.ne.s32.totalorder %s16670_s20, %s11134_s29  ;;  %p11139_p13 = scmp.lt.u32.totalorder %s16670_s20, %s16737_s6 }
 0x6fc   : > { %p11140_p0 = scmp.lt.u32.totalorder %s11138_s24, %s11134_s29  ;;  %p11142_p2 = scmp.lt.u32.totalorder %s11134_s29, %s16670_s20 }
 0x6fd   : > { %p11136_p11 = pnand %p11135_p10, %p11318_p3 }
 0x6fe   : > { %p11141_p1 = por %p11140_p0, %p11139_p13 }
 0x6ff   : > { %p11137_p12 = pneg %p11136_p11 }
 0x700   : > { %p11143_p4 = por %p11142_p2, %p11141_p1 }
 0x702   : > { %p11144_p5 = pnand %p11143_p4, %p11137_p12 }
 0x704   : > { %11147 = shalt.err (!%p11144_p5)
}
 0x705   : > { %s11231_s13 = smov 128  }
 0x706   : > { %10529 = dma.vmem_to_hbm [thread:$0]  (%p11318_p3), %s16665_s18, 2048, %s16670_s20, %s16678_s12, %s11231_s13, %s11231_s13, %s11218_s9  }
 0x707 PF: > { %p10535_p6 = scmp.ge.s32.totalorder %s11214_s28, 2  ;;  %s9992_s14 = sand.u32 1, %s11186_s21  }
 0x708   : > { %s9993_s17 = scalar_lea.sflag [#allocation3], %s9992_s14 }
 0x709   : > { %p10532_p7 = pnand %p10535_p6, %p11327_p8 }
 0x70b   : > { %11181 = dma.done.wait (!%p10532_p7), %s9993_s17, 2048  }
 0x70c   : > { %11183 = vsyncadd (!%p10532_p7), %s9993_s17, 4294965248  ;;  %s19_s28 = sadd.s32 1, %s11214_s28   ;;  %s17377_s21 = smov %s11190_s22 }
 0x70d   : > { %p16_p9 = scmp.ge.s32.totalorder %s19_s28, 6   ;;  %s17378_s22 = smov %s11194_s23 }
 0x70e   : > { %s17379_s23 = smov %s11336_s15  ;;  %s17380_s24 = smov %s11206_s26 }
 0x70f   : > { %s17381_s25 = smov %s11210_s27  ;;  %s17382_s26 = smov %s17385_s7 }
 0x710   : > { %s17383_s27 = smov %s17389_s8  ;;  %18 = sbr.rel (!%p16_p9) target bundleno = 5 (0x5), region = 79 }
 0x717   :  { %9998 = vsyncpa [#allocation3], 1 }
 0x718   :  { %10000 = vsyncpa [#allocation3 + $0x1], 1 }

</bundles_post_ra>
